<compile_context>
chip_gen: v7x
topology: tpu7x:2x2x1
jax: 0.10.0
libtpu: 0.0.40
codegen_flags: <defaults>
</compile_context>

<pallas_src>
import jax
import jax.numpy as jnp
from jax.experimental import pallas as pl
from jax.experimental.pallas import tpu as pltpu

_BN_EPS = 1e-5
_LANES = 128
_VMEM_LIMIT = 32 * 1024 * 1024  # safe on v5e/v6e/v7x; far above actual use (<1 MiB)

_VMEM_SPEC = pl.BlockSpec(memory_space=pltpu.MemorySpace.VMEM)  # whole array in VMEM


def _round_up(x, m):
    return ((x + m - 1) // m) * m


def _conv_bn_pool_relu(x_nhwc, w_oihw, gamma, beta):
    """Conv2d(k=3, pad=1, no bias) -> BatchNorm2d(batch stats) -> MaxPool(2,2) -> ReLU.

    Single fused pallas_call (no grid): whole batch resident in VMEM.
    Input has the REAL channel count; output is channel-padded to 128 lanes
    (dense store) and must be stripped by the caller.
    The conv bias is intentionally not applied: train-mode BN subtracts the
    batch mean, which cancels a per-channel bias exactly.
    """
    N, H, W, Cin = x_nhwc.shape
    Cout, Cin_w, K, _ = w_oihw.shape
    assert Cin_w == Cin
    Ho, Wo = H // 2, W // 2
    CP = _LANES                      # lane-padded output channel width
    ROWS = N * H * W                 # conv-output rows (whole batch)
    KK = K * K * Cin                 # real contraction width (36 / 72)
    inv_m = 1.0 / float(ROWS)

    # ---- glue (data movement only): halo pad + fused-tap weight layout ----
    xp = jnp.pad(x_nhwc, ((0, 0), (1, 1), (1, 1), (0, 0))).astype(jnp.float32)
    # (Cout,Cin,KH,KW) -> (KH,KW,Cin,Cout) -> (K*K*Cin, Cout), lane-pad, bf16.
    wt = jnp.transpose(w_oihw, (2, 3, 1, 0)).reshape(KK, Cout)
    wt = jnp.pad(wt, ((0, 0), (0, CP - Cout))).astype(jnp.bfloat16)
    g = jnp.pad(gamma.reshape(1, Cout), ((0, 0), (0, CP - Cout))).astype(jnp.float32)
    bt = jnp.pad(beta.reshape(1, Cout), ((0, 0), (0, CP - Cout))).astype(jnp.float32)

    def kernel(xp_ref, wt_ref, g_ref, bt_ref, o_ref):
        # In-kernel im2col: 9 tap slabs concatenated along lanes -> one matmul.
        taps = []
        for kh in range(K):
            for kw in range(K):
                slab = xp_ref[:, kh:kh + H, kw:kw + W, :]          # (N,H,W,Cin)
                taps.append(slab.reshape(ROWS, Cin))
        lhs = jnp.concatenate(taps, axis=-1).astype(jnp.bfloat16)  # (ROWS, KK) bf16
        z = jnp.dot(lhs, wt_ref[...],
                    preferred_element_type=jnp.float32)            # (ROWS, CP) f32

        # Train-mode BatchNorm over the whole batch (stats + apply fused).
        mean = jnp.sum(z, axis=0, keepdims=True) * inv_m           # (1, CP)
        zc = z - mean
        var = jnp.sum(zc * zc, axis=0, keepdims=True) * inv_m      # centered (biased)
        scale = g_ref[...] * jax.lax.rsqrt(var + _BN_EPS)
        zn = zc * scale + bt_ref[...]                              # bias folded out

        # 2x2 max-pool + ReLU, all at value level (tile-aligned reshapes).
        # Rows are ordered (n, h, w); 2*W rows per pooled H-row, W multiple of 8.
        zr = zn.reshape(N * Ho, 2 * W, CP)
        hp = jnp.maximum(zr[:, :W, :], zr[:, W:, :])               # (N*Ho, W, CP)
        hp2 = hp.reshape(N * Ho * Wo, 2, CP)                       # adjacent-w pairs
        o_ref[...] = jnp.maximum(jnp.max(hp2, axis=1), 0.0)        # single dense store

    out = pl.pallas_call(
        kernel,
        in_specs=[_VMEM_SPEC, _VMEM_SPEC, _VMEM_SPEC, _VMEM_SPEC],
        out_specs=_VMEM_SPEC,
        out_shape=jax.ShapeDtypeStruct((N * Ho * Wo, CP), jnp.float32),
        compiler_params=pltpu.CompilerParams(vmem_limit_bytes=_VMEM_LIMIT),
    )(xp, wt, g, bt)

    return out.reshape(N, Ho, Wo, CP)        # channel-padded NHWC


def _mlp_head(x, w1, b1, w2, b2, w3, b3):
    """Linear -> ReLU -> Linear -> ReLU -> Linear.  Weights are (in, out).

    Single un-gridded kernel (all operands ~200 KB, fit trivially in VMEM).
    bf16 matmul operands, f32 accumulation.  fc2 width and the class dim are
    lane-padded to 128 for lane-dense intermediates / a dense final store.
    """
    ROWS, K1 = x.shape
    H1 = w1.shape[1]
    H2 = w2.shape[1]
    NCLS = w3.shape[1]
    H2P = _round_up(H2, _LANES)
    CPAD = _round_up(NCLS, _LANES)

    # glue: lane padding + bf16 weight cast (zero pads are exact through ReLU/matmul)
    w1b = w1.astype(jnp.bfloat16)                                          # (K1, H1)
    b1f = b1.reshape(1, H1).astype(jnp.float32)
    w2p = jnp.pad(w2, ((0, 0), (0, H2P - H2))).astype(jnp.bfloat16)        # (H1, H2P)
    b2p = jnp.pad(b2.reshape(1, H2), ((0, 0), (0, H2P - H2))).astype(jnp.float32)
    w3p = jnp.pad(w3, ((0, H2P - H2), (0, CPAD - NCLS))).astype(jnp.bfloat16)
    b3p = jnp.pad(b3.reshape(1, NCLS), ((0, 0), (0, CPAD - NCLS))).astype(jnp.float32)

    def kernel(x_ref, w1_ref, b1_ref, w2_ref, b2_ref, w3_ref, b3_ref, o_ref):
        h = jnp.dot(x_ref[...].astype(jnp.bfloat16), w1_ref[...],
                    preferred_element_type=jnp.float32) + b1_ref[...]
        h = jnp.maximum(h, 0.0)
        h = jnp.dot(h.astype(jnp.bfloat16), w2_ref[...],
                    preferred_element_type=jnp.float32) + b2_ref[...]
        h = jnp.maximum(h, 0.0)
        o_ref[...] = jnp.dot(h.astype(jnp.bfloat16), w3_ref[...],
                             preferred_element_type=jnp.float32) + b3_ref[...]

    out = pl.pallas_call(
        kernel,
        in_specs=[_VMEM_SPEC] * 7,
        out_specs=_VMEM_SPEC,
        out_shape=jax.ShapeDtypeStruct((ROWS, CPAD), jnp.float32),
        compiler_params=pltpu.CompilerParams(vmem_limit_bytes=_VMEM_LIMIT),
    )(x, w1b, b1f, w2p, b2p, w3p, b3p)
    return out[:, :NCLS]


def init_params(key, in_channels, height, width, num_classes, init_scale=1.0):
    """Deterministic synthetic parameters matching the module's shapes."""
    c1 = in_channels * 2
    c2 = in_channels * 2 * 2
    lin_in = c2 * (height // 4) * (width // 4)
    sizes = [lin_in, lin_in >> 1, lin_in >> 2, num_classes]
    ks = jax.random.split(key, 16)

    def nrm(k, shape, std):
        return (std * jax.random.normal(k, shape)).astype(jnp.float32)

    params = {
        "conv1_w": nrm(ks[0], (c1, in_channels, 3, 3), 0.2),   # PyTorch (Cout,Cin,KH,KW)
        # conv biases kept for shape parity with the module; they cancel exactly
        # under train-mode BatchNorm and are therefore not applied in forward.
        "conv1_b": nrm(ks[1], (c1,), 0.05),
        "bn1_g": jnp.ones((c1,), jnp.float32),
        "bn1_b": jnp.zeros((c1,), jnp.float32),
        "conv2_w": nrm(ks[2], (c2, c1, 3, 3), 0.2),
        "conv2_b": nrm(ks[3], (c2,), 0.05),
        "bn2_g": jnp.ones((c2,), jnp.float32),
        "bn2_b": jnp.zeros((c2,), jnp.float32),
    }
    for li, (din, dout) in enumerate(zip(sizes[:-1], sizes[1:]), start=1):
        std = init_scale / (din ** 0.5)  # scaled to keep synthetic activations finite
        params[f"fc{li}_w"] = nrm(ks[3 + 2 * li], (dout, din), std)  # PyTorch (out, in)
        params[f"fc{li}_b"] = nrm(ks[4 + 2 * li], (dout,), 0.05)
    return params


def convnet_forward(params, x_nchw):
    C1 = params["conv1_w"].shape[0]
    C2 = params["conv2_w"].shape[0]

    x = jnp.transpose(x_nchw, (0, 2, 3, 1))                    # NCHW -> NHWC (glue)
    h = _conv_bn_pool_relu(x, params["conv1_w"], params["bn1_g"], params["bn1_b"])
    h = h[..., :C1]                                            # strip lane pad before conv2
    h = _conv_bn_pool_relu(h, params["conv2_w"], params["bn2_g"], params["bn2_b"])
    h = h[..., :C2]                                            # strip lane pad (glue)
    # nn.Flatten on NCHW: feature index = c*Hq*Wq + h*Wq + w.
    h = jnp.transpose(h, (0, 3, 1, 2)).reshape(h.shape[0], -1)
    return _mlp_head(
        h,
        params["fc1_w"].T, params["fc1_b"],
        params["fc2_w"].T, params["fc2_b"],
        params["fc3_w"].T, params["fc3_b"],
    )


if __name__ == "__main__":
    key = jax.random.PRNGKey(0)
    kx, kp = jax.random.split(key, 2)

    N, C, H, W = 2, 4, 16, 16
    x = jax.random.normal(kx, (N, C, H, W), dtype=jnp.float32)
    y = jnp.array([0, 1, 2, 0, 1, 2, 0, 1], dtype=jnp.int32)   # labels
    num_classes = int(jnp.unique(y).shape[0])                  # == 3, like _output_shape

    params = init_params(kp, C, H, W, num_classes)

    fwd = jax.jit(convnet_forward)
    out = fwd(params, x)
    jax.block_until_ready(out)
    assert out.shape == (N, num_classes), out.shape
    assert bool(jnp.all(jnp.isfinite(out)))
    print("KERNEL_OK")
</pallas_src>

<mosaic_0001>
module attributes {stable_mosaic.version = 11 : i64} {
  func.func @kernel(%arg0: memref<2x18x18x4xf32, #tpu.memory_space<vmem>>, %arg1: memref<36x128xbf16, #tpu.memory_space<vmem>>, %arg2: memref<1x128xf32, #tpu.memory_space<vmem>>, %arg3: memref<1x128xf32, #tpu.memory_space<vmem>>, %arg4: memref<128x128xf32, #tpu.memory_space<vmem>>) attributes {dimension_semantics = [], scalar_prefetch = 0 : i64, scratch_operands = 0 : i64, tpu.core_type = #tpu.core_type<tc>} {
    %c0 = arith.constant 0 : index
    %c0_0 = arith.constant 0 : index
    %c0_1 = arith.constant 0 : index
    %c0_2 = arith.constant 0 : index
    %0 = vector.load %arg0[%c0, %c0_0, %c0_1, %c0_2] : memref<2x18x18x4xf32, #tpu.memory_space<vmem>>, vector<2x16x16x4xf32>
    %1 = vector.shape_cast %0 : vector<2x16x16x4xf32> to vector<512x4xf32>
    %c0_3 = arith.constant 0 : index
    %c0_4 = arith.constant 0 : index
    %c1 = arith.constant 1 : index
    %c0_5 = arith.constant 0 : index
    %2 = vector.load %arg0[%c0_3, %c0_4, %c1, %c0_5] : memref<2x18x18x4xf32, #tpu.memory_space<vmem>>, vector<2x16x16x4xf32>
    %3 = vector.shape_cast %2 : vector<2x16x16x4xf32> to vector<512x4xf32>
    %c0_6 = arith.constant 0 : index
    %c0_7 = arith.constant 0 : index
    %c2 = arith.constant 2 : index
    %c0_8 = arith.constant 0 : index
    %4 = vector.load %arg0[%c0_6, %c0_7, %c2, %c0_8] : memref<2x18x18x4xf32, #tpu.memory_space<vmem>>, vector<2x16x16x4xf32>
    %5 = vector.shape_cast %4 : vector<2x16x16x4xf32> to vector<512x4xf32>
    %c0_9 = arith.constant 0 : index
    %c1_10 = arith.constant 1 : index
    %c0_11 = arith.constant 0 : index
    %c0_12 = arith.constant 0 : index
    %6 = vector.load %arg0[%c0_9, %c1_10, %c0_11, %c0_12] : memref<2x18x18x4xf32, #tpu.memory_space<vmem>>, vector<2x16x16x4xf32>
    %7 = vector.shape_cast %6 : vector<2x16x16x4xf32> to vector<512x4xf32>
    %c0_13 = arith.constant 0 : index
    %c1_14 = arith.constant 1 : index
    %c1_15 = arith.constant 1 : index
    %c0_16 = arith.constant 0 : index
    %8 = vector.load %arg0[%c0_13, %c1_14, %c1_15, %c0_16] : memref<2x18x18x4xf32, #tpu.memory_space<vmem>>, vector<2x16x16x4xf32>
    %9 = vector.shape_cast %8 : vector<2x16x16x4xf32> to vector<512x4xf32>
    %c0_17 = arith.constant 0 : index
    %c1_18 = arith.constant 1 : index
    %c2_19 = arith.constant 2 : index
    %c0_20 = arith.constant 0 : index
    %10 = vector.load %arg0[%c0_17, %c1_18, %c2_19, %c0_20] : memref<2x18x18x4xf32, #tpu.memory_space<vmem>>, vector<2x16x16x4xf32>
    %11 = vector.shape_cast %10 : vector<2x16x16x4xf32> to vector<512x4xf32>
    %c0_21 = arith.constant 0 : index
    %c2_22 = arith.constant 2 : index
    %c0_23 = arith.constant 0 : index
    %c0_24 = arith.constant 0 : index
    %12 = vector.load %arg0[%c0_21, %c2_22, %c0_23, %c0_24] : memref<2x18x18x4xf32, #tpu.memory_space<vmem>>, vector<2x16x16x4xf32>
    %13 = vector.shape_cast %12 : vector<2x16x16x4xf32> to vector<512x4xf32>
    %c0_25 = arith.constant 0 : index
    %c2_26 = arith.constant 2 : index
    %c1_27 = arith.constant 1 : index
    %c0_28 = arith.constant 0 : index
    %14 = vector.load %arg0[%c0_25, %c2_26, %c1_27, %c0_28] : memref<2x18x18x4xf32, #tpu.memory_space<vmem>>, vector<2x16x16x4xf32>
    %15 = vector.shape_cast %14 : vector<2x16x16x4xf32> to vector<512x4xf32>
    %c0_29 = arith.constant 0 : index
    %c2_30 = arith.constant 2 : index
    %c2_31 = arith.constant 2 : index
    %c0_32 = arith.constant 0 : index
    %16 = vector.load %arg0[%c0_29, %c2_30, %c2_31, %c0_32] : memref<2x18x18x4xf32, #tpu.memory_space<vmem>>, vector<2x16x16x4xf32>
    %17 = vector.shape_cast %16 : vector<2x16x16x4xf32> to vector<512x4xf32>
    %18 = tpu.concatenate %1, %3, %5, %7, %9, %11, %13, %15, %17 in 1 : vector<512x4xf32>, vector<512x4xf32>, vector<512x4xf32>, vector<512x4xf32>, vector<512x4xf32>, vector<512x4xf32>, vector<512x4xf32>, vector<512x4xf32>, vector<512x4xf32> -> vector<512x36xf32>
    %19 = arith.truncf %18 : vector<512x36xf32> to vector<512x36xbf16>
    %c0_33 = arith.constant 0 : index
    %c0_34 = arith.constant 0 : index
    %20 = vector.load %arg1[%c0_33, %c0_34] : memref<36x128xbf16, #tpu.memory_space<vmem>>, vector<36x128xbf16>
    %cst = arith.constant dense<0.000000e+00> : vector<512x128xf32>
    %21 = tpu.matmul %19, %20, %cst {dimension_numbers = #tpu.dot_dimension_numbers<[1], [0], [0], [1], [0, 0, 1, 1], [], []>} : vector<512x36xbf16>, vector<36x128xbf16>, vector<512x128xf32> -> vector<512x128xf32>
    %cst_35 = arith.constant dense<0.000000e+00> : vector<128xf32>
    %22 = vector.multi_reduction <add>, %21, %cst_35 [0] : vector<512x128xf32> to vector<128xf32>
    %23 = vector.shape_cast %22 : vector<128xf32> to vector<1x128xf32>
    %cst_36 = arith.constant 0.001953125 : f32
    %24 = vector.broadcast %cst_36 : f32 to vector<1x128xf32>
    %25 = arith.mulf %23, %24 : vector<1x128xf32>
    %26 = vector.broadcast %25 : vector<1x128xf32> to vector<512x128xf32>
    %27 = arith.subf %21, %26 : vector<512x128xf32>
    %28 = arith.mulf %27, %27 : vector<512x128xf32>
    %cst_37 = arith.constant dense<0.000000e+00> : vector<128xf32>
    %29 = vector.multi_reduction <add>, %28, %cst_37 [0] : vector<512x128xf32> to vector<128xf32>
    %30 = vector.shape_cast %29 : vector<128xf32> to vector<1x128xf32>
    %cst_38 = arith.constant 0.001953125 : f32
    %31 = vector.broadcast %cst_38 : f32 to vector<1x128xf32>
    %32 = arith.mulf %30, %31 : vector<1x128xf32>
    %c0_39 = arith.constant 0 : index
    %c0_40 = arith.constant 0 : index
    %33 = vector.load %arg2[%c0_39, %c0_40] : memref<1x128xf32, #tpu.memory_space<vmem>>, vector<1x128xf32>
    %cst_41 = arith.constant 9.99999974E-6 : f32
    %34 = vector.broadcast %cst_41 : f32 to vector<1x128xf32>
    %35 = arith.addf %32, %34 : vector<1x128xf32>
    %36 = math.rsqrt %35 : vector<1x128xf32>
    %37 = arith.mulf %33, %36 : vector<1x128xf32>
    %38 = vector.broadcast %37 : vector<1x128xf32> to vector<512x128xf32>
    %39 = arith.mulf %27, %38 : vector<512x128xf32>
    %c0_42 = arith.constant 0 : index
    %c0_43 = arith.constant 0 : index
    %40 = vector.load %arg3[%c0_42, %c0_43] : memref<1x128xf32, #tpu.memory_space<vmem>>, vector<1x128xf32>
    %41 = vector.broadcast %40 : vector<1x128xf32> to vector<512x128xf32>
    %42 = arith.addf %39, %41 : vector<512x128xf32>
    %43 = vector.shape_cast %42 : vector<512x128xf32> to vector<16x32x128xf32>
    %44 = vector.extract_strided_slice %43 {offsets = [0, 0, 0], sizes = [16, 16, 128], strides = [1, 1, 1]} : vector<16x32x128xf32> to vector<16x16x128xf32>
    %45 = vector.extract_strided_slice %43 {offsets = [0, 16, 0], sizes = [16, 16, 128], strides = [1, 1, 1]} : vector<16x32x128xf32> to vector<16x16x128xf32>
    %46 = arith.maximumf %44, %45 : vector<16x16x128xf32>
    %47 = vector.shape_cast %46 : vector<16x16x128xf32> to vector<128x2x128xf32>
    %cst_44 = arith.constant dense<0xFF800000> : vector<128x128xf32>
    %48 = vector.multi_reduction <maximumf>, %47, %cst_44 [1] : vector<128x2x128xf32> to vector<128x128xf32>
    %cst_45 = arith.constant 0.000000e+00 : f32
    %49 = vector.broadcast %cst_45 : f32 to vector<128x128xf32>
    %50 = arith.maximumf %48, %49 : vector<128x128xf32>
    %c0_46 = arith.constant 0 : index
    %c0_47 = arith.constant 0 : index
    %51 = vector.load %arg4[%c0_46, %c0_47] : memref<128x128xf32, #tpu.memory_space<vmem>>, vector<128x128xf32>
    tpu.vector_store %arg4[%c0_46, %c0_47], %50 {strides = array<i32>} : memref<128x128xf32, #tpu.memory_space<vmem>>, vector<128x128xf32>,
    return
  }
}

module attributes {stable_mosaic.version = 11 : i64} {
  func.func @kernel(%arg0: memref<2x10x10x8xf32, #tpu.memory_space<vmem>>, %arg1: memref<72x128xbf16, #tpu.memory_space<vmem>>, %arg2: memref<1x128xf32, #tpu.memory_space<vmem>>, %arg3: memref<1x128xf32, #tpu.memory_space<vmem>>, %arg4: memref<32x128xf32, #tpu.memory_space<vmem>>) attributes {dimension_semantics = [], scalar_prefetch = 0 : i64, scratch_operands = 0 : i64, tpu.core_type = #tpu.core_type<tc>} {
    %c0 = arith.constant 0 : index
    %c0_0 = arith.constant 0 : index
    %c0_1 = arith.constant 0 : index
    %c0_2 = arith.constant 0 : index
    %0 = vector.load %arg0[%c0, %c0_0, %c0_1, %c0_2] : memref<2x10x10x8xf32, #tpu.memory_space<vmem>>, vector<2x8x8x8xf32>
    %1 = vector.shape_cast %0 : vector<2x8x8x8xf32> to vector<128x8xf32>
    %c0_3 = arith.constant 0 : index
    %c0_4 = arith.constant 0 : index
    %c1 = arith.constant 1 : index
    %c0_5 = arith.constant 0 : index
    %2 = vector.load %arg0[%c0_3, %c0_4, %c1, %c0_5] : memref<2x10x10x8xf32, #tpu.memory_space<vmem>>, vector<2x8x8x8xf32>
    %3 = vector.shape_cast %2 : vector<2x8x8x8xf32> to vector<128x8xf32>
    %c0_6 = arith.constant 0 : index
    %c0_7 = arith.constant 0 : index
    %c2 = arith.constant 2 : index
    %c0_8 = arith.constant 0 : index
    %4 = vector.load %arg0[%c0_6, %c0_7, %c2, %c0_8] : memref<2x10x10x8xf32, #tpu.memory_space<vmem>>, vector<2x8x8x8xf32>
    %5 = vector.shape_cast %4 : vector<2x8x8x8xf32> to vector<128x8xf32>
    %c0_9 = arith.constant 0 : index
    %c1_10 = arith.constant 1 : index
    %c0_11 = arith.constant 0 : index
    %c0_12 = arith.constant 0 : index
    %6 = vector.load %arg0[%c0_9, %c1_10, %c0_11, %c0_12] : memref<2x10x10x8xf32, #tpu.memory_space<vmem>>, vector<2x8x8x8xf32>
    %7 = vector.shape_cast %6 : vector<2x8x8x8xf32> to vector<128x8xf32>
    %c0_13 = arith.constant 0 : index
    %c1_14 = arith.constant 1 : index
    %c1_15 = arith.constant 1 : index
    %c0_16 = arith.constant 0 : index
    %8 = vector.load %arg0[%c0_13, %c1_14, %c1_15, %c0_16] : memref<2x10x10x8xf32, #tpu.memory_space<vmem>>, vector<2x8x8x8xf32>
    %9 = vector.shape_cast %8 : vector<2x8x8x8xf32> to vector<128x8xf32>
    %c0_17 = arith.constant 0 : index
    %c1_18 = arith.constant 1 : index
    %c2_19 = arith.constant 2 : index
    %c0_20 = arith.constant 0 : index
    %10 = vector.load %arg0[%c0_17, %c1_18, %c2_19, %c0_20] : memref<2x10x10x8xf32, #tpu.memory_space<vmem>>, vector<2x8x8x8xf32>
    %11 = vector.shape_cast %10 : vector<2x8x8x8xf32> to vector<128x8xf32>
    %c0_21 = arith.constant 0 : index
    %c2_22 = arith.constant 2 : index
    %c0_23 = arith.constant 0 : index
    %c0_24 = arith.constant 0 : index
    %12 = vector.load %arg0[%c0_21, %c2_22, %c0_23, %c0_24] : memref<2x10x10x8xf32, #tpu.memory_space<vmem>>, vector<2x8x8x8xf32>
    %13 = vector.shape_cast %12 : vector<2x8x8x8xf32> to vector<128x8xf32>
    %c0_25 = arith.constant 0 : index
    %c2_26 = arith.constant 2 : index
    %c1_27 = arith.constant 1 : index
    %c0_28 = arith.constant 0 : index
    %14 = vector.load %arg0[%c0_25, %c2_26, %c1_27, %c0_28] : memref<2x10x10x8xf32, #tpu.memory_space<vmem>>, vector<2x8x8x8xf32>
    %15 = vector.shape_cast %14 : vector<2x8x8x8xf32> to vector<128x8xf32>
    %c0_29 = arith.constant 0 : index
    %c2_30 = arith.constant 2 : index
    %c2_31 = arith.constant 2 : index
    %c0_32 = arith.constant 0 : index
    %16 = vector.load %arg0[%c0_29, %c2_30, %c2_31, %c0_32] : memref<2x10x10x8xf32, #tpu.memory_space<vmem>>, vector<2x8x8x8xf32>
    %17 = vector.shape_cast %16 : vector<2x8x8x8xf32> to vector<128x8xf32>
    %18 = tpu.concatenate %1, %3, %5, %7, %9, %11, %13, %15, %17 in 1 : vector<128x8xf32>, vector<128x8xf32>, vector<128x8xf32>, vector<128x8xf32>, vector<128x8xf32>, vector<128x8xf32>, vector<128x8xf32>, vector<128x8xf32>, vector<128x8xf32> -> vector<128x72xf32>
    %19 = arith.truncf %18 : vector<128x72xf32> to vector<128x72xbf16>
    %c0_33 = arith.constant 0 : index
    %c0_34 = arith.constant 0 : index
    %20 = vector.load %arg1[%c0_33, %c0_34] : memref<72x128xbf16, #tpu.memory_space<vmem>>, vector<72x128xbf16>
    %cst = arith.constant dense<0.000000e+00> : vector<128x128xf32>
    %21 = tpu.matmul %19, %20, %cst {dimension_numbers = #tpu.dot_dimension_numbers<[1], [0], [0], [1], [0, 0, 1, 1], [], []>} : vector<128x72xbf16>, vector<72x128xbf16>, vector<128x128xf32> -> vector<128x128xf32>
    %cst_35 = arith.constant dense<0.000000e+00> : vector<128xf32>
    %22 = vector.multi_reduction <add>, %21, %cst_35 [0] : vector<128x128xf32> to vector<128xf32>
    %23 = vector.shape_cast %22 : vector<128xf32> to vector<1x128xf32>
    %cst_36 = arith.constant 7.812500e-03 : f32
    %24 = vector.broadcast %cst_36 : f32 to vector<1x128xf32>
    %25 = arith.mulf %23, %24 : vector<1x128xf32>
    %26 = vector.broadcast %25 : vector<1x128xf32> to vector<128x128xf32>
    %27 = arith.subf %21, %26 : vector<128x128xf32>
    %28 = arith.mulf %27, %27 : vector<128x128xf32>
    %cst_37 = arith.constant dense<0.000000e+00> : vector<128xf32>
    %29 = vector.multi_reduction <add>, %28, %cst_37 [0] : vector<128x128xf32> to vector<128xf32>
    %30 = vector.shape_cast %29 : vector<128xf32> to vector<1x128xf32>
    %cst_38 = arith.constant 7.812500e-03 : f32
    %31 = vector.broadcast %cst_38 : f32 to vector<1x128xf32>
    %32 = arith.mulf %30, %31 : vector<1x128xf32>
    %c0_39 = arith.constant 0 : index
    %c0_40 = arith.constant 0 : index
    %33 = vector.load %arg2[%c0_39, %c0_40] : memref<1x128xf32, #tpu.memory_space<vmem>>, vector<1x128xf32>
    %cst_41 = arith.constant 9.99999974E-6 : f32
    %34 = vector.broadcast %cst_41 : f32 to vector<1x128xf32>
    %35 = arith.addf %32, %34 : vector<1x128xf32>
    %36 = math.rsqrt %35 : vector<1x128xf32>
    %37 = arith.mulf %33, %36 : vector<1x128xf32>
    %38 = vector.broadcast %37 : vector<1x128xf32> to vector<128x128xf32>
    %39 = arith.mulf %27, %38 : vector<128x128xf32>
    %c0_42 = arith.constant 0 : index
    %c0_43 = arith.constant 0 : index
    %40 = vector.load %arg3[%c0_42, %c0_43] : memref<1x128xf32, #tpu.memory_space<vmem>>, vector<1x128xf32>
    %41 = vector.broadcast %40 : vector<1x128xf32> to vector<128x128xf32>
    %42 = arith.addf %39, %41 : vector<128x128xf32>
    %43 = vector.shape_cast %42 : vector<128x128xf32> to vector<8x16x128xf32>
    %44 = vector.extract_strided_slice %43 {offsets = [0, 0, 0], sizes = [8, 8, 128], strides = [1, 1, 1]} : vector<8x16x128xf32> to vector<8x8x128xf32>
    %45 = vector.extract_strided_slice %43 {offsets = [0, 8, 0], sizes = [8, 8, 128], strides = [1, 1, 1]} : vector<8x16x128xf32> to vector<8x8x128xf32>
    %46 = arith.maximumf %44, %45 : vector<8x8x128xf32>
    %47 = vector.shape_cast %46 : vector<8x8x128xf32> to vector<32x2x128xf32>
    %cst_44 = arith.constant dense<0xFF800000> : vector<32x128xf32>
    %48 = vector.multi_reduction <maximumf>, %47, %cst_44 [1] : vector<32x2x128xf32> to vector<32x128xf32>
    %cst_45 = arith.constant 0.000000e+00 : f32
    %49 = vector.broadcast %cst_45 : f32 to vector<32x128xf32>
    %50 = arith.maximumf %48, %49 : vector<32x128xf32>
    %c0_46 = arith.constant 0 : index
    %c0_47 = arith.constant 0 : index
    %51 = vector.load %arg4[%c0_46, %c0_47] : memref<32x128xf32, #tpu.memory_space<vmem>>, vector<32x128xf32>
    tpu.vector_store %arg4[%c0_46, %c0_47], %50 {strides = array<i32>} : memref<32x128xf32, #tpu.memory_space<vmem>>, vector<32x128xf32>,
    return
  }
}

module attributes {stable_mosaic.version = 11 : i64} {
  func.func @kernel(%arg0: memref<2x256xf32, #tpu.memory_space<vmem>>, %arg1: memref<256x128xbf16, #tpu.memory_space<vmem>>, %arg2: memref<1x128xf32, #tpu.memory_space<vmem>>, %arg3: memref<128x128xbf16, #tpu.memory_space<vmem>>, %arg4: memref<1x128xf32, #tpu.memory_space<vmem>>, %arg5: memref<128x128xbf16, #tpu.memory_space<vmem>>, %arg6: memref<1x128xf32, #tpu.memory_space<vmem>>, %arg7: memref<2x128xf32, #tpu.memory_space<vmem>>) attributes {dimension_semantics = [], scalar_prefetch = 0 : i64, scratch_operands = 0 : i64, tpu.core_type = #tpu.core_type<tc>} {
    %c0 = arith.constant 0 : index
    %c0_0 = arith.constant 0 : index
    %0 = vector.load %arg0[%c0, %c0_0] : memref<2x256xf32, #tpu.memory_space<vmem>>, vector<2x256xf32>
    %1 = arith.truncf %0 : vector<2x256xf32> to vector<2x256xbf16>
    %c0_1 = arith.constant 0 : index
    %c0_2 = arith.constant 0 : index
    %2 = vector.load %arg1[%c0_1, %c0_2] : memref<256x128xbf16, #tpu.memory_space<vmem>>, vector<256x128xbf16>
    %cst = arith.constant dense<0.000000e+00> : vector<2x128xf32>
    %3 = tpu.matmul %1, %2, %cst {dimension_numbers = #tpu.dot_dimension_numbers<[1], [0], [0], [1], [0, 0, 1, 1], [], []>} : vector<2x256xbf16>, vector<256x128xbf16>, vector<2x128xf32> -> vector<2x128xf32>
    %c0_3 = arith.constant 0 : index
    %c0_4 = arith.constant 0 : index
    %4 = vector.load %arg2[%c0_3, %c0_4] : memref<1x128xf32, #tpu.memory_space<vmem>>, vector<1x128xf32>
    %5 = vector.broadcast %4 : vector<1x128xf32> to vector<2x128xf32>
    %6 = arith.addf %3, %5 : vector<2x128xf32>
    %cst_5 = arith.constant 0.000000e+00 : f32
    %7 = vector.broadcast %cst_5 : f32 to vector<2x128xf32>
    %8 = arith.maximumf %6, %7 : vector<2x128xf32>
    %9 = arith.truncf %8 : vector<2x128xf32> to vector<2x128xbf16>
    %c0_6 = arith.constant 0 : index
    %c0_7 = arith.constant 0 : index
    %10 = vector.load %arg3[%c0_6, %c0_7] : memref<128x128xbf16, #tpu.memory_space<vmem>>, vector<128x128xbf16>
    %cst_8 = arith.constant dense<0.000000e+00> : vector<2x128xf32>
    %11 = tpu.matmul %9, %10, %cst_8 {dimension_numbers = #tpu.dot_dimension_numbers<[1], [0], [0], [1], [0, 0, 1, 1], [], []>} : vector<2x128xbf16>, vector<128x128xbf16>, vector<2x128xf32> -> vector<2x128xf32>
    %c0_9 = arith.constant 0 : index
    %c0_10 = arith.constant 0 : index
    %12 = vector.load %arg4[%c0_9, %c0_10] : memref<1x128xf32, #tpu.memory_space<vmem>>, vector<1x128xf32>
    %13 = vector.broadcast %12 : vector<1x128xf32> to vector<2x128xf32>
    %14 = arith.addf %11, %13 : vector<2x128xf32>
    %cst_11 = arith.constant 0.000000e+00 : f32
    %15 = vector.broadcast %cst_11 : f32 to vector<2x128xf32>
    %16 = arith.maximumf %14, %15 : vector<2x128xf32>
    %17 = arith.truncf %16 : vector<2x128xf32> to vector<2x128xbf16>
    %c0_12 = arith.constant 0 : index
    %c0_13 = arith.constant 0 : index
    %18 = vector.load %arg5[%c0_12, %c0_13] : memref<128x128xbf16, #tpu.memory_space<vmem>>, vector<128x128xbf16>
    %cst_14 = arith.constant dense<0.000000e+00> : vector<2x128xf32>
    %19 = tpu.matmul %17, %18, %cst_14 {dimension_numbers = #tpu.dot_dimension_numbers<[1], [0], [0], [1], [0, 0, 1, 1], [], []>} : vector<2x128xbf16>, vector<128x128xbf16>, vector<2x128xf32> -> vector<2x128xf32>
    %c0_15 = arith.constant 0 : index
    %c0_16 = arith.constant 0 : index
    %20 = vector.load %arg6[%c0_15, %c0_16] : memref<1x128xf32, #tpu.memory_space<vmem>>, vector<1x128xf32>
    %21 = vector.broadcast %20 : vector<1x128xf32> to vector<2x128xf32>
    %22 = arith.addf %19, %21 : vector<2x128xf32>
    %c0_17 = arith.constant 0 : index
    %c0_18 = arith.constant 0 : index
    %23 = vector.load %arg7[%c0_17, %c0_18] : memref<2x128xf32, #tpu.memory_space<vmem>>, vector<2x128xf32>
    tpu.vector_store %arg7[%c0_17, %c0_18], %22 {strides = array<i32>} : memref<2x128xf32, #tpu.memory_space<vmem>>, vector<2x128xf32>,
    return
  }
}

</mosaic_0001>

<bundles_post_ra>
// kernel: convnet_forward.4
= control target key start
LH: loop header
LB: loop body
LE: loop exit
PB: predicated region body
PF: predicated region fallthrough
CT: control target
= control target key end

     0   :  { %s2124_s5 = smov 16   ;;  %s2125_s6 = smov 8   ;;  %vm881_vm0 = vcmask 1043456   ;;  %vm676_vm1 = vcmask 64512   ;;  %vm693_vm2 = vcmask 130048   ;;  %vm710_vm3 = vcmask 195584   ;;  %s3006_s0 = inlined_call_operand.vmem [shape: f32[2,10,10,8], index: 0, kind: input, shape index: {}]   ;;  %s3007_s1 = inlined_call_operand.vmem [shape: bf16[72,128], index: 1, kind: input, shape index: {}]   ;;  %s3008_s2 = inlined_call_operand.vmem [shape: f32[1,128], index: 2, kind: input, shape index: {}]   ;;  %s3009_s3 = inlined_call_operand.vmem [shape: f32[1,128], index: 3, kind: input, shape index: {}]   ;;  %s3010_s4 = inlined_call_operand.vmem [shape: f32[32,128], index: 4, kind: output, shape index: {}]  }
   0x1   :  { %v50_v0 = vld [vmem:[%s3006_s0 + $0x2] sm:$0xff]  ;;  %v51_v1 = vld [vmem:[%s3006_s0 + $0x12] sm:$0xff]  ;;  %s2126_s17 = smov 24   ;;  %s2127_s20 = smov 32   ;;  %v2121_v40 = vld [vmem:[%s3007_s1 + $0x20] ss:$0 sps:$4 sm:$0xff]  }
   0x2   :  { %v34_v2 = vld [vmem:[%s3006_s0 + $0x1] sm:$0xff]  ;;  %v1807_v3 = vpack.i.bf16 %v51_v1, %v50_v0  ;;  %v35_v4 = vld [vmem:[%s3006_s0 + $0x11] sm:$0xff]  ;;  %s2128_s23 = smov 40   ;;  %s2129_s30 = smov 48   ;;  %v883_v44 = vsel %vm881_vm0, %v2121_v40, 0  ;;  %vm727_vm4 = vcmask 261120  }
   0x3   :  { %v52_v5 = vld [vmem:[%s3006_s0 + $0x22] sm:$0xff]  ;;  %v53_v6 = vld [vmem:[%s3006_s0 + $0x32] sm:$0xff]  ;;  %v1797_v7 = vpack.i.bf16 %v35_v4, %v34_v2  ;;  %s2130_s9 = smov 56   ;;  %s2131_s19 = smov 64   ;;  %vm744_vm5 = vcmask 326656   ;;  %vm761_vm6 = vcmask 392192  }
   0x4   :  { %v36_v8 = vld [vmem:[%s3006_s0 + $0x21] sm:$0xff]  ;;  %v37_v9 = vld [vmem:[%s3006_s0 + $0x31] sm:$0xff]  ;;  %1808 = vrot.lane.b32.xlu1 %v1807_v3, %s2124_s5  ;;  %v1812_v10 = vpack.i.bf16 %v53_v6, %v52_v5  ;;  %v1837_v23 = vpack.i.bf16 %v52_v5, %v51_v1  ;;  %vm778_vm7 = vcmask 457728   ;;  %vm795_vm8 = vcmask 523264  }
   0x5   :  { %1798 = vrot.lane.b32.xlu0 %v1797_v7, %s2125_s6  ;;  %v1802_v11 = vpack.i.bf16 %v37_v9, %v36_v8  ;;  %v2187_v12 = vld [vmem:[%s3006_s0 + $0x30] sm:$0xff]  ;;  %v2192_v13 = vld [vmem:[%s3006_s0 + $0x40] sm:$0xff]  ;;  %v1827_v20 = vpack.i.bf16 %v36_v8, %v35_v4  ;;  %v2118_v29 = vld [vmem:[%s3007_s1 + $0x8] sm:$0xff]   ;;  %vm856_vm9 = vcmask 588800   ;;  %vm1291_vm10 = vcmask 1041408  }
   0x6   :  { %v2197_v14 = vld [vmem:[%s3006_s0 + $0x10] sm:$0xff]  ;;  %v2202_v15 = vld [vmem:[%s3006_s0 + $0x20] sm:$0xff]  ;;  %v1822_v16 = vpack.i.bf16 %v2192_v13, %v2187_v12  ;;  %v2120_v34 = vld [vmem:[%s3007_s1 + $0x18] sm:$0xff]   ;;  %vm1580_vm11 = vcmask 1041409   ;;  %vm1582_vm12 = vcmask 1042434   ;;  %vm1584_vm13 = vcmask 1043459  }
   0x7   :  { %v1817_v17 = vpack.i.bf16 %v2202_v15, %v2197_v14  ;;  %v1646_v18 = vld [vmem:[%s3006_s0 + $0x41] sm:$0xff]  ;;  %v2223_v24 = vld [vmem:[%s3006_s0 + $0x50] sm:$0xff]  ;;  %v1847_v27 = vpack.i.bf16 %v2187_v12, %v2202_v15  ;;  %vm1586_vm14 = vcmask 1044484   ;;  %vm1588_vm15 = vcmask 1045509  }
   0x8   :  { %1813 = vrot.lane.b32.xlu1 %v1812_v10, %s2124_s5  ;;  %v1832_v19 = vpack.i.bf16 %v1646_v18, %v37_v9  ;;  %v1662_v21 = vld [vmem:[%s3006_s0 + $0x42] sm:$0xff]  ;;  %v1852_v25 = vpack.i.bf16 %v2223_v24, %v2192_v13  ;;  %v2231_v26 = vld [vmem:[%s3006_s0 + $0x51] sm:$0xff] }
   0x9   :  { %1803 = vrot.lane.b32.xlu0 %v1802_v11, %s2125_s6  ;;  %v1842_v22 = vpack.i.bf16 %v1662_v21, %v53_v6  ;;  %v2117_v28 = vld [vmem:[%s3007_s1] sm:$0xff]   ;;  %v1862_v30 = vpack.i.bf16 %v2231_v26, %v1646_v18  ;;  %v2119_v31 = vld [vmem:[%s3007_s1 + $0x10] sm:$0xff]  }
   0xa   :  { %1750 = vmatprep.subr.bf16.mxu0 %v2117_v28  ;;  %1776 = vmatprep.subr.bf16.mxu1 %v2117_v28  ;;  %v40_v32 = vld [vmem:[%s3006_s0 + $0x61] sm:$0xff]  ;;  %v41_v33 = vld [vmem:[%s3006_s0 + $0x71] sm:$0xff] }
   0xb   :  { %1751 = vmatpush3.bf16.msra.mxu0 %v2117_v28  ;;  %1781 = vmatpush3.bf16.msra.mxu1 %v2117_v28  ;;  %v1710_v35 = vld [vmem:[%s3006_s0 + $0x52] sm:$0xff]  ;;  %v1882_v36 = vpack.i.bf16 %v41_v33, %v40_v32  ;;  %v56_v38 = vld [vmem:[%s3006_s0 + $0x62] sm:$0xff]  ;;  %v1907_v50 = vpack.i.bf16 %v40_v32, %v2231_v26 }
   0xc   :  { %1823 = vrot.lane.b32.xlu1 %v1822_v16, %s2126_s17  ;;  %1752 = vmatprep.subr.bf16.mxu0 %v2118_v29  ;;  %v1877_v37 = vpack.i.bf16 %v1710_v35, %v1662_v21  ;;  %v57_v39 = vld [vmem:[%s3006_s0 + $0x72] sm:$0xff]  ;;  %v1634_v43 = vld [vmem:[%s3006_s0 + $0x80] sm:$0xff]  ;;  %v1917_v53 = vpack.i.bf16 %v56_v38, %v1710_v35 }
   0xd   :  { %1818 = vrot.lane.b32.xlu0 %v1817_v17, %s2126_s17  ;;  %1777 = vmatprep.subr.bf16.mxu1 %v2118_v29  ;;  %v1892_v41 = vpack.i.bf16 %v57_v39, %v56_v38  ;;  %v2278_v42 = vld [vmem:[%s3006_s0 + $0x70] sm:$0xff]  ;;  %v2286_v45 = vld [vmem:[%s3006_s0 + $0x60] sm:$0xff] }
   0xe   :  { %v1902_v46 = vpack.i.bf16 %v1634_v43, %v2278_v42  ;;  %v1897_v47 = vpack.i.bf16 %v2286_v45, %v2223_v24  ;;  %v1650_v48 = vld [vmem:[%s3006_s0 + $0x81] sm:$0xff]  ;;  %v1682_v54 = vld [vmem:[%s3006_s0 + $0x90] sm:$0xff]  ;;  %v1927_v56 = vpack.i.bf16 %v2278_v42, %v2286_v45 }
   0xf   :  { %1753 = vmatpush3.bf16.msra.mxu0 %v2118_v29  ;;  %1782 = vmatpush3.bf16.msra.mxu1 %v2118_v29  ;;  %v1912_v49 = vpack.i.bf16 %v1650_v48, %v41_v33  ;;  %v1666_v51 = vld [vmem:[%s3006_s0 + $0x82] sm:$0xff]  ;;  %v1932_v55 = vpack.i.bf16 %v1682_v54, %v1634_v43  ;;  %v1698_v57 = vld [vmem:[%s3006_s0 + $0x91] sm:$0xff] }
  0x10   :  { %1833 = vrot.lane.b32.xlu1 %v1832_v19, %s2127_s20  ;;  %1754 = vmatprep.subr.bf16.mxu0 %v2119_v31  ;;  %v1922_v52 = vpack.i.bf16 %v1666_v51, %v57_v39  ;;  %v1942_v58 = vpack.i.bf16 %v1698_v57, %v1650_v48  ;;  %v42_v59 = vld [vmem:[%s3006_s0 + $0xa1] sm:$0xff]  ;;  %v43_v60 = vld [vmem:[%s3006_s0 + $0xb1] sm:$0xff] }
  0x11   :  { %1828 = vrot.lane.b32.xlu0 %v1827_v20, %s2127_s20  ;;  %1778 = vmatprep.subr.bf16.mxu1 %v2119_v31  ;;  %v1952_v61 = vpack.i.bf16 %v43_v60, %v42_v59  ;;  %v44_v62 = vld [vmem:[%s3006_s0 + $0xc1] sm:$0xff]  ;;  %v45_v63 = vld [vmem:[%s3006_s0 + $0xd1] sm:$0xff] }
  0x12   :  { %v1714_v0 = vld [vmem:[%s3006_s0 + $0x92] sm:$0xff]  ;;  %v1962_v1 = vpack.i.bf16 %v45_v63, %v44_v62  ;;  %v60_v3 = vld [vmem:[%s3006_s0 + $0xc2] sm:$0xff]  ;;  %v1987_v21 = vpack.i.bf16 %v44_v62, %v43_v60 }
  0x13   :  { %1755 = vmatpush3.bf16.msra.mxu0 %v2119_v31  ;;  %1783 = vmatpush3.bf16.msra.mxu1 %v2119_v31  ;;  %v1957_v2 = vpack.i.bf16 %v1714_v0, %v1666_v51  ;;  %v61_v4 = vld [vmem:[%s3006_s0 + $0xd2] sm:$0xff]  ;;  %v58_v5 = vld [vmem:[%s3006_s0 + $0xa2] sm:$0xff] }
  0x14   :  { %1843 = vrot.lane.b32.xlu1 %v1842_v22, %s2128_s23  ;;  %1756 = vmatprep.subr.bf16.mxu0 %v2120_v34  ;;  %v59_v6 = vld [vmem:[%s3006_s0 + $0xb2] sm:$0xff]  ;;  %v1972_v7 = vpack.i.bf16 %v61_v4, %v60_v3  ;;  %v2367_v16 = vld [vmem:[%s3006_s0 + $0xc0] sm:$0xff] }
  0x15   :  { %1838 = vrot.lane.b32.xlu0 %v1837_v23, %s2128_s23  ;;  %1779 = vmatprep.subr.bf16.mxu1 %v2120_v34  ;;  %v1967_v8 = vpack.i.bf16 %v59_v6, %v58_v5  ;;  %v2352_v9 = vld [vmem:[%s3006_s0 + $0xd0] sm:$0xff]  ;;  %v1654_v19 = vld [vmem:[%s3006_s0 + $0xe1] sm:$0xff] }
  0x16   :  { %v1992_v20 = vpack.i.bf16 %v1654_v19, %v45_v63  ;;  %v1670_v22 = vld [vmem:[%s3006_s0 + $0xe2] sm:$0xff]  ;;  %v2388_v26 = vld [vmem:[%s3006_s0 + $0xf0] sm:$0xff]  ;;  %v2007_v28 = vpack.i.bf16 %v2352_v9, %v2367_v16 }
  0x17   :  { %1757 = vmatpush3.bf16.msra.mxu0 %v2120_v34  ;;  %1784 = vmatpush3.bf16.msra.mxu1 %v2120_v34  ;;  %v2002_v23 = vpack.i.bf16 %v1670_v22, %v61_v4  ;;  %v1702_v29 = vld [vmem:[%s3006_s0 + $0xf1] sm:$0xff]  ;;  %v48_v31 = vld [vmem:[%s3006_s0 + $0x101] sm:$0xff] }
  0x18   :  { %1853 = vrot.lane.b32.xlu1 %v1852_v25, %s2129_s30  ;;  %1786 = vmatprep.subr.msk.bf16.mxu0 %vm881_vm0, %v2121_v40  ;;  %v1997_v25 = vpack.i.bf16 %v60_v3, %v59_v6  ;;  %v49_v32 = vld [vmem:[%s3006_s0 + $0x111] sm:$0xff]  ;;  %v2067_v48 = vpack.i.bf16 %v48_v31, %v1702_v29  ;;  %v18_v6 = vld [vmem:[%s3006_s0] sm:$0xff] }
  0x19   :  { %1848 = vrot.lane.b32.xlu0 %v1847_v27, %s2129_s30  ;;  %1787 = vmatprep.subr.msk.bf16.mxu1 %vm881_vm0, %v2121_v40  ;;  %v1718_v33 = vld [vmem:[%s3006_s0 + $0xf2] sm:$0xff]  ;;  %v2042_v34 = vpack.i.bf16 %v49_v32, %v48_v31  ;;  %v1642_v40 = vld [vmem:[%s3006_s0 + $0x120] sm:$0xff]  ;;  %vm1590_vm0 = vcmask 1046534  }
  0x1a   :  { %v2037_v35 = vpack.i.bf16 %v1718_v33, %v1670_v22  ;;  %v2425_v39 = vld [vmem:[%s3006_s0 + $0x110] sm:$0xff] }
  0x1b   :  { %1759 = vmatpush3.bf16.msra.mxu0 %v883_v44  ;;  %1785 = vmatpush3.bf16.msra.mxu1 %v883_v44  ;;  %v2062_v43 = vpack.i.bf16 %v1642_v40, %v2425_v39  ;;  %v1722_v59 = vld [vmem:[%s3006_s0 + $0x132] sm:$0xff] }
  0x1c   :  { %1863 = vrot.lane.b32.xlu1 %v1862_v30, %s2130_s9 }
  0x1d   :  { %1858 = vrot.lane.b32.xlu0 %v1802_v11, %s2130_s9  ;;  %v2362_v11 = vld [vmem:[%s3006_s0 + $0xb0] sm:$0xff] }
  0x1e   :  { %v1977_v18 = vpack.i.bf16 %v2367_v16, %v2362_v11 }
  0x20   :  { %1873 = vrot.lane.b32.xlu1 %v1862_v30, %s2125_s6  ;;  %v2022_v30 = vpack.i.bf16 %v1702_v29, %v1654_v19 }
  0x21   :  { %1868 = vrot.lane.b32.xlu0 %v1812_v10, %s2131_s19  ;;  %v2357_v10 = vld [vmem:[%s3006_s0 + $0xe0] sm:$0xff] }
  0x22   :  { %v1982_v17 = vpack.i.bf16 %v2357_v10, %v2352_v9  ;;  %v2012_v27 = vpack.i.bf16 %v2388_v26, %v2357_v10 }
  0x24   :  { %1883 = vrot.lane.b32.xlu1 %v1882_v36, %s2125_s6 }
  0x25   :  { %1878 = vrot.lane.b32.xlu0 %v1877_v37, %s2131_s19 }
  0x28   :  { %1893 = vrot.lane.b32.xlu1 %v1892_v41, %s2124_s5 }
  0x29   :  { %1888 = vrot.lane.b32.xlu0 %v1877_v37, %s2124_s5  ;;  %v65_v37 = vld [vmem:[%s3006_s0 + $0x112] sm:$0xff] }
  0x2c   :  { %1903 = vrot.lane.b32.xlu1 %v1902_v46, %s2126_s17  ;;  %v1658_v46 = vld [vmem:[%s3006_s0 + $0x121] sm:$0xff] }
  0x2d   :  { %1898 = vrot.lane.b32.xlu0 %v1897_v47, %s2126_s17  ;;  %v2072_v47 = vpack.i.bf16 %v1658_v46, %v49_v32 }
  0x30   :  { %1913 = vrot.lane.b32.xlu1 %v1912_v49, %s2127_s20  ;;  %v1674_v49 = vld [vmem:[%s3006_s0 + $0x122] sm:$0xff] }
  0x31   :  { %1908 = vrot.lane.b32.xlu0 %v1907_v50, %s2127_s20  ;;  %v2082_v50 = vpack.i.bf16 %v1674_v49, %v65_v37  ;;  %v2112_v62 = vpack.i.bf16 %v1722_v59, %v1674_v49 }
  0x34   :  { %1923 = vrot.lane.b32.xlu1 %v1922_v52, %s2128_s23  ;;  %v1690_v52 = vld [vmem:[%s3006_s0 + $0x130] sm:$0xff] }
  0x35   :  { %1918 = vrot.lane.b32.xlu0 %v1917_v53, %s2128_s23  ;;  %v2092_v53 = vpack.i.bf16 %v1690_v52, %v1642_v40 }
  0x38   :  { %1933 = vrot.lane.b32.xlu1 %v1932_v55, %s2129_s30  ;;  %v1706_v55 = vld [vmem:[%s3006_s0 + $0x131] sm:$0xff] }
  0x39   :  { %1928 = vrot.lane.b32.xlu0 %v1927_v56, %s2129_s30 }
  0x3c   :  { %1943 = vrot.lane.b32.xlu1 %v1942_v58, %s2130_s9  ;;  %v2102_v58 = vpack.i.bf16 %v1706_v55, %v1658_v46 }
  0x3d   :  { %1938 = vrot.lane.b32.xlu0 %v1882_v36, %s2130_s9  ;;  %v64_v36 = vld [vmem:[%s3006_s0 + $0x102] sm:$0xff] }
  0x3e   :  { %v2052_v38 = vpack.i.bf16 %v65_v37, %v64_v36  ;;  %v2077_v51 = vpack.i.bf16 %v64_v36, %v1718_v33 }
  0x40   :  { %1953 = vrot.lane.b32.xlu1 %v1952_v61, %s2125_s6 }
  0x41   :  { %1948 = vrot.lane.b32.xlu0 %v1892_v41, %s2131_s19  ;;  %v2433_v41 = vld [vmem:[%s3006_s0 + $0x100] sm:$0xff] }
  0x42   :  { %v2057_v44 = vpack.i.bf16 %v2433_v41, %v2388_v26  ;;  %v2087_v54 = vpack.i.bf16 %v2425_v39, %v2433_v41 }
  0x44   :  { %1963 = vrot.lane.b32.xlu1 %v1962_v1, %s2125_s6 }
  0x45   :  { %1958 = vrot.lane.b32.xlu0 %v1957_v2, %s2131_s19 }
  0x48   :  { %1973 = vrot.lane.b32.xlu1 %v1972_v7, %s2124_s5 }
  0x49   :  { %1968 = vrot.lane.b32.xlu0 %v1967_v8, %s2124_s5 }
  0x4c   :  { %1983 = vrot.lane.b32.xlu1 %v1982_v17, %s2126_s17 }
  0x4d   :  { %1978 = vrot.lane.b32.xlu0 %v1977_v18, %s2126_s17 }
  0x50   :  { %1993 = vrot.lane.b32.xlu1 %v1992_v20, %s2127_s20 }
  0x51   :  { %1988 = vrot.lane.b32.xlu0 %v1987_v21, %s2127_s20 }
  0x54   :  { %2003 = vrot.lane.b32.xlu1 %v2002_v23, %s2128_s23 }
  0x55   :  { %1998 = vrot.lane.b32.xlu0 %v1997_v25, %s2128_s23 }
  0x58   :  { %2013 = vrot.lane.b32.xlu1 %v2012_v27, %s2129_s30 }
  0x59   :  { %2008 = vrot.lane.b32.xlu0 %v2007_v28, %s2129_s30 }
  0x5c   :  { %2023 = vrot.lane.b32.xlu1 %v2022_v30, %s2130_s9 }
  0x5d   :  { %2018 = vrot.lane.b32.xlu0 %v1962_v1, %s2130_s9 }
  0x60   :  { %2033 = vrot.lane.b32.xlu1 %v2022_v30, %s2125_s6 }
  0x61   :  { %2028 = vrot.lane.b32.xlu0 %v1972_v7, %s2131_s19 }
  0x64   :  { %2043 = vrot.lane.b32.xlu1 %v2042_v34, %s2125_s6 }
  0x65   :  { %2038 = vrot.lane.b32.xlu0 %v2037_v35, %s2131_s19 }
  0x68   :  { %2053 = vrot.lane.b32.xlu1 %v2052_v38, %s2124_s5 }
  0x69   :  { %2048 = vrot.lane.b32.xlu0 %v2037_v35, %s2124_s5 }
  0x6c   :  { %2063 = vrot.lane.b32.xlu1 %v2062_v43, %s2126_s17 }
  0x6d   :  { %2058 = vrot.lane.b32.xlu0 %v2057_v44, %s2126_s17 }
  0x70   :  { %2073 = vrot.lane.b32.xlu1 %v2072_v47, %s2127_s20 }
  0x71   :  { %2068 = vrot.lane.b32.xlu0 %v2067_v48, %s2127_s20 }
  0x74   :  { %2083 = vrot.lane.b32.xlu1 %v2082_v50, %s2128_s23 }
  0x75   :  { %2078 = vrot.lane.b32.xlu0 %v2077_v51, %s2128_s23 }
  0x76   :  { %v1809_v56 = vpop.permute.xlu1 %1808 }
  0x77   :  { %v1799_v57 = vpop.permute.xlu0 %1798  ;;  %v1811_v18 = vunpack.i.h.bf16 %v1809_v56  ;;  %v1810_v19 = vunpack.i.l.bf16 %v1809_v56 }
  0x78   :  { %2093 = vrot.lane.b32.xlu1 %v2092_v53, %s2129_s30  ;;  %v1801_v3 = vunpack.i.h.bf16 %v1799_v57  ;;  %v1800_v4 = vunpack.i.l.bf16 %v1799_v57 }
  0x79   :  { %2088 = vrot.lane.b32.xlu0 %v2087_v54, %s2129_s30 }
  0x7a   :  { %v1814_v60 = vpop.permute.xlu1 %1813  ;;  %v677_v20 = vsel %vm676_vm1, %v18_v6, %v1800_v4  ;;  %v678_v21 = vsel %vm676_vm1, %v2197_v14, %v1801_v3 }
  0x7b   :  { %v1804_v61 = vpop.permute.xlu0 %1803  ;;  %v1816_v22 = vunpack.i.h.bf16 %v1814_v60  ;;  %v1815_v23 = vunpack.i.l.bf16 %v1814_v60  ;;  %v695_v14 = vsel %vm693_vm2, %v678_v21, %v1811_v18 }
  0x7c   :  { %2103 = vrot.lane.b32.xlu1 %v2102_v58, %s2130_s9  ;;  %v1806_v7 = vunpack.i.h.bf16 %v1804_v61  ;;  %v1805_v8 = vunpack.i.l.bf16 %v1804_v61 }
  0x7d   :  { %2098 = vrot.lane.b32.xlu0 %v2042_v34, %s2130_s9  ;;  %v694_v34 = vsel %vm693_vm2, %v677_v20, %v1810_v19 }
  0x7e   :  { %v1824_v63 = vpop.permute.xlu1 %1823  ;;  %v679_v27 = vsel %vm676_vm1, %v2202_v15, %v1805_v8  ;;  %v680_v28 = vsel %vm676_vm1, %v2187_v12, %v1806_v7 }
  0x7f   :  { %v1819_v0 = vpop.permute.xlu0 %1818  ;;  %v1826_v29 = vunpack.i.h.bf16 %v1824_v63  ;;  %v1825_v30 = vunpack.i.l.bf16 %v1824_v63  ;;  %v696_v35 = vsel %vm693_vm2, %v679_v27, %v1815_v23  ;;  %v697_v15 = vsel %vm693_vm2, %v680_v28, %v1816_v22 }
  0x80   :  { %2113 = vrot.lane.b32.xlu1 %v2112_v62, %s2131_s19  ;;  %v1821_v32 = vunpack.i.h.bf16 %v1819_v0  ;;  %v1820_v33 = vunpack.i.l.bf16 %v1819_v0 }
  0x81   :  { %2108 = vrot.lane.b32.xlu0 %v2052_v38, %s2131_s19  ;;  %v713_v38 = vsel %vm710_vm3, %v696_v35, %v1825_v30  ;;  %v714_v40 = vsel %vm710_vm3, %v697_v15, %v1826_v29 }
  0x82   :  { %v2469_v1 = vpop.permute.xlu1 %1833  ;;  %v711_v47 = vsel %vm710_vm3, %v694_v34, %v1820_v33  ;;  %v712_v48 = vsel %vm710_vm3, %v695_v14, %v1821_v32 }
  0x83   :  { %v1829_v2 = vpop.permute.xlu0 %1828  ;;  %v1836_v51 = vunpack.i.h.bf16 %v2469_v1  ;;  %v1835_v52 = vunpack.i.l.bf16 %v2469_v1 }
  0x84   :  { %v1831_v36 = vunpack.i.h.bf16 %v1829_v2  ;;  %v1830_v37 = vunpack.i.l.bf16 %v1829_v2 }
  0x85   :  { %v731_v18 = vsel %vm727_vm4, %v714_v40, %v1836_v51 }
  0x86   :  { %v2471_v5 = vpop.permute.xlu1 %1843  ;;  %v728_v55 = vsel %vm727_vm4, %v711_v47, %v1830_v37  ;;  %v729_v56 = vsel %vm727_vm4, %v712_v48, %v1831_v36 }
  0x87   :  { %v1839_v17 = vpop.permute.xlu0 %1838  ;;  %v1846_v57 = vunpack.i.h.bf16 %v2471_v5  ;;  %v1845_v58 = vunpack.i.l.bf16 %v2471_v5 }
  0x88   :  { %v1841_v43 = vunpack.i.h.bf16 %v1839_v17  ;;  %v1840_v44 = vunpack.i.l.bf16 %v1839_v17  ;;  %v730_v17 = vsel %vm727_vm4, %v713_v38, %v1835_v52 }
  0x89   :  { %v747_v22 = vsel %vm744_vm5, %v730_v17, %v1845_v58  ;;  %v748_v23 = vsel %vm744_vm5, %v731_v18, %v1846_v57 }
  0x8a   :  { %v2479_v25 = vpop.permute.xlu1 %1853  ;;  %v745_v60 = vsel %vm744_vm5, %v728_v55, %v1840_v44  ;;  %v746_v61 = vsel %vm744_vm5, %v729_v56, %v1841_v43 }
  0x8b   :  { %v1849_v31 = vpop.permute.xlu0 %1848  ;;  %v1856_v62 = vunpack.i.h.bf16 %v2479_v25  ;;  %v1855_v63 = vunpack.i.l.bf16 %v2479_v25 }
  0x8c   :  { %v1851_v49 = vunpack.i.h.bf16 %v1849_v31  ;;  %v1850_v50 = vunpack.i.l.bf16 %v1849_v31 }
  0x8d   :  { %v764_v28 = vsel %vm761_vm6, %v747_v22, %v1855_v63  ;;  %v765_v29 = vsel %vm761_vm6, %v748_v23, %v1856_v62 }
  0x8e   :  { %v1864_v12 = vpop.permute.xlu1 %1863  ;;  %v762_v1 = vsel %vm761_vm6, %v745_v60, %v1850_v50  ;;  %v763_v2 = vsel %vm761_vm6, %v746_v61, %v1851_v49 }
  0x8f   :  { %v1859_v46 = vpop.permute.xlu0 %1858  ;;  %v1866_v6 = vunpack.i.h.bf16 %v1864_v12  ;;  %v1865_v7 = vunpack.i.l.bf16 %v1864_v12 }
  0x90   :  { %v1861_v53 = vunpack.i.h.bf16 %v1859_v46  ;;  %v1860_v54 = vunpack.i.l.bf16 %v1859_v46 }
  0x91   :  { %v781_v32 = vsel %vm778_vm7, %v764_v28, %v1865_v7  ;;  %v782_v33 = vsel %vm778_vm7, %v765_v29, %v1866_v6 }
  0x92   :  { %v1874_v59 = vpop.permute.xlu1 %1873  ;;  %v779_v5 = vsel %vm778_vm7, %v762_v1, %v1860_v54  ;;  %v780_v8 = vsel %vm778_vm7, %v763_v2, %v1861_v53 }
  0x93   :  { %v1869_v0 = vpop.permute.xlu0 %1868  ;;  %v1876_v48 = vunpack.i.h.bf16 %v1874_v59  ;;  %v1875_v49 = vunpack.i.l.bf16 %v1874_v59 }
  0x94   :  { %v1871_v3 = vunpack.i.h.bf16 %v1869_v0  ;;  %v1870_v4 = vunpack.i.l.bf16 %v1869_v0 }
  0x95   :  { %v681_v63 = vsel %vm676_vm1, %v2192_v13, %v1875_v49  ;;  %v682_v59 = vsel %vm676_vm1, %v2223_v24, %v1876_v48 }
  0x96   :  { %v1884_v19 = vpop.permute.xlu1 %1883  ;;  %v796_v20 = vsel %vm795_vm8, %v779_v5, %v1870_v4  ;;  %v797_v21 = vsel %vm795_vm8, %v780_v8, %v1871_v3 }
  0x97   :  { %v1879_v25 = vpop.permute.xlu0 %1878  ;;  %v812_v27 = vpack.c.bf16 %v797_v21, %v796_v20  ;;  %v1886_v46 = vunpack.i.h.bf16 %v1884_v19  ;;  %v1885_v47 = vunpack.i.l.bf16 %v1884_v19 }
  0x98   :  { %v1881_v30 = vunpack.i.h.bf16 %v1879_v25  ;;  %v1880_v31 = vunpack.i.l.bf16 %v1879_v25 }
  0x99   :  { %1760 = vmatprep.mubr.msk.bf16.mxu0 %vm856_vm9, %v812_v27  ;;  %v683_v58 = vsel %vm676_vm1, %v2286_v45, %v1885_v47  ;;  %v684_v60 = vsel %vm676_vm1, %v2278_v42, %v1886_v46 }
  0x9a   :  { %v798_v34 = vsel %vm795_vm8, %v781_v32, %v1880_v31  ;;  %v799_v14 = vsel %vm795_vm8, %v782_v33, %v1881_v30  ;;  %v1894_v35 = vpop.permute.xlu1 %1893 }
  0x9b   :  { %v813_v15 = vpack.c.bf16 %v799_v14, %v798_v34  ;;  %v1889_v36 = vpop.permute.xlu0 %1888  ;;  %v1896_v50 = vunpack.i.h.bf16 %v1894_v35  ;;  %v1895_v51 = vunpack.i.l.bf16 %v1894_v35 }
  0x9c   :  { %v1891_v52 = vunpack.i.h.bf16 %v1889_v36  ;;  %v1890_v53 = vunpack.i.l.bf16 %v1889_v36 }
  0x9d   :  { %1761 = vmatmul.mubr.msk.bf16.vlgmr.msra.gmra.mrb[0].mxu0 %vm856_vm9, %v813_v15  ;;  %v700_v0 = vsel %vm693_vm2, %v683_v58, %v1895_v51  ;;  %v701_v1 = vsel %vm693_vm2, %v684_v60, %v1896_v50 }
  0x9e   :  { %v1904_v37 = vpop.permute.xlu1 %1903  ;;  %v698_v2 = vsel %vm693_vm2, %v681_v63, %v1890_v53  ;;  %v699_v3 = vsel %vm693_vm2, %v682_v59, %v1891_v52 }
  0x9f   :  { %v1899_v12 = vpop.permute.xlu0 %1898  ;;  %v1906_v55 = vunpack.i.h.bf16 %v1904_v37  ;;  %v1905_v56 = vunpack.i.l.bf16 %v1904_v37 }
  0xa0   :  { %v1901_v61 = vunpack.i.h.bf16 %v1899_v12  ;;  %v1900_v62 = vunpack.i.l.bf16 %v1899_v12 }
  0xa1   :  { %v717_v42 = vsel %vm710_vm3, %v700_v0, %v1905_v56  ;;  %v718_v7 = vsel %vm710_vm3, %v701_v1, %v1906_v55 }
  0xa2   :  { %v2521_v38 = vpop.permute.xlu1 %1913  ;;  %v715_v24 = vsel %vm710_vm3, %v698_v2, %v1900_v62  ;;  %v716_v17 = vsel %vm710_vm3, %v699_v3, %v1901_v61 }
  0xa3   :  { %v1909_v40 = vpop.permute.xlu0 %1908  ;;  %v1916_v20 = vunpack.i.h.bf16 %v2521_v38  ;;  %v1915_v21 = vunpack.i.l.bf16 %v2521_v38 }
  0xa4   :  { %v1911_v45 = vunpack.i.h.bf16 %v1909_v40  ;;  %v1910_v4 = vunpack.i.l.bf16 %v1909_v40 }
  0xa5   :  { %v735_v46 = vsel %vm727_vm4, %v718_v7, %v1916_v20 }
  0xa6   :  { %v2523_v43 = vpop.permute.xlu1 %1923  ;;  %v732_v25 = vsel %vm727_vm4, %v715_v24, %v1910_v4  ;;  %v733_v27 = vsel %vm727_vm4, %v716_v17, %v1911_v45  ;;  %v26_v17 = vld [vmem:[%s3006_s0 + $0xa0] sm:$0xff] }
  0xa7   :  { %v1919_v44 = vpop.permute.xlu0 %1918  ;;  %v1926_v28 = vunpack.i.h.bf16 %v2523_v43  ;;  %v1925_v29 = vunpack.i.l.bf16 %v2523_v43 }
  0xa8   :  { %v1921_v5 = vunpack.i.h.bf16 %v1919_v44  ;;  %v1920_v13 = vunpack.i.l.bf16 %v1919_v44  ;;  %v734_v44 = vsel %vm727_vm4, %v717_v42, %v1915_v21 }
  0xa9   :  { %v751_v50 = vsel %vm744_vm5, %v734_v44, %v1925_v29  ;;  %v752_v51 = vsel %vm744_vm5, %v735_v46, %v1926_v28 }
  0xaa   :  { %v1934_v54 = vpop.permute.xlu1 %1933  ;;  %v749_v31 = vsel %vm744_vm5, %v732_v25, %v1920_v13  ;;  %v750_v32 = vsel %vm744_vm5, %v733_v27, %v1921_v5 }
  0xab   :  { %v1929_v57 = vpop.permute.xlu0 %1928  ;;  %v1936_v33 = vunpack.i.h.bf16 %v1934_v54  ;;  %v1935_v34 = vunpack.i.l.bf16 %v1934_v54 }
  0xac   :  { %v1931_v18 = vunpack.i.h.bf16 %v1929_v57  ;;  %v1930_v19 = vunpack.i.l.bf16 %v1929_v57 }
  0xad   :  { %v768_v54 = vsel %vm761_vm6, %v751_v50, %v1935_v34  ;;  %v769_v55 = vsel %vm761_vm6, %v752_v51, %v1936_v33 }
  0xae   :  { %v1944_v6 = vpop.permute.xlu1 %1943  ;;  %v766_v35 = vsel %vm761_vm6, %v749_v31, %v1930_v19  ;;  %v767_v15 = vsel %vm761_vm6, %v750_v32, %v1931_v18 }
  0xaf   :  { %v1939_v8 = vpop.permute.xlu0 %1938  ;;  %v1946_v12 = vunpack.i.h.bf16 %v1944_v6  ;;  %v1945_v38 = vunpack.i.l.bf16 %v1944_v6 }
  0xb0   :  { %v1941_v22 = vunpack.i.h.bf16 %v1939_v8  ;;  %v1940_v23 = vunpack.i.l.bf16 %v1939_v8 }
  0xb1   :  { %v785_v58 = vsel %vm778_vm7, %v768_v54, %v1945_v38  ;;  %v786_v60 = vsel %vm778_vm7, %v769_v55, %v1946_v12 }
  0xb2   :  { %v1954_v30 = vpop.permute.xlu1 %1953  ;;  %v783_v40 = vsel %vm778_vm7, %v766_v35, %v1940_v23  ;;  %v784_v43 = vsel %vm778_vm7, %v767_v15, %v1941_v22 }
  0xb3   :  { %v1949_v14 = vpop.permute.xlu0 %1948  ;;  %v1956_v5 = vunpack.i.h.bf16 %v1954_v30  ;;  %v1955_v13 = vunpack.i.l.bf16 %v1954_v30 }
  0xb4   :  { %v1951_v36 = vunpack.i.h.bf16 %v1949_v14  ;;  %v1950_v37 = vunpack.i.l.bf16 %v1949_v14 }
  0xb5   :  { %v685_v30 = vsel %vm676_vm1, %v26_v17, %v1955_v13  ;;  %v686_v31 = vsel %vm676_vm1, %v2362_v11, %v1956_v5 }
  0xb6   :  { %v800_v47 = vsel %vm795_vm8, %v783_v40, %v1950_v37  ;;  %v801_v48 = vsel %vm795_vm8, %v784_v43, %v1951_v36  ;;  %v1964_v49 = vpop.permute.xlu1 %1963 }
  0xb7   :  { %v814_v52 = vpack.c.bf16 %v801_v48, %v800_v47  ;;  %v1959_v53 = vpop.permute.xlu0 %1958  ;;  %v1966_v42 = vunpack.i.h.bf16 %v1964_v49  ;;  %v1965_v7 = vunpack.i.l.bf16 %v1964_v49 }
  0xb8   :  { %v1961_v56 = vunpack.i.h.bf16 %v1959_v53  ;;  %v1960_v57 = vunpack.i.l.bf16 %v1959_v53 }
  0xb9   :  { %1764 = vmatprep.mubr.msk.bf16.mxu0 %vm856_vm9, %v814_v52  ;;  %v687_v25 = vsel %vm676_vm1, %v2367_v16, %v1965_v7  ;;  %v688_v27 = vsel %vm676_vm1, %v2352_v9, %v1966_v42 }
  0xba   :  { %v802_v61 = vsel %vm795_vm8, %v785_v58, %v1960_v57  ;;  %v803_v62 = vsel %vm795_vm8, %v786_v60, %v1961_v56  ;;  %v1974_v63 = vpop.permute.xlu1 %1973 }
  0xbb   :  { %v815_v59 = vpack.c.bf16 %v803_v62, %v802_v61  ;;  %v1969_v0 = vpop.permute.xlu0 %1968  ;;  %v1976_v8 = vunpack.i.h.bf16 %v1974_v63  ;;  %v1975_v24 = vunpack.i.l.bf16 %v1974_v63 }
  0xbc   :  { %v1971_v18 = vunpack.i.h.bf16 %v1969_v0  ;;  %v1970_v19 = vunpack.i.l.bf16 %v1969_v0 }
  0xbd   :  { %1765 = vmatmul.mubr.msk.bf16.gmra.mrb[4].mxu0 %vm856_vm9, %v815_v59  ;;  %v704_v32 = vsel %vm693_vm2, %v687_v25, %v1975_v24  ;;  %v705_v33 = vsel %vm693_vm2, %v688_v27, %v1976_v8 }
  0xbe   :  { %v1984_v1 = vpop.permute.xlu1 %1983  ;;  %v702_v34 = vsel %vm693_vm2, %v685_v30, %v1970_v19  ;;  %v703_v14 = vsel %vm693_vm2, %v686_v31, %v1971_v18 }
  0xbf   :  { %v1979_v2 = vpop.permute.xlu0 %1978  ;;  %v1986_v21 = vunpack.i.h.bf16 %v1984_v1  ;;  %v1985_v22 = vunpack.i.l.bf16 %v1984_v1 }
  0xc0   :  { %v1981_v28 = vunpack.i.h.bf16 %v1979_v2  ;;  %v1980_v29 = vunpack.i.l.bf16 %v1979_v2 }
  0xc1   :  { %v721_v9 = vsel %vm710_vm3, %v704_v32, %v1985_v22  ;;  %v722_v36 = vsel %vm710_vm3, %v705_v33, %v1986_v21 }
  0xc2   :  { %v2567_v3 = vpop.permute.xlu1 %1993  ;;  %v719_v11 = vsel %vm710_vm3, %v702_v34, %v1980_v29  ;;  %v720_v40 = vsel %vm710_vm3, %v703_v14, %v1981_v28 }
  0xc3   :  { %v1989_v45 = vpop.permute.xlu0 %1988  ;;  %v1996_v46 = vunpack.i.h.bf16 %v2567_v3  ;;  %v1995_v47 = vunpack.i.l.bf16 %v2567_v3 }
  0xc4   :  { %v1991_v35 = vunpack.i.h.bf16 %v1989_v45  ;;  %v1990_v16 = vunpack.i.l.bf16 %v1989_v45 }
  0xc5   :  { %v738_v45 = vsel %vm727_vm4, %v721_v9, %v1995_v47 }
  0xc6   :  { %v2569_v4 = vpop.permute.xlu1 %2003  ;;  %v736_v50 = vsel %vm727_vm4, %v719_v11, %v1990_v16  ;;  %v737_v51 = vsel %vm727_vm4, %v720_v40, %v1991_v35 }
  0xc7   :  { %v1999_v6 = vpop.permute.xlu0 %1998  ;;  %v2006_v52 = vunpack.i.h.bf16 %v2569_v4  ;;  %v2005_v53 = vunpack.i.l.bf16 %v2569_v4  ;;  %v739_v4 = vsel %vm727_vm4, %v722_v36, %v1996_v46 }
  0xc8   :  { %v2001_v37 = vunpack.i.h.bf16 %v1999_v6  ;;  %v2000_v12 = vunpack.i.l.bf16 %v1999_v6 }
  0xc9   :  { %v755_v5 = vsel %vm744_vm5, %v738_v45, %v2005_v53  ;;  %v756_v13 = vsel %vm744_vm5, %v739_v4, %v2006_v52 }
  0xca   :  { %v2014_v20 = vpop.permute.xlu1 %2013  ;;  %v753_v55 = vsel %vm744_vm5, %v736_v50, %v2000_v12  ;;  %v754_v56 = vsel %vm744_vm5, %v737_v51, %v2001_v37 }
  0xcb   :  { %v2009_v23 = vpop.permute.xlu0 %2008  ;;  %v2016_v57 = vunpack.i.h.bf16 %v2014_v20  ;;  %v2015_v58 = vunpack.i.l.bf16 %v2014_v20 }
  0xcc   :  { %v2011_v43 = vunpack.i.h.bf16 %v2009_v23  ;;  %v2010_v44 = vunpack.i.l.bf16 %v2009_v23 }
  0xcd   :  { %v772_v17 = vsel %vm761_vm6, %v755_v5, %v2015_v58  ;;  %v773_v18 = vsel %vm761_vm6, %v756_v13, %v2016_v57 }
  0xce   :  { %v2024_v15 = vpop.permute.xlu1 %2023  ;;  %v770_v61 = vsel %vm761_vm6, %v753_v55, %v2010_v44  ;;  %v771_v62 = vsel %vm761_vm6, %v754_v56, %v2011_v43 }
  0xcf   :  { %v2019_v38 = vpop.permute.xlu0 %2018  ;;  %v2026_v0 = vunpack.i.h.bf16 %v2024_v15  ;;  %v2025_v1 = vunpack.i.l.bf16 %v2024_v15 }
  0xd0   :  { %v2021_v48 = vunpack.i.h.bf16 %v2019_v38  ;;  %v2020_v49 = vunpack.i.l.bf16 %v2019_v38 }
  0xd1   :  { %v789_v21 = vsel %vm778_vm7, %v772_v17, %v2025_v1  ;;  %v790_v22 = vsel %vm778_vm7, %v773_v18, %v2026_v0 }
  0xd2   :  { %v2034_v54 = vpop.permute.xlu1 %2033  ;;  %v787_v2 = vsel %vm778_vm7, %v770_v61, %v2020_v49  ;;  %v788_v3 = vsel %vm778_vm7, %v771_v62, %v2021_v48 }
  0xd3   :  { %v2029_v60 = vpop.permute.xlu0 %2028  ;;  %v2036_v35 = vunpack.i.h.bf16 %v2034_v54  ;;  %v2035_v16 = vunpack.i.l.bf16 %v2034_v54 }
  0xd4   :  { %v2031_v63 = vunpack.i.h.bf16 %v2029_v60  ;;  %v2030_v59 = vunpack.i.l.bf16 %v2029_v60 }
  0xd5   :  { %v689_v48 = vsel %vm676_vm1, %v2357_v10, %v2035_v16  ;;  %v690_v49 = vsel %vm676_vm1, %v2388_v26, %v2036_v35 }
  0xd6   :  { %v2044_v6 = vpop.permute.xlu1 %2043  ;;  %v804_v42 = vsel %vm795_vm8, %v787_v2, %v2030_v59  ;;  %v805_v7 = vsel %vm795_vm8, %v788_v3, %v2031_v63 }
  0xd7   :  { %v2039_v8 = vpop.permute.xlu0 %2038  ;;  %v816_v24 = vpack.c.bf16 %v805_v7, %v804_v42  ;;  %v2046_v34 = vunpack.i.h.bf16 %v2044_v6  ;;  %v2045_v14 = vunpack.i.l.bf16 %v2044_v6 }
  0xd8   :  { %v2041_v19 = vunpack.i.h.bf16 %v2039_v8  ;;  %v2040_v20 = vunpack.i.l.bf16 %v2039_v8 }
  0xd9   :  { %1768 = vmatprep.mubr.msk.bf16.mxu1 %vm856_vm9, %v816_v24  ;;  %v691_v43 = vsel %vm676_vm1, %v2433_v41, %v2045_v14  ;;  %v692_v44 = vsel %vm676_vm1, %v2425_v39, %v2046_v34  ;;  %vm1592_vm1 = vcmask 1047559  }
  0xda   :  { %v806_v23 = vsel %vm795_vm8, %v789_v21, %v2040_v20  ;;  %v807_v25 = vsel %vm795_vm8, %v790_v22, %v2041_v19  ;;  %v2054_v27 = vpop.permute.xlu1 %2053 }
  0xdb   :  { %v817_v28 = vpack.c.bf16 %v807_v25, %v806_v23  ;;  %v2049_v29 = vpop.permute.xlu0 %2048  ;;  %v2056_v15 = vunpack.i.h.bf16 %v2054_v27  ;;  %v2055_v9 = vunpack.i.l.bf16 %v2054_v27 }
  0xdc   :  { %v2051_v37 = vunpack.i.h.bf16 %v2049_v29  ;;  %v2050_v12 = vunpack.i.l.bf16 %v2049_v29 }
  0xdd   :  { %1769 = vmatmul.mubr.msk.bf16.vlgmr.msra.gmra.mrb[0].mxu1 %vm856_vm9, %v817_v28  ;;  %v708_v50 = vsel %vm693_vm2, %v691_v43, %v2055_v9  ;;  %v709_v51 = vsel %vm693_vm2, %v692_v44, %v2056_v15 }
  0xde   :  { %v2064_v30 = vpop.permute.xlu1 %2063  ;;  %v706_v53 = vsel %vm693_vm2, %v689_v48, %v2050_v12  ;;  %v707_v41 = vsel %vm693_vm2, %v690_v49, %v2051_v37 }
  0xdf   :  { %v2059_v31 = vpop.permute.xlu0 %2058  ;;  %v2066_v11 = vunpack.i.h.bf16 %v2064_v30  ;;  %v2065_v40 = vunpack.i.l.bf16 %v2064_v30 }
  0xe0   :  { %v2061_v46 = vunpack.i.h.bf16 %v2059_v31  ;;  %v2060_v47 = vunpack.i.l.bf16 %v2059_v31 }
  0xe1   :  { %v725_v56 = vsel %vm710_vm3, %v708_v50, %v2065_v40  ;;  %v726_v57 = vsel %vm710_vm3, %v709_v51, %v2066_v11 }
  0xe2   :  { %v2074_v32 = vpop.permute.xlu1 %2073  ;;  %v723_v26 = vsel %vm710_vm3, %v706_v53, %v2060_v47  ;;  %v724_v60 = vsel %vm710_vm3, %v707_v41, %v2061_v46 }
  0xe3   :  { %v2069_v33 = vpop.permute.xlu0 %2068  ;;  %v2076_v54 = vunpack.i.h.bf16 %v2074_v32  ;;  %v2075_v55 = vunpack.i.l.bf16 %v2074_v32 }
  0xe4   :  { %v2071_v10 = vunpack.i.h.bf16 %v2069_v33  ;;  %v2070_v58 = vunpack.i.l.bf16 %v2069_v33 }
  0xe5   :  { %v742_v3 = vsel %vm727_vm4, %v725_v56, %v2075_v55  ;;  %v743_v45 = vsel %vm727_vm4, %v726_v57, %v2076_v54 }
  0xe6   :  { %v2084_v36 = vpop.permute.xlu1 %2083  ;;  %v740_v7 = vsel %vm727_vm4, %v723_v26, %v2070_v58  ;;  %v741_v5 = vsel %vm727_vm4, %v724_v60, %v2071_v10 }
  0xe7   :  { %v2079_v38 = vpop.permute.xlu0 %2078  ;;  %v2086_v61 = vunpack.i.h.bf16 %v2084_v36  ;;  %v2085_v62 = vunpack.i.l.bf16 %v2084_v36 }
  0xe8   :  { %v2081_v63 = vunpack.i.h.bf16 %v2079_v38  ;;  %v2080_v59 = vunpack.i.l.bf16 %v2079_v38 }
  0xe9   :  { %v759_v24 = vsel %vm744_vm5, %v742_v3, %v2085_v62  ;;  %v760_v17 = vsel %vm744_vm5, %v743_v45, %v2086_v61 }
  0xea   :  { %v2094_v52 = vpop.permute.xlu1 %2093  ;;  %v757_v20 = vsel %vm744_vm5, %v740_v7, %v2080_v59  ;;  %v758_v21 = vsel %vm744_vm5, %v741_v5, %v2081_v63 }
  0xeb   :  { %v2089_v39 = vpop.permute.xlu0 %2088  ;;  %v2096_v0 = vunpack.i.h.bf16 %v2094_v52  ;;  %v2095_v1 = vunpack.i.l.bf16 %v2094_v52 }
  0xec   :  { %v2091_v4 = vunpack.i.h.bf16 %v2089_v39  ;;  %v2090_v6 = vunpack.i.l.bf16 %v2089_v39 }
  0xed   :  { %v776_v22 = vsel %vm761_vm6, %v759_v24, %v2095_v1  ;;  %v777_v23 = vsel %vm761_vm6, %v760_v17, %v2096_v0 }
  0xee   :  { %v2104_v2 = vpop.permute.xlu1 %2103  ;;  %v774_v27 = vsel %vm761_vm6, %v757_v20, %v2090_v6  ;;  %v775_v28 = vsel %vm761_vm6, %v758_v21, %v2091_v4 }
  0xef   :  { %v2099_v42 = vpop.permute.xlu0 %2098  ;;  %v2106_v13 = vunpack.i.h.bf16 %v2104_v2  ;;  %v2105_v8 = vunpack.i.l.bf16 %v2104_v2 }
  0xf0   :  { %v2101_v18 = vunpack.i.h.bf16 %v2099_v42  ;;  %v2100_v19 = vunpack.i.l.bf16 %v2099_v42 }
  0xf1   :  { %v793_v32 = vsel %vm778_vm7, %v776_v22, %v2105_v8  ;;  %v794_v33 = vsel %vm778_vm7, %v777_v23, %v2106_v13 }
  0xf2   :  { %v2114_v25 = vpop.permute.xlu1 %2113  ;;  %v791_v35 = vsel %vm778_vm7, %v774_v27, %v2100_v19  ;;  %v792_v16 = vsel %vm778_vm7, %v775_v28, %v2101_v18 }
  0xf3   :  { %v2116_v29 = vunpack.i.h.bf16 %v2114_v25  ;;  %v2115_v30 = vunpack.i.l.bf16 %v2114_v25  ;;  %v2109_v31 = vpop.permute.xlu0 %2108 }
  0xf4   :  { %v2111_v34 = vunpack.i.h.bf16 %v2109_v31  ;;  %v2110_v14 = vunpack.i.l.bf16 %v2109_v31 }
  0xf5   :  { %v810_v15 = vsel %vm795_vm8, %v793_v32, %v2115_v30  ;;  %v811_v9 = vsel %vm795_vm8, %v794_v33, %v2116_v29 }
  0xf6   :  { %v819_v36 = vpack.c.bf16 %v811_v9, %v810_v15  ;;  %v808_v37 = vsel %vm795_vm8, %v791_v35, %v2110_v14  ;;  %v809_v12 = vsel %vm795_vm8, %v792_v16, %v2111_v34 }
  0xf7   :  { %v818_v38 = vpack.c.bf16 %v809_v12, %v808_v37 }
  0xf9   :  { %1772 = vmatprep.mubr.msk.bf16.mxu1 %vm856_vm9, %v818_v38 }
  0xfa   :  { %1773 = vmatmul.mubr.msk.bf16.gmra.mrb[4].mxu1 %vm856_vm9, %v819_v36 }
 0x170   :  { %v1762_v11 = vpop.f32.mrb[0].mxu0 }
 0x171   :  { %v919_v40 = vpop.f32.mrb[1].mxu0 }
 0x172   :  { %v1763_v43 = vpop.f32.mrb[2].mxu0 }
 0x173   :  { %v922_v44 = vpop.f32.mrb[3].mxu0 }
 0x174   :  { %v982_v46 = vadd.f32 %v922_v44, %v919_v40 }
 0x176   :  { %v983_v47 = vadd.f32 %v1762_v11, %v982_v46 }
 0x178   :  { %v984_v48 = vadd.f32 %v1763_v43, %v983_v47 }
 0x190   :  { %v1766_v49 = vpop.f32.mrb[4].mxu0 }
 0x191   :  { %v935_v50 = vpop.f32.mrb[5].mxu0 }
 0x192   :  { %v985_v51 = vadd.f32 %v984_v48, %v935_v50  ;;  %v1767_v52 = vpop.f32.mrb[6].mxu0 }
 0x193   :  { %v938_v53 = vpop.f32.mrb[7].mxu0 }
 0x194   :  { %v986_v41 = vadd.f32 %v985_v51, %v938_v53 }
 0x196   :  { %v987_v54 = vadd.f32 %v1766_v49, %v986_v41 }
 0x198   :  { %v988_v55 = vadd.f32 %v1767_v52, %v987_v54 }
 0x1b0   :  { %v1770_v39 = vpop.f32.mrb[0].mxu1 }
 0x1b1   :  { %v951_v56 = vpop.f32.mrb[1].mxu1 }
 0x1b2   :  { %v989_v57 = vadd.f32 %v988_v55, %v951_v56  ;;  %v1771_v10 = vpop.f32.mrb[2].mxu1 }
 0x1b3   :  { %v954_v58 = vpop.f32.mrb[3].mxu1 }
 0x1b4   :  { %v990_v26 = vadd.f32 %v989_v57, %v954_v58 }
 0x1b6   :  { %v991_v60 = vadd.f32 %v1770_v39, %v990_v26 }
 0x1b8   :  { %v992_v61 = vadd.f32 %v1771_v10, %v991_v60 }
 0x1cd   :  { %v1774_v62 = vpop.f32.mrb[4].mxu1 }
 0x1ce   :  { %v967_v63 = vpop.f32.mrb[5].mxu1 }
 0x1cf   :  { %v993_v59 = vadd.f32 %v992_v61, %v967_v63  ;;  %v1775_v0 = vpop.f32.mrb[6].mxu1 }
 0x1d0   :  { %v970_v1 = vpop.f32.mrb[7].mxu1 }
 0x1d1   :  { %v994_v2 = vadd.f32 %v993_v59, %v970_v1 }
 0x1d3   :  { %v995_v3 = vadd.f32 %v1774_v62, %v994_v2 }
 0x1d5   :  { %v996_v45 = vadd.f32 %v1775_v0, %v995_v3  ;;  %v1063_v3 = vlaneseq }
 0x1d7   :  { %v997_v4 = vrot.slane %v996_v45, 4 }
 0x1d9   :  { %v998_v6 = vadd.f32 %v997_v4, %v996_v45  ;;  %v1064_v45 = vshrl.u32 %v1063_v3, 7  ;;  %v2132_v4 = vmov 1983009808  }
 0x1db   :  { %v999_v42 = vrot.slane %v998_v6, 2 }
 0x1dd   :  { %v1000_v7 = vadd.f32 %v999_v42, %v998_v6  ;;  %v1125_v6 = vunpack.c.l.s4 %v2132_v4  ;;  %v1058_v42 = vld [vmem:[%s3008_s2] sm:$0x1] }
 0x1df   :  { %v1001_v5 = vrot.slane %v1000_v7, 1 }
 0x1e1   :  { %v1002_v13 = vadd.f32 %v1001_v5, %v1000_v7  ;;  %v1065_v7 = vsub.s32 0, %v1064_v45 }
 0x1e3   :  { %v1003_v8 = vmul.f32 0.0078125, %v1002_v13  ;;  %v1126_v13 = vunpack.c.0.s8 %v1125_v6 }
 0x1e5   :  { %v2653_v24 = vsub.f32 %v919_v40, %v1003_v8  ;;  %v2655_v17 = vsub.f32 %v922_v44, %v1003_v8  ;;  %v2657_v18 = vsub.f32 %v1762_v11, %v1003_v8  ;;  %v2659_v19 = vsub.f32 %v1763_v43, %v1003_v8 }
 0x1e6   :  { %v2661_v20 = vsub.f32 %v935_v50, %v1003_v8  ;;  %v2663_v21 = vsub.f32 %v938_v53, %v1003_v8  ;;  %v2665_v22 = vsub.f32 %v1766_v49, %v1003_v8  ;;  %v2667_v23 = vsub.f32 %v1767_v52, %v1003_v8 }
 0x1e7   :  { %v2669_v25 = vsub.f32 %v951_v56, %v1003_v8  ;;  %v2671_v27 = vsub.f32 %v954_v58, %v1003_v8  ;;  %v2673_v28 = vsub.f32 %v1770_v39, %v1003_v8  ;;  %v2675_v29 = vsub.f32 %v1771_v10, %v1003_v8 }
 0x1e8   :  { %v2677_v30 = vsub.f32 %v967_v63, %v1003_v8  ;;  %v2679_v31 = vsub.f32 %v970_v1, %v1003_v8  ;;  %v2681_v32 = vsub.f32 %v1774_v62, %v1003_v8  ;;  %v2683_v33 = vsub.f32 %v1775_v0, %v1003_v8 }
 0x1e9   :  { %v1020_v34 = vmul.f32 %v2653_v24, %v2653_v24  ;;  %v1021_v14 = vmul.f32 %v2655_v17, %v2655_v17  ;;  %v1022_v35 = vmul.f32 %v2657_v18, %v2657_v18  ;;  %v1023_v15 = vmul.f32 %v2659_v19, %v2659_v19 }
 0x1ea   :  { %v1024_v36 = vmul.f32 %v2661_v20, %v2661_v20  ;;  %v1025_v12 = vmul.f32 %v2663_v21, %v2663_v21  ;;  %v1026_v11 = vmul.f32 %v2665_v22, %v2665_v22  ;;  %v1027_v43 = vmul.f32 %v2667_v23, %v2667_v23 }
 0x1eb   :  { %v1036_v16 = vadd.f32 %v1021_v14, %v1020_v34  ;;  %v1028_v46 = vmul.f32 %v2669_v25, %v2669_v25  ;;  %v1029_v48 = vmul.f32 %v2671_v27, %v2671_v27  ;;  %v1030_v50 = vmul.f32 %v2673_v28, %v2673_v28 }
 0x1ec   :  { %v1031_v52 = vmul.f32 %v2675_v29, %v2675_v29  ;;  %v1032_v41 = vmul.f32 %v2677_v30, %v2677_v30  ;;  %v1033_v55 = vmul.f32 %v2679_v31, %v2679_v31  ;;  %v1034_v56 = vmul.f32 %v2681_v32, %v2681_v32 }
 0x1ed   :  { %v1037_v9 = vadd.f32 %v1036_v16, %v1022_v35  ;;  %v1035_v10 = vmul.f32 %v2683_v33, %v2683_v33  ;;  %v2720_v14 = vsub.s32 %v1126_v13, %v1064_v45 }
 0x1ef   :  { %v1038_v37 = vadd.f32 %v1037_v9, %v1023_v15 }
 0x1f1   :  { %v1039_v38 = vadd.f32 %v1038_v37, %v1024_v36 }
 0x1f3   :  { %v1040_v40 = vadd.f32 %v1039_v38, %v1025_v12 }
 0x1f5   :  { %v1041_v44 = vadd.f32 %v1040_v40, %v1026_v11  ;;  %v1736_v11 = vld [vmem:[%s3009_s3] ss:$0 sm:$0xff] }
 0x1f7   :  { %v1042_v47 = vadd.f32 %v1041_v44, %v1027_v43 }
 0x1f9   :  { %v1043_v49 = vadd.f32 %v1042_v47, %v1028_v46 }
 0x1fb   :  { %v1044_v51 = vadd.f32 %v1043_v49, %v1029_v48 }
 0x1fd   :  { %v1045_v53 = vadd.f32 %v1044_v51, %v1030_v50 }
 0x1ff   :  { %v1046_v54 = vadd.f32 %v1045_v53, %v1031_v52 }
 0x201   :  { %v1047_v39 = vadd.f32 %v1046_v54, %v1032_v41 }
 0x203   :  { %v1048_v57 = vadd.f32 %v1047_v39, %v1033_v55 }
 0x205   :  { %v1049_v58 = vadd.f32 %v1048_v57, %v1034_v56 }
 0x207   :  { %v1050_v26 = vadd.f32 %v1049_v58, %v1035_v10 }
 0x209   :  { %v1051_v60 = vrot.slane %v1050_v26, 4 }
 0x20b   :  { %v1052_v61 = vadd.f32 %v1051_v60, %v1050_v26 }
 0x20d   :  { %v1053_v62 = vrot.slane %v1052_v61, 2 }
 0x20f   :  { %v1054_v63 = vadd.f32 %v1053_v62, %v1052_v61 }
 0x211   :  { %v1055_v59 = vrot.slane %v1054_v63, 1 }
 0x213   :  { %v1056_v0 = vadd.f32 %v1055_v59, %v1054_v63 }
 0x215   :  { %v1057_v1 = vmul.f32 0.0078125, %v1056_v0 }
 0x217   :  { %v1059_v2 = vadd.f32 1e-05, %v1057_v1 }
 0x219   :  { %2122 = vrsqrt.f32 %v1059_v2 }
 0x223   :  { %v2123_v5 = vpop.eup %2122 }
 0x224   :  { %v1061_v8 = vmul.f32 %v2123_v5, %v1058_v42 }
 0x226   :  { %v1066_v34 = vrot.slane %v1061_v8, %v1065_v7 }
 0x228   :  { %v1068_v35 = vmul.f32 %v1066_v34, %v2653_v24  ;;  %v1069_v16 = vmul.f32 %v1066_v34, %v2655_v17  ;;  %v1070_v15 = vmul.f32 %v1066_v34, %v2657_v18  ;;  %v1071_v9 = vmul.f32 %v1066_v34, %v2659_v19 }
 0x229   :  { %v1072_v36 = vmul.f32 %v1066_v34, %v2661_v20  ;;  %v1073_v37 = vmul.f32 %v1066_v34, %v2663_v21  ;;  %v1074_v12 = vmul.f32 %v1066_v34, %v2665_v22  ;;  %v1075_v38 = vmul.f32 %v1066_v34, %v2667_v23 }
 0x22a   :  { %v1076_v24 = vmul.f32 %v1066_v34, %v2669_v25  ;;  %v1077_v17 = vmul.f32 %v1066_v34, %v2671_v27  ;;  %v1078_v18 = vmul.f32 %v1066_v34, %v2673_v28  ;;  %v1079_v19 = vmul.f32 %v1066_v34, %v2675_v29 }
 0x22b   :  { %v1080_v20 = vmul.f32 %v1066_v34, %v2677_v30  ;;  %v1081_v21 = vmul.f32 %v1066_v34, %v2679_v31  ;;  %v1082_v22 = vmul.f32 %v1066_v34, %v2681_v32  ;;  %v1083_v23 = vmul.f32 %v1066_v34, %v2683_v33 }
 0x22c   :  { %v1091_v40 = vadd.f32 %v1736_v11, %v1068_v35  ;;  %v1092_v43 = vadd.f32 %v1736_v11, %v1069_v16  ;;  %v1093_v44 = vadd.f32 %v1736_v11, %v1070_v15  ;;  %v1094_v46 = vadd.f32 %v1736_v11, %v1071_v9 }
 0x22d   :  { %v1095_v47 = vadd.f32 %v1736_v11, %v1072_v36  ;;  %v1096_v25 = vadd.f32 %v1736_v11, %v1073_v37  ;;  %v1097_v48 = vadd.f32 %v1736_v11, %v1074_v12  ;;  %v1098_v27 = vadd.f32 %v1736_v11, %v1075_v38 }
 0x22e   :  { %v1099_v49 = vadd.f32 %v1736_v11, %v1076_v24  ;;  %v1100_v28 = vadd.f32 %v1736_v11, %v1077_v17  ;;  %v1101_v50 = vadd.f32 %v1736_v11, %v1078_v18  ;;  %v1102_v29 = vadd.f32 %v1736_v11, %v1079_v19 }
 0x22f   :  { %v1103_v51 = vadd.f32 %v1736_v11, %v1080_v20  ;;  %v1104_v30 = vadd.f32 %v1736_v11, %v1081_v21  ;;  %v1105_v52 = vadd.f32 %v1736_v11, %v1082_v22  ;;  %v1106_v31 = vadd.f32 %v1736_v11, %v1083_v23 }
 0x230   :  { %v1107_v32 = vmax.f32 %v1091_v40, %v1092_v43  ;;  %v1108_v53 = vmax.f32 %v1093_v44, %v1094_v46  ;;  %v1109_v33 = vmax.f32 %v1095_v47, %v1096_v25  ;;  %v1110_v41 = vmax.f32 %v1097_v48, %v1098_v27 }
 0x231   :  { %v1111_v54 = vmax.f32 %v1099_v49, %v1100_v28  ;;  %v1112_v55 = vmax.f32 %v1101_v50, %v1102_v29  ;;  %v1113_v39 = vmax.f32 %v1103_v51, %v1104_v30  ;;  %v1114_v56 = vmax.f32 %v1105_v52, %v1106_v31 }
 0x232   :  { %v1123_v57 = vcombine.high %v1107_v32, %v1107_v32  ;;  %v1130_v10 = vrot.slane %v1107_v32, %v2720_v14  ;;  %v1140_v58 = vcombine.high %v1108_v53, %v1108_v53  ;;  %v1147_v26 = vrot.slane %v1108_v53, %v2720_v14 }
 0x233   :  { %v1157_v60 = vcombine.high %v1109_v33, %v1109_v33  ;;  %v2744_v61 = vrot.slane %v1109_v33, %v2720_v14  ;;  %v1174_v62 = vcombine.high %v1110_v41, %v1110_v41  ;;  %v2747_v63 = vrot.slane %v1110_v41, %v2720_v14 }
 0x234   :  { %v1137_v59 = vrot.slane %v1123_v57, %v2720_v14  ;;  %v1138_v0 = vcombine.high %v1130_v10, %v1130_v10  ;;  %v1154_v1 = vrot.slane %v1140_v58, %v2720_v14  ;;  %v1155_v2 = vcombine.high %v1147_v26, %v1147_v26 }
 0x235   :  { %v2752_v3 = vrot.slane %v1157_v60, %v2720_v14  ;;  %v1172_v45 = vcombine.high %v2744_v61, %v2744_v61  ;;  %v2757_v4 = vrot.slane %v1174_v62, %v2720_v14  ;;  %v1189_v6 = vcombine.high %v2747_v63, %v2747_v63 }
 0x236   :  { %v1139_v42 = vcombine.high %v1137_v59, %v1137_v59  ;;  %v1156_v7 = vcombine.high %v1154_v1, %v1154_v1  ;;  %v1191_v5 = vcombine.high %v1111_v54, %v1111_v54  ;;  %v2762_v13 = vrot.slane %v1111_v54, %v2720_v14 }
 0x237   :  { %v1173_v8 = vcombine.high %v2752_v3, %v2752_v3  ;;  %v1190_v34 = vcombine.high %v2757_v4, %v2757_v4  ;;  %v1208_v35 = vcombine.high %v1112_v55, %v1112_v55  ;;  %v2769_v16 = vrot.slane %v1112_v55, %v2720_v14 }
 0x238   :  { %v2772_v15 = vrot.slane %v1191_v5, %v2720_v14  ;;  %v1206_v9 = vcombine.high %v2762_v13, %v2762_v13  ;;  %v1225_v36 = vcombine.high %v1113_v39, %v1113_v39  ;;  %v2777_v37 = vrot.slane %v1113_v39, %v2720_v14 }
 0x239   :  { %v2780_v12 = vrot.slane %v1208_v35, %v2720_v14  ;;  %v1223_v38 = vcombine.high %v2769_v16, %v2769_v16  ;;  %v1242_v11 = vcombine.high %v1114_v56, %v1114_v56  ;;  %v2785_v24 = vrot.slane %v1114_v56, %v2720_v14 }
 0x23a   :  { %v1207_v17 = vcombine.high %v2772_v15, %v2772_v15  ;;  %v2790_v18 = vrot.slane %v1225_v36, %v2720_v14  ;;  %v1240_v19 = vcombine.high %v2777_v37, %v2777_v37  ;;  %v1292_v20 = vsel %vm1291_vm10, %v1130_v10, -inf }
 0x23b   :  { %v1224_v21 = vcombine.high %v2780_v12, %v2780_v12  ;;  %v2798_v22 = vrot.slane %v1242_v11, %v2720_v14  ;;  %v1257_v23 = vcombine.high %v2785_v24, %v2785_v24  ;;  %v1293_v40 = vrot.slane %v1292_v20, 4 }
 0x23c   :  { %v1241_v43 = vcombine.high %v2790_v18, %v2790_v18  ;;  %v1299_v44 = vsel %vm1291_vm10, %v1138_v0, -inf  ;;  %v1306_v46 = vsel %vm1291_vm10, %v1137_v59, -inf  ;;  %v1313_v47 = vsel %vm1291_vm10, %v1139_v42, -inf }
 0x23d   :  { %v1258_v25 = vcombine.high %v2798_v22, %v2798_v22  ;;  %v1294_v48 = vmax.f32 %v1292_v20, %v1293_v40  ;;  %v1300_v27 = vrot.slane %v1299_v44, 4  ;;  %v1307_v14 = vrot.slane %v1306_v46, 4 }
 0x23e   :  { %v1314_v49 = vrot.slane %v1313_v47, 4  ;;  %v1320_v28 = vsel %vm1291_vm10, %v1147_v26, -inf  ;;  %v1327_v50 = vsel %vm1291_vm10, %v1155_v2, -inf  ;;  %v1334_v29 = vsel %vm1291_vm10, %v1154_v1, -inf }
 0x23f   :  { %v1295_v51 = vrot.slane %v1294_v48, 2  ;;  %v1301_v30 = vmax.f32 %v1299_v44, %v1300_v27  ;;  %v1308_v52 = vmax.f32 %v1306_v46, %v1307_v14  ;;  %v1321_v31 = vrot.slane %v1320_v28, 4 }
 0x240   :  { %v1315_v32 = vmax.f32 %v1313_v47, %v1314_v49  ;;  %v1328_v53 = vrot.slane %v1327_v50, 4  ;;  %v1335_v33 = vrot.slane %v1334_v29, 4  ;;  %v1341_v41 = vsel %vm1291_vm10, %v1156_v7, -inf }
 0x241   :  { %v1296_v54 = vmax.f32 %v1294_v48, %v1295_v51  ;;  %v1302_v55 = vrot.slane %v1301_v30, 2  ;;  %v1309_v39 = vrot.slane %v1308_v52, 2  ;;  %v1322_v56 = vmax.f32 %v1320_v28, %v1321_v31 }
 0x242   :  { %v1316_v57 = vrot.slane %v1315_v32, 2  ;;  %v1329_v10 = vmax.f32 %v1327_v50, %v1328_v53  ;;  %v1336_v58 = vmax.f32 %v1334_v29, %v1335_v33  ;;  %v1342_v26 = vrot.slane %v1341_v41, 4 }
 0x243   :  { %v1297_v60 = vrot.slane %v1296_v54, 1  ;;  %v1303_v62 = vmax.f32 %v1301_v30, %v1302_v55  ;;  %v1310_v59 = vmax.f32 %v1308_v52, %v1309_v39  ;;  %v1323_v0 = vrot.slane %v1322_v56, 2 }
 0x244   :  { %v1317_v1 = vmax.f32 %v1315_v32, %v1316_v57  ;;  %v1330_v2 = vrot.slane %v1329_v10, 2  ;;  %v1337_v42 = vrot.slane %v1336_v58, 2  ;;  %v1343_v5 = vmax.f32 %v1341_v41, %v1342_v26 }
 0x245   :  { %v2813_v35 = vmax.f32 %v1296_v54, %v1297_v60  ;;  %v1304_v36 = vrot.slane %v1303_v62, 1  ;;  %v1311_v7 = vrot.slane %v1310_v59, 1  ;;  %v1324_v11 = vmax.f32 %v1322_v56, %v1323_v0 }
 0x246   :  { %v1318_v20 = vrot.slane %v1317_v1, 1  ;;  %v1331_v40 = vmax.f32 %v1329_v10, %v1330_v2  ;;  %v1338_v44 = vmax.f32 %v1336_v58, %v1337_v42  ;;  %v1344_v46 = vrot.slane %v1343_v5, 2 }
 0x247   :  { %v2815_v47 = vmax.f32 %v1303_v62, %v1304_v36  ;;  %v2817_v48 = vmax.f32 %v1310_v59, %v1311_v7  ;;  %v1325_v27 = vrot.slane %v1324_v11, 1  ;;  %v1348_v14 = vsel %vm1291_vm10, %v2744_v61, -inf }
 0x248   :  { %v2821_v49 = vmax.f32 %v1317_v1, %v1318_v20  ;;  %v1332_v28 = vrot.slane %v1331_v40, 1  ;;  %v1339_v50 = vrot.slane %v1338_v44, 1  ;;  %v1345_v29 = vmax.f32 %v1343_v5, %v1344_v46 }
 0x249   :  { %v2823_v51 = vmax.f32 %v1324_v11, %v1325_v27  ;;  %v1349_v30 = vrot.slane %v1348_v14, 4  ;;  %v1355_v52 = vsel %vm1291_vm10, %v1172_v45, -inf  ;;  %v1362_v31 = vsel %vm1291_vm10, %v2752_v3, -inf }
 0x24a   :  { %v2831_v32 = vmax.f32 %v1331_v40, %v1332_v28  ;;  %v2833_v53 = vmax.f32 %v1338_v44, %v1339_v50  ;;  %v1346_v33 = vrot.slane %v1345_v29, 1  ;;  %v1356_v41 = vrot.slane %v1355_v52, 4 }
 0x24b   :  { %v1350_v54 = vmax.f32 %v1348_v14, %v1349_v30  ;;  %v1363_v55 = vrot.slane %v1362_v31, 4  ;;  %v1369_v39 = vsel %vm1291_vm10, %v1173_v8, -inf  ;;  %v1376_v61 = vsel %vm1291_vm10, %v2747_v63, -inf }
 0x24c   :  { %v2841_v45 = vmax.f32 %v1345_v29, %v1346_v33  ;;  %v1357_v56 = vmax.f32 %v1355_v52, %v1356_v41  ;;  %v1370_v57 = vrot.slane %v1369_v39, 4  ;;  %v1377_v10 = vrot.slane %v1376_v61, 4 }
 0x24d   :  { %v1351_v58 = vrot.slane %v1350_v54, 2  ;;  %v1364_v26 = vmax.f32 %v1362_v31, %v1363_v55  ;;  %v1383_v60 = vsel %vm1291_vm10, %v1189_v6, -inf  ;;  %v1390_v3 = vsel %vm1291_vm10, %v2757_v4, -inf }
 0x24e   :  { %v1358_v62 = vrot.slane %v1357_v56, 2  ;;  %v1371_v8 = vmax.f32 %v1369_v39, %v1370_v57  ;;  %v1378_v59 = vmax.f32 %v1376_v61, %v1377_v10  ;;  %v1384_v0 = vrot.slane %v1383_v60, 4 }
 0x24f   :  { %v1352_v1 = vmax.f32 %v1350_v54, %v1351_v58  ;;  %v1365_v2 = vrot.slane %v1364_v26, 2  ;;  %v1391_v42 = vrot.slane %v1390_v3, 4  ;;  %v1397_v5 = vsel %vm1291_vm10, %v1190_v34, -inf }
 0x250   :  { %v1359_v36 = vmax.f32 %v1357_v56, %v1358_v62  ;;  %v1372_v7 = vrot.slane %v1371_v8, 2  ;;  %v1379_v63 = vrot.slane %v1378_v59, 2  ;;  %v1385_v11 = vmax.f32 %v1383_v60, %v1384_v0 }
 0x251   :  { %v1353_v6 = vrot.slane %v1352_v1, 1  ;;  %v1366_v20 = vmax.f32 %v1364_v26, %v1365_v2  ;;  %v1392_v40 = vmax.f32 %v1390_v3, %v1391_v42  ;;  %v1398_v44 = vrot.slane %v1397_v5, 4 }
 0x252   :  { %v1360_v46 = vrot.slane %v1359_v36, 1  ;;  %v1373_v27 = vmax.f32 %v1371_v8, %v1372_v7  ;;  %v1380_v14 = vmax.f32 %v1378_v59, %v1379_v63  ;;  %v1386_v28 = vrot.slane %v1385_v11, 2 }
 0x253   :  { %v2853_v50 = vmax.f32 %v1352_v1, %v1353_v6  ;;  %v1367_v29 = vrot.slane %v1366_v20, 1  ;;  %v1393_v30 = vrot.slane %v1392_v40, 2  ;;  %v1399_v52 = vmax.f32 %v1397_v5, %v1398_v44 }
 0x254   :  { %v2855_v4 = vmax.f32 %v1359_v36, %v1360_v46  ;;  %v1374_v34 = vrot.slane %v1373_v27, 1  ;;  %v1381_v31 = vrot.slane %v1380_v14, 1  ;;  %v1387_v33 = vmax.f32 %v1385_v11, %v1386_v28 }
 0x255   :  { %v2857_v41 = vmax.f32 %v1366_v20, %v1367_v29  ;;  %v1394_v54 = vmax.f32 %v1392_v40, %v1393_v30  ;;  %v1400_v55 = vrot.slane %v1399_v52, 2  ;;  %v1404_v39 = vsel %vm1291_vm10, %v2762_v13, -inf }
 0x256   :  { %v2861_v61 = vmax.f32 %v1373_v27, %v1374_v34  ;;  %v2863_v56 = vmax.f32 %v1380_v14, %v1381_v31  ;;  %v1388_v57 = vrot.slane %v1387_v33, 1  ;;  %v1405_v10 = vrot.slane %v1404_v39, 4 }
 0x257   :  { %v1395_v58 = vrot.slane %v1394_v54, 1  ;;  %v1401_v26 = vmax.f32 %v1399_v52, %v1400_v55  ;;  %v1411_v60 = vsel %vm1291_vm10, %v1206_v9, -inf  ;;  %v1418_v3 = vsel %vm1291_vm10, %v2772_v15, -inf }
 0x258   :  { %v2871_v62 = vmax.f32 %v1387_v33, %v1388_v57  ;;  %v1406_v8 = vmax.f32 %v1404_v39, %v1405_v10  ;;  %v1412_v59 = vrot.slane %v1411_v60, 4  ;;  %v1419_v0 = vrot.slane %v1418_v3, 4 }
 0x259   :  { %v2873_v1 = vmax.f32 %v1394_v54, %v1395_v58  ;;  %v1402_v2 = vrot.slane %v1401_v26, 1  ;;  %v1425_v42 = vsel %vm1291_vm10, %v1207_v17, -inf  ;;  %v1432_v13 = vsel %vm1291_vm10, %v2769_v16, -inf }
 0x25a   :  { %v1407_v9 = vrot.slane %v1406_v8, 2  ;;  %v1413_v5 = vmax.f32 %v1411_v60, %v1412_v59  ;;  %v1420_v36 = vmax.f32 %v1418_v3, %v1419_v0  ;;  %v1426_v7 = vrot.slane %v1425_v42, 4 }
 0x25b   :  { %v2881_v63 = vmax.f32 %v1401_v26, %v1402_v2  ;;  %v1433_v11 = vrot.slane %v1432_v13, 4  ;;  %v1439_v6 = vsel %vm1291_vm10, %v1223_v38, -inf  ;;  %v1446_v15 = vsel %vm1291_vm10, %v2780_v12, -inf }
 0x25c   :  { %v1408_v20 = vmax.f32 %v1406_v8, %v1407_v9  ;;  %v1414_v17 = vrot.slane %v1413_v5, 2  ;;  %v1421_v40 = vrot.slane %v1420_v36, 2  ;;  %v1427_v44 = vmax.f32 %v1425_v42, %v1426_v7 }
 0x25d   :  { %v1434_v46 = vmax.f32 %v1432_v13, %v1433_v11  ;;  %v1440_v27 = vrot.slane %v1439_v6, 4  ;;  %v1447_v14 = vrot.slane %v1446_v15, 4  ;;  %v1453_v28 = vsel %vm1291_vm10, %v1224_v21, -inf }
 0x25e   :  { %v1409_v29 = vrot.slane %v1408_v20, 1  ;;  %v1415_v30 = vmax.f32 %v1413_v5, %v1414_v17  ;;  %v1422_v16 = vmax.f32 %v1420_v36, %v1421_v40  ;;  %v1428_v52 = vrot.slane %v1427_v44, 2 }
 0x25f   :  { %v1435_v38 = vrot.slane %v1434_v46, 2  ;;  %v1441_v34 = vmax.f32 %v1439_v6, %v1440_v27  ;;  %v1448_v31 = vmax.f32 %v1446_v15, %v1447_v14  ;;  %v1454_v33 = vrot.slane %v1453_v28, 4 }
 0x260   :  { %v2893_v54 = vmax.f32 %v1408_v20, %v1409_v29  ;;  %v1416_v55 = vrot.slane %v1415_v30, 1  ;;  %v1423_v39 = vrot.slane %v1422_v16, 1  ;;  %v1429_v57 = vmax.f32 %v1427_v44, %v1428_v52 }
 0x261   :  { %v1436_v10 = vmax.f32 %v1434_v46, %v1435_v38  ;;  %v1442_v58 = vrot.slane %v1441_v34, 2  ;;  %v1449_v26 = vrot.slane %v1448_v31, 2  ;;  %v1455_v60 = vmax.f32 %v1453_v28, %v1454_v33 }
 0x262   :  { %v2895_v12 = vmax.f32 %v1415_v30, %v1416_v55  ;;  %v2897_v21 = vmax.f32 %v1422_v16, %v1423_v39  ;;  %v1430_v3 = vrot.slane %v1429_v57, 1  ;;  %v1460_v8 = vsel %vm1291_vm10, %v2777_v37, -inf }
 0x263   :  { %v1437_v59 = vrot.slane %v1436_v10, 1  ;;  %v1443_v0 = vmax.f32 %v1441_v34, %v1442_v58  ;;  %v1450_v2 = vmax.f32 %v1448_v31, %v1449_v26  ;;  %v1456_v42 = vrot.slane %v1455_v60, 2 }
 0x264   :  { %v2901_v13 = vmax.f32 %v1429_v57, %v1430_v3  ;;  %v1461_v9 = vrot.slane %v1460_v8, 4  ;;  %v1467_v5 = vsel %vm1291_vm10, %v1240_v19, -inf  ;;  %v1474_v36 = vsel %vm1291_vm10, %v2790_v18, -inf }
 0x265   :  { %v2909_v7 = vmax.f32 %v1436_v10, %v1437_v59  ;;  %v1444_v11 = vrot.slane %v1443_v0, 1  ;;  %v1451_v6 = vrot.slane %v1450_v2, 1  ;;  %v1457_v15 = vmax.f32 %v1455_v60, %v1456_v42 }
 0x266   :  { %v1462_v20 = vmax.f32 %v1460_v8, %v1461_v9  ;;  %v1468_v17 = vrot.slane %v1467_v5, 4  ;;  %v1475_v40 = vrot.slane %v1474_v36, 4  ;;  %v1481_v44 = vsel %vm1291_vm10, %v1241_v43, -inf }
 0x267   :  { %v2915_v46 = vmax.f32 %v1443_v0, %v1444_v11  ;;  %v2917_v37 = vmax.f32 %v1450_v2, %v1451_v6  ;;  %v1458_v19 = vrot.slane %v1457_v15, 1  ;;  %v1482_v27 = vrot.slane %v1481_v44, 4 }
 0x268   :  { %v1463_v14 = vrot.slane %v1462_v20, 2  ;;  %v1469_v28 = vmax.f32 %v1467_v5, %v1468_v17  ;;  %v1476_v29 = vmax.f32 %v1474_v36, %v1475_v40  ;;  %v1488_v30 = vsel %vm1291_vm10, %v2785_v24, -inf }
 0x269   :  { %v2921_v16 = vmax.f32 %v1457_v15, %v1458_v19  ;;  %v1483_v52 = vmax.f32 %v1481_v44, %v1482_v27  ;;  %v1489_v38 = vrot.slane %v1488_v30, 4  ;;  %v1495_v18 = vsel %vm1291_vm10, %v1257_v23, -inf }
 0x26a   :  { %v1464_v43 = vmax.f32 %v1462_v20, %v1463_v14  ;;  %v1470_v34 = vrot.slane %v1469_v28, 2  ;;  %v1477_v31 = vrot.slane %v1476_v29, 2  ;;  %v1496_v33 = vrot.slane %v1495_v18, 4 }
 0x26b   :  { %v1484_v55 = vrot.slane %v1483_v52, 2  ;;  %v1490_v39 = vmax.f32 %v1488_v30, %v1489_v38  ;;  %v1502_v57 = vsel %vm1291_vm10, %v2798_v22, -inf  ;;  %v1509_v10 = vsel %vm1291_vm10, %v1258_v25, -inf }
 0x26c   :  { %v1465_v58 = vrot.slane %v1464_v43, 1  ;;  %v1471_v26 = vmax.f32 %v1469_v28, %v1470_v34  ;;  %v1478_v60 = vmax.f32 %v1476_v29, %v1477_v31  ;;  %v1497_v24 = vmax.f32 %v1495_v18, %v1496_v33 }
 0x26d   :  { %v1485_v3 = vmax.f32 %v1483_v52, %v1484_v55  ;;  %v1491_v23 = vrot.slane %v1490_v39, 2  ;;  %v1503_v8 = vrot.slane %v1502_v57, 4  ;;  %v1510_v59 = vrot.slane %v1509_v10, 4 }
 0x26e   :  { %v2933_v0 = vmax.f32 %v1464_v43, %v1465_v58  ;;  %v1472_v2 = vrot.slane %v1471_v26, 1  ;;  %v1479_v42 = vrot.slane %v1478_v60, 1  ;;  %v1498_v9 = vrot.slane %v1497_v24, 2 }
 0x26f   :  { %v1486_v5 = vrot.slane %v1485_v3, 1  ;;  %v1492_v36 = vmax.f32 %v1490_v39, %v1491_v23  ;;  %v1504_v11 = vmax.f32 %v1502_v57, %v1503_v8  ;;  %v1511_v6 = vmax.f32 %v1509_v10, %v1510_v59 }
 0x270   :  { %v1473_v22 = vmax.f32 %v1471_v26, %v1472_v2  ;;  %v2935_v15 = vmax.f32 %v1478_v60, %v1479_v42  ;;  %v1499_v25 = vmax.f32 %v1497_v24, %v1498_v9  ;;  %v1516_v20 = vmax.f32 %v2813_v35, 0.0 }
 0x271   :  { %v2938_v17 = vmax.f32 %v1485_v3, %v1486_v5  ;;  %v1493_v40 = vrot.slane %v1492_v36, 1  ;;  %v1505_v44 = vrot.slane %v1504_v11, 2  ;;  %v1512_v19 = vrot.slane %v1511_v6, 2 }
 0x272   :  { %v1500_v27 = vrot.slane %v1499_v25, 1  ;;  %v1517_v14 = vmax.f32 %v2815_v47, 0.0  ;;  %v1518_v28 = vmax.f32 %v2817_v48, 0.0  ;;  %v1519_v29 = vmax.f32 %v2821_v49, 0.0 }
 0x273   :  { %v1494_v30 = vmax.f32 %v1492_v36, %v1493_v40  ;;  %v1506_v52 = vmax.f32 %v1504_v11, %v1505_v44  ;;  %v1513_v38 = vmax.f32 %v1511_v6, %v1512_v19  ;;  %v1520_v18 = vmax.f32 %v2823_v51, 0.0 }
 0x274   :  { %v1501_v35 = vmax.f32 %v1499_v25, %v1500_v27  ;;  %v1521_v43 = vmax.f32 %v2831_v32, 0.0  ;;  %v1522_v34 = vmax.f32 %v2833_v53, 0.0  ;;  %v1523_v31 = vmax.f32 %v2841_v45, 0.0 }
 0x275   :  { %v1507_v47 = vrot.slane %v1506_v52, 1  ;;  %v1514_v33 = vrot.slane %v1513_v38, 1  ;;  %v1524_v48 = vmax.f32 %v2853_v50, 0.0  ;;  %v1525_v49 = vmax.f32 %v2855_v4, 0.0 }
 0x276   :  { %v1526_v55 = vmax.f32 %v2857_v41, 0.0  ;;  %v1527_v51 = vmax.f32 %v2861_v61, 0.0  ;;  %v1528_v39 = vmax.f32 %v2863_v56, 0.0  ;;  %v1529_v32 = vmax.f32 %v2871_v62, 0.0 }
 0x277   :  { %v1508_v53 = vmax.f32 %v1506_v52, %v1507_v47  ;;  %v1515_v57 = vmax.f32 %v1513_v38, %v1514_v33  ;;  %v1530_v45 = vmax.f32 %v2873_v1, 0.0  ;;  %v1531_v10 = vmax.f32 %v2881_v63, 0.0 }
 0x278   :  { %v1532_v50 = vmax.f32 %v2893_v54, 0.0  ;;  %v1533_v4 = vmax.f32 %v2895_v12, 0.0  ;;  %v1534_v41 = vmax.f32 %v2897_v21, 0.0  ;;  %v1535_v61 = vmax.f32 %v2901_v13, 0.0 }
 0x279   :  { %v1536_v56 = vmax.f32 %v2909_v7, 0.0  ;;  %v1537_v62 = vmax.f32 %v2915_v46, 0.0  ;;  %v1538_v58 = vmax.f32 %v2917_v37, 0.0  ;;  %v1539_v26 = vmax.f32 %v2921_v16, 0.0 }
 0x27a   :  { %v1540_v1 = vmax.f32 %v2933_v0, 0.0  ;;  %v1541_v63 = vmax.f32 %v1473_v22, 0.0  ;;  %v1542_v60 = vmax.f32 %v2935_v15, 0.0  ;;  %v1543_v54 = vmax.f32 %v2938_v17, 0.0 }
 0x27b   :  { %v1544_v12 = vmax.f32 %v1494_v30, 0.0  ;;  %v1545_v24 = vmax.f32 %v1501_v35, 0.0  ;;  %v1546_v21 = vmax.f32 %v1508_v53, 0.0  ;;  %v1547_v3 = vmax.f32 %v1515_v57, 0.0 }
 0x27c   :  { %v1581_v13 = vsel %vm1580_vm11, %v1517_v14, %v1516_v20  ;;  %v1594_v7 = vsel %vm1580_vm11, %v1525_v49, %v1524_v48  ;;  %v1601_v46 = vsel %vm1580_vm11, %v1533_v4, %v1532_v50  ;;  %v1608_v37 = vsel %vm1580_vm11, %v1541_v63, %v1540_v1 }
 0x27d   :  { %v1583_v16 = vsel %vm1582_vm12, %v1518_v28, %v1581_v13  ;;  %v1595_v23 = vsel %vm1582_vm12, %v1526_v55, %v1594_v7  ;;  %v1602_v8 = vsel %vm1582_vm12, %v1534_v41, %v1601_v46  ;;  %v1609_v59 = vsel %vm1582_vm12, %v1542_v60, %v1608_v37 }
 0x27e   :  { %v1585_v0 = vsel %vm1584_vm13, %v1519_v29, %v1583_v16  ;;  %v1596_v2 = vsel %vm1584_vm13, %v1527_v51, %v1595_v23  ;;  %v1603_v42 = vsel %vm1584_vm13, %v1535_v61, %v1602_v8  ;;  %v1610_v9 = vsel %vm1584_vm13, %v1543_v54, %v1609_v59 }
 0x27f   :  { %v1587_v5 = vsel %vm1586_vm14, %v1520_v18, %v1585_v0  ;;  %v1597_v36 = vsel %vm1586_vm14, %v1528_v39, %v1596_v2  ;;  %v1604_v11 = vsel %vm1586_vm14, %v1536_v56, %v1603_v42  ;;  %v1611_v6 = vsel %vm1586_vm14, %v1544_v12, %v1610_v9 }
 0x280   :  { %v1589_v22 = vsel %vm1588_vm15, %v1521_v43, %v1587_v5  ;;  %v1598_v15 = vsel %vm1588_vm15, %v1529_v32, %v1597_v36  ;;  %v1605_v25 = vsel %vm1588_vm15, %v1537_v62, %v1604_v11  ;;  %v1612_v20 = vsel %vm1588_vm15, %v1545_v24, %v1611_v6 }
 0x281   :  { %v1591_v17 = vsel %vm1590_vm0, %v1522_v34, %v1589_v22  ;;  %v1599_v40 = vsel %vm1590_vm0, %v1530_v45, %v1598_v15  ;;  %v1606_v44 = vsel %vm1590_vm0, %v1538_v58, %v1605_v25  ;;  %v1613_v19 = vsel %vm1590_vm0, %v1546_v21, %v1612_v20 }
 0x282   :  { %v1593_v27 = vsel %vm1592_vm1, %v1523_v31, %v1591_v17  ;;  %v1600_v14 = vsel %vm1592_vm1, %v1531_v10, %v1599_v40  ;;  %v1607_v28 = vsel %vm1592_vm1, %v1539_v26, %v1606_v44  ;;  %v1614_v29 = vsel %vm1592_vm1, %v1547_v3, %v1613_v19 }
 0x283   :  { %1619 = vst [vmem:[%s3010_s4] sm:$0xff] %v1593_v27  ;;  %1620 = vst [vmem:[%s3010_s4 + $0x8] sm:$0xff] %v1600_v14 }
 0x284   :  { %1621 = vst [vmem:[%s3010_s4 + $0x10] sm:$0xff] %v1607_v28  ;;  %1622 = vst [vmem:[%s3010_s4 + $0x18] sm:$0xff] %v1614_v29 }

// kernel: convnet_forward.5
= control target key start
LH: loop header
LB: loop body
LE: loop exit
PB: predicated region body
PF: predicated region fallthrough
CT: control target
= control target key end

     0   :  { %v633_v2 = vmov 0.0   ;;  %s814_s0 = inlined_call_operand.vmem [shape: f32[2,256], index: 0, kind: input, shape index: {}]   ;;  %s815_s1 = inlined_call_operand.vmem [shape: bf16[256,128], index: 1, kind: input, shape index: {}]   ;;  %s816_s2 = inlined_call_operand.vmem [shape: f32[1,128], index: 2, kind: input, shape index: {}]   ;;  %s817_s3 = inlined_call_operand.vmem [shape: bf16[128,128], index: 3, kind: input, shape index: {}]   ;;  %s818_s4 = inlined_call_operand.vmem [shape: f32[1,128], index: 4, kind: input, shape index: {}]   ;;  %s819_s5 = inlined_call_operand.vmem [shape: bf16[128,128], index: 5, kind: input, shape index: {}]   ;;  %s820_s6 = inlined_call_operand.vmem [shape: f32[1,128], index: 6, kind: input, shape index: {}]   ;;  %s821_s7 = inlined_call_operand.hbm [shape: f32[2,128], index: 7, kind: output, shape index: {}]  }
   0x1   :  { %v577_v0 = vld [vmem:[%s815_s1 + $0x40] sm:$0xff]   ;;  %534 = vmatprep.subr.bf16.mxu1 %v633_v2  ;;  %v579_v3 = vld [vmem:[%s815_s1 + $0x48] sm:$0xff]   ;;  %v581_v5 = vld [vmem:[%s815_s1 + $0x50] sm:$0xff]  }
   0x2   :  { %v578_v1 = vld [vmem:[%s815_s1] sm:$0xff]   ;;  %494 = vmatprep.subr.bf16.mxu0 %v577_v0  ;;  %v580_v4 = vld [vmem:[%s815_s1 + $0x8] sm:$0xff]   ;;  %v582_v6 = vld [vmem:[%s815_s1 + $0x10] sm:$0xff]  }
   0x3   :  { %495 = vmatpush3.bf16.msra.mxu0 %v578_v1  ;;  %v583_v7 = vld [vmem:[%s815_s1 + $0x58] sm:$0xff]   ;;  %v585_v9 = vld [vmem:[%s815_s1 + $0x60] sm:$0xff]   ;;  %v587_v11 = vld [vmem:[%s815_s1 + $0x68] sm:$0xff]  }
   0x4   :  { %496 = vmatprep.subr.bf16.mxu0 %v579_v3  ;;  %v584_v8 = vld [vmem:[%s815_s1 + $0x18] sm:$0xff]   ;;  %v586_v10 = vld [vmem:[%s815_s1 + $0x20] sm:$0xff]   ;;  %v588_v15 = vld [vmem:[%s815_s1 + $0x28] sm:$0xff]  }
   0x5   :  { %v458_v12 = vld.sshfl [vmem:[%s814_s0] sm:$0x33 pattern:$0x76325410]  ;;  %v594_v17 = vld [vmem:[%s817_s3 + $0x8] sm:$0xff]   ;;  %v589_v18 = vld [vmem:[%s815_s1 + $0x70] sm:$0xff]  }
   0x6   :  { %v37_v13 = vcombine.high %v458_v12, %v458_v12  ;;  %v593_v14 = vld [vmem:[%s817_s3] sm:$0xff]   ;;  %v590_v19 = vld [vmem:[%s815_s1 + $0x30] sm:$0xff]   ;;  %v591_v20 = vld [vmem:[%s815_s1 + $0x78] sm:$0xff]  }
   0x7   :  { %497 = vmatpush3.bf16.msra.mxu0 %v580_v4  ;;  %535 = vmatpush3.bf16.msra.mxu1 %v593_v14  ;;  %v595_v21 = vld [vmem:[%s817_s3 + $0x10] sm:$0xff]   ;;  %v592_v22 = vld [vmem:[%s815_s1 + $0x38] sm:$0xff]  }
   0x8   :  { %498 = vmatprep.subr.bf16.mxu0 %v581_v5  ;;  %v41_v16 = vpack.c.bf16 %v37_v13, %v37_v13  ;;  %536 = vmatprep.subr.bf16.mxu1 %v633_v2  ;;  %v596_v23 = vld [vmem:[%s817_s3 + $0x18] sm:$0xff]  }
   0xa   :  { %209 = vmatprep.mubr.bf16.mxu0 %v41_v16 }
   0xb   :  { %499 = vmatpush3.bf16.msra.mxu0 %v582_v6  ;;  %537 = vmatpush3.bf16.msra.mxu1 %v594_v17 }
   0xc   :  { %500 = vmatprep.subr.bf16.mxu0 %v583_v7  ;;  %538 = vmatprep.subr.bf16.mxu1 %v633_v2 }
   0xf   :  { %501 = vmatpush3.bf16.msra.mxu0 %v584_v8  ;;  %539 = vmatpush3.bf16.msra.mxu1 %v595_v21 }
  0x10   :  { %502 = vmatprep.subr.bf16.mxu0 %v585_v9  ;;  %540 = vmatprep.subr.bf16.mxu1 %v633_v2 }
  0x13   :  { %503 = vmatpush3.bf16.msra.mxu0 %v586_v10 }
  0x14   :  { %504 = vmatprep.subr.bf16.mxu0 %v587_v11 }
  0x17   :  { %505 = vmatpush3.bf16.msra.mxu0 %v588_v15 }
  0x18   :  { %506 = vmatprep.subr.bf16.mxu0 %v589_v18 }
  0x1b   :  { %507 = vmatpush3.bf16.msra.mxu0 %v590_v19 }
  0x1c   :  { %508 = vmatprep.subr.bf16.mxu0 %v591_v20 }
  0x1d   :  { %12 = vsyncpa [#allocation3], 0  ;;  %v40_v24 = vpack.c.bf16 %v458_v12, %v458_v12  ;;  %541 = vmatpush3.bf16.msra.mxu1 %v596_v23  ;;  %v597_v25 = vld [vmem:[%s817_s3 + $0x20] sm:$0xff]   ;;  %v598_v26 = vld [vmem:[%s817_s3 + $0x28] sm:$0xff]   ;;  %vm634_vm0 = vmmov 0   ;;  %s635_s21 = smov [#allocation2]  }
  0x1e   :  { %542 = vmatprep.subr.bf16.mxu1 %v633_v2  ;;  %v599_v27 = vld [vmem:[%s817_s3 + $0x30] sm:$0xff]   ;;  %v600_v28 = vld [vmem:[%s817_s3 + $0x38] sm:$0xff]   ;;  %550 = vmatprep.mubr.msk.bf16.mxu1 %vm634_vm0, %v633_v2  ;;  %v601_v29 = vld [vmem:[%s819_s5] sm:$0xff]   ;;  %s450_s22 = sshll.u32 %s635_s21, 4  ;;  %s451_s22 = int_to_ptr.vmem [resolvable:$true] %s450_s22 }
  0x1f   :  { %509 = vmatpush3.bf16.msra.mxu0 %v592_v22  ;;  %v602_v30 = vld [vmem:[%s819_s5 + $0x8] sm:$0xff]   ;;  %v603_v31 = vld [vmem:[%s819_s5 + $0x10] sm:$0xff]   ;;  %v604_v32 = vld [vmem:[%s819_s5 + $0x18] sm:$0xff]   ;;  %p614_p1 = scmp.lt.s32.totalorder %s451_s22, %s451_s22 }
  0x20   :  { %554 = vmatprep.subr.bf16.mxu0 %v633_v2  ;;  %v605_v33 = vld [vmem:[%s819_s5 + $0x20] sm:$0xff]   ;;  %v606_v34 = vld [vmem:[%s819_s5 + $0x28] sm:$0xff]   ;;  %v607_v44 = vld [vmem:[%s819_s5 + $0x30] sm:$0xff]  }
  0x21   :  { %543 = vmatpush3.bf16.msra.mxu1 %v597_v25  ;;  %v459_v36 = vld [vmem:[%s816_s2] ss:$0 sm:$0xff]  ;;  %v608_v45 = vld [vmem:[%s819_s5 + $0x38] sm:$0xff]  }
  0x22   :  { %210 = vmatmul.mubr.bf16.vlgmr.msra.gmra.mrb[0].mxu0 %v40_v24  ;;  %544 = vmatprep.subr.bf16.mxu1 %v633_v2  ;;  %v476_v46 = vld [vmem:[%s818_s4] ss:$0 sm:$0xff]  ;;  %s609_s4 = scalar_lea.vmem %s451_s22, 32 }
  0x23   :  { %570 = vmatprep.mubr.msk.bf16.mxu0 %vm634_vm0, %v633_v2  ;;  %555 = vmatpush3.bf16.msra.mxu0 %v601_v29  ;;  %v485_v54 = vld [vmem:[%s820_s6] ss:$0 sm:$0xff]  ;;  %p610_p0 = scmp.ne.s32.totalorder %s451_s22, %s609_s4  ;;  %p615_p2 = scmp.lt.s32.totalorder %s609_s4, %s609_s4 }
  0x24   :  { %556 = vmatprep.subr.bf16.mxu0 %v633_v2 }
  0x25   :  { %545 = vmatpush3.bf16.msra.mxu1 %v598_v26  ;;  %p616_p3 = por %p615_p2, %p614_p1 }
  0x26   :  { %546 = vmatprep.subr.bf16.mxu1 %v633_v2 }
  0x27   :  { %557 = vmatpush3.bf16.msra.mxu0 %v602_v30  ;;  %p617_p4 = pnand %p616_p3, %p610_p0 }
  0x28   :  { %558 = vmatprep.subr.bf16.mxu0 %v633_v2 }
  0x29   :  { %547 = vmatpush3.bf16.msra.mxu1 %v599_v27 }
  0x2a   :  { %548 = vmatprep.subr.bf16.mxu1 %v633_v2 }
  0x2b   :  { %559 = vmatpush3.bf16.msra.mxu0 %v603_v31 }
  0x2c   :  { %560 = vmatprep.subr.bf16.mxu0 %v633_v2 }
  0x2d   :  { %549 = vmatpush3.bf16.msra.mxu1 %v600_v28 }
  0x2f   :  { %561 = vmatpush3.bf16.msra.mxu0 %v604_v32 }
  0x30   :  { %562 = vmatprep.subr.bf16.mxu0 %v633_v2 }
  0x33   :  { %563 = vmatpush3.bf16.msra.mxu0 %v605_v33 }
  0x34   :  { %564 = vmatprep.subr.bf16.mxu0 %v633_v2 }
  0x37   :  { %565 = vmatpush3.bf16.msra.mxu0 %v606_v34 }
  0x38   :  { %566 = vmatprep.subr.bf16.mxu0 %v633_v2 }
  0x3b   :  { %567 = vmatpush3.bf16.msra.mxu0 %v607_v44 }
  0x3c   :  { %568 = vmatprep.subr.bf16.mxu0 %v633_v2 }
  0x3f   :  { %569 = vmatpush3.bf16.msra.mxu0 %v608_v45 }
  0xf5   :  { %v510_v35 = vpop.f32.mrb[0].mxu0 }
  0xf6   :  { %v511_v37 = vpop.f32.mrb[1].mxu0 }
  0xf7   :  { %v512_v38 = vadd.f32 %v511_v37, %v510_v35  ;;  %v513_v39 = vpop.f32.mrb[2].mxu0 }
  0xf8   :  { %v514_v40 = vpop.f32.mrb[3].mxu0 }
  0xf9   :  { %v212_v41 = vadd.f32 %v512_v38, %v459_v36 }
  0xfb   :  { %v217_v42 = vmax.f32 %v212_v41, 0.0 }
  0xfd   :  { %v218_v43 = vpack.c.bf16 %v217_v42, %v217_v42 }
  0xff   :  { %551 = vmatmul.mubr.bf16.vlgmr.msra.gmra.mrb[0].mxu1 %v218_v43 }
 0x1d2   :  { %v324_v47 = vpop.f32.mrb[0].mxu1 }
 0x1d3   :  { %v325_v48 = vadd.f32 %v476_v46, %v324_v47  ;;  %v552_v49 = vpop.f32.mrb[1].mxu1 }
 0x1d4   :  { %v327_v50 = vpop.f32.mrb[2].mxu1 }
 0x1d5   :  { %v330_v51 = vmax.f32 %v325_v48, 0.0  ;;  %v553_v52 = vpop.f32.mrb[3].mxu1 }
 0x1d7   :  { %v331_v53 = vpack.c.bf16 %v330_v51, %v330_v51 }
 0x1d9   :  { %571 = vmatmul.mubr.bf16.vlgmr.msra.gmra.mrb[4].mxu0 %v331_v53 }
 0x2ac   :  { %v437_v55 = vpop.f32.mrb[4].mxu0 }
 0x2ad   :  { %v438_v56 = vadd.f32 %v485_v54, %v437_v55  ;;  %v572_v57 = vpop.f32.mrb[5].mxu0 }
 0x2ae   :  { %v440_v58 = vpop.f32.mrb[6].mxu0 }
 0x2af   :  { %443 = vst [vmem:[#allocation2] sm:$0x3] %v438_v56  ;;  %v573_v59 = vpop.f32.mrb[7].mxu0 }
 0x2b0   :  { %620 = shalt.err (!%p617_p4)
}
 0x2b1   :  { %s621_s6 = scalar_lea.hbm %s821_s7, 32 }
 0x2b2   :  { %p622_p5 = scmp.ne.s32.totalorder %s821_s7, %s621_s6  ;;  %p625_p6 = scmp.lt.u32.totalorder %s621_s6, %s821_s7 }
 0x2b4   :  { %p627_p7 = pnand %p625_p6, %p622_p5 }
 0x2b6   :  { %630 = shalt.err (!%p627_p7)
}
 0x2b7   :  { %453 = dma.vmem_to_hbm [thread:$0]  %s451_s22, 32, %s821_s7, [#allocation3]  }
 0x2b8   :  { %631 = dma.done.wait [#allocation3], 32  }
 0x2b9   :  { %632 = vsyncadd [#allocation3], 4294967264 }
 0x2ba   :  { %457 = vsyncpa [#allocation3], 1 }

// kernel: convnet_forward.3
= control target key start
LH: loop header
LB: loop body
LE: loop exit
PB: predicated region body
PF: predicated region fallthrough
CT: control target
= control target key end

     0   :  { %s7903_s5 = smov 4   ;;  %s7904_s9 = smov 8   ;;  %vm2644_vm0 = vcmask 31744   ;;  %vm2709_vm1 = vcmask 64512   ;;  %vm3313_vm2 = vcmask 1041408   ;;  %vm2774_vm3 = vcmask 97280   ;;  %s13568_s0 = inlined_call_operand.vmem [shape: f32[2,18,18,4], index: 0, kind: input, shape index: {}]   ;;  %s13569_s1 = inlined_call_operand.vmem [shape: bf16[36,128], index: 1, kind: input, shape index: {}]   ;;  %s13570_s2 = inlined_call_operand.vmem [shape: f32[1,128], index: 2, kind: input, shape index: {}]   ;;  %s13571_s3 = inlined_call_operand.vmem [shape: f32[1,128], index: 3, kind: input, shape index: {}]   ;;  %s13572_s4 = inlined_call_operand.vmem [shape: f32[128,128], index: 4, kind: output, shape index: {}]  }
   0x1   :  { %v86_v0 = vld [vmem:[%s13568_s0 + $0x31] sm:$0xff]  ;;  %v87_v1 = vld [vmem:[%s13568_s0 + $0x39] sm:$0xff]  ;;  %v82_v2 = vld [vmem:[%s13568_s0 + $0x1] sm:$0xff]  ;;  %s7906_s12 = smov 16   ;;  %s7907_s17 = smov 20   ;;  %vm2839_vm4 = vcmask 130048  }
   0x2   :  { %v6614_v3 = vpack.i.bf16 %v87_v1, %v86_v0  ;;  %v83_v4 = vld [vmem:[%s13568_s0 + $0x9] sm:$0xff]  ;;  %v89_v6 = vld [vmem:[%s13568_s0 + $0x51] sm:$0xff]  ;;  %v84_v8 = vld [vmem:[%s13568_s0 + $0x19] sm:$0xff]  ;;  %s7908_s24 = smov 24   ;;  %s7910_s25 = smov 32   ;;  %vm2904_vm5 = vcmask 162816  }
   0x3   :  { %v88_v5 = vld [vmem:[%s13568_s0 + $0x49] sm:$0xff]  ;;  %v6604_v7 = vpack.i.bf16 %v83_v4, %v82_v2  ;;  %v85_v9 = vld [vmem:[%s13568_s0 + $0x21] sm:$0xff]  ;;  %v92_v12 = vld [vmem:[%s13568_s0 + $0x79] sm:$0xff]  ;;  %vm2969_vm6 = vcmask 195584   ;;  %vm3034_vm7 = vcmask 228352   ;;  %vm3099_vm8 = vcmask 261120  }
   0x4   :  { %6615 = vrot.lane.b32.xlu1 %v6614_v3, %s7903_s5  ;;  %v6619_v10 = vpack.i.bf16 %v89_v6, %v88_v5  ;;  %v6609_v11 = vpack.i.bf16 %v85_v9, %v84_v8  ;;  %v93_v13 = vld [vmem:[%s13568_s0 + $0x81] sm:$0xff]  ;;  %v91_v15 = vld [vmem:[%s13568_s0 + $0x69] sm:$0xff]  ;;  %v97_v19 = vld [vmem:[%s13568_s0 + $0xb1] sm:$0xff]  ;;  %vm3216_vm9 = vcmask 293888   ;;  %vm5907_vm10 = vcmask 1041409  }
   0x5   :  { %6605 = vrot.lane.b32.xlu0 %v6604_v7, %s7903_s5  ;;  %v90_v14 = vld [vmem:[%s13568_s0 + $0x61] sm:$0xff]  ;;  %v6629_v16 = vpack.i.bf16 %v93_v13, %v92_v12  ;;  %v96_v18 = vld [vmem:[%s13568_s0 + $0xa9] sm:$0xff]  ;;  %v94_v20 = vld [vmem:[%s13568_s0 + $0x91] sm:$0xff]  ;;  %vm5909_vm11 = vcmask 1042434   ;;  %vm5911_vm12 = vcmask 1043459   ;;  %vm5913_vm13 = vcmask 1044484  }
   0x6   :  { %v6624_v17 = vpack.i.bf16 %v91_v15, %v90_v14  ;;  %v95_v21 = vld [vmem:[%s13568_s0 + $0x99] sm:$0xff]  ;;  %v6639_v22 = vpack.i.bf16 %v97_v19, %v96_v18  ;;  %v101_v25 = vld [vmem:[%s13568_s0 + $0xe1] sm:$0xff]  ;;  %v99_v27 = vld [vmem:[%s13568_s0 + $0xc9] sm:$0xff]  ;;  %vm5915_vm14 = vcmask 1045509   ;;  %vm5917_vm15 = vcmask 1046534  }
   0x7   :  { %v6634_v23 = vpack.i.bf16 %v95_v21, %v94_v20  ;;  %v100_v24 = vld [vmem:[%s13568_s0 + $0xd9] sm:$0xff]  ;;  %v98_v26 = vld [vmem:[%s13568_s0 + $0xc1] sm:$0xff]  ;;  %v104_v30 = vld [vmem:[%s13568_s0 + $0x109] sm:$0xff] }
   0x8   :  { %6620 = vrot.lane.b32.xlu1 %v6619_v10, %s7903_s5  ;;  %v6649_v28 = vpack.i.bf16 %v101_v25, %v100_v24  ;;  %v6644_v29 = vpack.i.bf16 %v99_v27, %v98_v26  ;;  %v105_v31 = vld [vmem:[%s13568_s0 + $0x111] sm:$0xff]  ;;  %v103_v33 = vld [vmem:[%s13568_s0 + $0xf9] sm:$0xff]  ;;  %v109_v37 = vld [vmem:[%s13568_s0 + $0x141] sm:$0xff] }
   0x9   :  { %6610 = vrot.lane.b32.xlu0 %v6609_v11, %s7903_s5  ;;  %v102_v32 = vld [vmem:[%s13568_s0 + $0xf1] sm:$0xff]  ;;  %v6659_v34 = vpack.i.bf16 %v105_v31, %v104_v30  ;;  %v108_v36 = vld [vmem:[%s13568_s0 + $0x139] sm:$0xff]  ;;  %v106_v38 = vld [vmem:[%s13568_s0 + $0x121] sm:$0xff] }
   0xa   :  { %v6654_v35 = vpack.i.bf16 %v103_v33, %v102_v32  ;;  %v107_v39 = vld [vmem:[%s13568_s0 + $0x129] sm:$0xff]  ;;  %v6669_v40 = vpack.i.bf16 %v109_v37, %v108_v36  ;;  %v113_v43 = vld [vmem:[%s13568_s0 + $0x171] sm:$0xff]  ;;  %v111_v45 = vld [vmem:[%s13568_s0 + $0x159] sm:$0xff] }
   0xb   :  { %v6664_v41 = vpack.i.bf16 %v107_v39, %v106_v38  ;;  %v112_v42 = vld [vmem:[%s13568_s0 + $0x169] sm:$0xff]  ;;  %v110_v44 = vld [vmem:[%s13568_s0 + $0x151] sm:$0xff]  ;;  %v115_v51 = vld [vmem:[%s13568_s0 + $0x1b9] sm:$0xff] }
   0xc   :  { %6630 = vrot.lane.b32.xlu1 %v6629_v16, %s7903_s5  ;;  %v6679_v46 = vpack.i.bf16 %v113_v43, %v112_v42  ;;  %v6674_v47 = vpack.i.bf16 %v111_v45, %v110_v44  ;;  %v116_v48 = vld [vmem:[%s13568_s0 + $0x1c9] sm:$0xff]  ;;  %v117_v49 = vld [vmem:[%s13568_s0 + $0x1d1] sm:$0xff]  ;;  %v120_v54 = vld [vmem:[%s13568_s0 + $0x1f9] sm:$0xff] }
   0xd   :  { %6625 = vrot.lane.b32.xlu0 %v6624_v17, %s7903_s5  ;;  %v114_v50 = vld [vmem:[%s13568_s0 + $0x1b1] sm:$0xff]  ;;  %v6689_v52 = vpack.i.bf16 %v117_v49, %v116_v48  ;;  %v121_v55 = vld [vmem:[%s13568_s0 + $0x201] sm:$0xff]  ;;  %v119_v57 = vld [vmem:[%s13568_s0 + $0x1e9] sm:$0xff] }
   0xe   :  { %v6684_v53 = vpack.i.bf16 %v115_v51, %v114_v50  ;;  %v118_v56 = vld [vmem:[%s13568_s0 + $0x1e1] sm:$0xff]  ;;  %v6699_v58 = vpack.i.bf16 %v121_v55, %v120_v54  ;;  %v124_v60 = vld [vmem:[%s13568_s0 + $0x229] sm:$0xff]  ;;  %v125_v61 = vld [vmem:[%s13568_s0 + $0x231] sm:$0xff] }
   0xf   :  { %v6694_v59 = vpack.i.bf16 %v119_v57, %v118_v56  ;;  %v122_v62 = vld [vmem:[%s13568_s0 + $0x211] sm:$0xff]  ;;  %v123_v63 = vld [vmem:[%s13568_s0 + $0x219] sm:$0xff]  ;;  %v6709_v0 = vpack.i.bf16 %v125_v61, %v124_v60  ;;  %v129_v3 = vld [vmem:[%s13568_s0 + $0x261] sm:$0xff] }
  0x10   :  { %6640 = vrot.lane.b32.xlu1 %v6639_v22, %s7903_s5  ;;  %v6704_v1 = vpack.i.bf16 %v123_v63, %v122_v62  ;;  %v128_v2 = vld [vmem:[%s13568_s0 + $0x259] sm:$0xff]  ;;  %v126_v4 = vld [vmem:[%s13568_s0 + $0x241] sm:$0xff]  ;;  %v127_v5 = vld [vmem:[%s13568_s0 + $0x249] sm:$0xff] }
  0x11   :  { %6635 = vrot.lane.b32.xlu0 %v6634_v23, %s7903_s5  ;;  %v6719_v6 = vpack.i.bf16 %v129_v3, %v128_v2  ;;  %v6714_v7 = vpack.i.bf16 %v127_v5, %v126_v4  ;;  %v132_v8 = vld [vmem:[%s13568_s0 + $0x289] sm:$0xff]  ;;  %v133_v9 = vld [vmem:[%s13568_s0 + $0x291] sm:$0xff]  ;;  %v131_v11 = vld [vmem:[%s13568_s0 + $0x279] sm:$0xff] }
  0x12   :  { %v130_v10 = vld [vmem:[%s13568_s0 + $0x271] sm:$0xff]  ;;  %v6729_v12 = vpack.i.bf16 %v133_v9, %v132_v8  ;;  %v136_v14 = vld [vmem:[%s13568_s0 + $0x2b9] sm:$0xff]  ;;  %v137_v15 = vld [vmem:[%s13568_s0 + $0x2c1] sm:$0xff] }
  0x13   :  { %v6724_v13 = vpack.i.bf16 %v131_v11, %v130_v10  ;;  %v134_v16 = vld [vmem:[%s13568_s0 + $0x2a1] sm:$0xff]  ;;  %v135_v17 = vld [vmem:[%s13568_s0 + $0x2a9] sm:$0xff]  ;;  %v6739_v18 = vpack.i.bf16 %v137_v15, %v136_v14  ;;  %v141_v21 = vld [vmem:[%s13568_s0 + $0x2f1] sm:$0xff] }
  0x14   :  { %6650 = vrot.lane.b32.xlu1 %v6649_v28, %s7903_s5  ;;  %v6734_v19 = vpack.i.bf16 %v135_v17, %v134_v16  ;;  %v140_v20 = vld [vmem:[%s13568_s0 + $0x2e9] sm:$0xff]  ;;  %v138_v22 = vld [vmem:[%s13568_s0 + $0x2d1] sm:$0xff]  ;;  %v139_v23 = vld [vmem:[%s13568_s0 + $0x2d9] sm:$0xff] }
  0x15   :  { %6645 = vrot.lane.b32.xlu0 %v6644_v29, %s7903_s5  ;;  %v6749_v24 = vpack.i.bf16 %v141_v21, %v140_v20  ;;  %v6744_v25 = vpack.i.bf16 %v139_v23, %v138_v22  ;;  %v144_v26 = vld [vmem:[%s13568_s0 + $0x319] sm:$0xff]  ;;  %v145_v27 = vld [vmem:[%s13568_s0 + $0x321] sm:$0xff]  ;;  %v143_v29 = vld [vmem:[%s13568_s0 + $0x309] sm:$0xff] }
  0x16   :  { %v142_v28 = vld [vmem:[%s13568_s0 + $0x301] sm:$0xff]  ;;  %v6759_v30 = vpack.i.bf16 %v145_v27, %v144_v26  ;;  %v152_v38 = vld [vmem:[%s13568_s0 + $0x4a] sm:$0xff]  ;;  %v153_v39 = vld [vmem:[%s13568_s0 + $0x52] sm:$0xff] }
  0x17   :  { %v6754_v31 = vpack.i.bf16 %v143_v29, %v142_v28  ;;  %v148_v32 = vld [vmem:[%s13568_s0 + $0x1a] sm:$0xff]  ;;  %v149_v33 = vld [vmem:[%s13568_s0 + $0x22] sm:$0xff]  ;;  %v6779_v42 = vpack.i.bf16 %v153_v39, %v152_v38  ;;  %v160_v50 = vld [vmem:[%s13568_s0 + $0xaa] sm:$0xff] }
  0x18   :  { %6660 = vrot.lane.b32.xlu1 %v6659_v34, %s7903_s5  ;;  %v146_v34 = vld [vmem:[%s13568_s0 + $0x2] sm:$0xff]  ;;  %v6769_v36 = vpack.i.bf16 %v149_v33, %v148_v32  ;;  %v156_v44 = vld [vmem:[%s13568_s0 + $0x7a] sm:$0xff]  ;;  %v161_v51 = vld [vmem:[%s13568_s0 + $0xb2] sm:$0xff] }
  0x19   :  { %6655 = vrot.lane.b32.xlu0 %v6654_v35, %s7903_s5  ;;  %v147_v35 = vld [vmem:[%s13568_s0 + $0xa] sm:$0xff]  ;;  %v157_v45 = vld [vmem:[%s13568_s0 + $0x82] sm:$0xff]  ;;  %v6799_v54 = vpack.i.bf16 %v161_v51, %v160_v50  ;;  %v164_v56 = vld [vmem:[%s13568_s0 + $0xda] sm:$0xff] }
  0x1a   :  { %v6764_v37 = vpack.i.bf16 %v147_v35, %v146_v34  ;;  %v6789_v48 = vpack.i.bf16 %v157_v45, %v156_v44  ;;  %v165_v57 = vld [vmem:[%s13568_s0 + $0xe2] sm:$0xff]  ;;  %v168_v62 = vld [vmem:[%s13568_s0 + $0x10a] sm:$0xff]  ;;  %v169_v63 = vld [vmem:[%s13568_s0 + $0x112] sm:$0xff] }
  0x1b   :  { %v6809_v60 = vpack.i.bf16 %v165_v57, %v164_v56  ;;  %v6819_v2 = vpack.i.bf16 %v169_v63, %v168_v62  ;;  %v172_v4 = vld [vmem:[%s13568_s0 + $0x13a] sm:$0xff]  ;;  %v173_v5 = vld [vmem:[%s13568_s0 + $0x142] sm:$0xff]  ;;  %v176_v10 = vld [vmem:[%s13568_s0 + $0x16a] sm:$0xff] }
  0x1c   :  { %6670 = vrot.lane.b32.xlu1 %v6669_v40, %s7903_s5  ;;  %v150_v40 = vld [vmem:[%s13568_s0 + $0x32] sm:$0xff]  ;;  %v6829_v8 = vpack.i.bf16 %v173_v5, %v172_v4  ;;  %v180_v16 = vld [vmem:[%s13568_s0 + $0x1ca] sm:$0xff]  ;;  %v184_v22 = vld [vmem:[%s13568_s0 + $0x1fa] sm:$0xff] }
  0x1d   :  { %6665 = vrot.lane.b32.xlu0 %v6664_v41, %s7903_s5  ;;  %v151_v41 = vld [vmem:[%s13568_s0 + $0x3a] sm:$0xff]  ;;  %v177_v11 = vld [vmem:[%s13568_s0 + $0x172] sm:$0xff]  ;;  %v185_v23 = vld [vmem:[%s13568_s0 + $0x202] sm:$0xff] }
  0x1e   :  { %v6774_v43 = vpack.i.bf16 %v151_v41, %v150_v40  ;;  %v6839_v14 = vpack.i.bf16 %v177_v11, %v176_v10  ;;  %v181_v17 = vld [vmem:[%s13568_s0 + $0x1d2] sm:$0xff]  ;;  %v6859_v26 = vpack.i.bf16 %v185_v23, %v184_v22  ;;  %v188_v28 = vld [vmem:[%s13568_s0 + $0x22a] sm:$0xff]  ;;  %v192_v34 = vld [vmem:[%s13568_s0 + $0x25a] sm:$0xff] }
  0x1f   :  { %v6849_v20 = vpack.i.bf16 %v181_v17, %v180_v16  ;;  %v189_v29 = vld [vmem:[%s13568_s0 + $0x232] sm:$0xff]  ;;  %v193_v35 = vld [vmem:[%s13568_s0 + $0x262] sm:$0xff]  ;;  %v196_v40 = vld [vmem:[%s13568_s0 + $0x28a] sm:$0xff] }
  0x20   :  { %6680 = vrot.lane.b32.xlu1 %v6679_v46, %s7903_s5  ;;  %v154_v46 = vld [vmem:[%s13568_s0 + $0x62] sm:$0xff]  ;;  %v6869_v32 = vpack.i.bf16 %v189_v29, %v188_v28  ;;  %v6879_v38 = vpack.i.bf16 %v193_v35, %v192_v34  ;;  %v197_v41 = vld [vmem:[%s13568_s0 + $0x292] sm:$0xff]  ;;  %v203_v56 = vld [vmem:[%s13568_s0 + $0x2da] sm:$0xff] }
  0x21   :  { %6675 = vrot.lane.b32.xlu0 %v6674_v47, %s7903_s5  ;;  %v155_v47 = vld [vmem:[%s13568_s0 + $0x6a] sm:$0xff]  ;;  %v6889_v44 = vpack.i.bf16 %v197_v41, %v196_v40  ;;  %v206_v63 = vld [vmem:[%s13568_s0 + $0x302] sm:$0xff]  ;;  %v31_v22 = vld [vmem:[%s13568_s0 + $0x98] sm:$0xff] }
  0x22   :  { %v6784_v49 = vpack.i.bf16 %v155_v47, %v154_v46  ;;  %v200_v46 = vld [vmem:[%s13568_s0 + $0x2ba] sm:$0xff]  ;;  %v201_v47 = vld [vmem:[%s13568_s0 + $0x2c2] sm:$0xff]  ;;  %v22_v5 = vld [vmem:[%s13568_s0 + $0x30] sm:$0xff] }
  0x23   :  { %v6899_v50 = vpack.i.bf16 %v201_v47, %v200_v46  ;;  %v24_v16 = vld [vmem:[%s13568_s0 + $0x48] sm:$0xff]  ;;  %v25_v17 = vld [vmem:[%s13568_s0 + $0x50] sm:$0xff]  ;;  %v8456_v29 = vld [vmem:[%s13568_s0 + $0xc0] sm:$0xff] }
  0x24   :  { %6690 = vrot.lane.b32.xlu1 %v6689_v52, %s7903_s5  ;;  %v158_v52 = vld [vmem:[%s13568_s0 + $0x92] sm:$0xff]  ;;  %v8497_v41 = vld [vmem:[%s13568_s0 + $0xe0] sm:$0xff]  ;;  %v8515_v46 = vld [vmem:[%s13568_s0 + $0x128] sm:$0xff] }
  0x25   :  { %6685 = vrot.lane.b32.xlu0 %v6684_v53, %s7903_s5  ;;  %v159_v53 = vld [vmem:[%s13568_s0 + $0x9a] sm:$0xff] }
  0x26   :  { %v6794_v55 = vpack.i.bf16 %v159_v53, %v158_v52  ;;  %v204_v52 = vld [vmem:[%s13568_s0 + $0x2ea] sm:$0xff]  ;;  %v205_v53 = vld [vmem:[%s13568_s0 + $0x2f2] sm:$0xff] }
  0x27   :  { %v8492_v40 = vld [vmem:[%s13568_s0 + $0xd8] sm:$0xff] }
  0x28   :  { %6700 = vrot.lane.b32.xlu1 %v6699_v58, %s7903_s5  ;;  %v162_v58 = vld [vmem:[%s13568_s0 + $0xc2] sm:$0xff] }
  0x29   :  { %6695 = vrot.lane.b32.xlu0 %v6694_v59, %s7903_s5  ;;  %v163_v59 = vld [vmem:[%s13568_s0 + $0xca] sm:$0xff] }
  0x2a   :  { %v6804_v61 = vpack.i.bf16 %v163_v59, %v162_v58  ;;  %v6909_v58 = vpack.i.bf16 %v205_v53, %v204_v52  ;;  %v8540_v53 = vld [vmem:[%s13568_s0 + $0x150] sm:$0xff] }
  0x2c   :  { %6710 = vrot.lane.b32.xlu1 %v6709_v0, %s7903_s5  ;;  %v166_v0 = vld [vmem:[%s13568_s0 + $0xf2] sm:$0xff] }
  0x2d   :  { %6705 = vrot.lane.b32.xlu0 %v6704_v1, %s7903_s5  ;;  %v167_v1 = vld [vmem:[%s13568_s0 + $0xfa] sm:$0xff] }
  0x2e   :  { %v6814_v3 = vpack.i.bf16 %v167_v1, %v166_v0  ;;  %v207_v0 = vld [vmem:[%s13568_s0 + $0x30a] sm:$0xff] }
  0x30   :  { %6720 = vrot.lane.b32.xlu1 %v6719_v6, %s7903_s5  ;;  %v170_v6 = vld [vmem:[%s13568_s0 + $0x122] sm:$0xff] }
  0x31   :  { %6715 = vrot.lane.b32.xlu0 %v6714_v7, %s7903_s5  ;;  %v171_v7 = vld [vmem:[%s13568_s0 + $0x12a] sm:$0xff] }
  0x32   :  { %v6824_v9 = vpack.i.bf16 %v171_v7, %v170_v6  ;;  %v23_v6 = vld [vmem:[%s13568_s0 + $0x38] sm:$0xff] }
  0x33   :  { %v8408_v10 = vpack.i.bf16 %v23_v6, %v22_v5  ;;  %v8578_v5 = vld [vmem:[%s13568_s0 + $0x168] sm:$0xff]  ;;  %v8583_v6 = vld [vmem:[%s13568_s0 + $0x170] sm:$0xff] }
  0x34   :  { %6730 = vrot.lane.b32.xlu1 %v6729_v12, %s7903_s5  ;;  %v174_v12 = vld [vmem:[%s13568_s0 + $0x152] sm:$0xff] }
  0x35   :  { %6725 = vrot.lane.b32.xlu0 %v6724_v13, %s7903_s5  ;;  %v175_v13 = vld [vmem:[%s13568_s0 + $0x15a] sm:$0xff] }
  0x36   :  { %v6834_v15 = vpack.i.bf16 %v175_v13, %v174_v12  ;;  %v26_v13 = vld [vmem:[%s13568_s0 + $0x60] sm:$0xff] }
  0x38   :  { %6740 = vrot.lane.b32.xlu1 %v6739_v18, %s7903_s5  ;;  %v178_v18 = vld [vmem:[%s13568_s0 + $0x1b2] sm:$0xff] }
  0x39   :  { %6735 = vrot.lane.b32.xlu0 %v6734_v19, %s7903_s5  ;;  %v179_v19 = vld [vmem:[%s13568_s0 + $0x1ba] sm:$0xff] }
  0x3a   :  { %v6844_v21 = vpack.i.bf16 %v179_v19, %v178_v18  ;;  %v8430_v19 = vpack.i.bf16 %v25_v17, %v24_v16  ;;  %v8606_v17 = vld [vmem:[%s13568_s0 + $0x1c8] sm:$0xff] }
  0x3c   :  { %6750 = vrot.lane.b32.xlu1 %v6749_v24, %s7903_s5  ;;  %v182_v24 = vld [vmem:[%s13568_s0 + $0x1e2] sm:$0xff]  ;;  %13827 = vst [vmem:[#allocation10_spill] sm:$0xff] %v8430_v19 }
  0x3d   :  { %6745 = vrot.lane.b32.xlu0 %v6744_v25, %s7903_s5  ;;  %v183_v25 = vld [vmem:[%s13568_s0 + $0x1ea] sm:$0xff] }
  0x3e   :  { %v6854_v27 = vpack.i.bf16 %v183_v25, %v182_v24  ;;  %v28_v24 = vld [vmem:[%s13568_s0 + $0x78] sm:$0xff]  ;;  %v29_v25 = vld [vmem:[%s13568_s0 + $0x80] sm:$0xff] }
  0x40   :  { %6760 = vrot.lane.b32.xlu1 %v6759_v30, %s7903_s5  ;;  %v186_v30 = vld [vmem:[%s13568_s0 + $0x212] sm:$0xff] }
  0x41   :  { %6755 = vrot.lane.b32.xlu0 %v6754_v31, %s7903_s5  ;;  %v187_v31 = vld [vmem:[%s13568_s0 + $0x21a] sm:$0xff] }
  0x42   :  { %v6864_v33 = vpack.i.bf16 %v187_v31, %v186_v30  ;;  %v8461_v30 = vld [vmem:[%s13568_s0 + $0xc8] sm:$0xff] }
  0x43   :  { %v6959_v34 = vpack.i.bf16 %v8461_v30, %v8456_v29 }
  0x44   :  { %6770 = vrot.lane.b32.xlu1 %v6769_v36, %s7904_s9  ;;  %v190_v36 = vld [vmem:[%s13568_s0 + $0x242] sm:$0xff] }
  0x45   :  { %6765 = vrot.lane.b32.xlu0 %v6764_v37, %s7904_s9  ;;  %v191_v37 = vld [vmem:[%s13568_s0 + $0x24a] sm:$0xff] }
  0x46   :  { %v6874_v39 = vpack.i.bf16 %v191_v37, %v190_v36  ;;  %v8480_v37 = vld [vmem:[%s13568_s0 + $0xf0] sm:$0xff] }
  0x48   :  { %6780 = vrot.lane.b32.xlu1 %v6779_v42, %s7904_s9  ;;  %v194_v42 = vld [vmem:[%s13568_s0 + $0x272] sm:$0xff] }
  0x49   :  { %6775 = vrot.lane.b32.xlu0 %v6774_v43, %s7904_s9  ;;  %v195_v43 = vld [vmem:[%s13568_s0 + $0x27a] sm:$0xff] }
  0x4a   :  { %v6884_v45 = vpack.i.bf16 %v195_v43, %v194_v42  ;;  %v6964_v43 = vpack.i.bf16 %v8497_v41, %v8492_v40 }
  0x4c   :  { %6790 = vrot.lane.b32.xlu1 %v6789_v48, %s7904_s9  ;;  %v198_v48 = vld [vmem:[%s13568_s0 + $0x2a2] sm:$0xff] }
  0x4d   :  { %6785 = vrot.lane.b32.xlu0 %v6784_v49, %s7904_s9  ;;  %v199_v49 = vld [vmem:[%s13568_s0 + $0x2aa] sm:$0xff] }
  0x4e   :  { %v6894_v51 = vpack.i.bf16 %v199_v49, %v198_v48  ;;  %v8522_v48 = vld [vmem:[%s13568_s0 + $0x108] sm:$0xff]  ;;  %v8527_v49 = vld [vmem:[%s13568_s0 + $0x110] sm:$0xff] }
  0x50   :  { %6800 = vrot.lane.b32.xlu1 %v6799_v54, %s7904_s9 }
  0x51   :  { %6795 = vrot.lane.b32.xlu0 %v6794_v55, %s7904_s9  ;;  %v202_v55 = vld [vmem:[%s13568_s0 + $0x2d2] sm:$0xff] }
  0x52   :  { %v6904_v59 = vpack.i.bf16 %v203_v56, %v202_v55  ;;  %v8545_v55 = vld [vmem:[%s13568_s0 + $0x158] sm:$0xff] }
  0x54   :  { %6810 = vrot.lane.b32.xlu1 %v6809_v60, %s7904_s9  ;;  %v208_v60 = vld [vmem:[%s13568_s0 + $0x31a] sm:$0xff] }
  0x55   :  { %6805 = vrot.lane.b32.xlu0 %v6804_v61, %s7904_s9  ;;  %v209_v61 = vld [vmem:[%s13568_s0 + $0x322] sm:$0xff] }
  0x58   :  { %6820 = vrot.lane.b32.xlu1 %v6819_v2, %s7904_s9  ;;  %v6919_v2 = vpack.i.bf16 %v209_v61, %v208_v60  ;;  %v6989_v60 = vpack.i.bf16 %v8545_v55, %v8540_v53 }
  0x59   :  { %6815 = vrot.lane.b32.xlu0 %v6814_v3, %s7904_s9  ;;  %v6914_v3 = vpack.i.bf16 %v207_v0, %v206_v63  ;;  %v6092_v63 = vld [vmem:[%s13568_s0 + $0x180] sm:$0xff]  ;;  %v6093_v0 = vld [vmem:[%s13568_s0 + $0x188] sm:$0xff] }
  0x5c   :  { %6830 = vrot.lane.b32.xlu1 %v6829_v8, %s7904_s9  ;;  %v20_v8 = vld [vmem:[%s13568_s0 + $0x18] sm:$0xff] }
  0x5d   :  { %6825 = vrot.lane.b32.xlu0 %v6824_v9, %s7904_s9  ;;  %v21_v9 = vld [vmem:[%s13568_s0 + $0x20] sm:$0xff] }
  0x5e   :  { %v6924_v11 = vpack.i.bf16 %v21_v9, %v20_v8  ;;  %v6999_v8 = vpack.i.bf16 %v6093_v0, %v6092_v63  ;;  %v6994_v9 = vpack.i.bf16 %v8583_v6, %v8578_v5 }
  0x60   :  { %6840 = vrot.lane.b32.xlu1 %v6839_v14, %s7904_s9  ;;  %v27_v14 = vld [vmem:[%s13568_s0 + $0x68] sm:$0xff] }
  0x61   :  { %6835 = vrot.lane.b32.xlu0 %v6834_v15, %s7904_s9  ;;  %v6939_v18 = vpack.i.bf16 %v27_v14, %v26_v13  ;;  %v8594_v13 = vld [vmem:[%s13568_s0 + $0x1e0] sm:$0xff]  ;;  %v8599_v14 = vld [vmem:[%s13568_s0 + $0x1e8] sm:$0xff] }
  0x62   :  { %13830 = vst [vmem:[#allocation13_spill] sm:$0xff] %v8594_v13  ;;  %13831 = vst [vmem:[#allocation14_spill] sm:$0xff] %v8599_v14 }
  0x64   :  { %6850 = vrot.lane.b32.xlu1 %v6849_v20, %s7904_s9 }
  0x65   :  { %6845 = vrot.lane.b32.xlu0 %v6844_v21, %s7904_s9  ;;  %v30_v21 = vld [vmem:[%s13568_s0 + $0x90] sm:$0xff] }
  0x68   :  { %6860 = vrot.lane.b32.xlu1 %v6859_v26, %s7904_s9  ;;  %v6949_v26 = vpack.i.bf16 %v31_v22, %v30_v21  ;;  %v7009_v21 = vpack.i.bf16 %v8599_v14, %v8594_v13  ;;  %v6197_v14 = vld [vmem:[%s13568_s0 + $0x6a] sm:$0xff] }
  0x69   :  { %6855 = vrot.lane.b32.xlu0 %v6854_v27, %s7904_s9  ;;  %v6944_v27 = vpack.i.bf16 %v29_v25, %v28_v24  ;;  %v8624_v25 = vld [vmem:[%s13568_s0 + $0x210] sm:$0xff] }
  0x6a   :  { %13834 = vst [vmem:[#allocation17_spill] sm:$0xff] %v8624_v25 }
  0x6c   :  { %6870 = vrot.lane.b32.xlu1 %v6869_v32, %s7904_s9  ;;  %v32_v32 = vld [vmem:[%s13568_s0 + $0xa8] sm:$0xff] }
  0x6d   :  { %6865 = vrot.lane.b32.xlu0 %v6864_v33, %s7904_s9  ;;  %v33_v33 = vld [vmem:[%s13568_s0 + $0xb0] sm:$0xff] }
  0x6e   :  { %v6954_v35 = vpack.i.bf16 %v33_v33, %v32_v32  ;;  %v8636_v32 = vld [vmem:[%s13568_s0 + $0x1f8] sm:$0xff]  ;;  %v8641_v33 = vld [vmem:[%s13568_s0 + $0x200] sm:$0xff] }
  0x6f   :  { %13837 = vst [vmem:[#allocation20_spill] sm:$0xff] %v8636_v32  ;;  %13838 = vst [vmem:[#allocation21_spill] sm:$0xff] %v8641_v33 }
  0x70   :  { %6880 = vrot.lane.b32.xlu1 %v6879_v38, %s7904_s9  ;;  %v8485_v38 = vld [vmem:[%s13568_s0 + $0xf8] sm:$0xff] }
  0x71   :  { %6875 = vrot.lane.b32.xlu0 %v6874_v39, %s7904_s9  ;;  %v6969_v42 = vpack.i.bf16 %v8485_v38, %v8480_v37 }
  0x74   :  { %6890 = vrot.lane.b32.xlu1 %v6889_v44, %s7904_s9 }
  0x75   :  { %6885 = vrot.lane.b32.xlu0 %v6884_v45, %s7904_s9  ;;  %v8510_v45 = vld [vmem:[%s13568_s0 + $0x120] sm:$0xff] }
  0x76   :  { %v8361_v54 = vpop.permute.xlu1 %6615 }
  0x77   :  { %13819 = vst [vmem:[#allocation2_spill] sm:$0xff] %v8361_v54  ;;  %v8369_v57 = vpop.permute.xlu0 %6605 }
  0x78   :  { %13820 = vst [vmem:[#allocation3_spill] sm:$0xff] %v8369_v57  ;;  %6900 = vrot.lane.b32.xlu1 %v6899_v50, %s7904_s9  ;;  %v6979_v50 = vpack.i.bf16 %v8515_v46, %v8510_v45 }
  0x79   :  { %6895 = vrot.lane.b32.xlu0 %v6894_v51, %s7904_s9  ;;  %v6974_v51 = vpack.i.bf16 %v8527_v49, %v8522_v48 }
  0x7a   :  { %v8379_v62 = vpop.permute.xlu1 %6620 }
  0x7b   :  { %13821 = vst [vmem:[#allocation4_spill] sm:$0xff] %v8379_v62  ;;  %v8387_v1 = vpop.permute.xlu0 %6610  ;;  %v8731_v62 = vld [vmem:[%s13568_s0 + $0x290] sm:$0xff] }
  0x7c   :  { %13822 = vst [vmem:[#allocation5_spill] sm:$0xff] %v8387_v1  ;;  %6910 = vrot.lane.b32.xlu1 %v6909_v58, %s7904_s9  ;;  %v8552_v58 = vld [vmem:[%s13568_s0 + $0x138] sm:$0xff]  ;;  %v8719_v1 = vld [vmem:[%s13568_s0 + $0x2a8] sm:$0xff]  ;;  %13856 = vst [vmem:[#allocation39_spill] sm:$0xff] %v8731_v62 }
  0x7d   :  { %6905 = vrot.lane.b32.xlu0 %v6904_v59, %s7904_s9  ;;  %v8557_v59 = vld [vmem:[%s13568_s0 + $0x140] sm:$0xff]  ;;  %13853 = vst [vmem:[#allocation36_spill] sm:$0xff] %v8719_v1 }
  0x7e   :  { %v8391_v4 = vpop.permute.xlu1 %6630  ;;  %v6984_v61 = vpack.i.bf16 %v8557_v59, %v8552_v58 }
  0x7f   :  { %13823 = vst [vmem:[#allocation6_spill] sm:$0xff] %v8391_v4  ;;  %v8399_v7 = vpop.permute.xlu0 %6625  ;;  %v8714_v4 = vld [vmem:[%s13568_s0 + $0x2a0] sm:$0xff] }
  0x80   :  { %13824 = vst [vmem:[#allocation7_spill] sm:$0xff] %v8399_v7  ;;  %6920 = vrot.lane.b32.xlu1 %v6919_v2, %s7904_s9  ;;  %13852 = vst [vmem:[#allocation35_spill] sm:$0xff] %v8714_v4  ;;  %v7049_v57 = vpack.i.bf16 %v8719_v1, %v8714_v4 }
  0x81   :  { %6915 = vrot.lane.b32.xlu0 %v6914_v3, %s7904_s9  ;;  %s7905_s9 = smov 12  }
  0x82   :  { %v8411_v12 = vpop.permute.xlu1 %6640 }
  0x83   :  { %13825 = vst [vmem:[#allocation8_spill] sm:$0xff] %v8411_v12  ;;  %v8419_v15 = vpop.permute.xlu0 %6635 }
  0x84   :  { %13826 = vst [vmem:[#allocation9_spill] sm:$0xff] %v8419_v15  ;;  %6930 = vrot.lane.b32.xlu1 %v8408_v10, %s7905_s9 }
  0x85   :  { %6925 = vrot.lane.b32.xlu0 %v6924_v11, %s7905_s9 }
  0x86   :  { %v8432_v20 = vpop.permute.xlu1 %6650 }
  0x87   :  { %v8440_v23 = vpop.permute.xlu0 %6645 }
  0x88   :  { %6940 = vrot.lane.b32.xlu1 %v6939_v18, %s7905_s9  ;;  %v8611_v18 = vld [vmem:[%s13568_s0 + $0x1d0] sm:$0xff] }
  0x89   :  { %6935 = vrot.lane.b32.xlu0 %v8430_v19, %s7905_s9  ;;  %v7004_v22 = vpack.i.bf16 %v8611_v18, %v8606_v17 }
  0x8a   :  { %v8451_v28 = vpop.permute.xlu1 %6660 }
  0x8b   :  { %v8463_v31 = vpop.permute.xlu0 %6655  ;;  %v6662_v19 = vunpack.i.l.bf16 %v8451_v28 }
  0x8c   :  { %6950 = vrot.lane.b32.xlu1 %v6949_v26, %s7905_s9  ;;  %v8629_v26 = vld [vmem:[%s13568_s0 + $0x218] sm:$0xff] }
  0x8d   :  { %6945 = vrot.lane.b32.xlu0 %v6944_v27, %s7905_s9  ;;  %13835 = vst [vmem:[#allocation18_spill] sm:$0xff] %v8629_v26 }
  0x8e   :  { %v8475_v36 = vpop.permute.xlu1 %6670 }
  0x8f   :  { %v8487_v39 = vpop.permute.xlu0 %6665 }
  0x90   :  { %6960 = vrot.lane.b32.xlu1 %v6959_v34, %s7905_s9  ;;  %v7019_v34 = vpack.i.bf16 %v8629_v26, %v8624_v25  ;;  %v6195_v26 = vld [vmem:[%s13568_s0 + $0x52] sm:$0xff]  ;;  %v8894_v25 = vld [vmem:[%s13568_s0 + $0x60] sm:$0xff] }
  0x91   :  { %6955 = vrot.lane.b32.xlu0 %v6954_v35, %s7905_s9  ;;  %v7014_v35 = vpack.i.bf16 %v8641_v33, %v8636_v32  ;;  %v8925_v32 = vld [vmem:[%s13568_s0 + $0x80] sm:$0xff] }
  0x92   :  { %v8505_v44 = vpop.permute.xlu1 %6680 }
  0x93   :  { %v8517_v47 = vpop.permute.xlu0 %6675 }
  0x94   :  { %6970 = vrot.lane.b32.xlu1 %v6969_v42, %s7905_s9 }
  0x95   :  { %6965 = vrot.lane.b32.xlu0 %v6964_v43, %s7905_s9  ;;  %v8654_v43 = vld [vmem:[%s13568_s0 + $0x240] sm:$0xff] }
  0x96   :  { %v8535_v52 = vpop.permute.xlu1 %6690  ;;  %13840 = vst [vmem:[#allocation23_spill] sm:$0xff] %v8654_v43 }
  0x97   :  { %v8547_v56 = vpop.permute.xlu0 %6685 }
  0x98   :  { %6980 = vrot.lane.b32.xlu1 %v6979_v50, %s7905_s9  ;;  %v8659_v50 = vld [vmem:[%s13568_s0 + $0x248] sm:$0xff] }
  0x99   :  { %6975 = vrot.lane.b32.xlu0 %v6974_v51, %s7905_s9  ;;  %13841 = vst [vmem:[#allocation24_spill] sm:$0xff] %v8659_v50  ;;  %v7029_v63 = vpack.i.bf16 %v8659_v50, %v8654_v43  ;;  %v6134_v43 = vld [vmem:[%s13568_s0 + $0x79] sm:$0xff] }
  0x9a   :  { %v8571_v2 = vpop.permute.xlu1 %6700 }
  0x9b   :  { %v8573_v3 = vpop.permute.xlu0 %6695 }
  0x9c   :  { %13828 = vst [vmem:[#allocation11_spill] sm:$0xff] %v8573_v3  ;;  %6990 = vrot.lane.b32.xlu1 %v6989_v60, %s7905_s9  ;;  %v8666_v60 = vld [vmem:[%s13568_s0 + $0x228] sm:$0xff] }
  0x9d   :  { %6985 = vrot.lane.b32.xlu0 %v6984_v61, %s7905_s9  ;;  %13843 = vst [vmem:[#allocation26_spill] sm:$0xff] %v8666_v60  ;;  %v8671_v61 = vld [vmem:[%s13568_s0 + $0x230] sm:$0xff] }
  0x9e   :  { %v8589_v11 = vpop.permute.xlu1 %6710  ;;  %13844 = vst [vmem:[#allocation27_spill] sm:$0xff] %v8671_v61  ;;  %v7024_v0 = vpack.i.bf16 %v8671_v61, %v8666_v60  ;;  %v6196_v60 = vld [vmem:[%s13568_s0 + $0x62] sm:$0xff] }
  0x9f   :  { %13829 = vst [vmem:[#allocation12_spill] sm:$0xff] %v8589_v11  ;;  %v8601_v16 = vpop.permute.xlu0 %6705  ;;  %v6201_v11 = vld [vmem:[%s13568_s0 + $0x9a] sm:$0xff] }
  0xa0   :  { %13832 = vst [vmem:[#allocation15_spill] sm:$0xff] %v8601_v16  ;;  %7000 = vrot.lane.b32.xlu1 %v6999_v8, %s7905_s9  ;;  %v6200_v16 = vld [vmem:[%s13568_s0 + $0x92] sm:$0xff] }
  0xa1   :  { %6995 = vrot.lane.b32.xlu0 %v6994_v9, %s7905_s9  ;;  %v8684_v9 = vld [vmem:[%s13568_s0 + $0x270] sm:$0xff] }
  0xa2   :  { %v8619_v24 = vpop.permute.xlu1 %6720  ;;  %13846 = vst [vmem:[#allocation29_spill] sm:$0xff] %v8684_v9 }
  0xa3   :  { %13833 = vst [vmem:[#allocation16_spill] sm:$0xff] %v8619_v24  ;;  %v8631_v27 = vpop.permute.xlu0 %6715 }
  0xa4   :  { %13836 = vst [vmem:[#allocation19_spill] sm:$0xff] %v8631_v27  ;;  %7010 = vrot.lane.b32.xlu1 %v7009_v21, %s7905_s9  ;;  %v8689_v21 = vld [vmem:[%s13568_s0 + $0x278] sm:$0xff] }
  0xa5   :  { %7005 = vrot.lane.b32.xlu0 %v7004_v22, %s7905_s9  ;;  %13847 = vst [vmem:[#allocation30_spill] sm:$0xff] %v8689_v21  ;;  %v7039_v15 = vpack.i.bf16 %v8689_v21, %v8684_v9  ;;  %v8779_v21 = vld [vmem:[%s13568_s0 + $0x308] sm:$0xff]  ;;  %v6193_v27 = vld [vmem:[%s13568_s0 + $0x3a] sm:$0xff] }
  0xa6   :  { %v8649_v42 = vpop.permute.xlu1 %6730  ;;  %13865 = vst [vmem:[#allocation48_spill] sm:$0xff] %v8779_v21  ;;  %v6127_v9 = vld [vmem:[%s13568_s0 + $0x21] sm:$0xff] }
  0xa7   :  { %13839 = vst [vmem:[#allocation22_spill] sm:$0xff] %v8649_v42  ;;  %v8661_v51 = vpop.permute.xlu0 %6725  ;;  %v6192_v42 = vld [vmem:[%s13568_s0 + $0x32] sm:$0xff] }
  0xa8   :  { %13842 = vst [vmem:[#allocation25_spill] sm:$0xff] %v8661_v51  ;;  %7020 = vrot.lane.b32.xlu1 %v7019_v34, %s7905_s9  ;;  %v8696_v34 = vld [vmem:[%s13568_s0 + $0x258] sm:$0xff] }
  0xa9   :  { %7015 = vrot.lane.b32.xlu0 %v7014_v35, %s7905_s9  ;;  %13849 = vst [vmem:[#allocation32_spill] sm:$0xff] %v8696_v34  ;;  %v8701_v35 = vld [vmem:[%s13568_s0 + $0x260] sm:$0xff] }
  0xaa   :  { %v8679_v8 = vpop.permute.xlu1 %6740  ;;  %13850 = vst [vmem:[#allocation33_spill] sm:$0xff] %v8701_v35  ;;  %v7034_v12 = vpack.i.bf16 %v8701_v35, %v8696_v34  ;;  %v6135_v35 = vld [vmem:[%s13568_s0 + $0x81] sm:$0xff] }
  0xab   :  { %13845 = vst [vmem:[#allocation28_spill] sm:$0xff] %v8679_v8  ;;  %v8691_v22 = vpop.permute.xlu0 %6735  ;;  %v8774_v8 = vld [vmem:[%s13568_s0 + $0x300] sm:$0xff] }
  0xac   :  { %13848 = vst [vmem:[#allocation31_spill] sm:$0xff] %v8691_v22  ;;  %7030 = vrot.lane.b32.xlu1 %v7029_v63, %s7905_s9  ;;  %v8749_v22 = vld [vmem:[%s13568_s0 + $0x2d8] sm:$0xff]  ;;  %13864 = vst [vmem:[#allocation47_spill] sm:$0xff] %v8774_v8 }
  0xad   :  { %7025 = vrot.lane.b32.xlu0 %v7024_v0, %s7905_s9  ;;  %v8726_v0 = vld [vmem:[%s13568_s0 + $0x288] sm:$0xff]  ;;  %13859 = vst [vmem:[#allocation42_spill] sm:$0xff] %v8749_v22  ;;  %v8862_v34 = vld [vmem:[%s13568_s0 + $0x1a] sm:$0xff] }
  0xae   :  { %v8709_v7 = vpop.permute.xlu1 %6750  ;;  %13855 = vst [vmem:[#allocation38_spill] sm:$0xff] %v8726_v0  ;;  %v7044_v54 = vpack.i.bf16 %v8731_v62, %v8726_v0  ;;  %v6133_v62 = vld [vmem:[%s13568_s0 + $0x69] sm:$0xff]  ;;  %v6137_v0 = vld [vmem:[%s13568_s0 + $0x99] sm:$0xff] }
  0xaf   :  { %13851 = vst [vmem:[#allocation34_spill] sm:$0xff] %v8709_v7  ;;  %v8721_v63 = vpop.permute.xlu0 %6745  ;;  %v8744_v7 = vld [vmem:[%s13568_s0 + $0x2d0] sm:$0xff] }
  0xb0   :  { %13854 = vst [vmem:[#allocation37_spill] sm:$0xff] %v8721_v63  ;;  %7040 = vrot.lane.b32.xlu1 %v7039_v15, %s7905_s9  ;;  %13858 = vst [vmem:[#allocation41_spill] sm:$0xff] %v8744_v7  ;;  %v7059_v1 = vpack.i.bf16 %v8749_v22, %v8744_v7  ;;  %v7069_v22 = vpack.i.bf16 %v8779_v21, %v8774_v8  ;;  %v6124_v7 = vld [vmem:[%s13568_s0 + $0x330] sm:$0xff] }
  0xb1   :  { %7035 = vrot.lane.b32.xlu0 %v7034_v12, %s7905_s9  ;;  %v8756_v12 = vld [vmem:[%s13568_s0 + $0x2b8] sm:$0xff] }
  0xb2   :  { %v8739_v63 = vpop.permute.xlu1 %6760  ;;  %13861 = vst [vmem:[#allocation44_spill] sm:$0xff] %v8756_v12  ;;  %v6128_v8 = vld [vmem:[%s13568_s0 + $0x31] sm:$0xff] }
  0xb3   :  { %13857 = vst [vmem:[#allocation40_spill] sm:$0xff] %v8739_v63  ;;  %v8751_v15 = vpop.permute.xlu0 %6755  ;;  %v8761_v63 = vld [vmem:[%s13568_s0 + $0x2c0] sm:$0xff] }
  0xb4   :  { %13860 = vst [vmem:[#allocation43_spill] sm:$0xff] %v8751_v15  ;;  %13862 = vst [vmem:[#allocation45_spill] sm:$0xff] %v8761_v63  ;;  %7050 = vrot.lane.b32.xlu1 %v7049_v57, %s7905_s9  ;;  %v7054_v15 = vpack.i.bf16 %v8761_v63, %v8756_v12  ;;  %v6125_v63 = vld [vmem:[%s13568_s0 + $0x338] sm:$0xff] }
  0xb5   :  { %7045 = vrot.lane.b32.xlu0 %v7044_v54, %s7905_s9  ;;  %v8786_v54 = vld [vmem:[%s13568_s0 + $0x2e8] sm:$0xff] }
  0xb6   :  { %v8769_v4 = vpop.permute.xlu1 %6770  ;;  %13867 = vst [vmem:[#allocation50_spill] sm:$0xff] %v8786_v54 }
  0xb7   :  { %13863 = vst [vmem:[#allocation46_spill] sm:$0xff] %v8769_v4  ;;  %v8781_v57 = vpop.permute.xlu0 %6765  ;;  %v8791_v4 = vld [vmem:[%s13568_s0 + $0x2f0] sm:$0xff] }
  0xb8   :  { %13866 = vst [vmem:[#allocation49_spill] sm:$0xff] %v8781_v57  ;;  %13868 = vst [vmem:[#allocation51_spill] sm:$0xff] %v8791_v4  ;;  %7060 = vrot.lane.b32.xlu1 %v7059_v1, %s7905_s9  ;;  %v7064_v57 = vpack.i.bf16 %v8791_v4, %v8786_v54  ;;  %v8808_v1 = vld [vmem:[%s13568_s0 + $0x318] sm:$0xff]  ;;  %v7079_v54 = vpack.i.bf16 %v6125_v63, %v6124_v7  ;;  %v6130_v7 = vld [vmem:[%s13568_s0 + $0x49] sm:$0xff] }
  0xb9   :  { %7055 = vrot.lane.b32.xlu0 %v7054_v15, %s7905_s9  ;;  %13869 = vst [vmem:[#allocation52_spill] sm:$0xff] %v8808_v1  ;;  %v8815_v15 = vld [vmem:[%s13568_s0 + $0x320] sm:$0xff]  ;;  %v6136_v63 = vld [vmem:[%s13568_s0 + $0x91] sm:$0xff] }
  0xba   :  { %v8810_v12 = vpop.permute.xlu1 %6780  ;;  %13871 = vst [vmem:[#allocation54_spill] sm:$0xff] %v8815_v15  ;;  %v6129_v4 = vld [vmem:[%s13568_s0 + $0x39] sm:$0xff]  ;;  %v7074_v50 = vpack.i.bf16 %v8815_v15, %v8808_v1  ;;  %v6138_v15 = vld [vmem:[%s13568_s0 + $0xa9] sm:$0xff]  ;;  %v6139_v1 = vld [vmem:[%s13568_s0 + $0xb1] sm:$0xff] }
  0xbb   :  { %13870 = vst [vmem:[#allocation53_spill] sm:$0xff] %v8810_v12  ;;  %v8817_v21 = vpop.permute.xlu0 %6775  ;;  %v6126_v12 = vld [vmem:[%s13568_s0 + $0x19] sm:$0xff]  ;;  %v8897_v61 = vpack.i.bf16 %v6129_v4, %v6128_v8  ;;  %v8915_v8 = vpack.i.bf16 %v6137_v0, %v6136_v63  ;;  %v8934_v0 = vpack.i.bf16 %v6135_v35, %v6134_v43  ;;  %v6648_v43 = vunpack.i.h.bf16 %v8440_v23 }
  0xbc   :  { %13872 = vst [vmem:[#allocation55_spill] sm:$0xff] %v8817_v21  ;;  %7070 = vrot.lane.b32.xlu1 %v7069_v22, %s7905_s9  ;;  %v6132_v21 = vld [vmem:[%s13568_s0 + $0x61] sm:$0xff]  ;;  %v6131_v22 = vld [vmem:[%s13568_s0 + $0x51] sm:$0xff]  ;;  %v7084_v13 = vpack.i.bf16 %v6127_v9, %v6126_v12  ;;  %v6652_v9 = vunpack.i.l.bf16 %v8432_v20  ;;  %v6647_v35 = vunpack.i.l.bf16 %v8440_v23  ;;  %v8955_v12 = vpack.i.bf16 %v6139_v1, %v6138_v15 }
  0xbd   :  { %7065 = vrot.lane.b32.xlu0 %v7064_v57, %s7905_s9  ;;  %v8867_v57 = vld [vmem:[%s13568_s0 + $0x22] sm:$0xff]  ;;  %v8911_v33 = vpack.i.bf16 %v6133_v62, %v6132_v21  ;;  %v8913_v4 = vpack.i.bf16 %v6131_v22, %v6130_v7  ;;  %v6653_v62 = vunpack.i.h.bf16 %v8432_v20  ;;  %v8944_v22 = vld [vmem:[%s13568_s0 + $0x90] sm:$0xff]  ;;  %v8949_v20 = vld [vmem:[%s13568_s0 + $0x98] sm:$0xff]  ;;  %v6663_v1 = vunpack.i.h.bf16 %v8451_v28 }
  0xbe   :  { %v8869_v51 = vpop.permute.xlu1 %6790  ;;  %v6199_v7 = vld [vmem:[%s13568_s0 + $0x82] sm:$0xff]  ;;  %v8987_v28 = vpack.i.bf16 %v6201_v11, %v6200_v16 }
  0xbf   :  { %13873 = vst [vmem:[#allocation56_spill] sm:$0xff] %v8869_v51  ;;  %v8883_v24 = vpop.permute.xlu0 %6785  ;;  %v6194_v51 = vld [vmem:[%s13568_s0 + $0x4a] sm:$0xff]  ;;  %v2668_v11 = vsel %vm2644_vm0, %v8527_v49, %v6663_v1 }
  0xc0   :  { %13874 = vst [vmem:[#allocation57_spill] sm:$0xff] %v8883_v24  ;;  %7080 = vrot.lane.b32.xlu1 %v7079_v54, %s7905_s9  ;;  %v8902_v24 = vld [vmem:[%s13568_s0 + $0x68] sm:$0xff]  ;;  %v8920_v54 = vld [vmem:[%s13568_s0 + $0x78] sm:$0xff]  ;;  %v8968_v23 = vpack.i.bf16 %v6195_v26, %v6194_v51  ;;  %v2663_v26 = vsel %vm2644_vm0, %v8492_v40, %v6652_v9  ;;  %v2664_v51 = vsel %vm2644_vm0, %v8497_v41, %v6653_v62  ;;  %v6658_v9 = vunpack.i.h.bf16 %v8463_v31 }
  0xc1   :  { %7075 = vrot.lane.b32.xlu0 %v7074_v50, %s7905_s9  ;;  %v6198_v50 = vld [vmem:[%s13568_s0 + $0x7a] sm:$0xff]  ;;  %v2667_v40 = vsel %vm2644_vm0, %v8522_v48, %v6662_v19 }
  0xc2   :  { %v8932_v21 = vpop.permute.xlu1 %6800 }
  0xc3   :  { %13875 = vst [vmem:[#allocation58_spill] sm:$0xff] %v8932_v21  ;;  %v8953_v63 = vpop.permute.xlu0 %6795  ;;  %v8957_v21 = vpack.i.bf16 %v6193_v27, %v6192_v42  ;;  %v7169_v27 = vpack.i.bf16 %v8902_v24, %v8894_v25  ;;  %v8972_v42 = vpack.i.bf16 %v6197_v14, %v6196_v60  ;;  %v6657_v14 = vunpack.i.l.bf16 %v8463_v31  ;;  %v13899_v24 = vld [vmem:[#allocation39_spill] sm:$0xff] }
  0xc4   :  { %13876 = vst [vmem:[#allocation59_spill] sm:$0xff] %v8953_v63  ;;  %7090 = vrot.lane.b32.xlu1 %v8897_v61, %s7906_s12  ;;  %v8978_v63 = vpack.i.bf16 %v6199_v7, %v6198_v50  ;;  %v2662_v50 = vsel %vm2644_vm0, %v8461_v30, %v6648_v43  ;;  %v6673_v31 = vunpack.i.h.bf16 %v8475_v36  ;;  %v6668_v43 = vunpack.i.h.bf16 %v8487_v39 }
  0xc5   :  { %7085 = vrot.lane.b32.xlu0 %v7084_v13, %s7906_s12  ;;  %v2661_v13 = vsel %vm2644_vm0, %v8456_v29, %v6647_v35  ;;  %v6672_v29 = vunpack.i.l.bf16 %v8475_v36  ;;  %v2665_v19 = vsel %vm2644_vm0, %v8480_v37, %v6657_v14  ;;  %v6667_v35 = vunpack.i.l.bf16 %v8487_v39  ;;  %v7884_v37 = vld [vmem:[%s13569_s1] sm:$0xff]  }
  0xc6   :  { %v6811_v60 = vpop.permute.xlu1 %6810  ;;  %v2666_v36 = vsel %vm2644_vm0, %v8485_v38, %v6658_v9  ;;  %6517 = vmatprep.subr.bf16.mxu0 %v7884_v37  ;;  %v2672_v38 = vsel %vm2644_vm0, %v8557_v59, %v6673_v31  ;;  %v6677_v9 = vunpack.i.l.bf16 %v8517_v47  ;;  %6587 = vmatprep.subr.bf16.mxu1 %v7884_v37 }
  0xc7   :  { %v6813_v7 = vunpack.i.h.bf16 %v6811_v60  ;;  %v6812_v15 = vunpack.i.l.bf16 %v6811_v60  ;;  %v6806_v3 = vpop.permute.xlu0 %6805  ;;  %v2671_v39 = vsel %vm2644_vm0, %v8552_v58, %v6672_v29  ;;  %6518 = vmatpush3.bf16.msra.mxu0 %v7884_v37  ;;  %6590 = vmatpush3.bf16.msra.mxu1 %v7884_v37  ;;  %v6688_v37 = vunpack.i.h.bf16 %v8547_v56 }
  0xc8   :  { %v6808_v41 = vunpack.i.h.bf16 %v6806_v3  ;;  %v6807_v62 = vunpack.i.l.bf16 %v6806_v3  ;;  %7100 = vrot.lane.b32.xlu1 %v8911_v33, %s7906_s12 }
  0xc9   :  { %v9002_v30 = vsel %vm2709_vm1, %v2663_v26, %v6812_v15  ;;  %v9005_v16 = vsel %vm2709_vm1, %v2664_v51, %v6813_v7  ;;  %7095 = vrot.lane.b32.xlu0 %v8913_v4, %s7906_s12  ;;  %v6682_v51 = vunpack.i.l.bf16 %v8505_v44 }
  0xca   :  { %v9013_v48 = vsel %vm2709_vm1, %v2661_v13, %v6807_v62  ;;  %v9016_v49 = vsel %vm2709_vm1, %v2662_v50, %v6808_v41  ;;  %v6821_v3 = vpop.permute.xlu1 %6820  ;;  %v6683_v13 = vunpack.i.h.bf16 %v8505_v44  ;;  %v2670_v62 = vsel %vm2644_vm0, %v8515_v46, %v6668_v43 }
  0xcb   :  { %v6823_v1 = vunpack.i.h.bf16 %v6821_v3  ;;  %v6822_v15 = vunpack.i.l.bf16 %v6821_v3  ;;  %v6816_v26 = vpop.permute.xlu0 %6815  ;;  %v2675_v31 = vsel %vm2644_vm0, %v8578_v5, %v6682_v51  ;;  %v6678_v3 = vunpack.i.h.bf16 %v8517_v47 }
  0xcc   :  { %v6818_v14 = vunpack.i.h.bf16 %v6816_v26  ;;  %v6817_v60 = vunpack.i.l.bf16 %v6816_v26  ;;  %7110 = vrot.lane.b32.xlu1 %v8915_v8, %s7906_s12  ;;  %v2676_v46 = vsel %vm2644_vm0, %v8583_v6, %v6683_v13  ;;  %v6692_v43 = vunpack.i.l.bf16 %v8535_v52  ;;  %v51_v13 = vld [vmem:[%s13568_s0 + $0x1b8] sm:$0xff] }
  0xcd   :  { %v9032_v50 = vsel %vm2709_vm1, %v2667_v40, %v6822_v15  ;;  %v9035_v7 = vsel %vm2709_vm1, %v2668_v11, %v6823_v1  ;;  %7105 = vrot.lane.b32.xlu0 %v8934_v0, %s7906_s12  ;;  %v2669_v40 = vsel %vm2644_vm0, %v8510_v45, %v6667_v35  ;;  %v13877_v45 = vpack.i.bf16 %v8867_v57, %v8862_v34 }
  0xce   :  { %v9043_v41 = vsel %vm2709_vm1, %v2665_v19, %v6817_v60  ;;  %v9046_v44 = vsel %vm2709_vm1, %v2666_v36, %v6818_v14  ;;  %v6831_v58 = vpop.permute.xlu1 %6830  ;;  %v7885_v19 = vld [vmem:[%s13569_s1 + $0x8] sm:$0xff]   ;;  %v2673_v47 = vsel %vm2644_vm0, %v8540_v53, %v6677_v9  ;;  %v6693_v34 = vunpack.i.h.bf16 %v8535_v52  ;;  %v7886_v52 = vld [vmem:[%s13569_s1 + $0x10] ss:$0 sps:$4 sm:$0x33]   ;;  %s7909_s1 = smov 28  }
  0xcf   :  { %v6833_v11 = vunpack.i.h.bf16 %v6831_v58  ;;  %v6832_v29 = vunpack.i.l.bf16 %v6831_v58  ;;  %v6826_v59 = vpop.permute.xlu0 %6825  ;;  %6519 = vmatprep.subr.bf16.mxu0 %v7885_v19  ;;  %6588 = vmatprep.subr.bf16.mxu1 %v7885_v19  ;;  %v6687_v36 = vunpack.i.l.bf16 %v8547_v56  ;;  %v2674_v53 = vsel %vm2644_vm0, %v8545_v55, %v6678_v3 }
  0xd0   :  { %v6828_v1 = vunpack.i.h.bf16 %v6826_v59  ;;  %v6827_v15 = vunpack.i.l.bf16 %v6826_v59  ;;  %7120 = vrot.lane.b32.xlu1 %v13877_v45, %s7907_s17  ;;  %6520 = vmatpush3.bf16.msra.mxu0 %v7885_v19  ;;  %v2679_v9 = vsel %vm2644_vm0, %v8606_v17, %v6692_v43  ;;  %v2678_v59 = vsel %vm2644_vm0, %v51_v13, %v6688_v37  ;;  %v13879_v37 = vld [vmem:[#allocation10_spill] sm:$0xff] }
  0xd1   :  { %v9066_v35 = vsel %vm2709_vm1, %v2671_v39, %v6832_v29  ;;  %v9069_v5 = vsel %vm2709_vm1, %v2672_v38, %v6833_v11  ;;  %7115 = vrot.lane.b32.xlu0 %v8955_v12, %s7906_s12  ;;  %6591 = vmatpush3.bf16.msra.mxu1 %v7885_v19  ;;  %v50_v39 = vld [vmem:[%s13568_s0 + $0x1b0] sm:$0xff] }
  0xd2   :  { %v9077_v57 = vsel %vm2709_vm1, %v2669_v40, %v6827_v15  ;;  %v9080_v6 = vsel %vm2709_vm1, %v2670_v62, %v6828_v1  ;;  %v6841_v26 = vpop.permute.xlu1 %6840  ;;  %6593 = vmatprep.subr.msk.bf16.mxu0 %vm3313_vm2, %v7886_v52  ;;  %v3315_v40 = vsel %vm3313_vm2, %v7886_v52, 0  ;;  %6594 = vmatprep.subr.msk.bf16.mxu1 %vm3313_vm2, %v7886_v52  ;;  %v2677_v29 = vsel %vm2644_vm0, %v50_v39, %v6687_v36  ;;  %v13881_v52 = vld [vmem:[#allocation15_spill] sm:$0xff] }
  0xd3   :  { %v6843_v51 = vunpack.i.h.bf16 %v6841_v26  ;;  %v6842_v14 = vunpack.i.l.bf16 %v6841_v26  ;;  %v6836_v60 = vpop.permute.xlu0 %6835  ;;  %v6702_v1 = vunpack.i.l.bf16 %v8571_v2  ;;  %v6707_v39 = vunpack.i.l.bf16 %v13881_v52 }
  0xd4   :  { %v6838_v56 = vunpack.i.h.bf16 %v6836_v60  ;;  %v6837_v38 = vunpack.i.l.bf16 %v6836_v60  ;;  %7130 = vrot.lane.b32.xlu1 %v8408_v10, %s7908_s24  ;;  %v2680_v10 = vsel %vm2644_vm0, %v8611_v18, %v6693_v34  ;;  %6522 = vmatpush3.bf16.msra.mxu0 %v3315_v40  ;;  %v6703_v18 = vunpack.i.h.bf16 %v8571_v2  ;;  %v13880_v2 = vld [vmem:[#allocation12_spill] sm:$0xff] }
  0xd5   :  { %v9100_v55 = vsel %vm2709_vm1, %v2675_v31, %v6842_v14  ;;  %v9103_v58 = vsel %vm2709_vm1, %v2676_v46, %v6843_v51  ;;  %7125 = vrot.lane.b32.xlu0 %v8957_v21, %s7907_s17  ;;  %6592 = vmatpush3.bf16.msra.mxu1 %v3315_v40  ;;  %v13878_v46 = vld [vmem:[#allocation11_spill] sm:$0xff]  ;;  %v6713_v36 = vunpack.i.h.bf16 %v13880_v2  ;;  %v6712_v51 = vunpack.i.l.bf16 %v13880_v2 }
  0xd6   :  { %v9112_v62 = vsel %vm2709_vm1, %v2673_v47, %v6837_v38  ;;  %v9115_v17 = vsel %vm2709_vm1, %v2674_v53, %v6838_v56  ;;  %v6851_v11 = vpop.permute.xlu1 %6850  ;;  %v6698_v43 = vunpack.i.h.bf16 %v13878_v46  ;;  %v6697_v47 = vunpack.i.l.bf16 %v13878_v46 }
  0xd7   :  { %v6853_v19 = vunpack.i.h.bf16 %v6851_v11  ;;  %v6852_v31 = vunpack.i.l.bf16 %v6851_v11  ;;  %v6846_v3 = vpop.permute.xlu0 %6845  ;;  %v6708_v53 = vunpack.i.h.bf16 %v13881_v52 }
  0xd8   :  { %v6848_v15 = vunpack.i.h.bf16 %v6846_v3  ;;  %v6847_v45 = vunpack.i.l.bf16 %v6846_v3  ;;  %7140 = vrot.lane.b32.xlu1 %v8897_v61, %s7909_s1  ;;  %v13885_v3 = vld [vmem:[#allocation14_spill] sm:$0xff] }
  0xd9   :  { %v9127_v34 = vsel %vm2709_vm1, %v2679_v9, %v6852_v31  ;;  %v9130_v26 = vsel %vm2709_vm1, %v2680_v10, %v6853_v19  ;;  %7135 = vrot.lane.b32.xlu0 %v13879_v37, %s7908_s24  ;;  %v13882_v9 = vld [vmem:[#allocation20_spill] sm:$0xff]  ;;  %v13883_v10 = vld [vmem:[#allocation21_spill] sm:$0xff]  ;;  %v13887_v37 = vld [vmem:[#allocation27_spill] sm:$0xff] }
  0xda   :  { %v9137_v14 = vsel %vm2709_vm1, %v2677_v29, %v6847_v45  ;;  %v9140_v61 = vsel %vm2709_vm1, %v2678_v59, %v6848_v15  ;;  %v6861_v60 = vpop.permute.xlu1 %6860  ;;  %v2683_v40 = vsel %vm2644_vm0, %v13882_v9, %v6702_v1  ;;  %v2684_v11 = vsel %vm2644_vm0, %v13883_v10, %v6703_v18  ;;  %v13884_v59 = vld [vmem:[#allocation13_spill] sm:$0xff]  ;;  %v13886_v18 = vld [vmem:[#allocation26_spill] sm:$0xff] }
  0xdb   :  { %v6863_v13 = vunpack.i.h.bf16 %v6861_v60  ;;  %v6862_v56 = vunpack.i.l.bf16 %v6861_v60  ;;  %v6856_v38 = vpop.permute.xlu0 %6855  ;;  %v2681_v31 = vsel %vm2644_vm0, %v13884_v59, %v6697_v47  ;;  %v2682_v15 = vsel %vm2644_vm0, %v13885_v3, %v6698_v43  ;;  %v13888_v60 = vld [vmem:[#allocation17_spill] sm:$0xff] }
  0xdc   :  { %v6858_v19 = vunpack.i.h.bf16 %v6856_v38  ;;  %v6857_v29 = vunpack.i.l.bf16 %v6856_v38  ;;  %7150 = vrot.lane.b32.xlu1 %v8957_v21, %s7910_s25  ;;  %v2687_v46 = vsel %vm2644_vm0, %v13886_v18, %v6712_v51  ;;  %v2688_v21 = vsel %vm2644_vm0, %v13887_v37, %v6713_v36  ;;  %v13890_v51 = vld [vmem:[#allocation16_spill] sm:$0xff] }
  0xdd   :  { %v9155_v45 = vsel %vm2709_vm1, %v2683_v40, %v6862_v56  ;;  %v9158_v1 = vsel %vm2709_vm1, %v2684_v11, %v6863_v13  ;;  %7145 = vrot.lane.b32.xlu0 %v8913_v4, %s7909_s1  ;;  %v2685_v52 = vsel %vm2644_vm0, %v13888_v60, %v6707_v39  ;;  %v13889_v13 = vld [vmem:[#allocation18_spill] sm:$0xff]  ;;  %v6723_v40 = vunpack.i.h.bf16 %v13890_v51  ;;  %v13893_v60 = vld [vmem:[#allocation25_spill] sm:$0xff] }
  0xde   :  { %v9167_v47 = vsel %vm2709_vm1, %v2681_v31, %v6857_v29  ;;  %v9170_v43 = vsel %vm2709_vm1, %v2682_v15, %v6858_v19  ;;  %v6871_v2 = vpop.permute.xlu1 %6870  ;;  %v2686_v56 = vsel %vm2644_vm0, %v13889_v13, %v6708_v53  ;;  %v6722_v36 = vunpack.i.l.bf16 %v13890_v51  ;;  %v13891_v19 = vld [vmem:[#allocation19_spill] sm:$0xff]  ;;  %v13892_v31 = vld [vmem:[#allocation22_spill] sm:$0xff]  ;;  %v13895_v51 = vld [vmem:[#allocation33_spill] sm:$0xff] }
  0xdf   :  { %v6873_v4 = vunpack.i.h.bf16 %v6871_v2  ;;  %v6872_v38 = vunpack.i.l.bf16 %v6871_v2  ;;  %v6866_v9 = vpop.permute.xlu0 %6865  ;;  %v6718_v29 = vunpack.i.h.bf16 %v13891_v19  ;;  %v6717_v59 = vunpack.i.l.bf16 %v13891_v19 }
  0xe0   :  { %v6868_v10 = vunpack.i.h.bf16 %v6866_v9  ;;  %v6867_v11 = vunpack.i.l.bf16 %v6866_v9  ;;  %7160 = vrot.lane.b32.xlu1 %v8968_v23, %s7907_s17  ;;  %v6733_v3 = vunpack.i.h.bf16 %v13892_v31  ;;  %v6732_v15 = vunpack.i.l.bf16 %v13892_v31  ;;  %v13894_v9 = vld [vmem:[#allocation32_spill] sm:$0xff] }
  0xe1   :  { %v9183_v39 = vsel %vm2709_vm1, %v2687_v46, %v6872_v38  ;;  %v9186_v53 = vsel %vm2709_vm1, %v2688_v21, %v6873_v4  ;;  %7155 = vrot.lane.b32.xlu0 %v8968_v23, %s7910_s25  ;;  %v6728_v46 = vunpack.i.h.bf16 %v13893_v60  ;;  %v6727_v13 = vunpack.i.l.bf16 %v13893_v60 }
  0xe2   :  { %v9193_v18 = vsel %vm2709_vm1, %v2685_v52, %v6867_v11  ;;  %v9196_v37 = vsel %vm2709_vm1, %v2686_v56, %v6868_v10  ;;  %v6881_v2 = vpop.permute.xlu1 %6880  ;;  %v2691_v23 = vsel %vm2644_vm0, %v13894_v9, %v6722_v36  ;;  %v2692_v19 = vsel %vm2644_vm0, %v13895_v51, %v6723_v40  ;;  %v13896_v56 = vld [vmem:[#allocation23_spill] sm:$0xff]  ;;  %v13897_v11 = vld [vmem:[#allocation24_spill] sm:$0xff]  ;;  %v13898_v40 = vld [vmem:[#allocation38_spill] sm:$0xff] }
  0xe3   :  { %v6883_v21 = vunpack.i.h.bf16 %v6881_v2  ;;  %v6882_v4 = vunpack.i.l.bf16 %v6881_v2  ;;  %v6876_v38 = vpop.permute.xlu0 %6875  ;;  %v2689_v10 = vsel %vm2644_vm0, %v13896_v56, %v6717_v59  ;;  %v2690_v2 = vsel %vm2644_vm0, %v13897_v11, %v6718_v29  ;;  %v13901_v9 = vld [vmem:[#allocation30_spill] sm:$0xff] }
  0xe4   :  { %v6878_v31 = vunpack.i.h.bf16 %v6876_v38  ;;  %v6877_v52 = vunpack.i.l.bf16 %v6876_v38  ;;  %7170 = vrot.lane.b32.xlu1 %v7169_v27, %s7908_s24  ;;  %v2695_v38 = vsel %vm2644_vm0, %v13898_v40, %v6732_v15  ;;  %v2696_v25 = vsel %vm2644_vm0, %v13899_v24, %v6733_v3  ;;  %v13902_v15 = vld [vmem:[#allocation28_spill] sm:$0xff] }
  0xe5   :  { %v9213_v60 = vsel %vm2709_vm1, %v2691_v23, %v6882_v4  ;;  %v9216_v36 = vsel %vm2709_vm1, %v2692_v19, %v6883_v21  ;;  %7165 = vrot.lane.b32.xlu0 %v8972_v42, %s7907_s17  ;;  %v13900_v4 = vld [vmem:[#allocation29_spill] sm:$0xff]  ;;  %v2694_v23 = vsel %vm2644_vm0, %v13901_v9, %v6728_v46  ;;  %v6743_v11 = vunpack.i.h.bf16 %v13902_v15 }
  0xe6   :  { %v9225_v27 = vsel %vm2709_vm1, %v2689_v10, %v6877_v52  ;;  %v9228_v29 = vsel %vm2709_vm1, %v2690_v2, %v6878_v31  ;;  %v6891_v59 = vpop.permute.xlu1 %6890  ;;  %v2693_v21 = vsel %vm2644_vm0, %v13900_v4, %v6727_v13  ;;  %v6742_v3 = vunpack.i.l.bf16 %v13902_v15  ;;  %v13903_v31 = vld [vmem:[#allocation31_spill] sm:$0xff] }
  0xe7   :  { %v6893_v51 = vunpack.i.h.bf16 %v6891_v59  ;;  %v6892_v19 = vunpack.i.l.bf16 %v6891_v59  ;;  %v6886_v56 = vpop.permute.xlu0 %6885  ;;  %v6738_v10 = vunpack.i.h.bf16 %v13903_v31  ;;  %v6737_v2 = vunpack.i.l.bf16 %v13903_v31  ;;  %v13907_v59 = vld [vmem:[#allocation34_spill] sm:$0xff] }
  0xe8   :  { %v6888_v40 = vunpack.i.h.bf16 %v6886_v56  ;;  %v6887_v52 = vunpack.i.l.bf16 %v6886_v56  ;;  %7180 = vrot.lane.b32.xlu1 %v8911_v33, %s7909_s1  ;;  %v13906_v24 = vpack.i.bf16 %v8925_v32, %v8920_v54  ;;  %v6753_v4 = vunpack.i.h.bf16 %v13907_v59  ;;  %v13910_v32 = vld [vmem:[#allocation44_spill] sm:$0xff] }
  0xe9   :  { %v9241_v13 = vsel %vm2709_vm1, %v2695_v38, %v6892_v19  ;;  %v9244_v46 = vsel %vm2709_vm1, %v2696_v25, %v6893_v51  ;;  %v6752_v9 = vunpack.i.l.bf16 %v13907_v59  ;;  %v13909_v19 = vld [vmem:[#allocation37_spill] sm:$0xff]  ;;  %v2699_v54 = vsel %vm2644_vm0, %v13910_v32, %v6742_v3 }
  0xea   :  { %13904 = vst [vmem:[#allocation11_spill] sm:$0xff] %v9241_v13  ;;  %13905 = vst [vmem:[#allocation10_spill] sm:$0xff] %v9244_v46  ;;  %7175 = vrot.lane.b32.xlu0 %v13906_v24, %s7908_s24  ;;  %v9253_v33 = vsel %vm2709_vm1, %v2693_v21, %v6887_v52  ;;  %v9256_v56 = vsel %vm2709_vm1, %v2694_v23, %v6888_v40  ;;  %v6901_v38 = vpop.permute.xlu1 %6900  ;;  %v6748_v15 = vunpack.i.h.bf16 %v13909_v19  ;;  %v6747_v25 = vunpack.i.l.bf16 %v13909_v19  ;;  %v13911_v24 = vld [vmem:[#allocation45_spill] sm:$0xff]  ;;  %v13912_v23 = vld [vmem:[#allocation35_spill] sm:$0xff] }
  0xeb   :  { %13908 = vst [vmem:[#allocation12_spill] sm:$0xff] %v9256_v56  ;;  %v6903_v51 = vunpack.i.h.bf16 %v6901_v38  ;;  %v6902_v31 = vunpack.i.l.bf16 %v6901_v38  ;;  %v6896_v46 = vpop.permute.xlu0 %6895  ;;  %v2700_v59 = vsel %vm2644_vm0, %v13911_v24, %v6743_v11  ;;  %v2697_v40 = vsel %vm2644_vm0, %v13912_v23, %v6737_v2  ;;  %v13913_v52 = vld [vmem:[#allocation36_spill] sm:$0xff]  ;;  %v13915_v11 = vld [vmem:[#allocation50_spill] sm:$0xff]  ;;  %v13919_v32 = vld [vmem:[#allocation41_spill] sm:$0xff] }
  0xec   :  { %v6898_v13 = vunpack.i.h.bf16 %v6896_v46  ;;  %v6897_v21 = vunpack.i.l.bf16 %v6896_v46  ;;  %7190 = vrot.lane.b32.xlu1 %v8972_v42, %s7910_s25  ;;  %v2698_v19 = vsel %vm2644_vm0, %v13913_v52, %v6738_v10  ;;  %v2703_v3 = vsel %vm2644_vm0, %v13915_v11, %v6752_v9  ;;  %v13916_v46 = vld [vmem:[#allocation51_spill] sm:$0xff]  ;;  %v13921_v9 = vld [vmem:[#allocation40_spill] sm:$0xff] }
  0xed   :  { %v9271_v38 = vsel %vm2709_vm1, %v2699_v54, %v6902_v31  ;;  %v9274_v56 = vsel %vm2709_vm1, %v2700_v59, %v6903_v51  ;;  %v2704_v42 = vsel %vm2644_vm0, %v13916_v46, %v6753_v4  ;;  %v2701_v51 = vsel %vm2644_vm0, %v13919_v32, %v6747_v25  ;;  %v13920_v54 = vld [vmem:[#allocation42_spill] sm:$0xff]  ;;  %v13922_v25 = vld [vmem:[#allocation43_spill] sm:$0xff] }
  0xee   :  { %13914 = vst [vmem:[#allocation15_spill] sm:$0xff] %v9274_v56  ;;  %7185 = vrot.lane.b32.xlu0 %v8934_v0, %s7909_s1  ;;  %v9283_v2 = vsel %vm2709_vm1, %v2697_v40, %v6897_v21  ;;  %v9286_v10 = vsel %vm2709_vm1, %v2698_v19, %v6898_v13  ;;  %v6911_v31 = vpop.permute.xlu1 %6910  ;;  %v2702_v24 = vsel %vm2644_vm0, %v13920_v54, %v6748_v15  ;;  %v6763_v52 = vunpack.i.h.bf16 %v13921_v9  ;;  %v6264_v13 = vld [vmem:[%s13568_s0 + $0xa8] sm:$0xff]  ;;  %v6265_v15 = vld [vmem:[%s13568_s0 + $0xb0] sm:$0xff] }
  0xef   :  { %13917 = vst [vmem:[#allocation20_spill] sm:$0xff] %v9283_v2  ;;  %13918 = vst [vmem:[#allocation21_spill] sm:$0xff] %v9286_v10  ;;  %v6913_v0 = vunpack.i.h.bf16 %v6911_v31  ;;  %v6912_v59 = vunpack.i.l.bf16 %v6911_v31  ;;  %v6906_v23 = vpop.permute.xlu0 %6905  ;;  %v6762_v4 = vunpack.i.l.bf16 %v13921_v9  ;;  %v6758_v40 = vunpack.i.h.bf16 %v13922_v25  ;;  %v13924_v56 = vld [vmem:[#allocation52_spill] sm:$0xff] }
  0xf0   :  { %v6908_v11 = vunpack.i.h.bf16 %v6906_v23  ;;  %v6907_v21 = vunpack.i.l.bf16 %v6906_v23  ;;  %7200 = vrot.lane.b32.xlu1 %v8978_v63, %s7907_s17  ;;  %v6757_v19 = vunpack.i.l.bf16 %v13922_v25  ;;  %v7214_v25 = vpack.i.bf16 %v6265_v15, %v6264_v13 }
  0xf1   :  { %v9305_v46 = vsel %vm2709_vm1, %v2703_v3, %v6912_v59  ;;  %v9308_v31 = vsel %vm2709_vm1, %v2704_v42, %v6913_v0  ;;  %v2707_v3 = vsel %vm2644_vm0, %v13924_v56, %v6762_v4  ;;  %v13925_v59 = vld [vmem:[#allocation54_spill] sm:$0xff]  ;;  %v6141_v4 = vld [vmem:[%s13568_s0 + $0xc9] sm:$0xff] }
  0xf2   :  { %13923 = vst [vmem:[#allocation13_spill] sm:$0xff] %v9308_v31  ;;  %7195 = vrot.lane.b32.xlu0 %v8978_v63, %s7910_s25  ;;  %v9313_v32 = vsel %vm2709_vm1, %v2701_v51, %v6907_v21  ;;  %v9316_v54 = vsel %vm2709_vm1, %v2702_v24, %v6908_v11  ;;  %v6921_v23 = vpop.permute.xlu1 %6920  ;;  %v2708_v42 = vsel %vm2644_vm0, %v13925_v59, %v6763_v52  ;;  %v13927_v51 = vld [vmem:[#allocation47_spill] sm:$0xff]  ;;  %v13928_v11 = vld [vmem:[#allocation48_spill] sm:$0xff] }
  0xf3   :  { %v6923_v9 = vunpack.i.h.bf16 %v6921_v23  ;;  %v6922_v10 = vunpack.i.l.bf16 %v6921_v23  ;;  %v6916_v2 = vpop.permute.xlu0 %6915  ;;  %v13926_v63 = vpack.i.bf16 %v8949_v20, %v8944_v22  ;;  %v2705_v24 = vsel %vm2644_vm0, %v13927_v51, %v6757_v19  ;;  %v6267_v51 = vld [vmem:[%s13568_s0 + $0xc8] sm:$0xff] }
  0xf4   :  { %v6918_v0 = vunpack.i.h.bf16 %v6916_v2  ;;  %v6917_v31 = vunpack.i.l.bf16 %v6916_v2  ;;  %v2706_v21 = vsel %vm2644_vm0, %v13928_v11, %v6758_v40  ;;  %v6392_v40 = vld [vmem:[%s13568_s0 + $0xaa] sm:$0xff] }
  0xf5   :  { %7210 = vrot.lane.b32.xlu1 %v13926_v63, %s7908_s24  ;;  %v9331_v13 = vsel %vm2709_vm1, %v2707_v3, %v6922_v10  ;;  %v9334_v56 = vsel %vm2709_vm1, %v2708_v42, %v6923_v9  ;;  %v6140_v10 = vld [vmem:[%s13568_s0 + $0xc1] sm:$0xff] }
  0xf6   :  { %7205 = vrot.lane.b32.xlu0 %v8987_v28, %s7907_s17  ;;  %v9339_v2 = vsel %vm2709_vm1, %v2705_v24, %v6917_v31  ;;  %v9342_v22 = vsel %vm2709_vm1, %v2706_v21, %v6918_v0  ;;  %v9344_v20 = vpop.permute.xlu1 %6930  ;;  %v7239_v31 = vpack.i.bf16 %v6141_v4, %v6140_v10  ;;  %v6204_v9 = vld [vmem:[%s13568_s0 + $0xc2] sm:$0xff]  ;;  %v6332_v10 = vld [vmem:[%s13568_s0 + $0xd9] sm:$0xff] }
  0xf7   :  { %v9346_v52 = vpop.permute.xlu0 %6925  ;;  %v6269_v42 = vld [vmem:[%s13568_s0 + $0xe0] sm:$0xff] }
  0xf8   :  { %v6266_v63 = vld [vmem:[%s13568_s0 + $0xc0] sm:$0xff] }
  0xf9   :  { %7220 = vrot.lane.b32.xlu1 %v8915_v8, %s7909_s1  ;;  %v6393_v8 = vld [vmem:[%s13568_s0 + $0xb2] sm:$0xff]  ;;  %v7254_v21 = vpack.i.bf16 %v6267_v51, %v6266_v63  ;;  %v6333_v4 = vld [vmem:[%s13568_s0 + $0xe1] sm:$0xff] }
  0xfa   :  { %7215 = vrot.lane.b32.xlu0 %v7214_v25, %s7908_s24  ;;  %v9357_v15 = vpop.permute.xlu1 %6940  ;;  %v7234_v23 = vpack.i.bf16 %v6393_v8, %v6392_v40  ;;  %v6205_v25 = vld [vmem:[%s13568_s0 + $0xca] sm:$0xff]  ;;  %v6396_v63 = vld [vmem:[%s13568_s0 + $0xda] sm:$0xff]  ;;  %v6397_v51 = vld [vmem:[%s13568_s0 + $0xe2] sm:$0xff] }
  0xfb   :  { %v9365_v19 = vpop.permute.xlu0 %6935 }
  0xfd   :  { %7230 = vrot.lane.b32.xlu1 %v8987_v28, %s7910_s25  ;;  %v7249_v28 = vpack.i.bf16 %v6205_v25, %v6204_v9 }
  0xfe   :  { %7225 = vrot.lane.b32.xlu0 %v8955_v12, %s7909_s1  ;;  %v9377_v3 = vpop.permute.xlu1 %6950  ;;  %v6268_v12 = vld [vmem:[%s13568_s0 + $0xd8] sm:$0xff] }
  0xff   :  { %v9379_v59 = vpop.permute.xlu0 %6945  ;;  %v7259_v11 = vpack.i.bf16 %v6269_v42, %v6268_v12  ;;  %v7269_v12 = vpack.i.bf16 %v6333_v4, %v6332_v10 }
 0x101   :  { %7240 = vrot.lane.b32.xlu1 %v7239_v31, %s7906_s12 }
 0x102   :  { %7235 = vrot.lane.b32.xlu0 %v7234_v23, %s7910_s25  ;;  %v9389_v0 = vpop.permute.xlu1 %6960 }
 0x103   :  { %13929 = vst [vmem:[#allocation14_spill] sm:$0xff] %v9389_v0  ;;  %v9397_v24 = vpop.permute.xlu0 %6955 }
 0x104   :  { %13930 = vst [vmem:[#allocation26_spill] sm:$0xff] %v9397_v24 }
 0x105   :  { %7250 = vrot.lane.b32.xlu1 %v7249_v28, %s7907_s17 }
 0x106   :  { %7245 = vrot.lane.b32.xlu0 %v7234_v23, %s7907_s17  ;;  %v6971_v40 = vpop.permute.xlu1 %6970 }
 0x107   :  { %v6973_v8 = vunpack.i.h.bf16 %v6971_v40  ;;  %v6972_v9 = vunpack.i.l.bf16 %v6971_v40  ;;  %v6966_v25 = vpop.permute.xlu0 %6965 }
 0x108   :  { %v6968_v24 = vunpack.i.h.bf16 %v6966_v25  ;;  %v6967_v0 = vunpack.i.l.bf16 %v6966_v25 }
 0x109   :  { %7260 = vrot.lane.b32.xlu1 %v7259_v11, %s7908_s24  ;;  %v9410_v23 = vsel %vm2774_vm3, %v9002_v30, %v6972_v9  ;;  %v9414_v42 = vsel %vm2774_vm3, %v9005_v16, %v6973_v8  ;;  %v7279_v9 = vpack.i.bf16 %v6397_v51, %v6396_v63 }
 0x10a   :  { %7255 = vrot.lane.b32.xlu0 %v7254_v21, %s7908_s24  ;;  %v9425_v11 = vsel %vm2774_vm3, %v9013_v48, %v6967_v0  ;;  %v9429_v30 = vsel %vm2774_vm3, %v9016_v49, %v6968_v24  ;;  %v6981_v16 = vpop.permute.xlu1 %6980  ;;  %v6144_v49 = vld [vmem:[%s13568_s0 + $0xf1] sm:$0xff]  ;;  %v6145_v0 = vld [vmem:[%s13568_s0 + $0xf9] sm:$0xff] }
 0x10b   :  { %v6983_v10 = vunpack.i.h.bf16 %v6981_v16  ;;  %v6982_v4 = vunpack.i.l.bf16 %v6981_v16  ;;  %v6976_v21 = vpop.permute.xlu0 %6975 }
 0x10c   :  { %v6978_v40 = vunpack.i.h.bf16 %v6976_v21  ;;  %v6977_v8 = vunpack.i.l.bf16 %v6976_v21 }
 0x10d   :  { %7270 = vrot.lane.b32.xlu1 %v7269_v12, %s7909_s1  ;;  %v9434_v25 = vsel %vm2774_vm3, %v9032_v50, %v6982_v4  ;;  %v9438_v48 = vsel %vm2774_vm3, %v9035_v7, %v6983_v10  ;;  %v9456_v4 = vpack.i.bf16 %v6145_v0, %v6144_v49 }
 0x10e   :  { %7265 = vrot.lane.b32.xlu0 %v7239_v31, %s7909_s1  ;;  %v9449_v24 = vsel %vm2774_vm3, %v9043_v41, %v6977_v8  ;;  %v9453_v50 = vsel %vm2774_vm3, %v9046_v44, %v6978_v40  ;;  %v6991_v7 = vpop.permute.xlu1 %6990  ;;  %v6208_v44 = vld [vmem:[%s13568_s0 + $0xf2] sm:$0xff]  ;;  %v6209_v40 = vld [vmem:[%s13568_s0 + $0xfa] sm:$0xff] }
 0x10f   :  { %v6993_v63 = vunpack.i.h.bf16 %v6991_v7  ;;  %v6992_v51 = vunpack.i.l.bf16 %v6991_v7  ;;  %v6986_v31 = vpop.permute.xlu0 %6985 }
 0x110   :  { %v6988_v16 = vunpack.i.h.bf16 %v6986_v31  ;;  %v6987_v10 = vunpack.i.l.bf16 %v6986_v31 }
 0x111   :  { %7280 = vrot.lane.b32.xlu1 %v7279_v9, %s7910_s25  ;;  %v9460_v21 = vsel %vm2774_vm3, %v9066_v35, %v6992_v51  ;;  %v9464_v41 = vsel %vm2774_vm3, %v9069_v5, %v6993_v63  ;;  %v9483_v51 = vpack.i.bf16 %v6209_v40, %v6208_v44  ;;  %v6271_v44 = vld [vmem:[%s13568_s0 + $0xf8] sm:$0xff] }
 0x112   :  { %7275 = vrot.lane.b32.xlu0 %v7249_v28, %s7910_s25  ;;  %v9475_v8 = vsel %vm2774_vm3, %v9077_v57, %v6987_v10  ;;  %v9479_v35 = vsel %vm2774_vm3, %v9080_v6, %v6988_v16  ;;  %v7001_v5 = vpop.permute.xlu1 %7000  ;;  %v6272_v6 = vld [vmem:[%s13568_s0 + $0x108] sm:$0xff]  ;;  %v6273_v16 = vld [vmem:[%s13568_s0 + $0x110] sm:$0xff] }
 0x113   :  { %v7003_v49 = vunpack.i.h.bf16 %v7001_v5  ;;  %v7002_v0 = vunpack.i.l.bf16 %v7001_v5  ;;  %v6996_v28 = vpop.permute.xlu0 %6995 }
 0x114   :  { %v6998_v7 = vunpack.i.h.bf16 %v6996_v28  ;;  %v6997_v63 = vunpack.i.l.bf16 %v6996_v28 }
 0x115   :  { %7290 = vrot.lane.b32.xlu1 %v9456_v4, %s7906_s12  ;;  %v9487_v31 = vsel %vm2774_vm3, %v9100_v55, %v7002_v0  ;;  %v9491_v57 = vsel %vm2774_vm3, %v9103_v58, %v7003_v49 }
 0x116   :  { %13931 = vst [vmem:[#allocation27_spill] sm:$0xff] %v9491_v57  ;;  %7285 = vrot.lane.b32.xlu0 %v7269_v12, %s7906_s12  ;;  %v9502_v10 = vsel %vm2774_vm3, %v9112_v62, %v6997_v63  ;;  %v9506_v55 = vsel %vm2774_vm3, %v9115_v17, %v6998_v7  ;;  %v7011_v58 = vpop.permute.xlu1 %7010  ;;  %v6270_v12 = vld [vmem:[%s13568_s0 + $0xf0] sm:$0xff]  ;;  %v7309_v62 = vpack.i.bf16 %v6273_v16, %v6272_v6 }
 0x117   :  { %13932 = vst [vmem:[#allocation17_spill] sm:$0xff] %v9502_v10  ;;  %13933 = vst [vmem:[#allocation18_spill] sm:$0xff] %v9506_v55  ;;  %v7013_v40 = vunpack.i.h.bf16 %v7011_v58  ;;  %v7012_v5 = vunpack.i.l.bf16 %v7011_v58  ;;  %v7006_v49 = vpop.permute.xlu0 %7005  ;;  %v7304_v63 = vpack.i.bf16 %v6271_v44, %v6270_v12  ;;  %v6336_v58 = vld [vmem:[%s13568_s0 + $0x109] sm:$0xff] }
 0x118   :  { %v7008_v0 = vunpack.i.h.bf16 %v7006_v49  ;;  %v7007_v28 = vunpack.i.l.bf16 %v7006_v49  ;;  %v6337_v49 = vld [vmem:[%s13568_s0 + $0x111] sm:$0xff] }
 0x119   :  { %7300 = vrot.lane.b32.xlu1 %v9483_v51, %s7907_s17  ;;  %v9518_v17 = vsel %vm2774_vm3, %v9127_v34, %v7012_v5  ;;  %v9522_v7 = vsel %vm2774_vm3, %v9130_v26, %v7013_v40  ;;  %v7319_v5 = vpack.i.bf16 %v6337_v49, %v6336_v58 }
 0x11a   :  { %13934 = vst [vmem:[#allocation16_spill] sm:$0xff] %v9518_v17  ;;  %13935 = vst [vmem:[#allocation19_spill] sm:$0xff] %v9522_v7  ;;  %7295 = vrot.lane.b32.xlu0 %v7279_v9, %s7907_s17  ;;  %v9533_v6 = vsel %vm2774_vm3, %v9137_v14, %v7007_v28  ;;  %v9537_v34 = vsel %vm2774_vm3, %v9140_v61, %v7008_v0  ;;  %v7021_v26 = vpop.permute.xlu1 %7020  ;;  %v6400_v61 = vld [vmem:[%s13568_s0 + $0x10a] sm:$0xff]  ;;  %v6401_v0 = vld [vmem:[%s13568_s0 + $0x112] sm:$0xff] }
 0x11b   :  { %13936 = vst [vmem:[#allocation22_spill] sm:$0xff] %v9533_v6  ;;  %13937 = vst [vmem:[#allocation25_spill] sm:$0xff] %v9537_v34  ;;  %v7023_v16 = vunpack.i.h.bf16 %v7021_v26  ;;  %v7022_v9 = vunpack.i.l.bf16 %v7021_v26  ;;  %v7016_v12 = vpop.permute.xlu0 %7015 }
 0x11c   :  { %v7018_v44 = vunpack.i.h.bf16 %v7016_v12  ;;  %v7017_v40 = vunpack.i.l.bf16 %v7016_v12  ;;  %v6149_v12 = vld [vmem:[%s13568_s0 + $0x129] sm:$0xff] }
 0x11d   :  { %7310 = vrot.lane.b32.xlu1 %v7309_v62, %s7908_s24  ;;  %v9542_v7 = vsel %vm2774_vm3, %v9155_v45, %v7022_v9  ;;  %v9546_v14 = vsel %vm2774_vm3, %v9158_v1, %v7023_v16  ;;  %v7329_v16 = vpack.i.bf16 %v6401_v0, %v6400_v61 }
 0x11e   :  { %13938 = vst [vmem:[#allocation32_spill] sm:$0xff] %v9542_v7  ;;  %13939 = vst [vmem:[#allocation33_spill] sm:$0xff] %v9546_v14  ;;  %7305 = vrot.lane.b32.xlu0 %v7304_v63, %s7908_s24  ;;  %v9557_v28 = vsel %vm2774_vm3, %v9167_v47, %v7017_v40  ;;  %v9561_v45 = vsel %vm2774_vm3, %v9170_v43, %v7018_v44  ;;  %v7031_v1 = vpop.permute.xlu1 %7030  ;;  %v6148_v43 = vld [vmem:[%s13568_s0 + $0x121] sm:$0xff] }
 0x11f   :  { %13940 = vst [vmem:[#allocation23_spill] sm:$0xff] %v9557_v28  ;;  %13941 = vst [vmem:[#allocation24_spill] sm:$0xff] %v9561_v45  ;;  %v7033_v62 = vunpack.i.h.bf16 %v7031_v1  ;;  %v7032_v58 = vunpack.i.l.bf16 %v7031_v1  ;;  %v7026_v63 = vpop.permute.xlu0 %7025 }
 0x120   :  { %v7028_v49 = vunpack.i.h.bf16 %v7026_v63  ;;  %v7027_v26 = vunpack.i.l.bf16 %v7026_v63  ;;  %v6213_v63 = vld [vmem:[%s13568_s0 + $0x12a] sm:$0xff] }
 0x121   :  { %7320 = vrot.lane.b32.xlu1 %v7319_v5, %s7909_s1  ;;  %v9566_v9 = vsel %vm2774_vm3, %v9183_v39, %v7032_v58  ;;  %v9570_v47 = vsel %vm2774_vm3, %v9186_v53, %v7033_v62  ;;  %v9589_v62 = vpack.i.bf16 %v6149_v12, %v6148_v43 }
 0x122   :  { %13942 = vst [vmem:[#allocation38_spill] sm:$0xff] %v9566_v9  ;;  %13943 = vst [vmem:[#allocation39_spill] sm:$0xff] %v9570_v47  ;;  %7315 = vrot.lane.b32.xlu0 %v9456_v4, %s7909_s1  ;;  %v9582_v44 = vsel %vm2774_vm3, %v9193_v18, %v7027_v26  ;;  %v9586_v39 = vsel %vm2774_vm3, %v9196_v37, %v7028_v49  ;;  %v7041_v53 = vpop.permute.xlu1 %7040  ;;  %v6212_v37 = vld [vmem:[%s13568_s0 + $0x122] sm:$0xff] }
 0x123   :  { %13944 = vst [vmem:[#allocation29_spill] sm:$0xff] %v9582_v44  ;;  %13945 = vst [vmem:[#allocation30_spill] sm:$0xff] %v9586_v39  ;;  %v7043_v40 = vunpack.i.h.bf16 %v7041_v53  ;;  %v7042_v61 = vunpack.i.l.bf16 %v7041_v53  ;;  %v7036_v4 = vpop.permute.xlu0 %7035  ;;  %v13979_v44 = vld [vmem:[#allocation46_spill] sm:$0xff]  ;;  %v6344_v9 = vld [vmem:[%s13568_s0 + $0x169] sm:$0xff] }
 0x124   :  { %v7038_v0 = vunpack.i.h.bf16 %v7036_v4  ;;  %v7037_v1 = vunpack.i.l.bf16 %v7036_v4  ;;  %v6772_v47 = vunpack.i.l.bf16 %v13979_v44 }
 0x125   :  { %7330 = vrot.lane.b32.xlu1 %v7329_v16, %s7910_s25  ;;  %v9593_v58 = vsel %vm2774_vm3, %v9213_v60, %v7042_v61  ;;  %v9597_v18 = vsel %vm2774_vm3, %v9216_v36, %v7043_v40  ;;  %v7349_v40 = vpack.i.bf16 %v6213_v63, %v6212_v37  ;;  %v13950_v61 = vld [vmem:[#allocation11_spill] sm:$0xff]  ;;  %v13955_v63 = vld [vmem:[#allocation12_spill] sm:$0xff] }
 0x126   :  { %13946 = vst [vmem:[#allocation28_spill] sm:$0xff] %v9593_v58  ;;  %13947 = vst [vmem:[#allocation31_spill] sm:$0xff] %v9597_v18  ;;  %7325 = vrot.lane.b32.xlu0 %v9483_v51, %s7910_s25  ;;  %v9609_v49 = vsel %vm2774_vm3, %v9225_v27, %v7037_v1  ;;  %v9613_v60 = vsel %vm2774_vm3, %v9228_v29, %v7038_v0  ;;  %v7051_v36 = vpop.permute.xlu1 %7050  ;;  %v13952_v27 = vld [vmem:[#allocation10_spill] sm:$0xff]  ;;  %v6276_v29 = vld [vmem:[%s13568_s0 + $0x138] sm:$0xff] }
 0x127   :  { %13948 = vst [vmem:[#allocation34_spill] sm:$0xff] %v9609_v49  ;;  %13949 = vst [vmem:[#allocation37_spill] sm:$0xff] %v9613_v60  ;;  %v7053_v26 = vunpack.i.h.bf16 %v7051_v36  ;;  %v7052_v43 = vunpack.i.l.bf16 %v7051_v36  ;;  %v7046_v51 = vpop.permute.xlu0 %7045  ;;  %v6277_v0 = vld [vmem:[%s13568_s0 + $0x140] sm:$0xff]  ;;  %v13965_v60 = vld [vmem:[#allocation13_spill] sm:$0xff] }
 0x128   :  { %v7048_v12 = vunpack.i.h.bf16 %v7046_v51  ;;  %v7047_v53 = vunpack.i.l.bf16 %v7046_v51  ;;  %v13978_v49 = vld [vmem:[#allocation7_spill] sm:$0xff] }
 0x129   :  { %7340 = vrot.lane.b32.xlu1 %v9589_v62, %s7906_s12  ;;  %v9619_v4 = vsel %vm2774_vm3, %v13950_v61, %v7052_v43  ;;  %v9623_v1 = vsel %vm2774_vm3, %v13952_v27, %v7053_v26  ;;  %v6275_v43 = vld [vmem:[%s13568_s0 + $0x128] sm:$0xff]  ;;  %v6627_v18 = vunpack.i.l.bf16 %v13978_v49  ;;  %v6628_v39 = vunpack.i.h.bf16 %v13978_v49  ;;  %v13980_v49 = vld [vmem:[#allocation49_spill] sm:$0xff] }
 0x12a   :  { %13951 = vst [vmem:[#allocation44_spill] sm:$0xff] %v9619_v4  ;;  %13953 = vst [vmem:[#allocation45_spill] sm:$0xff] %v9623_v1  ;;  %7335 = vrot.lane.b32.xlu0 %v7319_v5, %s7906_s12  ;;  %v9634_v37 = vsel %vm2774_vm3, %v9253_v33, %v7047_v53  ;;  %v9638_v36 = vsel %vm2774_vm3, %v13955_v63, %v7048_v12  ;;  %v7061_v26 = vpop.permute.xlu1 %7060  ;;  %v6274_v5 = vld [vmem:[%s13568_s0 + $0x120] sm:$0xff]  ;;  %v7359_v33 = vpack.i.bf16 %v6277_v0, %v6276_v29  ;;  %v13958_v53 = vld [vmem:[#allocation15_spill] sm:$0xff] }
 0x12b   :  { %13954 = vst [vmem:[#allocation35_spill] sm:$0xff] %v9634_v37  ;;  %13956 = vst [vmem:[#allocation36_spill] sm:$0xff] %v9638_v36  ;;  %v7063_v51 = vunpack.i.h.bf16 %v7061_v26  ;;  %v7062_v61 = vunpack.i.l.bf16 %v7061_v26  ;;  %v7056_v27 = vpop.permute.xlu0 %7055  ;;  %v7354_v36 = vpack.i.bf16 %v6275_v43, %v6274_v5  ;;  %v6340_v26 = vld [vmem:[%s13568_s0 + $0x139] sm:$0xff]  ;;  %v13960_v29 = vld [vmem:[#allocation20_spill] sm:$0xff]  ;;  %v6767_v28 = vunpack.i.l.bf16 %v13980_v49 }
 0x12c   :  { %v7058_v1 = vunpack.i.h.bf16 %v7056_v27  ;;  %v7057_v4 = vunpack.i.l.bf16 %v7056_v27  ;;  %v6341_v27 = vld [vmem:[%s13568_s0 + $0x141] sm:$0xff] }
 0x12d   :  { %7350 = vrot.lane.b32.xlu1 %v7349_v40, %s7907_s17  ;;  %v9649_v12 = vsel %vm2774_vm3, %v9271_v38, %v7062_v61  ;;  %v9653_v63 = vsel %vm2774_vm3, %v13958_v53, %v7063_v51  ;;  %v13962_v38 = vld [vmem:[#allocation21_spill] sm:$0xff] }
 0x12e   :  { %13957 = vst [vmem:[#allocation50_spill] sm:$0xff] %v9649_v12  ;;  %13959 = vst [vmem:[#allocation51_spill] sm:$0xff] %v9653_v63  ;;  %7345 = vrot.lane.b32.xlu0 %v7329_v16, %s7907_s17  ;;  %v9664_v0 = vsel %vm2774_vm3, %v13960_v29, %v7057_v4  ;;  %v9668_v61 = vsel %vm2774_vm3, %v13962_v38, %v7058_v1  ;;  %v7071_v51 = vpop.permute.xlu1 %7070  ;;  %v7369_v12 = vpack.i.bf16 %v6341_v27, %v6340_v26  ;;  %v6404_v1 = vld [vmem:[%s13568_s0 + $0x13a] sm:$0xff]  ;;  %v6405_v29 = vld [vmem:[%s13568_s0 + $0x142] sm:$0xff] }
 0x12f   :  { %13961 = vst [vmem:[#allocation41_spill] sm:$0xff] %v9664_v0  ;;  %13963 = vst [vmem:[#allocation42_spill] sm:$0xff] %v9668_v61  ;;  %v7073_v53 = vunpack.i.h.bf16 %v7071_v51  ;;  %v7072_v16 = vunpack.i.l.bf16 %v7071_v51  ;;  %v7066_v5 = vpop.permute.xlu0 %7065 }
 0x130   :  { %v7068_v43 = vunpack.i.h.bf16 %v7066_v5  ;;  %v7067_v63 = vunpack.i.l.bf16 %v7066_v5 }
 0x131   :  { %7360 = vrot.lane.b32.xlu1 %v7359_v33, %s7908_s24  ;;  %v9673_v37 = vsel %vm2774_vm3, %v9305_v46, %v7072_v16  ;;  %v9677_v4 = vsel %vm2774_vm3, %v13965_v60, %v7073_v53  ;;  %v7379_v53 = vpack.i.bf16 %v6405_v29, %v6404_v1  ;;  %v6216_v1 = vld [vmem:[%s13568_s0 + $0x152] sm:$0xff] }
 0x132   :  { %13964 = vst [vmem:[#allocation40_spill] sm:$0xff] %v9673_v37  ;;  %13966 = vst [vmem:[#allocation43_spill] sm:$0xff] %v9677_v4  ;;  %7355 = vrot.lane.b32.xlu0 %v7354_v36, %s7908_s24  ;;  %v9688_v33 = vsel %vm2774_vm3, %v9313_v32, %v7067_v63  ;;  %v9692_v46 = vsel %vm2774_vm3, %v9316_v54, %v7068_v43  ;;  %v7081_v60 = vpop.permute.xlu1 %7080  ;;  %v6152_v54 = vld [vmem:[%s13568_s0 + $0x151] sm:$0xff]  ;;  %v6153_v63 = vld [vmem:[%s13568_s0 + $0x159] sm:$0xff] }
 0x133   :  { %13967 = vst [vmem:[#allocation52_spill] sm:$0xff] %v9688_v33  ;;  %13968 = vst [vmem:[#allocation54_spill] sm:$0xff] %v9692_v46  ;;  %v7083_v26 = vunpack.i.h.bf16 %v7081_v60  ;;  %v7082_v27 = vunpack.i.l.bf16 %v7081_v60  ;;  %v7076_v36 = vpop.permute.xlu0 %7075  ;;  %v13977_v37 = vld [vmem:[#allocation6_spill] sm:$0xff] }
 0x134   :  { %v7078_v38 = vunpack.i.h.bf16 %v7076_v36  ;;  %v7077_v51 = vunpack.i.l.bf16 %v7076_v36  ;;  %v6280_v36 = vld [vmem:[%s13568_s0 + $0x168] sm:$0xff]  ;;  %v6633_v61 = vunpack.i.h.bf16 %v13977_v37  ;;  %v6632_v0 = vunpack.i.l.bf16 %v13977_v37  ;;  %v6345_v37 = vld [vmem:[%s13568_s0 + $0x171] sm:$0xff] }
 0x135   :  { %7370 = vrot.lane.b32.xlu1 %v7369_v12, %s7909_s1  ;;  %v9697_v16 = vsel %vm2774_vm3, %v9331_v13, %v7082_v27  ;;  %v9701_v32 = vsel %vm2774_vm3, %v9334_v56, %v7083_v26 }
 0x136   :  { %13969 = vst [vmem:[#allocation47_spill] sm:$0xff] %v9697_v16  ;;  %13970 = vst [vmem:[#allocation48_spill] sm:$0xff] %v9701_v32  ;;  %7365 = vrot.lane.b32.xlu0 %v9589_v62, %s7909_s1  ;;  %v9713_v5 = vsel %vm2774_vm3, %v9339_v2, %v7077_v51  ;;  %v9717_v13 = vsel %vm2774_vm3, %v9342_v22, %v7078_v38  ;;  %v9719_v56 = vpop.permute.xlu1 %7090  ;;  %v9724_v62 = vpack.i.bf16 %v6153_v63, %v6152_v54  ;;  %v6217_v2 = vld [vmem:[%s13568_s0 + $0x15a] sm:$0xff]  ;;  %v6281_v38 = vld [vmem:[%s13568_s0 + $0x170] sm:$0xff] }
 0x137   :  { %13971 = vst [vmem:[#allocation11_spill] sm:$0xff] %v9713_v5  ;;  %13972 = vst [vmem:[#allocation10_spill] sm:$0xff] %v9717_v13  ;;  %v9721_v43 = vpop.permute.xlu0 %7085  ;;  %v13973_v22 = vld [vmem:[#allocation2_spill] sm:$0xff]  ;;  %v7889_v51 = vld [vmem:[%s13568_s0 + $0x30] sm:$0xff]  ;;  %v7409_v58 = vpack.i.bf16 %v6281_v38, %v6280_v36  ;;  %v6768_v38 = vunpack.i.h.bf16 %v13980_v49 }
 0x138   :  { %v6618_v29 = vunpack.i.h.bf16 %v13973_v22  ;;  %v6617_v60 = vunpack.i.l.bf16 %v13973_v22  ;;  %v7890_v63 = vld [vmem:[%s13568_s0 + $0x38] sm:$0xff]  ;;  %v6278_v5 = vld [vmem:[%s13568_s0 + $0x150] sm:$0xff]  ;;  %v7087_v14 = vunpack.i.l.bf16 %v9721_v43 }
 0x139   :  { %7380 = vrot.lane.b32.xlu1 %v7379_v53, %s7910_s25  ;;  %v13976_v16 = vld [vmem:[#allocation5_spill] sm:$0xff] }
 0x13a   :  { %7375 = vrot.lane.b32.xlu0 %v7349_v40, %s7910_s25  ;;  %v9735_v26 = vpop.permute.xlu1 %7100  ;;  %v9741_v40 = vpack.i.bf16 %v6217_v2, %v6216_v1  ;;  %v9754_v54 = vsel %vm2644_vm0, %v7889_v51, %v6617_v60  ;;  %v13974_v1 = vld [vmem:[#allocation3_spill] sm:$0xff]  ;;  %v6279_v60 = vld [vmem:[%s13568_s0 + $0x158] sm:$0xff]  ;;  %v18_v51 = vld [vmem:[%s13568_s0] sm:$0xff]  ;;  %v6613_v46 = vunpack.i.h.bf16 %v13976_v16  ;;  %v6612_v33 = vunpack.i.l.bf16 %v13976_v16 }
 0x13b   :  { %v9737_v27 = vpop.permute.xlu0 %7095  ;;  %v6608_v2 = vunpack.i.h.bf16 %v13974_v1  ;;  %v6607_v22 = vunpack.i.l.bf16 %v13974_v1  ;;  %v7404_v16 = vpack.i.bf16 %v6279_v60, %v6278_v5  ;;  %v7892_v60 = vld [vmem:[%s13568_s0 + $0x50] sm:$0xff] }
 0x13d   :  { %7390 = vrot.lane.b32.xlu1 %v9724_v62, %s7906_s12  ;;  %v2645_v45 = vsel %vm2644_vm0, %v18_v51, %v6607_v22 }
 0x13e   :  { %7385 = vrot.lane.b32.xlu0 %v7369_v12, %s7906_s12  ;;  %v9760_v12 = vsel %vm2644_vm0, %v7890_v63, %v6618_v29  ;;  %v9764_v13 = vpop.permute.xlu1 %7110  ;;  %v19_v29 = vld [vmem:[%s13568_s0 + $0x8] sm:$0xff]  ;;  %v13975_v63 = vld [vmem:[#allocation4_spill] sm:$0xff] }
 0x13f   :  { %v6623_v1 = vunpack.i.h.bf16 %v13975_v63  ;;  %v6622_v32 = vunpack.i.l.bf16 %v13975_v63  ;;  %v9782_v4 = vpop.permute.xlu0 %7105  ;;  %v6773_v63 = vunpack.i.h.bf16 %v13979_v44  ;;  %v2646_v36 = vsel %vm2644_vm0, %v19_v29, %v6608_v2  ;;  %v7893_v2 = vld [vmem:[%s13568_s0 + $0x18] sm:$0xff]  ;;  %v7894_v29 = vld [vmem:[%s13568_s0 + $0x20] sm:$0xff] }
 0x140   :  { %v2647_v51 = vsel %vm2644_vm0, %v7893_v2, %v6612_v33 }
 0x141   :  { %7400 = vrot.lane.b32.xlu1 %v9741_v40, %s7907_s17  ;;  %v9815_v22 = vsel %vm2644_vm0, %v7892_v60, %v6623_v1  ;;  %v7896_v60 = vld [vmem:[%s13568_s0 + $0x80] sm:$0xff] }
 0x142   :  { %7395 = vrot.lane.b32.xlu0 %v7379_v53, %s7907_s17  ;;  %v9803_v44 = vpop.permute.xlu1 %7120  ;;  %v7891_v53 = vld [vmem:[%s13568_s0 + $0x48] sm:$0xff]  ;;  %v9837_v33 = vsel %vm2644_vm0, %v7896_v60, %v6633_v61  ;;  %v2712_v61 = vsel %vm2709_vm1, %v2647_v51, %v6772_v47  ;;  %v7088_v47 = vunpack.i.h.bf16 %v9721_v43 }
 0x143   :  { %v9809_v5 = vsel %vm2644_vm0, %v7891_v53, %v6622_v32  ;;  %v2648_v32 = vsel %vm2644_vm0, %v7894_v29, %v6613_v46  ;;  %v9825_v49 = vpop.permute.xlu0 %7115  ;;  %v7895_v53 = vld [vmem:[%s13568_s0 + $0x78] sm:$0xff]  ;;  %v7897_v46 = vld [vmem:[%s13568_s0 + $0x60] sm:$0xff]  ;;  %v9846_v29 = vpack.i.bf16 %v6345_v37, %v6344_v9  ;;  %v6157_v51 = vld [vmem:[%s13568_s0 + $0x189] sm:$0xff]  ;;  %v7123_v34 = vunpack.i.h.bf16 %v9803_v44 }
 0x144   :  { %v9831_v1 = vsel %vm2644_vm0, %v7895_v53, %v6632_v0  ;;  %v9843_v2 = vsel %vm2644_vm0, %v7897_v46, %v6627_v18  ;;  %v7898_v0 = vld [vmem:[%s13568_s0 + $0x68] sm:$0xff]  ;;  %v2713_v60 = vsel %vm2709_vm1, %v2648_v32, %v6773_v63  ;;  %v6409_v9 = vld [vmem:[%s13568_s0 + $0x172] sm:$0xff]  ;;  %v2710_v18 = vsel %vm2709_vm1, %v2645_v45, %v6767_v28 }
 0x145   :  { %7410 = vrot.lane.b32.xlu1 %v7409_v58, %s7908_s24  ;;  %v9852_v53 = vsel %vm2644_vm0, %v7898_v0, %v6628_v39  ;;  %v6408_v58 = vld [vmem:[%s13568_s0 + $0x16a] sm:$0xff]  ;;  %v2711_v39 = vsel %vm2709_vm1, %v2646_v36, %v6768_v38  ;;  %v13981_v37 = vld [vmem:[#allocation53_spill] sm:$0xff]  ;;  %v6933_v32 = vunpack.i.h.bf16 %v9344_v20  ;;  %v6932_v0 = vunpack.i.l.bf16 %v9344_v20  ;;  %v6220_v45 = vld [vmem:[%s13568_s0 + $0x182] sm:$0xff] }
 0x146   :  { %7405 = vrot.lane.b32.xlu0 %v7404_v16, %s7908_s24  ;;  %v7131_v63 = vpop.permute.xlu1 %7130  ;;  %v6156_v16 = vld [vmem:[%s13568_s0 + $0x181] sm:$0xff]  ;;  %v6221_v36 = vld [vmem:[%s13568_s0 + $0x18a] sm:$0xff]  ;;  %v6928_v38 = vunpack.i.h.bf16 %v9346_v52  ;;  %v6927_v46 = vunpack.i.l.bf16 %v9346_v52  ;;  %v9887_v20 = vpack.i.bf16 %v6409_v9, %v6408_v58  ;;  %v7122_v52 = vunpack.i.l.bf16 %v9803_v44 }
 0x147   :  { %v9875_v28 = vpop.permute.xlu0 %7125  ;;  %v9893_v7 = vpack.i.bf16 %v6157_v51, %v6156_v16  ;;  %v9897_v17 = vpack.i.bf16 %v6221_v36, %v6220_v45  ;;  %v2777_v58 = vsel %vm2774_vm3, %v2712_v61, %v6932_v0  ;;  %v2778_v9 = vsel %vm2774_vm3, %v2713_v60, %v6933_v32 }
 0x148   :  { %v7133_v55 = vunpack.i.h.bf16 %v7131_v63  ;;  %v7132_v43 = vunpack.i.l.bf16 %v7131_v63  ;;  %v2776_v16 = vsel %vm2774_vm3, %v2711_v39, %v6928_v38  ;;  %v7093_v44 = vunpack.i.h.bf16 %v9719_v56 }
 0x149   :  { %7420 = vrot.lane.b32.xlu1 %v9846_v29, %s7909_s1  ;;  %v7092_v45 = vunpack.i.l.bf16 %v9719_v56  ;;  %v2841_v60 = vsel %vm2839_vm4, %v2776_v16, %v7088_v47 }
 0x14a   :  { %7415 = vrot.lane.b32.xlu0 %v9724_v62, %s7909_s1  ;;  %v7141_v6 = vpop.permute.xlu1 %7140  ;;  %v2775_v62 = vsel %vm2774_vm3, %v2710_v18, %v6927_v46  ;;  %v2906_v39 = vsel %vm2904_vm5, %v2841_v60, %v7123_v34  ;;  %v7127_v46 = vunpack.i.l.bf16 %v9875_v28 }
 0x14b   :  { %v7136_v10 = vpop.permute.xlu0 %7135  ;;  %v7143_v51 = vunpack.i.h.bf16 %v7141_v6  ;;  %v7142_v57 = vunpack.i.l.bf16 %v7141_v6  ;;  %v2840_v61 = vsel %vm2839_vm4, %v2775_v62, %v7087_v14  ;;  %v7128_v6 = vunpack.i.h.bf16 %v9875_v28  ;;  %v6284_v28 = vld [vmem:[%s13568_s0 + $0x198] sm:$0xff] }
 0x14c   :  { %v2905_v18 = vsel %vm2904_vm5, %v2840_v61, %v7122_v52  ;;  %v2971_v14 = vsel %vm2969_vm6, %v2906_v39, %v7133_v55  ;;  %v7138_v47 = vunpack.i.h.bf16 %v7136_v10  ;;  %v7137_v38 = vunpack.i.l.bf16 %v7136_v10  ;;  %v6285_v52 = vld [vmem:[%s13568_s0 + $0x1a0] sm:$0xff] }
 0x14d   :  { %7430 = vrot.lane.b32.xlu1 %v9887_v20, %s7910_s25  ;;  %v2970_v56 = vsel %vm2969_vm6, %v2905_v18, %v7132_v43  ;;  %v3036_v34 = vsel %vm3034_vm7, %v2971_v14, %v7143_v51  ;;  %v2842_v51 = vsel %vm2839_vm4, %v2777_v58, %v7092_v45  ;;  %v2843_v61 = vsel %vm2839_vm4, %v2778_v9, %v7093_v44  ;;  %v6282_v39 = vld [vmem:[%s13568_s0 + $0x180] sm:$0xff]  ;;  %v13983_v14 = vld [vmem:[#allocation8_spill] sm:$0xff] }
 0x14e   :  { %7425 = vrot.lane.b32.xlu0 %v9741_v40, %s7910_s25  ;;  %v7151_v63 = vpop.permute.xlu1 %7150  ;;  %v3035_v40 = vsel %vm3034_vm7, %v2970_v56, %v7142_v57  ;;  %v13982_v57 = vld [vmem:[#allocation55_spill] sm:$0xff]  ;;  %v7459_v45 = vpack.i.bf16 %v6285_v52, %v6284_v28  ;;  %v13984_v28 = vunpack.i.l.bf16 %v13981_v37 }
 0x14f   :  { %v7153_v32 = vunpack.i.h.bf16 %v7151_v63  ;;  %v7152_v0 = vunpack.i.l.bf16 %v7151_v63  ;;  %v7146_v36 = vpop.permute.xlu0 %7145  ;;  %v6778_v16 = vunpack.i.h.bf16 %v13982_v57  ;;  %v6777_v63 = vunpack.i.l.bf16 %v13982_v57  ;;  %v6412_v57 = vld [vmem:[%s13568_s0 + $0x19a] sm:$0xff] }
 0x150   :  { %v7148_v43 = vunpack.i.h.bf16 %v7146_v36  ;;  %v7147_v62 = vunpack.i.l.bf16 %v7146_v36  ;;  %v2716_v52 = vsel %vm2709_vm1, %v9809_v5, %v13984_v28  ;;  %v6160_v5 = vld [vmem:[%s13568_s0 + $0x1e1] sm:$0xff] }
 0x151   :  { %7440 = vrot.lane.b32.xlu1 %v9893_v7, %s7906_s12  ;;  %v3100_v10 = vsel %vm3099_vm8, %v3035_v40, %v7152_v0  ;;  %v3101_v55 = vsel %vm3099_vm8, %v3036_v34, %v7153_v32  ;;  %v2907_v32 = vsel %vm2904_vm5, %v2842_v51, %v7127_v46  ;;  %v2908_v0 = vsel %vm2904_vm5, %v2843_v61, %v7128_v6  ;;  %v6413_v51 = vld [vmem:[%s13568_s0 + $0x1a2] sm:$0xff] }
 0x152   :  { %7435 = vrot.lane.b32.xlu0 %v9846_v29, %s7906_s12  ;;  %v9934_v60 = vpop.permute.xlu1 %7160  ;;  %v3164_v18 = vpack.c.bf16 %v3101_v55, %v3100_v10  ;;  %v6283_v29 = vld [vmem:[%s13568_s0 + $0x188] sm:$0xff]  ;;  %v2972_v9 = vsel %vm2969_vm6, %v2907_v32, %v7137_v38  ;;  %v2973_v44 = vsel %vm2969_vm6, %v2908_v0, %v7138_v47  ;;  %v6643_v40 = vunpack.i.h.bf16 %v13983_v14  ;;  %v6348_v47 = vld [vmem:[%s13568_s0 + $0x199] sm:$0xff] }
 0x153   :  { %v7156_v58 = vpop.permute.xlu0 %7155  ;;  %v3037_v34 = vsel %vm3034_vm7, %v2972_v9, %v7147_v62  ;;  %v3038_v46 = vsel %vm3034_vm7, %v2973_v44, %v7148_v43  ;;  %v7454_v6 = vpack.i.bf16 %v6283_v29, %v6282_v39  ;;  %v6349_v38 = vld [vmem:[%s13568_s0 + $0x1a1] sm:$0xff]  ;;  %v13985_v62 = vunpack.i.h.bf16 %v13981_v37  ;;  %v6161_v29 = vld [vmem:[%s13568_s0 + $0x1e9] sm:$0xff] }
 0x154   :  { %v7158_v36 = vunpack.i.h.bf16 %v7156_v58  ;;  %v7157_v56 = vunpack.i.l.bf16 %v7156_v58  ;;  %6523 = vmatprep.mubr.msk.bf16.mxu0 %vm3216_vm9, %v3164_v18  ;;  %v6943_v37 = vunpack.i.h.bf16 %v9357_v15  ;;  %v6942_v61 = vunpack.i.l.bf16 %v9357_v15  ;;  %v9992_v32 = vld [vmem:[%s13568_s0 + $0x1c9] sm:$0xff] }
 0x155   :  { %7450 = vrot.lane.b32.xlu1 %v9897_v17, %s7907_s17  ;;  %v2717_v43 = vsel %vm2709_vm1, %v9815_v22, %v13985_v62  ;;  %v2714_v22 = vsel %vm2709_vm1, %v9754_v54, %v6777_v63  ;;  %v9997_v54 = vld [vmem:[%s13568_s0 + $0x1d1] sm:$0xff]  ;;  %v2715_v15 = vsel %vm2709_vm1, %v9760_v12, %v6778_v16  ;;  %v6938_v63 = vunpack.i.h.bf16 %v9365_v19 }
 0x156   :  { %7445 = vrot.lane.b32.xlu0 %v9887_v20, %s7907_s17  ;;  %v3102_v20 = vsel %vm3099_vm8, %v3037_v34, %v7157_v56  ;;  %v3103_v10 = vsel %vm3099_vm8, %v3038_v46, %v7158_v36  ;;  %v7171_v55 = vpop.permute.xlu1 %7170  ;;  %v6937_v0 = vunpack.i.l.bf16 %v9365_v19  ;;  %v7469_v58 = vpack.i.bf16 %v6349_v38, %v6348_v47  ;;  %v13986_v9 = vld [vmem:[#allocation56_spill] sm:$0xff] }
 0x157   :  { %v9984_v18 = vpop.permute.xlu0 %7165  ;;  %v3165_v39 = vpack.c.bf16 %v3103_v10, %v3102_v20  ;;  %v6793_v44 = vunpack.i.h.bf16 %v13986_v9  ;;  %v7098_v36 = vunpack.i.h.bf16 %v9737_v27  ;;  %v7097_v56 = vunpack.i.l.bf16 %v9737_v27 }
 0x158   :  { %v7479_v34 = vpack.i.bf16 %v6413_v51, %v6412_v57  ;;  %v7163_v12 = vunpack.i.h.bf16 %v9934_v60  ;;  %v7162_v16 = vunpack.i.l.bf16 %v9934_v60  ;;  %v10011_v19 = vpack.i.bf16 %v6161_v29, %v6160_v5 }
 0x159   :  { %7460 = vrot.lane.b32.xlu1 %v7459_v45, %s7908_s24  ;;  %6524 = vmatmul.mubr.msk.bf16.vlgmr.msra.gmra.mrb[0].mxu0 %vm3216_vm9, %v3165_v39  ;;  %v7484_v45 = vpack.i.bf16 %v9997_v54, %v9992_v32  ;;  %v2781_v47 = vsel %vm2774_vm3, %v2716_v52, %v6942_v61  ;;  %v2782_v38 = vsel %vm2774_vm3, %v2717_v43, %v6943_v37  ;;  %v7173_v27 = vunpack.i.h.bf16 %v7171_v55 }
 0x15a   :  { %7455 = vrot.lane.b32.xlu0 %v7454_v6, %s7908_s24  ;;  %v7181_v46 = vpop.permute.xlu1 %7180  ;;  %v7172_v28 = vunpack.i.l.bf16 %v7171_v55  ;;  %v2779_v62 = vsel %vm2774_vm3, %v2714_v22, %v6937_v0  ;;  %v2780_v20 = vsel %vm2774_vm3, %v2715_v15, %v6938_v63  ;;  %v7103_v60 = vunpack.i.h.bf16 %v9735_v26 }
 0x15b   :  { %v7183_v10 = vunpack.i.h.bf16 %v7181_v46  ;;  %v7182_v57 = vunpack.i.l.bf16 %v7181_v46  ;;  %v7102_v51 = vunpack.i.l.bf16 %v9735_v26  ;;  %v2844_v5 = vsel %vm2839_vm4, %v2779_v62, %v7097_v56  ;;  %v6222_v62 = vld [vmem:[%s13568_s0 + $0x1ca] sm:$0xff] }
 0x15c   :  { %v7176_v6 = vpop.permute.xlu0 %7175  ;;  %v2845_v52 = vsel %vm2839_vm4, %v2780_v20, %v7098_v36  ;;  %v2909_v43 = vsel %vm2904_vm5, %v2844_v5, %v7162_v16  ;;  %v7168_v22 = vunpack.i.h.bf16 %v9984_v18  ;;  %v7167_v37 = vunpack.i.l.bf16 %v9984_v18  ;;  %v6224_v18 = vld [vmem:[%s13568_s0 + $0x1e2] sm:$0xff]  ;;  %v6223_v20 = vld [vmem:[%s13568_s0 + $0x1d2] sm:$0xff] }
 0x15d   :  { %7470 = vrot.lane.b32.xlu1 %v7469_v58, %s7909_s1  ;;  %v2910_v55 = vsel %vm2904_vm5, %v2845_v52, %v7163_v12  ;;  %v2974_v39 = vsel %vm2969_vm6, %v2909_v43, %v7172_v28  ;;  %v7178_v63 = vunpack.i.h.bf16 %v7176_v6  ;;  %v7177_v0 = vunpack.i.l.bf16 %v7176_v6  ;;  %v6225_v58 = vld [vmem:[%s13568_s0 + $0x1ea] sm:$0xff] }
 0x15e   :  { %7465 = vrot.lane.b32.xlu0 %v9893_v7, %s7909_s1  ;;  %v7191_v61 = vpop.permute.xlu1 %7190  ;;  %v2975_v26 = vsel %vm2969_vm6, %v2910_v55, %v7173_v27  ;;  %v3039_v15 = vsel %vm3034_vm7, %v2974_v39, %v7182_v57  ;;  %v6792_v46 = vunpack.i.l.bf16 %v13986_v9  ;;  %v2847_v27 = vsel %vm2839_vm4, %v2782_v38, %v7103_v60  ;;  %v6288_v39 = vld [vmem:[%s13568_s0 + $0x1f8] sm:$0xff]  ;;  %v6417_v9 = vld [vmem:[%s13568_s0 + $0x202] sm:$0xff] }
 0x15f   :  { %v7193_v29 = vunpack.i.h.bf16 %v7191_v61  ;;  %v7192_v32 = vunpack.i.l.bf16 %v7191_v61  ;;  %v3040_v7 = vsel %vm3034_vm7, %v2975_v26, %v7183_v10  ;;  %v13987_v10 = vld [vmem:[#allocation57_spill] sm:$0xff]  ;;  %v2912_v5 = vsel %vm2904_vm5, %v2847_v27, %v7168_v22  ;;  %v6289_v26 = vld [vmem:[%s13568_s0 + $0x200] sm:$0xff] }
 0x160   :  { %v7186_v54 = vpop.permute.xlu0 %7185  ;;  %v6787_v57 = vunpack.i.l.bf16 %v13987_v10  ;;  %v2977_v60 = vsel %vm2969_vm6, %v2912_v5, %v7178_v63  ;;  %v6788_v55 = vunpack.i.h.bf16 %v13987_v10  ;;  %v7494_v61 = vpack.i.bf16 %v6223_v20, %v6222_v62  ;;  %v6287_v63 = vld [vmem:[%s13568_s0 + $0x1e8] sm:$0xff] }
 0x161   :  { %7480 = vrot.lane.b32.xlu1 %v7479_v34, %s7910_s25  ;;  %v3104_v36 = vsel %vm3099_vm8, %v3039_v15, %v7192_v32  ;;  %v3105_v56 = vsel %vm3099_vm8, %v3040_v7, %v7193_v29  ;;  %v7188_v12 = vunpack.i.h.bf16 %v7186_v54  ;;  %v7187_v16 = vunpack.i.l.bf16 %v7186_v54 }
 0x162   :  { %7475 = vrot.lane.b32.xlu0 %v9897_v17, %s7910_s25  ;;  %v2846_v34 = vsel %vm2839_vm4, %v2781_v47, %v7102_v51  ;;  %v10048_v28 = vpop.permute.xlu1 %7200  ;;  %v3166_v6 = vpack.c.bf16 %v3105_v56, %v3104_v36  ;;  %v10059_v51 = vpack.i.bf16 %v6225_v58, %v6224_v18  ;;  %v6642_v29 = vunpack.i.l.bf16 %v13983_v14  ;;  %v7901_v14 = vld [vmem:[%s13568_s0 + $0x90] sm:$0xff] }
 0x163   :  { %v2911_v17 = vsel %vm2904_vm5, %v2846_v34, %v7167_v37  ;;  %v3042_v22 = vsel %vm3034_vm7, %v2977_v60, %v7188_v12  ;;  %v2720_v32 = vsel %vm2709_vm1, %v9831_v1, %v6792_v46  ;;  %v2721_v1 = vsel %vm2709_vm1, %v9837_v33, %v6793_v44  ;;  %v6353_v12 = vld [vmem:[%s13568_s0 + $0x201] sm:$0xff] }
 0x164   :  { %v7196_v47 = vpop.permute.xlu0 %7195  ;;  %v2976_v38 = vsel %vm2969_vm6, %v2911_v17, %v7177_v0  ;;  %6527 = vmatprep.mubr.msk.bf16.mxu0 %vm3216_vm9, %v3166_v6  ;;  %v6352_v0 = vld [vmem:[%s13568_s0 + $0x1f9] sm:$0xff]  ;;  %v6953_v18 = vunpack.i.h.bf16 %v9377_v3  ;;  %v6952_v58 = vunpack.i.l.bf16 %v9377_v3  ;;  %v2718_v33 = vsel %vm2709_vm1, %v9843_v2, %v6787_v57 }
 0x165   :  { %v7198_v52 = vunpack.i.h.bf16 %v7196_v47  ;;  %v7197_v43 = vunpack.i.l.bf16 %v7196_v47  ;;  %7490 = vrot.lane.b32.xlu1 %v10011_v19, %s7906_s12  ;;  %v3041_v37 = vsel %vm3034_vm7, %v2976_v38, %v7187_v16  ;;  %v6416_v16 = vld [vmem:[%s13568_s0 + $0x1fa] sm:$0xff]  ;;  %v6948_v3 = vunpack.i.h.bf16 %v9379_v59 }
 0x166   :  { %7485 = vrot.lane.b32.xlu0 %v7484_v45, %s7906_s12  ;;  %v6286_v45 = vld [vmem:[%s13568_s0 + $0x1e0] sm:$0xff]  ;;  %v6947_v44 = vunpack.i.l.bf16 %v9379_v59  ;;  %v7509_v46 = vpack.i.bf16 %v6289_v26, %v6288_v39  ;;  %v2719_v34 = vsel %vm2709_vm1, %v9852_v53, %v6788_v55  ;;  %v7108_v27 = vunpack.i.h.bf16 %v9782_v4 }
 0x167   :  { %v3106_v54 = vsel %vm3099_vm8, %v3041_v37, %v7197_v43  ;;  %v3107_v15 = vsel %vm3099_vm8, %v3042_v22, %v7198_v52  ;;  %v7211_v7 = vpop.permute.xlu1 %7210  ;;  %v7107_v6 = vunpack.i.l.bf16 %v9782_v4  ;;  %v7504_v2 = vpack.i.bf16 %v6287_v63, %v6286_v45 }
 0x168   :  { %v10096_v36 = vpop.permute.xlu0 %7205  ;;  %v3167_v56 = vpack.c.bf16 %v3107_v15, %v3106_v54  ;;  %v7203_v62 = vunpack.i.h.bf16 %v10048_v28  ;;  %v7202_v59 = vunpack.i.l.bf16 %v10048_v28  ;;  %v10121_v10 = vpack.i.bf16 %v6353_v12, %v6352_v0 }
 0x169   :  { %7500 = vrot.lane.b32.xlu1 %v10059_v51, %s7907_s17  ;;  %v10123_v57 = vpack.i.bf16 %v6417_v9, %v6416_v16  ;;  %v2785_v53 = vsel %vm2774_vm3, %v2720_v32, %v6952_v58  ;;  %v2786_v17 = vsel %vm2774_vm3, %v2721_v1, %v6953_v18  ;;  %v7213_v5 = vunpack.i.h.bf16 %v7211_v7 }
 0x16a   :  { %7495 = vrot.lane.b32.xlu0 %v7494_v61, %s7907_s17  ;;  %6528 = vmatmul.mubr.msk.bf16.gmra.mrb[4].mxu0 %vm3216_vm9, %v3167_v56  ;;  %v7212_v4 = vunpack.i.l.bf16 %v7211_v7  ;;  %v2783_v38 = vsel %vm2774_vm3, %v2718_v33, %v6947_v44  ;;  %v2784_v60 = vsel %vm2774_vm3, %v2719_v34, %v6948_v3  ;;  %v7113_v28 = vunpack.i.h.bf16 %v9764_v13  ;;  %v6165_v56 = vld [vmem:[%s13568_s0 + $0x219] sm:$0xff] }
 0x16b   :  { %v7221_v20 = vpop.permute.xlu1 %7220  ;;  %v7112_v55 = vunpack.i.l.bf16 %v9764_v13  ;;  %v2848_v37 = vsel %vm2839_vm4, %v2783_v38, %v7107_v6  ;;  %v2849_v22 = vsel %vm2839_vm4, %v2784_v60, %v7108_v27  ;;  %v7208_v26 = vunpack.i.h.bf16 %v10096_v36  ;;  %v13988_v3 = vld [vmem:[#allocation9_spill] sm:$0xff] }
 0x16c   :  { %v7216_v47 = vpop.permute.xlu0 %7215  ;;  %v7223_v52 = vunpack.i.h.bf16 %v7221_v20  ;;  %v7222_v43 = vunpack.i.l.bf16 %v7221_v20  ;;  %v2913_v61 = vsel %vm2904_vm5, %v2848_v37, %v7202_v59  ;;  %v2914_v39 = vsel %vm2904_vm5, %v2849_v22, %v7203_v62  ;;  %v13990_v37 = vld [vmem:[#allocation59_spill] sm:$0xff] }
 0x16d   :  { %7510 = vrot.lane.b32.xlu1 %v7509_v46, %s7908_s24  ;;  %v7207_v32 = vunpack.i.l.bf16 %v10096_v36  ;;  %v2978_v15 = vsel %vm2969_vm6, %v2913_v61, %v7212_v4  ;;  %v2979_v7 = vsel %vm2969_vm6, %v2914_v39, %v7213_v5  ;;  %v7218_v18 = vunpack.i.h.bf16 %v7216_v47  ;;  %v6164_v36 = vld [vmem:[%s13568_s0 + $0x211] sm:$0xff] }
 0x16e   :  { %7505 = vrot.lane.b32.xlu0 %v7504_v2, %s7908_s24  ;;  %v3043_v0 = vsel %vm3034_vm7, %v2978_v15, %v7222_v43  ;;  %v3044_v1 = vsel %vm3034_vm7, %v2979_v7, %v7223_v52  ;;  %v7217_v58 = vunpack.i.l.bf16 %v7216_v47  ;;  %v6638_v44 = vunpack.i.h.bf16 %v13988_v3  ;;  %v7900_v7 = vld [vmem:[%s13568_s0 + $0xb0] sm:$0xff] }
 0x16f   :  { %v7231_v54 = vpop.permute.xlu1 %7230  ;;  %v2850_v46 = vsel %vm2839_vm4, %v2785_v53, %v7112_v55  ;;  %v2851_v34 = vsel %vm2839_vm4, %v2786_v17, %v7113_v28  ;;  %v6637_v2 = vunpack.i.l.bf16 %v13988_v3  ;;  %v10163_v5 = vpack.i.bf16 %v6165_v56, %v6164_v36  ;;  %v13989_v17 = vld [vmem:[#allocation58_spill] sm:$0xff]  ;;  %v6228_v28 = vld [vmem:[%s13568_s0 + $0x212] sm:$0xff] }
 0x170   :  { %v7233_v13 = vunpack.i.h.bf16 %v7231_v54  ;;  %v7232_v45 = vunpack.i.l.bf16 %v7231_v54  ;;  %v7226_v63 = vpop.permute.xlu0 %7225  ;;  %v2915_v62 = vsel %vm2904_vm5, %v2850_v46, %v7207_v32  ;;  %v2916_v59 = vsel %vm2904_vm5, %v2851_v34, %v7208_v26  ;;  %v6229_v55 = vld [vmem:[%s13568_s0 + $0x21a] sm:$0xff]  ;;  %v7899_v54 = vld [vmem:[%s13568_s0 + $0xa8] sm:$0xff] }
 0x171   :  { %7520 = vrot.lane.b32.xlu1 %v10121_v10, %s7909_s1  ;;  %v7228_v9 = vunpack.i.h.bf16 %v7226_v63  ;;  %v7227_v33 = vunpack.i.l.bf16 %v7226_v63  ;;  %v2981_v4 = vsel %vm2969_vm6, %v2916_v59, %v7218_v18  ;;  %v6803_v38 = vunpack.i.h.bf16 %v13989_v17  ;;  %v6293_v18 = vld [vmem:[%s13568_s0 + $0x230] sm:$0xff]  ;;  %v13992_v56 = vld [vmem:[#allocation26_spill] sm:$0xff]  ;;  %v7902_v3 = vld [vmem:[%s13568_s0 + $0x98] sm:$0xff] }
 0x172   :  { %v3108_v12 = vsel %vm3099_vm8, %v3043_v0, %v7232_v45  ;;  %v3109_v16 = vsel %vm3099_vm8, %v3044_v1, %v7233_v13  ;;  %7515 = vrot.lane.b32.xlu0 %v10011_v19, %s7909_s1  ;;  %v2980_v19 = vsel %vm2969_vm6, %v2915_v62, %v7217_v58  ;;  %v6802_v60 = vunpack.i.l.bf16 %v13989_v17  ;;  %v13991_v45 = vld [vmem:[#allocation14_spill] sm:$0xff]  ;;  %v6291_v58 = vld [vmem:[%s13568_s0 + $0x218] sm:$0xff] }
 0x173   :  { %v10158_v27 = vpop.permute.xlu1 %7240  ;;  %v3168_v6 = vpack.c.bf16 %v3109_v16, %v3108_v12  ;;  %v3045_v52 = vsel %vm3034_vm7, %v2980_v19, %v7227_v33  ;;  %v3046_v43 = vsel %vm3034_vm7, %v2981_v4, %v7228_v9  ;;  %v6798_v22 = vunpack.i.h.bf16 %v13990_v37  ;;  %v6356_v9 = vld [vmem:[%s13568_s0 + $0x229] sm:$0xff]  ;;  %v6357_v33 = vld [vmem:[%s13568_s0 + $0x231] sm:$0xff] }
 0x174   :  { %v7236_v20 = vpop.permute.xlu0 %7235  ;;  %v6797_v61 = vunpack.i.l.bf16 %v13990_v37  ;;  %v2659_v15 = vsel %vm2644_vm0, %v7899_v54, %v6642_v29  ;;  %v2660_v13 = vsel %vm2644_vm0, %v7900_v7, %v6643_v40  ;;  %v6962_v63 = vunpack.i.l.bf16 %v13991_v45  ;;  %v6290_v29 = vld [vmem:[%s13568_s0 + $0x210] sm:$0xff] }
 0x175   :  { %v7238_v47 = vunpack.i.h.bf16 %v7236_v20  ;;  %v7237_v53 = vunpack.i.l.bf16 %v7236_v20  ;;  %7530 = vrot.lane.b32.xlu1 %v10123_v57, %s7910_s25  ;;  %6531 = vmatprep.mubr.msk.bf16.mxu0 %vm3216_vm9, %v3168_v6  ;;  %v2657_v40 = vsel %vm2644_vm0, %v7901_v14, %v6637_v2  ;;  %v6963_v36 = vunpack.i.h.bf16 %v13991_v45 }
 0x176   :  { %7525 = vrot.lane.b32.xlu0 %v10059_v51, %s7910_s25  ;;  %v6292_v51 = vld [vmem:[%s13568_s0 + $0x228] sm:$0xff]  ;;  %v6957_v12 = vunpack.i.l.bf16 %v13992_v56  ;;  %v10223_v16 = vpack.i.bf16 %v6229_v55, %v6228_v28  ;;  %v2658_v46 = vsel %vm2644_vm0, %v7902_v3, %v6638_v44  ;;  %v2724_v34 = vsel %vm2709_vm1, %v2659_v15, %v6802_v60 }
 0x177   :  { %v3110_v39 = vsel %vm3099_vm8, %v3045_v52, %v7237_v53  ;;  %v3111_v26 = vsel %vm3099_vm8, %v3046_v43, %v7238_v47  ;;  %v10186_v32 = vpop.permute.xlu1 %7250  ;;  %v2725_v6 = vsel %vm2709_vm1, %v2660_v13, %v6803_v38  ;;  %v6958_v2 = vunpack.i.h.bf16 %v13992_v56  ;;  %v6420_v44 = vld [vmem:[%s13568_s0 + $0x22a] sm:$0xff]  ;;  %v6421_v47 = vld [vmem:[%s13568_s0 + $0x232] sm:$0xff] }
 0x178   :  { %v10204_v0 = vpop.permute.xlu0 %7245  ;;  %v3169_v1 = vpack.c.bf16 %v3111_v26, %v3110_v39  ;;  %v2722_v62 = vsel %vm2709_vm1, %v2657_v40, %v6797_v61  ;;  %v2723_v59 = vsel %vm2709_vm1, %v2658_v46, %v6798_v22  ;;  %v7559_v19 = vpack.i.bf16 %v6293_v18, %v6292_v51 }
 0x179   :  { %7540 = vrot.lane.b32.xlu1 %v10163_v5, %s7906_s12  ;;  %v7554_v4 = vpack.i.bf16 %v6291_v58, %v6290_v29  ;;  %v2789_v53 = vsel %vm2774_vm3, %v2724_v34, %v6962_v63  ;;  %v7117_v17 = vunpack.i.l.bf16 %v9825_v49  ;;  %v10252_v60 = vpack.i.bf16 %v6357_v33, %v6356_v9 }
 0x17a   :  { %7535 = vrot.lane.b32.xlu0 %v10121_v10, %s7906_s12  ;;  %6532 = vmatmul.mubr.msk.bf16.gmra.mrb[8].mxu0 %vm3216_vm9, %v3169_v1  ;;  %v7118_v10 = vunpack.i.h.bf16 %v9825_v49  ;;  %v2790_v52 = vsel %vm2774_vm3, %v2725_v6, %v6963_v36  ;;  %v2787_v43 = vsel %vm2774_vm3, %v2722_v62, %v6957_v12  ;;  %v7243_v28 = vunpack.i.h.bf16 %v10158_v27 }
 0x17b   :  { %v7261_v20 = vpop.permute.xlu1 %7260  ;;  %v7242_v55 = vunpack.i.l.bf16 %v10158_v27  ;;  %v2788_v37 = vsel %vm2774_vm3, %v2723_v59, %v6958_v2  ;;  %v7253_v22 = vunpack.i.h.bf16 %v10186_v32  ;;  %v7252_v49 = vunpack.i.l.bf16 %v10186_v32 }
 0x17c   :  { %v7256_v38 = vpop.permute.xlu0 %7255  ;;  %v10265_v61 = vpack.i.bf16 %v6421_v47, %v6420_v44  ;;  %v7248_v39 = vunpack.i.h.bf16 %v10204_v0  ;;  %v7247_v26 = vunpack.i.l.bf16 %v10204_v0  ;;  %v7263_v51 = vunpack.i.h.bf16 %v7261_v20 }
 0x17d   :  { %7550 = vrot.lane.b32.xlu1 %v10223_v16, %s7907_s17  ;;  %v7262_v27 = vunpack.i.l.bf16 %v7261_v20  ;;  %v2852_v15 = vsel %vm2839_vm4, %v2787_v43, %v7117_v17  ;;  %v2853_v7 = vsel %vm2839_vm4, %v2788_v37, %v7118_v10  ;;  %v7258_v13 = vunpack.i.h.bf16 %v7256_v38  ;;  %v6169_v10 = vld [vmem:[%s13568_s0 + $0x249] sm:$0xff] }
 0x17e   :  { %7545 = vrot.lane.b32.xlu0 %v10123_v57, %s7907_s17  ;;  %v7257_v45 = vunpack.i.l.bf16 %v7256_v38  ;;  %v2854_v32 = vsel %vm2839_vm4, %v2789_v53, %v7242_v55  ;;  %v2855_v57 = vsel %vm2839_vm4, %v2790_v52, %v7243_v28  ;;  %v2917_v40 = vsel %vm2904_vm5, %v2852_v15, %v7247_v26  ;;  %v6168_v53 = vld [vmem:[%s13568_s0 + $0x241] sm:$0xff]  ;;  %v6360_v15 = vld [vmem:[%s13568_s0 + $0x259] sm:$0xff] }
 0x17f   :  { %v7271_v54 = vpop.permute.xlu1 %7270  ;;  %v2919_v0 = vsel %vm2904_vm5, %v2854_v32, %v7252_v49  ;;  %v2920_v29 = vsel %vm2904_vm5, %v2855_v57, %v7253_v22  ;;  %v2918_v36 = vsel %vm2904_vm5, %v2853_v7, %v7248_v39  ;;  %v6232_v37 = vld [vmem:[%s13568_s0 + $0x242] sm:$0xff]  ;;  %v6233_v22 = vld [vmem:[%s13568_s0 + $0x24a] sm:$0xff]  ;;  %vm5919_vm0 = vcmask 1047559  }
 0x180   :  { %v7266_v63 = vpop.permute.xlu0 %7265  ;;  %v7273_v1 = vunpack.i.h.bf16 %v7271_v54  ;;  %v7272_v18 = vunpack.i.l.bf16 %v7271_v54  ;;  %v2984_v56 = vsel %vm2969_vm6, %v2919_v0, %v7262_v27  ;;  %v2985_v12 = vsel %vm2969_vm6, %v2920_v29, %v7263_v51  ;;  %v6297_v51 = vld [vmem:[%s13568_s0 + $0x260] sm:$0xff]  ;;  %v6295_v54 = vld [vmem:[%s13568_s0 + $0x248] sm:$0xff] }
 0x181   :  { %7560 = vrot.lane.b32.xlu1 %v7559_v19, %s7908_s24  ;;  %v7268_v58 = vunpack.i.h.bf16 %v7266_v63  ;;  %v7267_v14 = vunpack.i.l.bf16 %v7266_v63  ;;  %v2982_v33 = vsel %vm2969_vm6, %v2917_v40, %v7257_v45  ;;  %v2983_v3 = vsel %vm2969_vm6, %v2918_v36, %v7258_v13  ;;  %v6294_v27 = vld [vmem:[%s13568_s0 + $0x240] sm:$0xff] }
 0x182   :  { %7555 = vrot.lane.b32.xlu0 %v7554_v4, %s7908_s24  ;;  %v3049_v2 = vsel %vm3034_vm7, %v2984_v56, %v7272_v18  ;;  %v3050_v62 = vsel %vm3034_vm7, %v2985_v12, %v7273_v1  ;;  %v10317_v26 = vpack.i.bf16 %v6233_v22, %v6232_v37  ;;  %v6361_v13 = vld [vmem:[%s13568_s0 + $0x261] sm:$0xff]  ;;  %v7604_v29 = vpack.i.bf16 %v6295_v54, %v6294_v27  ;;  %v6172_v54 = vld [vmem:[%s13568_s0 + $0x271] sm:$0xff] }
 0x183   :  { %v7281_v9 = vpop.permute.xlu1 %7280  ;;  %v3047_v19 = vsel %vm3034_vm7, %v2982_v33, %v7267_v14  ;;  %v3048_v4 = vsel %vm3034_vm7, %v2983_v3, %v7268_v58  ;;  %v6425_v45 = vld [vmem:[%s13568_s0 + $0x262] sm:$0xff]  ;;  %v7619_v40 = vpack.i.bf16 %v6361_v13, %v6360_v15  ;;  %v6173_v15 = vld [vmem:[%s13568_s0 + $0x279] sm:$0xff] }
 0x184   :  { %v7283_v46 = vunpack.i.h.bf16 %v7281_v9  ;;  %v7282_v34 = vunpack.i.l.bf16 %v7281_v9  ;;  %v7276_v6 = vpop.permute.xlu0 %7275 }
 0x185   :  { %v7278_v59 = vunpack.i.h.bf16 %v7276_v6  ;;  %v7277_v20 = vunpack.i.l.bf16 %v7276_v6  ;;  %7570 = vrot.lane.b32.xlu1 %v10252_v60, %s7909_s1 }
 0x186   :  { %v3114_v44 = vsel %vm3099_vm8, %v3049_v2, %v7282_v34  ;;  %v3115_v47 = vsel %vm3099_vm8, %v3050_v62, %v7283_v46  ;;  %7565 = vrot.lane.b32.xlu0 %v10163_v5, %s7909_s1  ;;  %v10303_v5 = vpack.i.bf16 %v6169_v10, %v6168_v53 }
 0x187   :  { %v3112_v17 = vsel %vm3099_vm8, %v3047_v19, %v7277_v20  ;;  %v3113_v38 = vsel %vm3099_vm8, %v3048_v4, %v7278_v59  ;;  %v7291_v52 = vpop.permute.xlu1 %7290  ;;  %v3171_v43 = vpack.c.bf16 %v3115_v47, %v3114_v44 }
 0x188   :  { %v7286_v28 = vpop.permute.xlu0 %7285  ;;  %v3170_v55 = vpack.c.bf16 %v3113_v38, %v3112_v17  ;;  %v7293_v63 = vunpack.i.h.bf16 %v7291_v52  ;;  %v7292_v32 = vunpack.i.l.bf16 %v7291_v52 }
 0x189   :  { %7580 = vrot.lane.b32.xlu1 %v10265_v61, %s7910_s25  ;;  %v7288_v1 = vunpack.i.h.bf16 %v7286_v28  ;;  %v7287_v18 = vunpack.i.l.bf16 %v7286_v28 }
 0x18a   :  { %7575 = vrot.lane.b32.xlu0 %v10223_v16, %s7910_s25  ;;  %6535 = vmatprep.mubr.msk.bf16.mxu0 %vm3216_vm9, %v3170_v55  ;;  %v6296_v16 = vld [vmem:[%s13568_s0 + $0x258] sm:$0xff]  ;;  %v2858_v46 = vsel %vm2839_vm4, %v9410_v23, %v7292_v32  ;;  %v2859_v34 = vsel %vm2839_vm4, %v9414_v42, %v7293_v63 }
 0x18b   :  { %6536 = vmatmul.mubr.msk.bf16.gmra.mrb[12].mxu0 %vm3216_vm9, %v3171_v43  ;;  %v7301_v49 = vpop.permute.xlu1 %7300  ;;  %v7609_v0 = vpack.i.bf16 %v6297_v51, %v6296_v16  ;;  %v2857_v59 = vsel %vm2839_vm4, %v9429_v30, %v7288_v1  ;;  %v6237_v1 = vld [vmem:[%s13568_s0 + $0x27a] sm:$0xff] }
 0x18c   :  { %v7296_v39 = vpop.permute.xlu0 %7295  ;;  %v7303_v58 = vunpack.i.h.bf16 %v7301_v49  ;;  %v7302_v14 = vunpack.i.l.bf16 %v7301_v49 }
 0x18d   :  { %7590 = vrot.lane.b32.xlu1 %v10303_v5, %s7906_s12  ;;  %v7298_v56 = vunpack.i.h.bf16 %v7296_v39  ;;  %v7297_v12 = vunpack.i.l.bf16 %v7296_v39 }
 0x18e   :  { %7585 = vrot.lane.b32.xlu0 %v10252_v60, %s7906_s12  ;;  %v6424_v60 = vld [vmem:[%s13568_s0 + $0x25a] sm:$0xff]  ;;  %v2923_v4 = vsel %vm2904_vm5, %v2858_v46, %v7302_v14  ;;  %v2924_v23 = vsel %vm2904_vm5, %v2859_v34, %v7303_v58  ;;  %v6301_v58 = vld [vmem:[%s13568_s0 + $0x290] sm:$0xff] }
 0x18f   :  { %v7311_v7 = vpop.permute.xlu1 %7310  ;;  %v10349_v36 = vpack.i.bf16 %v6425_v45, %v6424_v60  ;;  %v2922_v53 = vsel %vm2904_vm5, %v2857_v59, %v7298_v56  ;;  %v6298_v14 = vld [vmem:[%s13568_s0 + $0x270] sm:$0xff]  ;;  %v6299_v56 = vld [vmem:[%s13568_s0 + $0x278] sm:$0xff] }
 0x190   :  { %v7306_v57 = vpop.permute.xlu0 %7305  ;;  %v7313_v9 = vunpack.i.h.bf16 %v7311_v7  ;;  %v7312_v33 = vunpack.i.l.bf16 %v7311_v7  ;;  %v7654_v59 = vpack.i.bf16 %v6299_v56, %v6298_v14 }
 0x191   :  { %7600 = vrot.lane.b32.xlu1 %v10317_v26, %s7907_s17  ;;  %v7308_v6 = vunpack.i.h.bf16 %v7306_v57  ;;  %v7307_v2 = vunpack.i.l.bf16 %v7306_v57  ;;  %v6236_v57 = vld [vmem:[%s13568_s0 + $0x272] sm:$0xff] }
 0x192   :  { %7595 = vrot.lane.b32.xlu0 %v10265_v61, %s7907_s17  ;;  %v2856_v61 = vsel %vm2839_vm4, %v9425_v11, %v7287_v18  ;;  %v2988_v11 = vsel %vm2969_vm6, %v2923_v4, %v7312_v33  ;;  %v2989_v30 = vsel %vm2969_vm6, %v2924_v23, %v7313_v9  ;;  %v6365_v33 = vld [vmem:[%s13568_s0 + $0x291] sm:$0xff] }
 0x193   :  { %v7321_v3 = vpop.permute.xlu1 %7320  ;;  %v2921_v42 = vsel %vm2904_vm5, %v2856_v61, %v7297_v12  ;;  %v2987_v38 = vsel %vm2969_vm6, %v2922_v53, %v7308_v6  ;;  %v6364_v12 = vld [vmem:[%s13568_s0 + $0x289] sm:$0xff] }
 0x194   :  { %v7316_v62 = vpop.permute.xlu0 %7315  ;;  %v7323_v20 = vunpack.i.h.bf16 %v7321_v3  ;;  %v7322_v19 = vunpack.i.l.bf16 %v7321_v3  ;;  %v2986_v17 = vsel %vm2969_vm6, %v2921_v42, %v7307_v2  ;;  %v6429_v3 = vld [vmem:[%s13568_s0 + $0x292] sm:$0xff]  ;;  %v7669_v4 = vpack.i.bf16 %v6365_v33, %v6364_v12 }
 0x195   :  { %7610 = vrot.lane.b32.xlu1 %v7609_v0, %s7908_s24  ;;  %v7318_v44 = vunpack.i.h.bf16 %v7316_v62  ;;  %v7317_v47 = vunpack.i.l.bf16 %v7316_v62 }
 0x196   :  { %7605 = vrot.lane.b32.xlu0 %v7604_v29, %s7908_s24  ;;  %v3053_v55 = vsel %vm3034_vm7, %v2988_v11, %v7322_v19  ;;  %v3054_v37 = vsel %vm3034_vm7, %v2989_v30, %v7323_v20  ;;  %v10402_v29 = vpack.i.bf16 %v6237_v1, %v6236_v57 }
 0x197   :  { %v7331_v10 = vpop.permute.xlu1 %7330  ;;  %v3051_v39 = vsel %vm3034_vm7, %v2986_v17, %v7317_v47  ;;  %v3052_v16 = vsel %vm3034_vm7, %v2987_v38, %v7318_v44 }
 0x198   :  { %v7333_v52 = vunpack.i.h.bf16 %v7331_v10  ;;  %v7332_v43 = vunpack.i.l.bf16 %v7331_v10  ;;  %v7326_v28 = vpop.permute.xlu0 %7325 }
 0x199   :  { %v7328_v22 = vunpack.i.h.bf16 %v7326_v28  ;;  %v7327_v49 = vunpack.i.l.bf16 %v7326_v28  ;;  %7620 = vrot.lane.b32.xlu1 %v7619_v40, %s7909_s1 }
 0x19a   :  { %v3118_v51 = vsel %vm3099_vm8, %v3053_v55, %v7332_v43  ;;  %v3119_v27 = vsel %vm3099_vm8, %v3054_v37, %v7333_v52  ;;  %7615 = vrot.lane.b32.xlu0 %v10303_v5, %s7909_s1  ;;  %v10388_v5 = vpack.i.bf16 %v6173_v15, %v6172_v54 }
 0x19b   :  { %v3116_v7 = vsel %vm3099_vm8, %v3051_v39, %v7327_v49  ;;  %v3117_v13 = vsel %vm3099_vm8, %v3052_v16, %v7328_v22  ;;  %v7341_v60 = vpop.permute.xlu1 %7340  ;;  %v3173_v45 = vpack.c.bf16 %v3119_v27, %v3118_v51 }
 0x19c   :  { %v7336_v63 = vpop.permute.xlu0 %7335  ;;  %v3172_v32 = vpack.c.bf16 %v3117_v13, %v3116_v7  ;;  %v7343_v46 = vunpack.i.h.bf16 %v7341_v60  ;;  %v7342_v34 = vunpack.i.l.bf16 %v7341_v60 }
 0x19d   :  { %7630 = vrot.lane.b32.xlu1 %v10349_v36, %s7910_s25  ;;  %v7338_v2 = vunpack.i.h.bf16 %v7336_v63  ;;  %v7337_v62 = vunpack.i.l.bf16 %v7336_v63 }
 0x19e   :  { %7625 = vrot.lane.b32.xlu0 %v10317_v26, %s7910_s25  ;;  %6539 = vmatprep.mubr.msk.bf16.mxu0 %vm3216_vm9, %v3172_v32  ;;  %v6300_v26 = vld [vmem:[%s13568_s0 + $0x288] sm:$0xff]  ;;  %v2862_v30 = vsel %vm2839_vm4, %v9434_v25, %v7342_v34  ;;  %v2863_v10 = vsel %vm2839_vm4, %v9438_v48, %v7343_v46 }
 0x19f   :  { %6540 = vmatmul.mubr.msk.bf16.gmra.mrb[16].mxu0 %vm3216_vm9, %v3173_v45  ;;  %v7351_v18 = vpop.permute.xlu1 %7350  ;;  %v7659_v61 = vpack.i.bf16 %v6301_v58, %v6300_v26  ;;  %v2861_v43 = vsel %vm2839_vm4, %v9453_v50, %v7338_v2  ;;  %v6177_v26 = vld [vmem:[%s13568_s0 + $0x2a9] sm:$0xff]  ;;  %v6305_v2 = vld [vmem:[%s13568_s0 + $0x2c0] sm:$0xff] }
 0x1a0   :  { %v7346_v0 = vpop.permute.xlu0 %7345  ;;  %v7353_v20 = vunpack.i.h.bf16 %v7351_v18  ;;  %v7352_v19 = vunpack.i.l.bf16 %v7351_v18 }
 0x1a1   :  { %7640 = vrot.lane.b32.xlu1 %v10388_v5, %s7906_s12  ;;  %v7348_v44 = vunpack.i.h.bf16 %v7346_v0  ;;  %v7347_v47 = vunpack.i.l.bf16 %v7346_v0  ;;  %v6176_v0 = vld [vmem:[%s13568_s0 + $0x2a1] sm:$0xff] }
 0x1a2   :  { %7635 = vrot.lane.b32.xlu0 %v7619_v40, %s7906_s12  ;;  %v6428_v40 = vld [vmem:[%s13568_s0 + $0x28a] sm:$0xff]  ;;  %v2927_v37 = vsel %vm2904_vm5, %v2862_v30, %v7352_v19  ;;  %v2928_v25 = vsel %vm2904_vm5, %v2863_v10, %v7353_v20  ;;  %v6369_v19 = vld [vmem:[%s13568_s0 + $0x2c1] sm:$0xff] }
 0x1a3   :  { %v7361_v9 = vpop.permute.xlu1 %7360  ;;  %v10433_v23 = vpack.i.bf16 %v6429_v3, %v6428_v40  ;;  %v2926_v39 = vsel %vm2904_vm5, %v2861_v43, %v7348_v44  ;;  %v6240_v40 = vld [vmem:[%s13568_s0 + $0x2a2] sm:$0xff]  ;;  %v6241_v3 = vld [vmem:[%s13568_s0 + $0x2aa] sm:$0xff] }
 0x1a4   :  { %v7356_v6 = vpop.permute.xlu0 %7355  ;;  %v7363_v42 = vunpack.i.h.bf16 %v7361_v9  ;;  %v7362_v53 = vunpack.i.l.bf16 %v7361_v9  ;;  %v6433_v44 = vld [vmem:[%s13568_s0 + $0x2c2] sm:$0xff] }
 0x1a5   :  { %7650 = vrot.lane.b32.xlu1 %v10402_v29, %s7907_s17  ;;  %v7358_v17 = vunpack.i.h.bf16 %v7356_v6  ;;  %v7357_v38 = vunpack.i.l.bf16 %v7356_v6  ;;  %v10486_v6 = vpack.i.bf16 %v6241_v3, %v6240_v40  ;;  %v6181_v40 = vld [vmem:[%s13568_s0 + $0x2d9] sm:$0xff] }
 0x1a6   :  { %7645 = vrot.lane.b32.xlu0 %v10349_v36, %s7907_s17  ;;  %v2860_v36 = vsel %vm2839_vm4, %v9449_v24, %v7337_v62  ;;  %v2992_v24 = vsel %vm2969_vm6, %v2927_v37, %v7362_v53  ;;  %v2993_v50 = vsel %vm2969_vm6, %v2928_v25, %v7363_v42  ;;  %v6302_v62 = vld [vmem:[%s13568_s0 + $0x2a0] sm:$0xff] }
 0x1a7   :  { %v7371_v11 = vpop.permute.xlu1 %7370  ;;  %v2925_v48 = vsel %vm2904_vm5, %v2860_v36, %v7347_v47  ;;  %v2991_v27 = vsel %vm2969_vm6, %v2926_v39, %v7358_v17 }
 0x1a8   :  { %v7366_v52 = vpop.permute.xlu0 %7365  ;;  %v7373_v28 = vunpack.i.h.bf16 %v7371_v11  ;;  %v7372_v55 = vunpack.i.l.bf16 %v7371_v11  ;;  %v2990_v51 = vsel %vm2969_vm6, %v2925_v48, %v7357_v38 }
 0x1a9   :  { %7660 = vrot.lane.b32.xlu1 %v7659_v61, %s7908_s24  ;;  %v7368_v22 = vunpack.i.h.bf16 %v7366_v52  ;;  %v7367_v49 = vunpack.i.l.bf16 %v7366_v52  ;;  %v6303_v61 = vld [vmem:[%s13568_s0 + $0x2a8] sm:$0xff] }
 0x1aa   :  { %7655 = vrot.lane.b32.xlu0 %v7654_v59, %s7908_s24  ;;  %v3057_v13 = vsel %vm3034_vm7, %v2992_v24, %v7372_v55  ;;  %v3058_v60 = vsel %vm3034_vm7, %v2993_v50, %v7373_v28  ;;  %v6368_v59 = vld [vmem:[%s13568_s0 + $0x2b9] sm:$0xff]  ;;  %v7704_v17 = vpack.i.bf16 %v6303_v61, %v6302_v62 }
 0x1ab   :  { %v7381_v16 = vpop.permute.xlu1 %7380  ;;  %v3055_v32 = vsel %vm3034_vm7, %v2990_v51, %v7367_v49  ;;  %v3056_v57 = vsel %vm3034_vm7, %v2991_v27, %v7368_v22  ;;  %v7719_v36 = vpack.i.bf16 %v6369_v19, %v6368_v59  ;;  %v6244_v61 = vld [vmem:[%s13568_s0 + $0x2d2] sm:$0xff]  ;;  %v6245_v59 = vld [vmem:[%s13568_s0 + $0x2da] sm:$0xff] }
 0x1ac   :  { %v7383_v54 = vunpack.i.h.bf16 %v7381_v16  ;;  %v7382_v15 = vunpack.i.l.bf16 %v7381_v16  ;;  %v7376_v7 = vpop.permute.xlu0 %7375 }
 0x1ad   :  { %v7378_v45 = vunpack.i.h.bf16 %v7376_v7  ;;  %v7377_v63 = vunpack.i.l.bf16 %v7376_v7  ;;  %7670 = vrot.lane.b32.xlu1 %v7669_v4, %s7909_s1 }
 0x1ae   :  { %v3122_v1 = vsel %vm3099_vm8, %v3057_v13, %v7382_v15  ;;  %v3123_v18 = vsel %vm3099_vm8, %v3058_v60, %v7383_v54  ;;  %7665 = vrot.lane.b32.xlu0 %v10388_v5, %s7909_s1  ;;  %v10472_v5 = vpack.i.bf16 %v6177_v26, %v6176_v0 }
 0x1af   :  { %v3120_v58 = vsel %vm3099_vm8, %v3055_v32, %v7377_v63  ;;  %v3121_v14 = vsel %vm3099_vm8, %v3056_v57, %v7378_v45  ;;  %v7391_v56 = vpop.permute.xlu1 %7390  ;;  %v3175_v12 = vpack.c.bf16 %v3123_v18, %v3122_v1 }
 0x1b0   :  { %v7386_v9 = vpop.permute.xlu0 %7385  ;;  %v3174_v33 = vpack.c.bf16 %v3121_v14, %v3120_v58  ;;  %v7393_v47 = vunpack.i.h.bf16 %v7391_v56  ;;  %v7392_v42 = vunpack.i.l.bf16 %v7391_v56 }
 0x1b1   :  { %7680 = vrot.lane.b32.xlu1 %v10433_v23, %s7910_s25  ;;  %v7388_v11 = vunpack.i.h.bf16 %v7386_v9  ;;  %v7387_v30 = vunpack.i.l.bf16 %v7386_v9 }
 0x1b2   :  { %7675 = vrot.lane.b32.xlu0 %v10402_v29, %s7910_s25  ;;  %6543 = vmatprep.mubr.msk.bf16.mxu0 %vm3216_vm9, %v3174_v33  ;;  %v6304_v29 = vld [vmem:[%s13568_s0 + $0x2b8] sm:$0xff]  ;;  %v2866_v49 = vsel %vm2839_vm4, %v9460_v21, %v7392_v42  ;;  %v2867_v48 = vsel %vm2839_vm4, %v9464_v41, %v7393_v47  ;;  %v6306_v47 = vld [vmem:[%s13568_s0 + $0x2d0] sm:$0xff] }
 0x1b3   :  { %6544 = vmatmul.mubr.msk.bf16.gmra.mrb[20].mxu0 %vm3216_vm9, %v3175_v12  ;;  %v7401_v46 = vpop.permute.xlu1 %7400  ;;  %v7709_v10 = vpack.i.bf16 %v6305_v2, %v6304_v29  ;;  %v2865_v16 = vsel %vm2839_vm4, %v9479_v35, %v7388_v11  ;;  %v6180_v33 = vld [vmem:[%s13568_s0 + $0x2d1] sm:$0xff] }
 0x1b4   :  { %v7396_v34 = vpop.permute.xlu0 %7395  ;;  %v7403_v38 = vunpack.i.h.bf16 %v7401_v46  ;;  %v7402_v52 = vunpack.i.l.bf16 %v7401_v46  ;;  %v6307_v42 = vld [vmem:[%s13568_s0 + $0x2d8] sm:$0xff] }
 0x1b5   :  { %7690 = vrot.lane.b32.xlu1 %v10472_v5, %s7906_s12  ;;  %v7398_v28 = vunpack.i.h.bf16 %v7396_v34  ;;  %v7397_v55 = vunpack.i.l.bf16 %v7396_v34 }
 0x1b6   :  { %7685 = vrot.lane.b32.xlu0 %v7669_v4, %s7906_s12  ;;  %v6432_v4 = vld [vmem:[%s13568_s0 + $0x2ba] sm:$0xff]  ;;  %v2931_v54 = vsel %vm2904_vm5, %v2866_v49, %v7402_v52  ;;  %v2932_v21 = vsel %vm2904_vm5, %v2867_v48, %v7403_v38 }
 0x1b7   :  { %v7411_v20 = vpop.permute.xlu1 %7410  ;;  %v10517_v43 = vpack.i.bf16 %v6433_v44, %v6432_v4  ;;  %v2930_v13 = vsel %vm2904_vm5, %v2865_v16, %v7398_v28  ;;  %v10570_v4 = vpack.i.bf16 %v6245_v59, %v6244_v61  ;;  %v6309_v44 = vld [vmem:[%s13568_s0 + $0x2f0] sm:$0xff]  ;;  %v6184_v59 = vld [vmem:[%s13568_s0 + $0x301] sm:$0xff] }
 0x1b8   :  { %v7406_v53 = vpop.permute.xlu0 %7405  ;;  %v7413_v37 = vunpack.i.h.bf16 %v7411_v20  ;;  %v7412_v25 = vunpack.i.l.bf16 %v7411_v20 }
 0x1b9   :  { %7700 = vrot.lane.b32.xlu1 %v10486_v6, %s7907_s17  ;;  %v7408_v39 = vunpack.i.h.bf16 %v7406_v53  ;;  %v7407_v24 = vunpack.i.l.bf16 %v7406_v53  ;;  %v6372_v53 = vld [vmem:[%s13568_s0 + $0x2e9] sm:$0xff] }
 0x1ba   :  { %7695 = vrot.lane.b32.xlu0 %v10433_v23, %s7907_s17  ;;  %v2864_v23 = vsel %vm2839_vm4, %v9475_v8, %v7387_v30  ;;  %v2996_v8 = vsel %vm2969_vm6, %v2931_v54, %v7412_v25  ;;  %v2997_v35 = vsel %vm2969_vm6, %v2932_v21, %v7413_v37  ;;  %v6373_v30 = vld [vmem:[%s13568_s0 + $0x2f1] sm:$0xff]  ;;  %v7754_v25 = vpack.i.bf16 %v6307_v42, %v6306_v47  ;;  %v13993_v54 = vld [vmem:[#allocation27_spill] sm:$0xff] }
 0x1bb   :  { %v7421_v22 = vpop.permute.xlu1 %7420  ;;  %v2929_v41 = vsel %vm2904_vm5, %v2864_v23, %v7397_v55  ;;  %v2995_v63 = vsel %vm2969_vm6, %v2930_v13, %v7408_v39  ;;  %v7769_v48 = vpack.i.bf16 %v6373_v30, %v6372_v53  ;;  %v13994_v13 = vld [vmem:[#allocation17_spill] sm:$0xff]  ;;  %v6249_v30 = vld [vmem:[%s13568_s0 + $0x30a] sm:$0xff] }
 0x1bc   :  { %v7416_v50 = vpop.permute.xlu0 %7415  ;;  %v7423_v51 = vunpack.i.h.bf16 %v7421_v22  ;;  %v7422_v27 = vunpack.i.l.bf16 %v7421_v22  ;;  %v2994_v45 = vsel %vm2969_vm6, %v2929_v41, %v7407_v24 }
 0x1bd   :  { %7710 = vrot.lane.b32.xlu1 %v7709_v10, %s7908_s24  ;;  %v7418_v15 = vunpack.i.h.bf16 %v7416_v50  ;;  %v7417_v7 = vunpack.i.l.bf16 %v7416_v50  ;;  %v6436_v10 = vld [vmem:[%s13568_s0 + $0x2ea] sm:$0xff] }
 0x1be   :  { %7705 = vrot.lane.b32.xlu0 %v7704_v17, %s7908_s24  ;;  %v3061_v18 = vsel %vm3034_vm7, %v2996_v8, %v7422_v27  ;;  %v3062_v0 = vsel %vm3034_vm7, %v2997_v35, %v7423_v51  ;;  %v6437_v17 = vld [vmem:[%s13568_s0 + $0x2f2] sm:$0xff]  ;;  %v13995_v8 = vld [vmem:[#allocation18_spill] sm:$0xff] }
 0x1bf   :  { %v7431_v60 = vpop.permute.xlu1 %7430  ;;  %v3059_v14 = vsel %vm3034_vm7, %v2994_v45, %v7417_v7  ;;  %v3060_v56 = vsel %vm3034_vm7, %v2995_v63, %v7418_v15  ;;  %v10601_v39 = vpack.i.bf16 %v6437_v17, %v6436_v10 }
 0x1c0   :  { %v7433_v32 = vunpack.i.h.bf16 %v7431_v60  ;;  %v7432_v57 = vunpack.i.l.bf16 %v7431_v60  ;;  %v7426_v1 = vpop.permute.xlu0 %7425 }
 0x1c1   :  { %v7428_v26 = vunpack.i.h.bf16 %v7426_v1  ;;  %v7427_v58 = vunpack.i.l.bf16 %v7426_v1  ;;  %7720 = vrot.lane.b32.xlu1 %v7719_v36, %s7909_s1 }
 0x1c2   :  { %v3126_v12 = vsel %vm3099_vm8, %v3061_v18, %v7432_v57  ;;  %v3127_v9 = vsel %vm3099_vm8, %v3062_v0, %v7433_v32  ;;  %7715 = vrot.lane.b32.xlu0 %v10472_v5, %s7909_s1  ;;  %v10556_v5 = vpack.i.bf16 %v6181_v40, %v6180_v33 }
 0x1c3   :  { %v3177_v3 = vpack.c.bf16 %v3127_v9, %v3126_v12  ;;  %v3124_v46 = vsel %vm3099_vm8, %v3059_v14, %v7427_v58  ;;  %v3125_v34 = vsel %vm3099_vm8, %v3060_v56, %v7428_v26  ;;  %v7441_v29 = vpop.permute.xlu1 %7440 }
 0x1c4   :  { %v3176_v2 = vpack.c.bf16 %v3125_v34, %v3124_v46  ;;  %v7436_v62 = vpop.permute.xlu0 %7435  ;;  %v7443_v38 = vunpack.i.h.bf16 %v7441_v29  ;;  %v7442_v52 = vunpack.i.l.bf16 %v7441_v29 }
 0x1c5   :  { %7730 = vrot.lane.b32.xlu1 %v10517_v43, %s7910_s25  ;;  %v7438_v28 = vunpack.i.h.bf16 %v7436_v62  ;;  %v7437_v55 = vunpack.i.l.bf16 %v7436_v62 }
 0x1c6   :  { %7725 = vrot.lane.b32.xlu0 %v10486_v6, %s7910_s25  ;;  %6547 = vmatprep.mubr.msk.bf16.mxu0 %vm3216_vm9, %v3176_v2  ;;  %v6308_v6 = vld [vmem:[%s13568_s0 + $0x2e8] sm:$0xff]  ;;  %v2870_v27 = vsel %vm2839_vm4, %v9487_v31, %v7442_v52  ;;  %v2871_v21 = vsel %vm2839_vm4, %v13993_v54, %v7443_v38  ;;  %v6313_v52 = vld [vmem:[%s13568_s0 + $0x320] sm:$0xff] }
 0x1c7   :  { %6548 = vmatmul.mubr.msk.bf16.gmra.mrb[24].mxu0 %vm3216_vm9, %v3177_v3  ;;  %v7451_v20 = vpop.permute.xlu1 %7450  ;;  %v7759_v37 = vpack.i.bf16 %v6309_v44, %v6308_v6  ;;  %v2869_v35 = vsel %vm2839_vm4, %v13995_v8, %v7438_v28  ;;  %v6311_v28 = vld [vmem:[%s13568_s0 + $0x308] sm:$0xff] }
 0x1c8   :  { %v7446_v19 = vpop.permute.xlu0 %7445  ;;  %v7453_v22 = vunpack.i.h.bf16 %v7451_v20  ;;  %v7452_v49 = vunpack.i.l.bf16 %v7451_v20  ;;  %v6185_v20 = vld [vmem:[%s13568_s0 + $0x309] sm:$0xff] }
 0x1c9   :  { %7740 = vrot.lane.b32.xlu1 %v10556_v5, %s7906_s12  ;;  %v7448_v24 = vunpack.i.h.bf16 %v7446_v19  ;;  %v7447_v50 = vunpack.i.l.bf16 %v7446_v19 }
 0x1ca   :  { %7735 = vrot.lane.b32.xlu0 %v7719_v36, %s7906_s12  ;;  %v2935_v63 = vsel %vm2904_vm5, %v2870_v27, %v7452_v49  ;;  %v2936_v31 = vsel %vm2904_vm5, %v2871_v21, %v7453_v22  ;;  %v6440_v22 = vld [vmem:[%s13568_s0 + $0x31a] sm:$0xff]  ;;  %v6441_v49 = vld [vmem:[%s13568_s0 + $0x322] sm:$0xff] }
 0x1cb   :  { %v7461_v11 = vpop.permute.xlu1 %7460  ;;  %v2934_v18 = vsel %vm2904_vm5, %v2869_v35, %v7448_v24 }
 0x1cc   :  { %v7456_v36 = vpop.permute.xlu0 %7455  ;;  %v7463_v23 = vunpack.i.h.bf16 %v7461_v11  ;;  %v7462_v16 = vunpack.i.l.bf16 %v7461_v11  ;;  %v6248_v11 = vld [vmem:[%s13568_s0 + $0x302] sm:$0xff] }
 0x1cd   :  { %7750 = vrot.lane.b32.xlu1 %v10570_v4, %s7907_s17  ;;  %v7458_v15 = vunpack.i.h.bf16 %v7456_v36  ;;  %v7457_v7 = vunpack.i.l.bf16 %v7456_v36  ;;  %v10654_v38 = vpack.i.bf16 %v6249_v30, %v6248_v11  ;;  %v6310_v36 = vld [vmem:[%s13568_s0 + $0x300] sm:$0xff] }
 0x1ce   :  { %7745 = vrot.lane.b32.xlu0 %v10517_v43, %s7907_s17  ;;  %v2868_v43 = vsel %vm2839_vm4, %v13994_v13, %v7437_v55  ;;  %v3000_v0 = vsel %vm2969_vm6, %v2935_v63, %v7462_v16  ;;  %v3001_v26 = vsel %vm2969_vm6, %v2936_v31, %v7463_v23  ;;  %v6376_v55 = vld [vmem:[%s13568_s0 + $0x319] sm:$0xff]  ;;  %v7804_v27 = vpack.i.bf16 %v6311_v28, %v6310_v36  ;;  %v13997_v63 = vld [vmem:[#allocation19_spill] sm:$0xff] }
 0x1cf   :  { %v7471_v51 = vpop.permute.xlu1 %7470  ;;  %v2933_v1 = vsel %vm2904_vm5, %v2868_v43, %v7447_v50  ;;  %v2999_v56 = vsel %vm2969_vm6, %v2934_v18, %v7458_v15  ;;  %v13998_v18 = vld [vmem:[#allocation22_spill] sm:$0xff] }
 0x1d0   :  { %v7466_v41 = vpop.permute.xlu0 %7465  ;;  %v7473_v60 = vunpack.i.h.bf16 %v7471_v51  ;;  %v7472_v45 = vunpack.i.l.bf16 %v7471_v51  ;;  %v2998_v14 = vsel %vm2969_vm6, %v2933_v1, %v7457_v7  ;;  %v10685_v7 = vpack.i.bf16 %v6441_v49, %v6440_v22  ;;  %v6253_v22 = vld [vmem:[%s13568_s0 + $0x33a] sm:$0xff] }
 0x1d1   :  { %7760 = vrot.lane.b32.xlu1 %v7759_v37, %s7908_s24  ;;  %v7468_v32 = vunpack.i.h.bf16 %v7466_v41  ;;  %v7467_v57 = vunpack.i.l.bf16 %v7466_v41 }
 0x1d2   :  { %7755 = vrot.lane.b32.xlu0 %v7754_v25, %s7908_s24  ;;  %v3065_v40 = vsel %vm3034_vm7, %v3000_v0, %v7472_v45  ;;  %v3066_v3 = vsel %vm3034_vm7, %v3001_v26, %v7473_v60  ;;  %v6377_v25 = vld [vmem:[%s13568_s0 + $0x321] sm:$0xff]  ;;  %v13996_v60 = vld [vmem:[#allocation16_spill] sm:$0xff]  ;;  %v13999_v0 = vld [vmem:[#allocation25_spill] sm:$0xff] }
 0x1d3   :  { %v7481_v58 = vpop.permute.xlu1 %7480  ;;  %v3063_v29 = vsel %vm3034_vm7, %v2998_v14, %v7467_v57  ;;  %v3064_v2 = vsel %vm3034_vm7, %v2999_v56, %v7468_v32  ;;  %v7819_v15 = vpack.i.bf16 %v6377_v25, %v6376_v55  ;;  %v6252_v25 = vld [vmem:[%s13568_s0 + $0x332] sm:$0xff] }
 0x1d4   :  { %v7483_v12 = vunpack.i.h.bf16 %v7481_v58  ;;  %v7482_v9 = vunpack.i.l.bf16 %v7481_v58  ;;  %v7476_v33 = vpop.permute.xlu0 %7475 }
 0x1d5   :  { %v7478_v46 = vunpack.i.h.bf16 %v7476_v33  ;;  %v7477_v34 = vunpack.i.l.bf16 %v7476_v33  ;;  %7770 = vrot.lane.b32.xlu1 %v7769_v48, %s7909_s1 }
 0x1d6   :  { %v3130_v62 = vsel %vm3099_vm8, %v3065_v40, %v7482_v9  ;;  %v3131_v61 = vsel %vm3099_vm8, %v3066_v3, %v7483_v12  ;;  %7765 = vrot.lane.b32.xlu0 %v10556_v5, %s7909_s1  ;;  %v10640_v5 = vpack.i.bf16 %v6185_v20, %v6184_v59 }
 0x1d7   :  { %v3179_v19 = vpack.c.bf16 %v3131_v61, %v3130_v62  ;;  %v3128_v6 = vsel %vm3099_vm8, %v3063_v29, %v7477_v34  ;;  %v3129_v44 = vsel %vm3099_vm8, %v3064_v2, %v7478_v46  ;;  %v7491_v47 = vpop.permute.xlu1 %7490 }
 0x1d8   :  { %v3178_v42 = vpack.c.bf16 %v3129_v44, %v3128_v6  ;;  %v7486_v53 = vpop.permute.xlu0 %7485  ;;  %v7492_v24 = vunpack.i.l.bf16 %v7491_v47 }
 0x1d9   :  { %7780 = vrot.lane.b32.xlu1 %v10601_v39, %s7910_s25  ;;  %v7488_v23 = vunpack.i.h.bf16 %v7486_v53  ;;  %v7487_v16 = vunpack.i.l.bf16 %v7486_v53 }
 0x1da   :  { %7775 = vrot.lane.b32.xlu0 %v10570_v4, %s7910_s25  ;;  %6551 = vmatprep.mubr.msk.bf16.mxu0 %vm3216_vm9, %v3178_v42  ;;  %v6312_v4 = vld [vmem:[%s13568_s0 + $0x318] sm:$0xff]  ;;  %v2874_v45 = vsel %vm2839_vm4, %v13996_v60, %v7492_v24  ;;  %v10738_v24 = vpack.i.bf16 %v6253_v22, %v6252_v25 }
 0x1db   :  { %6552 = vmatmul.mubr.msk.bf16.gmra.mrb[28].mxu0 %vm3216_vm9, %v3179_v19  ;;  %v7501_v10 = vpop.permute.xlu1 %7500  ;;  %v7809_v51 = vpack.i.bf16 %v6313_v52, %v6312_v4  ;;  %v2873_v26 = vsel %vm2839_vm4, %v13999_v0, %v7488_v23  ;;  %v6314_v23 = vld [vmem:[%s13568_s0 + $0x330] sm:$0xff] }
 0x1dc   :  { %v7496_v17 = vpop.permute.xlu0 %7495  ;;  %v7503_v54 = vunpack.i.h.bf16 %v7501_v10  ;;  %v7502_v21 = vunpack.i.l.bf16 %v7501_v10  ;;  %v6188_v10 = vld [vmem:[%s13568_s0 + $0x331] sm:$0xff] }
 0x1dd   :  { %7790 = vrot.lane.b32.xlu1 %v10640_v5, %s7906_s12  ;;  %v7498_v41 = vunpack.i.h.bf16 %v7496_v17  ;;  %v7497_v13 = vunpack.i.l.bf16 %v7496_v17  ;;  %v6189_v17 = vld [vmem:[%s13568_s0 + $0x339] sm:$0xff] }
 0x1de   :  { %7785 = vrot.lane.b32.xlu0 %v7769_v48, %s7906_s12  ;;  %v7493_v48 = vunpack.i.h.bf16 %v7491_v47  ;;  %v2939_v56 = vsel %vm2904_vm5, %v2874_v45, %v7502_v21  ;;  %v6444_v21 = vld [vmem:[%s13568_s0 + $0x34a] sm:$0xff] }
 0x1df   :  { %v7511_v37 = vpop.permute.xlu1 %7510  ;;  %v2938_v3 = vsel %vm2904_vm5, %v2873_v26, %v7498_v41 }
 0x1e0   :  { %v7506_v50 = vpop.permute.xlu0 %7505  ;;  %v7513_v43 = vunpack.i.h.bf16 %v7511_v37  ;;  %v7512_v8 = vunpack.i.l.bf16 %v7511_v37  ;;  %v2875_v31 = vsel %vm2839_vm4, %v13997_v63, %v7493_v48  ;;  %v10724_v37 = vpack.i.bf16 %v6189_v17, %v6188_v10 }
 0x1e1   :  { %7800 = vrot.lane.b32.xlu1 %v10654_v38, %s7907_s17  ;;  %v7508_v32 = vunpack.i.h.bf16 %v7506_v50  ;;  %v7507_v57 = vunpack.i.l.bf16 %v7506_v50  ;;  %v2940_v12 = vsel %vm2904_vm5, %v2875_v31, %v7503_v54  ;;  %v6317_v50 = vld [vmem:[%s13568_s0 + $0x350] sm:$0xff] }
 0x1e2   :  { %7795 = vrot.lane.b32.xlu0 %v10601_v39, %s7907_s17  ;;  %v2872_v39 = vsel %vm2839_vm4, %v13998_v18, %v7487_v16  ;;  %v3004_v46 = vsel %vm2969_vm6, %v2939_v56, %v7512_v8  ;;  %v3005_v34 = vsel %vm2969_vm6, %v2940_v12, %v7513_v43  ;;  %v6315_v16 = vld [vmem:[%s13568_s0 + $0x338] sm:$0xff] }
 0x1e3   :  { %v7521_v35 = vpop.permute.xlu1 %7520  ;;  %v2937_v40 = vsel %vm2904_vm5, %v2872_v39, %v7497_v13  ;;  %v3003_v62 = vsel %vm2969_vm6, %v2938_v3, %v7508_v32  ;;  %v6381_v54 = vld [vmem:[%s13568_s0 + $0x351] sm:$0xff]  ;;  %v7854_v45 = vpack.i.bf16 %v6315_v16, %v6314_v23  ;;  %v14002_v3 = vld [vmem:[#allocation23_spill] sm:$0xff] }
 0x1e4   :  { %v7516_v1 = vpop.permute.xlu0 %7515  ;;  %v7523_v58 = vunpack.i.h.bf16 %v7521_v35  ;;  %v7522_v14 = vunpack.i.l.bf16 %v7521_v35  ;;  %v3002_v2 = vsel %vm2969_vm6, %v2937_v40, %v7507_v57  ;;  %v14001_v56 = vld [vmem:[#allocation33_spill] sm:$0xff] }
 0x1e5   :  { %7810 = vrot.lane.b32.xlu1 %v7809_v51, %s7908_s24  ;;  %v7518_v9 = vunpack.i.h.bf16 %v7516_v1  ;;  %v7517_v33 = vunpack.i.l.bf16 %v7516_v1  ;;  %v6380_v51 = vld [vmem:[%s13568_s0 + $0x349] sm:$0xff] }
 0x1e6   :  { %7805 = vrot.lane.b32.xlu0 %v7804_v27, %s7908_s24  ;;  %v3069_v19 = vsel %vm3034_vm7, %v3004_v46, %v7522_v14  ;;  %v3070_v6 = vsel %vm3034_vm7, %v3005_v34, %v7523_v58  ;;  %v7869_v32 = vpack.i.bf16 %v6381_v54, %v6380_v51  ;;  %v14000_v58 = vld [vmem:[#allocation32_spill] sm:$0xff] }
 0x1e7   :  { %v7531_v29 = vpop.permute.xlu1 %7530  ;;  %v3067_v11 = vsel %vm3034_vm7, %v3002_v2, %v7517_v33  ;;  %v3068_v30 = vsel %vm3034_vm7, %v3003_v62, %v7518_v9 }
 0x1e8   :  { %v7533_v61 = vunpack.i.h.bf16 %v7531_v29  ;;  %v7532_v59 = vunpack.i.l.bf16 %v7531_v29  ;;  %v7526_v20 = vpop.permute.xlu0 %7525 }
 0x1e9   :  { %v7528_v44 = vunpack.i.h.bf16 %v7526_v20  ;;  %v7527_v47 = vunpack.i.l.bf16 %v7526_v20  ;;  %7820 = vrot.lane.b32.xlu1 %v7819_v15, %s7909_s1 }
 0x1ea   :  { %v3134_v42 = vsel %vm3099_vm8, %v3069_v19, %v7532_v59  ;;  %v3135_v53 = vsel %vm3099_vm8, %v3070_v6, %v7533_v61  ;;  %7815 = vrot.lane.b32.xlu0 %v10640_v5, %s7909_s1 }
 0x1eb   :  { %v3181_v4 = vpack.c.bf16 %v3135_v53, %v3134_v42  ;;  %v7541_v52 = vpop.permute.xlu1 %7540  ;;  %v3132_v36 = vsel %vm3099_vm8, %v3067_v11, %v7527_v47  ;;  %v3133_v28 = vsel %vm3099_vm8, %v3068_v30, %v7528_v44 }
 0x1ec   :  { %v7536_v55 = vpop.permute.xlu0 %7535  ;;  %v3180_v5 = vpack.c.bf16 %v3133_v28, %v3132_v36  ;;  %v7543_v41 = vunpack.i.h.bf16 %v7541_v52  ;;  %v7542_v13 = vunpack.i.l.bf16 %v7541_v52 }
 0x1ed   :  { %7830 = vrot.lane.b32.xlu1 %v10685_v7, %s7910_s25  ;;  %v7538_v8 = vunpack.i.h.bf16 %v7536_v55  ;;  %v7537_v35 = vunpack.i.l.bf16 %v7536_v55 }
 0x1ee   :  { %7825 = vrot.lane.b32.xlu0 %v10654_v38, %s7910_s25  ;;  %6555 = vmatprep.mubr.msk.bf16.mxu1 %vm3216_vm9, %v3180_v5  ;;  %v6316_v38 = vld [vmem:[%s13568_s0 + $0x348] sm:$0xff]  ;;  %v2878_v14 = vsel %vm2839_vm4, %v14000_v58, %v7542_v13  ;;  %v2879_v12 = vsel %vm2839_vm4, %v14001_v56, %v7543_v41 }
 0x1ef   :  { %6556 = vmatmul.mubr.msk.bf16.vlgmr.msra.gmra.mrb[0].mxu1 %vm3216_vm9, %v3181_v4  ;;  %v7551_v49 = vpop.permute.xlu1 %7550  ;;  %v7859_v60 = vpack.i.bf16 %v6317_v50, %v6316_v38  ;;  %v2876_v46 = vsel %vm2839_vm4, %v14002_v3, %v7537_v35 }
 0x1f0   :  { %v7546_v48 = vpop.permute.xlu0 %7545  ;;  %v7553_v63 = vunpack.i.h.bf16 %v7551_v49  ;;  %v7552_v31 = vunpack.i.l.bf16 %v7551_v49 }
 0x1f1   :  { %7840 = vrot.lane.b32.xlu1 %v10724_v37, %s7906_s12  ;;  %v7548_v1 = vunpack.i.h.bf16 %v7546_v48  ;;  %v7547_v18 = vunpack.i.l.bf16 %v7546_v48 }
 0x1f2   :  { %7835 = vrot.lane.b32.xlu0 %v7819_v15, %s7906_s12  ;;  %v6445_v15 = vld [vmem:[%s13568_s0 + $0x352] sm:$0xff]  ;;  %v2943_v62 = vsel %vm2904_vm5, %v2878_v14, %v7552_v31  ;;  %v2944_v61 = vsel %vm2904_vm5, %v2879_v12, %v7553_v63  ;;  %v14007_v14 = vld [vmem:[#allocation30_spill] sm:$0xff] }
 0x1f3   :  { %v7561_v27 = vpop.permute.xlu1 %7560  ;;  %v7879_v57 = vpack.i.bf16 %v6445_v15, %v6444_v21  ;;  %v2941_v19 = vsel %vm2904_vm5, %v2876_v46, %v7547_v18 }
 0x1f4   :  { %v7556_v43 = vpop.permute.xlu0 %7555  ;;  %v7563_v39 = vunpack.i.h.bf16 %v7561_v27  ;;  %v7562_v0 = vunpack.i.l.bf16 %v7561_v27 }
 0x1f5   :  { %7850 = vrot.lane.b32.xlu1 %v10738_v24, %s7907_s17  ;;  %v7558_v9 = vunpack.i.h.bf16 %v7556_v43  ;;  %v7557_v33 = vunpack.i.l.bf16 %v7556_v43 }
 0x1f6   :  { %7845 = vrot.lane.b32.xlu0 %v10685_v7, %s7907_s17  ;;  %v14003_v7 = vld [vmem:[#allocation24_spill] sm:$0xff]  ;;  %v3008_v44 = vsel %vm2969_vm6, %v2943_v62, %v7562_v0  ;;  %v3009_v47 = vsel %vm2969_vm6, %v2944_v61, %v7563_v39 }
 0x1f7   :  { %v7571_v26 = vpop.permute.xlu1 %7570  ;;  %v2877_v34 = vsel %vm2839_vm4, %v14003_v7, %v7538_v8  ;;  %v3006_v53 = vsel %vm2969_vm6, %v2941_v19, %v7557_v33 }
 0x1f8   :  { %v7566_v40 = vpop.permute.xlu0 %7565  ;;  %v7573_v29 = vunpack.i.h.bf16 %v7571_v26  ;;  %v7572_v2 = vunpack.i.l.bf16 %v7571_v26  ;;  %v2942_v6 = vsel %vm2904_vm5, %v2877_v34, %v7548_v1  ;;  %v14006_v26 = vld [vmem:[#allocation29_spill] sm:$0xff] }
 0x1f9   :  { %7860 = vrot.lane.b32.xlu1 %v7859_v60, %s7908_s24  ;;  %v7568_v59 = vunpack.i.h.bf16 %v7566_v40  ;;  %v7567_v20 = vunpack.i.l.bf16 %v7566_v40  ;;  %v3007_v11 = vsel %vm2969_vm6, %v2942_v6, %v7558_v9 }
 0x1fa   :  { %7855 = vrot.lane.b32.xlu0 %v7854_v45, %s7908_s24  ;;  %v3073_v4 = vsel %vm3034_vm7, %v3008_v44, %v7572_v2  ;;  %v3074_v52 = vsel %vm3034_vm7, %v3009_v47, %v7573_v29 }
 0x1fb   :  { %v7581_v42 = vpop.permute.xlu1 %7580  ;;  %v3071_v55 = vsel %vm3034_vm7, %v3006_v53, %v7567_v20  ;;  %v3072_v5 = vsel %vm3034_vm7, %v3007_v11, %v7568_v59 }
 0x1fc   :  { %v7583_v30 = vunpack.i.h.bf16 %v7581_v42  ;;  %v7582_v10 = vunpack.i.l.bf16 %v7581_v42  ;;  %v7576_v17 = vpop.permute.xlu0 %7575 }
 0x1fd   :  { %v7578_v36 = vunpack.i.h.bf16 %v7576_v17  ;;  %v7577_v28 = vunpack.i.l.bf16 %v7576_v17  ;;  %7870 = vrot.lane.b32.xlu1 %v7869_v32, %s7909_s1 }
 0x1fe   :  { %v3138_v25 = vsel %vm3099_vm8, %v3073_v4, %v7582_v10  ;;  %v3139_v22 = vsel %vm3099_vm8, %v3074_v52, %v7583_v30  ;;  %7865 = vrot.lane.b32.xlu0 %v10724_v37, %s7909_s1 }
 0x1ff   :  { %v3183_v49 = vpack.c.bf16 %v3139_v22, %v3138_v25  ;;  %v3136_v48 = vsel %vm3099_vm8, %v3071_v55, %v7577_v28  ;;  %v3137_v38 = vsel %vm3099_vm8, %v3072_v5, %v7578_v36  ;;  %v7591_v50 = vpop.permute.xlu1 %7590 }
 0x200   :  { %v3182_v23 = vpack.c.bf16 %v3137_v38, %v3136_v48  ;;  %v7586_v16 = vpop.permute.xlu0 %7585  ;;  %v7593_v54 = vunpack.i.h.bf16 %v7591_v50  ;;  %v7592_v21 = vunpack.i.l.bf16 %v7591_v50 }
 0x201   :  { %7880 = vrot.lane.b32.xlu1 %v7879_v57, %s7910_s25  ;;  %v7588_v41 = vunpack.i.h.bf16 %v7586_v16  ;;  %v7587_v13 = vunpack.i.l.bf16 %v7586_v16  ;;  %v14005_v57 = vld [vmem:[#allocation39_spill] sm:$0xff] }
 0x202   :  { %7875 = vrot.lane.b32.xlu0 %v10738_v24, %s7910_s25  ;;  %6559 = vmatprep.mubr.msk.bf16.mxu1 %vm3216_vm9, %v3182_v23  ;;  %v14004_v24 = vld [vmem:[#allocation38_spill] sm:$0xff]  ;;  %v2883_v1 = vsel %vm2839_vm4, %v14005_v57, %v7593_v54 }
 0x203   :  { %6560 = vmatmul.mubr.msk.bf16.gmra.mrb[4].mxu1 %vm3216_vm9, %v3183_v49  ;;  %v7601_v51 = vpop.permute.xlu1 %7600  ;;  %v2882_v32 = vsel %vm2839_vm4, %v14004_v24, %v7592_v21  ;;  %v2880_v58 = vsel %vm2839_vm4, %v14006_v26, %v7587_v13  ;;  %v2881_v56 = vsel %vm2839_vm4, %v14007_v14, %v7588_v41  ;;  %v14008_v13 = vld [vmem:[#allocation28_spill] sm:$0xff] }
 0x204   :  { %v7596_v27 = vpop.permute.xlu0 %7595  ;;  %v7603_v43 = vunpack.i.h.bf16 %v7601_v51  ;;  %v7602_v8 = vunpack.i.l.bf16 %v7601_v51 }
 0x205   :  { %v7598_v35 = vunpack.i.h.bf16 %v7596_v27  ;;  %v7597_v60 = vunpack.i.l.bf16 %v7596_v27 }
 0x206   :  { %v2947_v33 = vsel %vm2904_vm5, %v2882_v32, %v7602_v8  ;;  %v2948_v40 = vsel %vm2904_vm5, %v2883_v1, %v7603_v43  ;;  %v14009_v8 = vld [vmem:[#allocation31_spill] sm:$0xff]  ;;  %v14011_v32 = vld [vmem:[#allocation37_spill] sm:$0xff] }
 0x207   :  { %v7611_v37 = vpop.permute.xlu1 %7610  ;;  %v2945_v7 = vsel %vm2904_vm5, %v2880_v58, %v7597_v60  ;;  %v2946_v34 = vsel %vm2904_vm5, %v2881_v56, %v7598_v35 }
 0x208   :  { %v7606_v15 = vpop.permute.xlu0 %7605  ;;  %v7613_v45 = vunpack.i.h.bf16 %v7611_v37  ;;  %v7612_v63 = vunpack.i.l.bf16 %v7611_v37 }
 0x209   :  { %v7608_v18 = vunpack.i.h.bf16 %v7606_v15  ;;  %v7607_v39 = vunpack.i.l.bf16 %v7606_v15 }
 0x20a   :  { %v3012_v29 = vsel %vm2969_vm6, %v2947_v33, %v7612_v63  ;;  %v3013_v2 = vsel %vm2969_vm6, %v2948_v40, %v7613_v45 }
 0x20b   :  { %v7621_v31 = vpop.permute.xlu1 %7620  ;;  %v3010_v61 = vsel %vm2969_vm6, %v2945_v7, %v7607_v39  ;;  %v3011_v59 = vsel %vm2969_vm6, %v2946_v34, %v7608_v18 }
 0x20c   :  { %v7616_v0 = vpop.permute.xlu0 %7615  ;;  %v7623_v12 = vunpack.i.h.bf16 %v7621_v31  ;;  %v7622_v9 = vunpack.i.l.bf16 %v7621_v31  ;;  %v14010_v31 = vld [vmem:[#allocation34_spill] sm:$0xff] }
 0x20d   :  { %v7618_v3 = vunpack.i.h.bf16 %v7616_v0  ;;  %v7617_v46 = vunpack.i.l.bf16 %v7616_v0 }
 0x20e   :  { %v3077_v44 = vsel %vm3034_vm7, %v3012_v29, %v7622_v9  ;;  %v3078_v47 = vsel %vm3034_vm7, %v3013_v2, %v7623_v12 }
 0x20f   :  { %v7631_v62 = vpop.permute.xlu1 %7630  ;;  %v3075_v11 = vsel %vm3034_vm7, %v3010_v61, %v7617_v46  ;;  %v3076_v30 = vsel %vm3034_vm7, %v3011_v59, %v7618_v3 }
 0x210   :  { %v7633_v20 = vunpack.i.h.bf16 %v7631_v62  ;;  %v7632_v19 = vunpack.i.l.bf16 %v7631_v62  ;;  %v7626_v6 = vpop.permute.xlu0 %7625 }
 0x211   :  { %v7628_v42 = vunpack.i.h.bf16 %v7626_v6  ;;  %v7627_v53 = vunpack.i.l.bf16 %v7626_v6 }
 0x212   :  { %v3142_v10 = vsel %vm3099_vm8, %v3077_v44, %v7632_v19  ;;  %v3143_v17 = vsel %vm3099_vm8, %v3078_v47, %v7633_v20 }
 0x213   :  { %v3185_v4 = vpack.c.bf16 %v3143_v17, %v3142_v10  ;;  %v3140_v52 = vsel %vm3099_vm8, %v3075_v11, %v7627_v53  ;;  %v3141_v36 = vsel %vm3099_vm8, %v3076_v30, %v7628_v42  ;;  %v7641_v28 = vpop.permute.xlu1 %7640 }
 0x214   :  { %v3184_v55 = vpack.c.bf16 %v3141_v36, %v3140_v52  ;;  %v7636_v5 = vpop.permute.xlu0 %7635  ;;  %v7643_v48 = vunpack.i.h.bf16 %v7641_v28  ;;  %v7642_v38 = vunpack.i.l.bf16 %v7641_v28 }
 0x215   :  { %v7638_v23 = vunpack.i.h.bf16 %v7636_v5  ;;  %v7637_v16 = vunpack.i.l.bf16 %v7636_v5 }
 0x216   :  { %6563 = vmatprep.mubr.msk.bf16.mxu1 %vm3216_vm9, %v3184_v55  ;;  %v2886_v43 = vsel %vm2839_vm4, %v14008_v13, %v7642_v38  ;;  %v2887_v35 = vsel %vm2839_vm4, %v14009_v8, %v7643_v48  ;;  %v14013_v13 = vld [vmem:[#allocation45_spill] sm:$0xff]  ;;  %v14014_v8 = vld [vmem:[#allocation35_spill] sm:$0xff] }
 0x217   :  { %6564 = vmatmul.mubr.msk.bf16.gmra.mrb[8].mxu1 %vm3216_vm9, %v3185_v4  ;;  %v7651_v25 = vpop.permute.xlu1 %7650  ;;  %v2884_v24 = vsel %vm2839_vm4, %v14010_v31, %v7637_v16  ;;  %v2885_v57 = vsel %vm2839_vm4, %v14011_v32, %v7638_v23  ;;  %v14015_v31 = vld [vmem:[#allocation36_spill] sm:$0xff] }
 0x218   :  { %v7646_v22 = vpop.permute.xlu0 %7645  ;;  %v7653_v51 = vunpack.i.h.bf16 %v7651_v25  ;;  %v7652_v27 = vunpack.i.l.bf16 %v7651_v25 }
 0x219   :  { %v7648_v37 = vunpack.i.h.bf16 %v7646_v22  ;;  %v7647_v54 = vunpack.i.l.bf16 %v7646_v22 }
 0x21a   :  { %v2951_v39 = vsel %vm2904_vm5, %v2886_v43, %v7652_v27  ;;  %v2952_v0 = vsel %vm2904_vm5, %v2887_v35, %v7653_v51 }
 0x21b   :  { %v7661_v49 = vpop.permute.xlu1 %7660  ;;  %v2949_v14 = vsel %vm2904_vm5, %v2884_v24, %v7647_v54  ;;  %v2950_v56 = vsel %vm2904_vm5, %v2885_v57, %v7648_v37 }
 0x21c   :  { %v7656_v50 = vpop.permute.xlu0 %7655  ;;  %v7663_v21 = vunpack.i.h.bf16 %v7661_v49  ;;  %v7662_v15 = vunpack.i.l.bf16 %v7661_v49 }
 0x21d   :  { %v7658_v60 = vunpack.i.h.bf16 %v7656_v50  ;;  %v7657_v45 = vunpack.i.l.bf16 %v7656_v50  ;;  %v14012_v50 = vld [vmem:[#allocation44_spill] sm:$0xff] }
 0x21e   :  { %v3016_v12 = vsel %vm2969_vm6, %v2951_v39, %v7662_v15  ;;  %v3017_v9 = vsel %vm2969_vm6, %v2952_v0, %v7663_v21 }
 0x21f   :  { %v7671_v41 = vpop.permute.xlu1 %7670  ;;  %v3014_v40 = vsel %vm2969_vm6, %v2949_v14, %v7657_v45  ;;  %v3015_v3 = vsel %vm2969_vm6, %v2950_v56, %v7658_v60 }
 0x220   :  { %v7666_v63 = vpop.permute.xlu0 %7665  ;;  %v7673_v1 = vunpack.i.h.bf16 %v7671_v41  ;;  %v7672_v18 = vunpack.i.l.bf16 %v7671_v41 }
 0x221   :  { %v7668_v26 = vunpack.i.h.bf16 %v7666_v63  ;;  %v7667_v58 = vunpack.i.l.bf16 %v7666_v63 }
 0x222   :  { %v3081_v29 = vsel %vm3034_vm7, %v3016_v12, %v7672_v18  ;;  %v3082_v2 = vsel %vm3034_vm7, %v3017_v9, %v7673_v1 }
 0x223   :  { %v7681_v33 = vpop.permute.xlu1 %7680  ;;  %v3079_v59 = vsel %vm3034_vm7, %v3014_v40, %v7667_v58  ;;  %v3080_v20 = vsel %vm3034_vm7, %v3015_v3, %v7668_v26 }
 0x224   :  { %v7683_v46 = vunpack.i.h.bf16 %v7681_v33  ;;  %v7682_v7 = vunpack.i.l.bf16 %v7681_v33  ;;  %v7676_v34 = vpop.permute.xlu0 %7675 }
 0x225   :  { %v7678_v62 = vunpack.i.h.bf16 %v7676_v34  ;;  %v7677_v61 = vunpack.i.l.bf16 %v7676_v34 }
 0x226   :  { %v3146_v19 = vsel %vm3099_vm8, %v3081_v29, %v7682_v7  ;;  %v3147_v6 = vsel %vm3099_vm8, %v3082_v2, %v7683_v46 }
 0x227   :  { %v3187_v44 = vpack.c.bf16 %v3147_v6, %v3146_v19  ;;  %v3144_v47 = vsel %vm3099_vm8, %v3079_v59, %v7677_v61  ;;  %v3145_v42 = vsel %vm3099_vm8, %v3080_v20, %v7678_v62  ;;  %v7691_v53 = vpop.permute.xlu1 %7690 }
 0x228   :  { %v3186_v11 = vpack.c.bf16 %v3145_v42, %v3144_v47  ;;  %v7686_v30 = vpop.permute.xlu0 %7685  ;;  %v7692_v52 = vunpack.i.l.bf16 %v7691_v53  ;;  %v7693_v5 = vunpack.i.h.bf16 %v7691_v53 }
 0x229   :  { %v7687_v25 = vunpack.i.l.bf16 %v7686_v30  ;;  %v7688_v48 = vunpack.i.h.bf16 %v7686_v30 }
 0x22a   :  { %6567 = vmatprep.mubr.msk.bf16.mxu1 %vm3216_vm9, %v3186_v11  ;;  %v2890_v23 = vsel %vm2839_vm4, %v14012_v50, %v7692_v52  ;;  %v2891_v43 = vsel %vm2839_vm4, %v14013_v13, %v7693_v5 }
 0x22b   :  { %6568 = vmatmul.mubr.msk.bf16.gmra.mrb[12].mxu1 %vm3216_vm9, %v3187_v44  ;;  %v7701_v10 = vpop.permute.xlu1 %7700  ;;  %v2888_v35 = vsel %vm2839_vm4, %v14014_v8, %v7687_v25  ;;  %v2889_v24 = vsel %vm2839_vm4, %v14015_v31, %v7688_v48 }
 0x22c   :  { %v7696_v17 = vpop.permute.xlu0 %7695  ;;  %v10855_v4 = vpop.f32.mrb[0].mxu0  ;;  %v7703_v16 = vunpack.i.h.bf16 %v7701_v10  ;;  %v7702_v51 = vunpack.i.l.bf16 %v7701_v10 }
 0x22d   :  { %v10857_v36 = vpop.f32.mrb[1].mxu0  ;;  %v7698_v27 = vunpack.i.h.bf16 %v7696_v17  ;;  %v7697_v37 = vunpack.i.l.bf16 %v7696_v17 }
 0x22e   :  { %v10859_v28 = vpop.f32.mrb[2].mxu0  ;;  %v2955_v18 = vsel %vm2904_vm5, %v2890_v23, %v7702_v51  ;;  %v2956_v39 = vsel %vm2904_vm5, %v2891_v43, %v7703_v16 }
 0x22f   :  { %v7711_v55 = vpop.permute.xlu1 %7710  ;;  %v10861_v49 = vpop.f32.mrb[3].mxu0  ;;  %v2953_v58 = vsel %vm2904_vm5, %v2888_v35, %v7697_v37  ;;  %v2954_v14 = vsel %vm2904_vm5, %v2889_v24, %v7698_v27  ;;  %v14016_v35 = vld [vmem:[#allocation50_spill] sm:$0xff] }
 0x230   :  { %v7706_v22 = vpop.permute.xlu0 %7705  ;;  %v3606_v38 = vadd.f32 %v10861_v49, %v10857_v36  ;;  %v7713_v54 = vunpack.i.h.bf16 %v7711_v55  ;;  %v7712_v21 = vunpack.i.l.bf16 %v7711_v55 }
 0x231   :  { %v7708_v60 = vunpack.i.h.bf16 %v7706_v22  ;;  %v7707_v45 = vunpack.i.l.bf16 %v7706_v22 }
 0x232   :  { %v3607_v15 = vadd.f32 %v10855_v4, %v3606_v38  ;;  %v3020_v56 = vsel %vm2969_vm6, %v2955_v18, %v7712_v21  ;;  %v3021_v12 = vsel %vm2969_vm6, %v2956_v39, %v7713_v54  ;;  %v14019_v18 = vld [vmem:[#allocation42_spill] sm:$0xff] }
 0x233   :  { %v7721_v41 = vpop.permute.xlu1 %7720  ;;  %v3018_v33 = vsel %vm2969_vm6, %v2953_v58, %v7707_v45  ;;  %v3019_v40 = vsel %vm2969_vm6, %v2954_v14, %v7708_v60  ;;  %v14017_v45 = vld [vmem:[#allocation51_spill] sm:$0xff] }
 0x234   :  { %v7716_v63 = vpop.permute.xlu0 %7715  ;;  %v7723_v32 = vunpack.i.h.bf16 %v7721_v41  ;;  %v7722_v57 = vunpack.i.l.bf16 %v7721_v41  ;;  %v3608_v1 = vadd.f32 %v10859_v28, %v3607_v15 }
 0x235   :  { %v7718_v0 = vunpack.i.h.bf16 %v7716_v63  ;;  %v7717_v26 = vunpack.i.l.bf16 %v7716_v63 }
 0x236   :  { %v3085_v34 = vsel %vm3034_vm7, %v3020_v56, %v7722_v57  ;;  %v3086_v29 = vsel %vm3034_vm7, %v3021_v12, %v7723_v32  ;;  %v14018_v57 = vld [vmem:[#allocation41_spill] sm:$0xff] }
 0x237   :  { %v7731_v9 = vpop.permute.xlu1 %7730  ;;  %v3083_v61 = vsel %vm3034_vm7, %v3018_v33, %v7717_v26  ;;  %v3084_v59 = vsel %vm3034_vm7, %v3019_v40, %v7718_v0 }
 0x238   :  { %v7733_v3 = vunpack.i.h.bf16 %v7731_v9  ;;  %v7732_v46 = vunpack.i.l.bf16 %v7731_v9  ;;  %v7726_v7 = vpop.permute.xlu0 %7725 }
 0x239   :  { %v7728_v2 = vunpack.i.h.bf16 %v7726_v7  ;;  %v7727_v62 = vunpack.i.l.bf16 %v7726_v7 }
 0x23a   :  { %v3150_v20 = vsel %vm3099_vm8, %v3085_v34, %v7732_v46  ;;  %v3151_v19 = vsel %vm3099_vm8, %v3086_v29, %v7733_v3 }
 0x23b   :  { %v3189_v6 = vpack.c.bf16 %v3151_v19, %v3150_v20  ;;  %v3148_v44 = vsel %vm3099_vm8, %v3083_v61, %v7727_v62  ;;  %v3149_v47 = vsel %vm3099_vm8, %v3084_v59, %v7728_v2  ;;  %v7741_v42 = vpop.permute.xlu1 %7740 }
 0x23c   :  { %v3188_v53 = vpack.c.bf16 %v3149_v47, %v3148_v44  ;;  %v7736_v11 = vpop.permute.xlu0 %7735  ;;  %v7743_v50 = vunpack.i.h.bf16 %v7741_v42  ;;  %v7742_v23 = vunpack.i.l.bf16 %v7741_v42 }
 0x23d   :  { %v10891_v30 = vpop.f32.mrb[4].mxu0  ;;  %v7738_v51 = vunpack.i.h.bf16 %v7736_v11  ;;  %v7737_v27 = vunpack.i.l.bf16 %v7736_v11 }
 0x23e   :  { %v10893_v10 = vpop.f32.mrb[5].mxu0  ;;  %6571 = vmatprep.mubr.msk.bf16.mxu1 %vm3216_vm9, %v3188_v53  ;;  %v2894_v60 = vsel %vm2839_vm4, %v14016_v35, %v7742_v23  ;;  %v2895_v63 = vsel %vm2839_vm4, %v14017_v45, %v7743_v50 }
 0x23f   :  { %v3609_v17 = vadd.f32 %v3608_v1, %v10893_v10  ;;  %v10897_v52 = vpop.f32.mrb[6].mxu0  ;;  %6572 = vmatmul.mubr.msk.bf16.gmra.mrb[16].mxu1 %vm3216_vm9, %v3189_v6  ;;  %v7751_v55 = vpop.permute.xlu1 %7750  ;;  %v2892_v1 = vsel %vm2839_vm4, %v14018_v57, %v7737_v27  ;;  %v2893_v39 = vsel %vm2839_vm4, %v14019_v18, %v7738_v51 }
 0x240   :  { %v7746_v5 = vpop.permute.xlu0 %7745  ;;  %v10900_v25 = vpop.f32.mrb[7].mxu0  ;;  %v7753_v54 = vunpack.i.h.bf16 %v7751_v55  ;;  %v7752_v21 = vunpack.i.l.bf16 %v7751_v55 }
 0x241   :  { %v3610_v22 = vadd.f32 %v3609_v17, %v10900_v25  ;;  %v7748_v15 = vunpack.i.h.bf16 %v7746_v5  ;;  %v7747_v41 = vunpack.i.l.bf16 %v7746_v5 }
 0x242   :  { %v2959_v58 = vsel %vm2904_vm5, %v2894_v60, %v7752_v21  ;;  %v2960_v14 = vsel %vm2904_vm5, %v2895_v63, %v7753_v54 }
 0x243   :  { %v3611_v48 = vadd.f32 %v10891_v30, %v3610_v22  ;;  %v7761_v38 = vpop.permute.xlu1 %7760  ;;  %v2957_v9 = vsel %vm2904_vm5, %v2892_v1, %v7747_v41  ;;  %v2958_v33 = vsel %vm2904_vm5, %v2893_v39, %v7748_v15  ;;  %v14020_v39 = vld [vmem:[#allocation40_spill] sm:$0xff] }
 0x244   :  { %v7756_v16 = vpop.permute.xlu0 %7755  ;;  %v7763_v13 = vunpack.i.h.bf16 %v7761_v38  ;;  %v7762_v43 = vunpack.i.l.bf16 %v7761_v38 }
 0x245   :  { %v3612_v37 = vadd.f32 %v10897_v52, %v3611_v48  ;;  %v7758_v31 = vunpack.i.h.bf16 %v7756_v16  ;;  %v7757_v24 = vunpack.i.l.bf16 %v7756_v16 }
 0x246   :  { %v3024_v40 = vsel %vm2969_vm6, %v2959_v58, %v7762_v43  ;;  %v3025_v3 = vsel %vm2969_vm6, %v2960_v14, %v7763_v13  ;;  %v14022_v14 = vld [vmem:[#allocation52_spill] sm:$0xff] }
 0x247   :  { %v7771_v8 = vpop.permute.xlu1 %7770  ;;  %v3022_v7 = vsel %vm2969_vm6, %v2957_v9, %v7757_v24  ;;  %v3023_v34 = vsel %vm2969_vm6, %v2958_v33, %v7758_v31  ;;  %v14023_v33 = vld [vmem:[#allocation54_spill] sm:$0xff] }
 0x248   :  { %v7766_v32 = vpop.permute.xlu0 %7765  ;;  %v7773_v0 = vunpack.i.h.bf16 %v7771_v8  ;;  %v7772_v26 = vunpack.i.l.bf16 %v7771_v8 }
 0x249   :  { %v7768_v56 = vunpack.i.h.bf16 %v7766_v32  ;;  %v7767_v12 = vunpack.i.l.bf16 %v7766_v32 }
 0x24a   :  { %v3089_v61 = vsel %vm3034_vm7, %v3024_v40, %v7772_v26  ;;  %v3090_v59 = vsel %vm3034_vm7, %v3025_v3, %v7773_v0  ;;  %v14021_v26 = vld [vmem:[#allocation43_spill] sm:$0xff] }
 0x24b   :  { %v7781_v46 = vpop.permute.xlu1 %7780  ;;  %v3087_v44 = vsel %vm3034_vm7, %v3022_v7, %v7767_v12  ;;  %v3088_v47 = vsel %vm3034_vm7, %v3023_v34, %v7768_v56 }
 0x24c   :  { %v7783_v29 = vunpack.i.h.bf16 %v7781_v46  ;;  %v7782_v2 = vunpack.i.l.bf16 %v7781_v46  ;;  %v7776_v62 = vpop.permute.xlu0 %7775 }
 0x24d   :  { %v7778_v20 = vunpack.i.h.bf16 %v7776_v62  ;;  %v7777_v19 = vunpack.i.l.bf16 %v7776_v62  ;;  %v10923_v6 = vpop.f32.mrb[8].mxu0 }
 0x24e   :  { %v3154_v42 = vsel %vm3099_vm8, %v3089_v61, %v7782_v2  ;;  %v3155_v53 = vsel %vm3099_vm8, %v3090_v59, %v7783_v29  ;;  %v10929_v11 = vpop.f32.mrb[9].mxu0 }
 0x24f   :  { %v3191_v17 = vpack.c.bf16 %v3155_v53, %v3154_v42  ;;  %v3152_v55 = vsel %vm3099_vm8, %v3087_v44, %v7777_v19  ;;  %v3153_v5 = vsel %vm3099_vm8, %v3088_v47, %v7778_v20  ;;  %v3613_v22 = vadd.f32 %v3612_v37, %v10929_v11  ;;  %v10934_v48 = vpop.f32.mrb[10].mxu0  ;;  %v7791_v38 = vpop.permute.xlu1 %7790 }
 0x250   :  { %v3190_v50 = vpack.c.bf16 %v3153_v5, %v3152_v55  ;;  %v7786_v23 = vpop.permute.xlu0 %7785  ;;  %v10936_v16 = vpop.f32.mrb[11].mxu0  ;;  %v7793_v41 = vunpack.i.h.bf16 %v7791_v38  ;;  %v7792_v13 = vunpack.i.l.bf16 %v7791_v38 }
 0x251   :  { %v3614_v51 = vadd.f32 %v3613_v22, %v10936_v16  ;;  %v7787_v43 = vunpack.i.l.bf16 %v7786_v23  ;;  %v7788_v35 = vunpack.i.h.bf16 %v7786_v23 }
 0x252   :  { %6575 = vmatprep.mubr.msk.bf16.mxu1 %vm3216_vm9, %v3190_v50  ;;  %v2898_v0 = vsel %vm2839_vm4, %v14020_v39, %v7792_v13  ;;  %v2899_v58 = vsel %vm2839_vm4, %v14021_v26, %v7793_v41 }
 0x253   :  { %v3615_v27 = vadd.f32 %v10923_v6, %v3614_v51  ;;  %6576 = vmatmul.mubr.msk.bf16.gmra.mrb[20].mxu1 %vm3216_vm9, %v3191_v17  ;;  %v7801_v54 = vpop.permute.xlu1 %7800  ;;  %v2896_v56 = vsel %vm2839_vm4, %v14022_v14, %v7787_v43  ;;  %v2897_v40 = vsel %vm2839_vm4, %v14023_v33, %v7788_v35 }
 0x254   :  { %v7796_v21 = vpop.permute.xlu0 %7795  ;;  %v7802_v60 = vunpack.i.l.bf16 %v7801_v54  ;;  %v7803_v45 = vunpack.i.h.bf16 %v7801_v54 }
 0x255   :  { %v3616_v15 = vadd.f32 %v10934_v48, %v3615_v27  ;;  %v7798_v63 = vunpack.i.h.bf16 %v7796_v21  ;;  %v7797_v31 = vunpack.i.l.bf16 %v7796_v21 }
 0x256   :  { %v2963_v3 = vsel %vm2904_vm5, %v2898_v0, %v7802_v60  ;;  %v2964_v34 = vsel %vm2904_vm5, %v2899_v58, %v7803_v45 }
 0x257   :  { %v7811_v37 = vpop.permute.xlu1 %7810  ;;  %v2961_v29 = vsel %vm2904_vm5, %v2896_v56, %v7797_v31  ;;  %v2962_v2 = vsel %vm2904_vm5, %v2897_v40, %v7798_v63 }
 0x258   :  { %v7806_v8 = vpop.permute.xlu0 %7805  ;;  %v7813_v24 = vunpack.i.h.bf16 %v7811_v37  ;;  %v7812_v32 = vunpack.i.l.bf16 %v7811_v37 }
 0x259   :  { %v7808_v57 = vunpack.i.h.bf16 %v7806_v8  ;;  %v7807_v1 = vunpack.i.l.bf16 %v7806_v8 }
 0x25a   :  { %v3028_v59 = vsel %vm2969_vm6, %v2963_v3, %v7812_v32  ;;  %v3029_v20 = vsel %vm2969_vm6, %v2964_v34, %v7813_v24 }
 0x25b   :  { %v7821_v18 = vpop.permute.xlu1 %7820  ;;  %v3026_v19 = vsel %vm2969_vm6, %v2961_v29, %v7807_v1  ;;  %v3027_v44 = vsel %vm2969_vm6, %v2962_v2, %v7808_v57  ;;  %v14025_v29 = vld [vmem:[#allocation48_spill] sm:$0xff] }
 0x25c   :  { %v7822_v12 = vunpack.i.l.bf16 %v7821_v18  ;;  %v7816_v9 = vpop.permute.xlu0 %7815  ;;  %v7823_v46 = vunpack.i.h.bf16 %v7821_v18 }
 0x25d   :  { %v7817_v7 = vunpack.i.l.bf16 %v7816_v9  ;;  %v7818_v62 = vunpack.i.h.bf16 %v7816_v9 }
 0x25e   :  { %v10955_v61 = vpop.f32.mrb[12].mxu0  ;;  %v3093_v53 = vsel %vm3034_vm7, %v3028_v59, %v7822_v12  ;;  %v3094_v50 = vsel %vm3034_vm7, %v3029_v20, %v7823_v46 }
 0x25f   :  { %v10961_v47 = vpop.f32.mrb[13].mxu0  ;;  %v7831_v42 = vpop.permute.xlu1 %7830  ;;  %v3091_v23 = vsel %vm3034_vm7, %v3026_v19, %v7817_v7  ;;  %v3092_v21 = vsel %vm3034_vm7, %v3027_v44, %v7818_v62  ;;  %v14024_v7 = vld [vmem:[#allocation47_spill] sm:$0xff]  ;;  %v14027_v44 = vld [vmem:[#allocation10_spill] sm:$0xff] }
 0x260   :  { %v3617_v17 = vadd.f32 %v3616_v15, %v10961_v47  ;;  %v7833_v55 = vunpack.i.h.bf16 %v7831_v42  ;;  %v7832_v5 = vunpack.i.l.bf16 %v7831_v42  ;;  %v7826_v22 = vpop.permute.xlu0 %7825  ;;  %v10965_v38 = vpop.f32.mrb[14].mxu0  ;;  %v14026_v62 = vld [vmem:[#allocation11_spill] sm:$0xff] }
 0x261   :  { %v7828_v51 = vunpack.i.h.bf16 %v7826_v22  ;;  %v7827_v27 = vunpack.i.l.bf16 %v7826_v22  ;;  %v10969_v54 = vpop.f32.mrb[15].mxu0 }
 0x262   :  { %v3158_v37 = vsel %vm3099_vm8, %v3093_v53, %v7832_v5  ;;  %v3159_v41 = vsel %vm3099_vm8, %v3094_v50, %v7833_v55  ;;  %v3618_v15 = vadd.f32 %v3617_v17, %v10969_v54 }
 0x263   :  { %v3193_v13 = vpack.c.bf16 %v3159_v41, %v3158_v37  ;;  %v3156_v43 = vsel %vm3099_vm8, %v3091_v23, %v7827_v27  ;;  %v3157_v8 = vsel %vm3099_vm8, %v3092_v21, %v7828_v51  ;;  %v7841_v35 = vpop.permute.xlu1 %7840 }
 0x264   :  { %v3192_v60 = vpack.c.bf16 %v3157_v8, %v3156_v43  ;;  %v3619_v45 = vadd.f32 %v10955_v61, %v3618_v15  ;;  %v7836_v63 = vpop.permute.xlu0 %7835  ;;  %v7843_v1 = vunpack.i.h.bf16 %v7841_v35  ;;  %v7842_v18 = vunpack.i.l.bf16 %v7841_v35 }
 0x265   :  { %v7837_v39 = vunpack.i.l.bf16 %v7836_v63  ;;  %v7838_v26 = vunpack.i.h.bf16 %v7836_v63 }
 0x266   :  { %6579 = vmatprep.mubr.msk.bf16.mxu1 %vm3216_vm9, %v3192_v60  ;;  %v3620_v31 = vadd.f32 %v10965_v38, %v3619_v45  ;;  %v2902_v34 = vsel %vm2839_vm4, %v14024_v7, %v7842_v18  ;;  %v2903_v2 = vsel %vm2839_vm4, %v14025_v29, %v7843_v1 }
 0x267   :  { %6580 = vmatmul.mubr.msk.bf16.gmra.mrb[24].mxu1 %vm3216_vm9, %v3193_v13  ;;  %v7851_v24 = vpop.permute.xlu1 %7850  ;;  %v2900_v59 = vsel %vm2839_vm4, %v14026_v62, %v7837_v39  ;;  %v2901_v42 = vsel %vm2839_vm4, %v14027_v44, %v7838_v26 }
 0x268   :  { %v7846_v32 = vpop.permute.xlu0 %7845  ;;  %v7852_v58 = vunpack.i.l.bf16 %v7851_v24  ;;  %v7853_v14 = vunpack.i.h.bf16 %v7851_v24 }
 0x269   :  { %v7848_v56 = vunpack.i.h.bf16 %v7846_v32  ;;  %v7847_v12 = vunpack.i.l.bf16 %v7846_v32 }
 0x26a   :  { %v2967_v53 = vsel %vm2904_vm5, %v2902_v34, %v7852_v58  ;;  %v2968_v5 = vsel %vm2904_vm5, %v2903_v2, %v7853_v14 }
 0x26b   :  { %v7861_v57 = vpop.permute.xlu1 %7860  ;;  %v2965_v22 = vsel %vm2904_vm5, %v2900_v59, %v7847_v12  ;;  %v2966_v50 = vsel %vm2904_vm5, %v2901_v42, %v7848_v56 }
 0x26c   :  { %v7856_v0 = vpop.permute.xlu0 %7855  ;;  %v7863_v9 = vunpack.i.h.bf16 %v7861_v57  ;;  %v7862_v33 = vunpack.i.l.bf16 %v7861_v57 }
 0x26d   :  { %v7858_v40 = vunpack.i.h.bf16 %v7856_v0  ;;  %v7857_v3 = vunpack.i.l.bf16 %v7856_v0 }
 0x26e   :  { %v3032_v27 = vsel %vm2969_vm6, %v2967_v53, %v7862_v33  ;;  %v3033_v21 = vsel %vm2969_vm6, %v2968_v5, %v7863_v9 }
 0x26f   :  { %v7871_v46 = vpop.permute.xlu1 %7870  ;;  %v3030_v37 = vsel %vm2969_vm6, %v2965_v22, %v7857_v3  ;;  %v3031_v41 = vsel %vm2969_vm6, %v2966_v50, %v7858_v40 }
 0x270   :  { %v7872_v20 = vunpack.i.l.bf16 %v7871_v46  ;;  %v7866_v19 = vpop.permute.xlu0 %7865  ;;  %v7873_v17 = vunpack.i.h.bf16 %v7871_v46 }
 0x271   :  { %v7867_v55 = vunpack.i.l.bf16 %v7866_v19  ;;  %v7868_v23 = vunpack.i.h.bf16 %v7866_v19 }
 0x272   :  { %v10993_v51 = vpop.f32.mrb[16].mxu0  ;;  %v3097_v43 = vsel %vm3034_vm7, %v3032_v27, %v7872_v20  ;;  %v3098_v24 = vsel %vm3034_vm7, %v3033_v21, %v7873_v17 }
 0x273   :  { %v10999_v15 = vpop.f32.mrb[17].mxu0  ;;  %v7881_v13 = vpop.permute.xlu1 %7880  ;;  %v3095_v32 = vsel %vm3034_vm7, %v3030_v37, %v7867_v55  ;;  %v3096_v39 = vsel %vm3034_vm7, %v3031_v41, %v7868_v23 }
 0x274   :  { %v3621_v8 = vadd.f32 %v3620_v31, %v10999_v15  ;;  %v7883_v35 = vunpack.i.h.bf16 %v7881_v13  ;;  %v7882_v60 = vunpack.i.l.bf16 %v7881_v13  ;;  %v7876_v45 = vpop.permute.xlu0 %7875  ;;  %v11003_v63 = vpop.f32.mrb[18].mxu0 }
 0x275   :  { %v7878_v57 = vunpack.i.h.bf16 %v7876_v45  ;;  %v7877_v1 = vunpack.i.l.bf16 %v7876_v45  ;;  %v11007_v18 = vpop.f32.mrb[19].mxu0 }
 0x276   :  { %v3162_v0 = vsel %vm3099_vm8, %v3097_v43, %v7882_v60  ;;  %v3163_v26 = vsel %vm3099_vm8, %v3098_v24, %v7883_v35  ;;  %v3622_v31 = vadd.f32 %v3621_v8, %v11007_v18 }
 0x277   :  { %v3195_v58 = vpack.c.bf16 %v3163_v26, %v3162_v0  ;;  %v3160_v14 = vsel %vm3099_vm8, %v3095_v32, %v7877_v1  ;;  %v3161_v56 = vsel %vm3099_vm8, %v3096_v39, %v7878_v57 }
 0x278   :  { %v3194_v12 = vpack.c.bf16 %v3161_v56, %v3160_v14  ;;  %v3623_v9 = vadd.f32 %v10993_v51, %v3622_v31 }
 0x27a   :  { %6583 = vmatprep.mubr.msk.bf16.mxu1 %vm3216_vm9, %v3194_v12  ;;  %v3624_v33 = vadd.f32 %v11003_v63, %v3623_v9 }
 0x27b   :  { %6584 = vmatmul.mubr.msk.bf16.gmra.mrb[28].mxu1 %vm3216_vm9, %v3195_v58 }
 0x286   :  { %v11019_v40 = vpop.f32.mrb[20].mxu0 }
 0x287   :  { %v11021_v3 = vpop.f32.mrb[21].mxu0 }
 0x288   :  { %v3625_v46 = vadd.f32 %v3624_v33, %v11021_v3  ;;  %v11024_v7 = vpop.f32.mrb[22].mxu0 }
 0x289   :  { %v11026_v34 = vpop.f32.mrb[23].mxu0 }
 0x28a   :  { %v3626_v29 = vadd.f32 %v3625_v46, %v11026_v34 }
 0x28c   :  { %v3627_v2 = vadd.f32 %v11019_v40, %v3626_v29 }
 0x28e   :  { %v3628_v62 = vadd.f32 %v11024_v7, %v3627_v2 }
 0x29a   :  { %v11031_v59 = vpop.f32.mrb[24].mxu0 }
 0x29b   :  { %v11033_v20 = vpop.f32.mrb[25].mxu0 }
 0x29c   :  { %v3629_v19 = vadd.f32 %v3628_v62, %v11033_v20  ;;  %v11036_v44 = vpop.f32.mrb[26].mxu0 }
 0x29d   :  { %v11038_v42 = vpop.f32.mrb[27].mxu0 }
 0x29e   :  { %v3630_v53 = vadd.f32 %v3629_v19, %v11038_v42 }
 0x2a0   :  { %v3631_v17 = vadd.f32 %v11031_v59, %v3630_v53 }
 0x2a2   :  { %v3632_v55 = vadd.f32 %v11036_v44, %v3631_v17 }
 0x2ae   :  { %v11043_v5 = vpop.f32.mrb[28].mxu0 }
 0x2af   :  { %v11045_v22 = vpop.f32.mrb[29].mxu0 }
 0x2b0   :  { %v3633_v50 = vadd.f32 %v3632_v55, %v11045_v22  ;;  %v11048_v23 = vpop.f32.mrb[30].mxu0 }
 0x2b1   :  { %v11050_v27 = vpop.f32.mrb[31].mxu0 }
 0x2b2   :  { %v3634_v21 = vadd.f32 %v3633_v50, %v11050_v27 }
 0x2b4   :  { %v3635_v37 = vadd.f32 %v11043_v5, %v3634_v21 }
 0x2b6   :  { %v3636_v41 = vadd.f32 %v11048_v23, %v3635_v37 }
 0x2c2   :  { %v11055_v13 = vpop.f32.mrb[0].mxu1 }
 0x2c3   :  { %v11057_v43 = vpop.f32.mrb[1].mxu1 }
 0x2c4   :  { %v3637_v8 = vadd.f32 %v3636_v41, %v11057_v43  ;;  %v11060_v35 = vpop.f32.mrb[2].mxu1 }
 0x2c5   :  { %v11062_v60 = vpop.f32.mrb[3].mxu1 }
 0x2c6   :  { %v3638_v45 = vadd.f32 %v3637_v8, %v11062_v60 }
 0x2c8   :  { %v3639_v24 = vadd.f32 %v11055_v13, %v3638_v45 }
 0x2ca   :  { %v3640_v32 = vadd.f32 %v11060_v35, %v3639_v24 }
 0x2d6   :  { %v11067_v57 = vpop.f32.mrb[4].mxu1 }
 0x2d7   :  { %v11069_v1 = vpop.f32.mrb[5].mxu1 }
 0x2d8   :  { %v3641_v39 = vadd.f32 %v3640_v32, %v11069_v1  ;;  %v11072_v0 = vpop.f32.mrb[6].mxu1 }
 0x2d9   :  { %v11074_v26 = vpop.f32.mrb[7].mxu1 }
 0x2da   :  { %v3642_v31 = vadd.f32 %v3641_v39, %v11074_v26 }
 0x2dc   :  { %v3643_v58 = vadd.f32 %v11067_v57, %v3642_v31 }
 0x2de   :  { %v3644_v14 = vadd.f32 %v11072_v0, %v3643_v58 }
 0x2ea   :  { %v11079_v56 = vpop.f32.mrb[8].mxu1 }
 0x2eb   :  { %v11081_v12 = vpop.f32.mrb[9].mxu1 }
 0x2ec   :  { %v3645_v9 = vadd.f32 %v3644_v14, %v11081_v12  ;;  %v11084_v33 = vpop.f32.mrb[10].mxu1 }
 0x2ed   :  { %v11086_v46 = vpop.f32.mrb[11].mxu1 }
 0x2ee   :  { %v3646_v29 = vadd.f32 %v3645_v9, %v11086_v46 }
 0x2f0   :  { %v3647_v2 = vadd.f32 %v11079_v56, %v3646_v29 }
 0x2f2   :  { %v3648_v62 = vadd.f32 %v11084_v33, %v3647_v2 }
 0x2fe   :  { %v11091_v19 = vpop.f32.mrb[12].mxu1 }
 0x2ff   :  { %v11093_v53 = vpop.f32.mrb[13].mxu1 }
 0x300   :  { %v3649_v17 = vadd.f32 %v3648_v62, %v11093_v53  ;;  %v11096_v55 = vpop.f32.mrb[14].mxu1 }
 0x301   :  { %v11098_v50 = vpop.f32.mrb[15].mxu1 }
 0x302   :  { %v3650_v21 = vadd.f32 %v3649_v17, %v11098_v50 }
 0x304   :  { %v3651_v37 = vadd.f32 %v11091_v19, %v3650_v21 }
 0x306   :  { %v3652_v41 = vadd.f32 %v11096_v55, %v3651_v37 }
 0x312   :  { %v11103_v8 = vpop.f32.mrb[16].mxu1 }
 0x313   :  { %14028 = vst [vmem:[#allocation12_spill] sm:$0xff] %v11103_v8  ;;  %v11105_v45 = vpop.f32.mrb[17].mxu1 }
 0x314   :  { %14029 = vst [vmem:[#allocation15_spill] sm:$0xff] %v11105_v45  ;;  %v3653_v24 = vadd.f32 %v3652_v41, %v11105_v45  ;;  %v11108_v32 = vpop.f32.mrb[18].mxu1 }
 0x315   :  { %14030 = vst [vmem:[#allocation20_spill] sm:$0xff] %v11108_v32  ;;  %v11110_v39 = vpop.f32.mrb[19].mxu1 }
 0x316   :  { %14031 = vst [vmem:[#allocation21_spill] sm:$0xff] %v11110_v39  ;;  %v3654_v31 = vadd.f32 %v3653_v24, %v11110_v39 }
 0x318   :  { %v3655_v58 = vadd.f32 %v11103_v8, %v3654_v31 }
 0x31a   :  { %v3656_v14 = vadd.f32 %v11108_v32, %v3655_v58 }
 0x326   :  { %v11115_v9 = vpop.f32.mrb[20].mxu1 }
 0x327   :  { %14032 = vst [vmem:[#allocation13_spill] sm:$0xff] %v11115_v9  ;;  %v11117_v29 = vpop.f32.mrb[21].mxu1 }
 0x328   :  { %14033 = vst [vmem:[#allocation2_spill] sm:$0xff] %v11117_v29  ;;  %v3657_v2 = vadd.f32 %v3656_v14, %v11117_v29  ;;  %v11120_v62 = vpop.f32.mrb[22].mxu1 }
 0x329   :  { %14034 = vst [vmem:[#allocation3_spill] sm:$0xff] %v11120_v62  ;;  %v11122_v17 = vpop.f32.mrb[23].mxu1 }
 0x32a   :  { %14035 = vst [vmem:[#allocation4_spill] sm:$0xff] %v11122_v17  ;;  %v3658_v21 = vadd.f32 %v3657_v2, %v11122_v17 }
 0x32c   :  { %v3659_v37 = vadd.f32 %v11115_v9, %v3658_v21 }
 0x32e   :  { %v3660_v41 = vadd.f32 %v11120_v62, %v3659_v37 }
 0x33a   :  { %v11127_v24 = vpop.f32.mrb[24].mxu1 }
 0x33b   :  { %14036 = vst [vmem:[#allocation5_spill] sm:$0xff] %v11127_v24  ;;  %v11129_v31 = vpop.f32.mrb[25].mxu1 }
 0x33c   :  { %14037 = vst [vmem:[#allocation6_spill] sm:$0xff] %v11129_v31  ;;  %v3661_v58 = vadd.f32 %v3660_v41, %v11129_v31  ;;  %v11132_v32 = vpop.f32.mrb[26].mxu1 }
 0x33d   :  { %14038 = vst [vmem:[#allocation7_spill] sm:$0xff] %v11132_v32  ;;  %v11134_v8 = vpop.f32.mrb[27].mxu1 }
 0x33e   :  { %14039 = vst [vmem:[#allocation46_spill] sm:$0xff] %v11134_v8  ;;  %v3662_v14 = vadd.f32 %v3661_v58, %v11134_v8 }
 0x340   :  { %v3663_v29 = vadd.f32 %v11127_v24, %v3662_v14 }
 0x342   :  { %v3664_v2 = vadd.f32 %v11132_v32, %v3663_v29 }
 0x34e   :  { %v11139_v17 = vpop.f32.mrb[28].mxu1 }
 0x34f   :  { %v11141_v21 = vpop.f32.mrb[29].mxu1 }
 0x350   :  { %14040 = vst [vmem:[#allocation49_spill] sm:$0xff] %v11141_v21  ;;  %v3665_v37 = vadd.f32 %v3664_v2, %v11141_v21  ;;  %v11144_v62 = vpop.f32.mrb[30].mxu1 }
 0x351   :  { %v11146_v9 = vpop.f32.mrb[31].mxu1 }
 0x352   :  { %v3666_v41 = vadd.f32 %v3665_v37, %v11146_v9 }
 0x354   :  { %v3667_v31 = vadd.f32 %v11139_v17, %v3666_v41  ;;  %v14054_v41 = vld [vmem:[#allocation20_spill] sm:$0xff] }
 0x356   :  { %v3668_v58 = vadd.f32 %v11144_v62, %v3667_v31  ;;  %v14052_v31 = vld [vmem:[#allocation12_spill] sm:$0xff] }
 0x358   :  { %v3669_v8 = vrot.slane %v3668_v58, 4 }
 0x35a   :  { %v3670_v14 = vadd.f32 %v3669_v8, %v3668_v58  ;;  %v14056_v58 = vld [vmem:[#allocation2_spill] sm:$0xff] }
 0x35c   :  { %v3671_v24 = vrot.slane %v3670_v14, 2 }
 0x35e   :  { %v3672_v29 = vadd.f32 %v3671_v24, %v3670_v14  ;;  %v14050_v24 = vld [vmem:[#allocation21_spill] sm:$0xff]  ;;  %v14058_v14 = vld [vmem:[#allocation4_spill] sm:$0xff] }
 0x360   :  { %v3673_v32 = vrot.slane %v3672_v29, 1 }
 0x362   :  { %v3674_v39 = vadd.f32 %v3673_v32, %v3672_v29 }
 0x364   :  { %v11151_v45 = vmul.f32 0.001953125, %v3674_v39  ;;  %v14048_v39 = vld [vmem:[#allocation15_spill] sm:$0xff] }
 0x366   :  { %v11155_v2 = vsub.f32 %v10857_v36, %v11151_v45  ;;  %v11159_v21 = vsub.f32 %v10861_v49, %v11151_v45  ;;  %v11163_v37 = vsub.f32 %v10855_v4, %v11151_v45  ;;  %v11167_v8 = vsub.f32 %v10859_v28, %v11151_v45 }
 0x367   :  { %v11171_v32 = vsub.f32 %v10893_v10, %v11151_v45  ;;  %v11175_v36 = vsub.f32 %v10900_v25, %v11151_v45  ;;  %v11179_v49 = vsub.f32 %v10891_v30, %v11151_v45  ;;  %v11183_v4 = vsub.f32 %v10897_v52, %v11151_v45 }
 0x368   :  { %14041 = vst [vmem:[#allocation53_spill] sm:$0xff] %v11155_v2  ;;  %14042 = vst [vmem:[#allocation55_spill] sm:$0xff] %v11159_v21  ;;  %v11187_v28 = vsub.f32 %v10929_v11, %v11151_v45  ;;  %v11191_v10 = vsub.f32 %v10936_v16, %v11151_v45  ;;  %v11195_v25 = vsub.f32 %v10923_v6, %v11151_v45 }
 0x369   :  { %14043 = vst [vmem:[#allocation8_spill] sm:$0xff] %v11163_v37  ;;  %v11199_v30 = vsub.f32 %v10934_v48, %v11151_v45  ;;  %v11203_v52 = vsub.f32 %v10961_v47, %v11151_v45  ;;  %v11207_v11 = vsub.f32 %v10969_v54, %v11151_v45  ;;  %v11211_v16 = vsub.f32 %v10955_v61, %v11151_v45 }
 0x36a   :  { %v11215_v6 = vsub.f32 %v10965_v38, %v11151_v45  ;;  %v11219_v48 = vsub.f32 %v10999_v15, %v11151_v45  ;;  %v11223_v47 = vsub.f32 %v11007_v18, %v11151_v45  ;;  %v11227_v54 = vsub.f32 %v10993_v51, %v11151_v45 }
 0x36b   :  { %v11231_v61 = vsub.f32 %v11003_v63, %v11151_v45  ;;  %v11235_v38 = vsub.f32 %v11021_v3, %v11151_v45  ;;  %v11239_v15 = vsub.f32 %v11026_v34, %v11151_v45  ;;  %v11243_v18 = vsub.f32 %v11019_v40, %v11151_v45 }
 0x36c   :  { %v11247_v51 = vsub.f32 %v11024_v7, %v11151_v45  ;;  %v11251_v63 = vsub.f32 %v11033_v20, %v11151_v45  ;;  %v11255_v3 = vsub.f32 %v11038_v42, %v11151_v45  ;;  %v11259_v34 = vsub.f32 %v11031_v59, %v11151_v45 }
 0x36d   :  { %v11263_v40 = vsub.f32 %v11036_v44, %v11151_v45  ;;  %v11267_v7 = vsub.f32 %v11045_v22, %v11151_v45  ;;  %v11271_v20 = vsub.f32 %v11050_v27, %v11151_v45  ;;  %v11275_v42 = vsub.f32 %v11043_v5, %v11151_v45 }
 0x36e   :  { %v11279_v59 = vsub.f32 %v11048_v23, %v11151_v45  ;;  %v11283_v44 = vsub.f32 %v11057_v43, %v11151_v45  ;;  %v11287_v22 = vsub.f32 %v11062_v60, %v11151_v45  ;;  %v11291_v27 = vsub.f32 %v11055_v13, %v11151_v45 }
 0x36f   :  { %v11295_v5 = vsub.f32 %v11060_v35, %v11151_v45  ;;  %v11299_v23 = vsub.f32 %v11069_v1, %v11151_v45  ;;  %v11303_v43 = vsub.f32 %v11074_v26, %v11151_v45  ;;  %v11307_v60 = vsub.f32 %v11067_v57, %v11151_v45 }
 0x370   :  { %v11311_v13 = vsub.f32 %v11072_v0, %v11151_v45  ;;  %v11315_v35 = vsub.f32 %v11081_v12, %v11151_v45  ;;  %v11319_v1 = vsub.f32 %v11086_v46, %v11151_v45  ;;  %v11323_v26 = vsub.f32 %v11079_v56, %v11151_v45 }
 0x371   :  { %v11327_v57 = vsub.f32 %v11084_v33, %v11151_v45  ;;  %v11331_v0 = vsub.f32 %v11093_v53, %v11151_v45  ;;  %v11335_v12 = vsub.f32 %v11098_v50, %v11151_v45  ;;  %v11339_v46 = vsub.f32 %v11091_v19, %v11151_v45 }
 0x372   :  { %v11343_v56 = vsub.f32 %v11096_v55, %v11151_v45  ;;  %v11347_v33 = vsub.f32 %v14048_v39, %v11151_v45  ;;  %v11351_v53 = vsub.f32 %v14050_v24, %v11151_v45  ;;  %v11355_v50 = vsub.f32 %v14052_v31, %v11151_v45  ;;  %v14060_v39 = vld [vmem:[#allocation13_spill] sm:$0xff] }
 0x373   :  { %14044 = vst [vmem:[#allocation56_spill] sm:$0xff] %v11331_v0  ;;  %14045 = vst [vmem:[#allocation57_spill] sm:$0xff] %v11335_v12  ;;  %v11359_v19 = vsub.f32 %v14054_v41, %v11151_v45  ;;  %v11363_v55 = vsub.f32 %v14056_v58, %v11151_v45  ;;  %v11367_v29 = vsub.f32 %v14058_v14, %v11151_v45 }
 0x374   :  { %14046 = vst [vmem:[#allocation9_spill] sm:$0xff] %v11339_v46  ;;  %14047 = vst [vmem:[#allocation58_spill] sm:$0xff] %v11343_v56  ;;  %v11371_v24 = vsub.f32 %v14060_v39, %v11151_v45 }
 0x375   :  { %14049 = vst [vmem:[#allocation59_spill] sm:$0xff] %v11347_v33  ;;  %14051 = vst [vmem:[#allocation14_spill] sm:$0xff] %v11351_v53  ;;  %v14062_v53 = vld [vmem:[#allocation3_spill] sm:$0xff] }
 0x376   :  { %14053 = vst [vmem:[#allocation26_spill] sm:$0xff] %v11355_v50  ;;  %14055 = vst [vmem:[#allocation27_spill] sm:$0xff] %v11359_v19  ;;  %v11375_v31 = vsub.f32 %v14062_v53, %v11151_v45  ;;  %v14064_v50 = vld [vmem:[#allocation6_spill] sm:$0xff] }
 0x377   :  { %14057 = vst [vmem:[#allocation17_spill] sm:$0xff] %v11363_v55  ;;  %14059 = vst [vmem:[#allocation18_spill] sm:$0xff] %v11367_v29  ;;  %v11379_v41 = vsub.f32 %v14064_v50, %v11151_v45  ;;  %v14066_v19 = vld [vmem:[#allocation46_spill] sm:$0xff]  ;;  %v14068_v55 = vld [vmem:[#allocation5_spill] sm:$0xff]  ;;  %v11399_v50 = vsub.f32 %v11146_v9, %v11151_v45  ;;  %v3743_v9 = vmul.f32 %v11167_v8, %v11167_v8 }
 0x378   :  { %14061 = vst [vmem:[#allocation16_spill] sm:$0xff] %v11371_v24  ;;  %14063 = vst [vmem:[#allocation19_spill] sm:$0xff] %v11375_v31  ;;  %v11383_v58 = vsub.f32 %v14066_v19, %v11151_v45  ;;  %v11387_v14 = vsub.f32 %v14068_v55, %v11151_v45  ;;  %v14070_v29 = vld [vmem:[#allocation7_spill] sm:$0xff]  ;;  %v14072_v24 = vld [vmem:[#allocation49_spill] sm:$0xff]  ;;  %v11403_v19 = vsub.f32 %v11139_v17, %v11151_v45 }
 0x379   :  { %14065 = vst [vmem:[#allocation22_spill] sm:$0xff] %v11379_v41  ;;  %v11391_v39 = vsub.f32 %v14070_v29, %v11151_v45  ;;  %v11395_v53 = vsub.f32 %v14072_v24, %v11151_v45  ;;  %14074 = vst [vmem:[#allocation24_spill] sm:$0xff] %v11399_v50  ;;  %v11407_v55 = vsub.f32 %v11144_v62, %v11151_v45 }
 0x37a   :  { %14067 = vst [vmem:[#allocation25_spill] sm:$0xff] %v11383_v58  ;;  %14069 = vst [vmem:[#allocation32_spill] sm:$0xff] %v11387_v14  ;;  %v3740_v29 = vmul.f32 %v11155_v2, %v11155_v2  ;;  %v3742_v24 = vmul.f32 %v11163_v37, %v11163_v37  ;;  %v3744_v17 = vmul.f32 %v11171_v32, %v11171_v32 }
 0x37b   :  { %14071 = vst [vmem:[#allocation33_spill] sm:$0xff] %v11391_v39  ;;  %14073 = vst [vmem:[#allocation23_spill] sm:$0xff] %v11395_v53  ;;  %v3741_v39 = vmul.f32 %v11159_v21, %v11159_v21  ;;  %v3745_v45 = vmul.f32 %v11175_v36, %v11175_v36  ;;  %v3746_v2 = vmul.f32 %v11179_v49, %v11179_v49 }
 0x37c   :  { %14075 = vst [vmem:[#allocation38_spill] sm:$0xff] %v11403_v19  ;;  %v3747_v37 = vmul.f32 %v11183_v4, %v11183_v4 }
 0x37d   :  { %v3804_v53 = vadd.f32 %v3741_v39, %v3740_v29  ;;  %v3748_v29 = vmul.f32 %v11187_v28, %v11187_v28 }
 0x37f   :  { %v3805_v50 = vadd.f32 %v3804_v53, %v3742_v24  ;;  %v3749_v24 = vmul.f32 %v11191_v10, %v11191_v10 }
 0x381   :  { %v3806_v19 = vadd.f32 %v3805_v50, %v3743_v9  ;;  %v3750_v9 = vmul.f32 %v11195_v25, %v11195_v25 }
 0x383   :  { %v3807_v62 = vadd.f32 %v3806_v19, %v3744_v17  ;;  %v3751_v17 = vmul.f32 %v11199_v30, %v11199_v30 }
 0x385   :  { %v3808_v21 = vadd.f32 %v3807_v62, %v3745_v45  ;;  %v3752_v62 = vmul.f32 %v11203_v52, %v11203_v52 }
 0x387   :  { %v3809_v39 = vadd.f32 %v3808_v21, %v3746_v2  ;;  %v3753_v2 = vmul.f32 %v11207_v11, %v11207_v11 }
 0x389   :  { %v3810_v53 = vadd.f32 %v3809_v39, %v3747_v37  ;;  %v3754_v39 = vmul.f32 %v11211_v16, %v11211_v16 }
 0x38b   :  { %v3811_v50 = vadd.f32 %v3810_v53, %v3748_v29  ;;  %v3755_v53 = vmul.f32 %v11215_v6, %v11215_v6 }
 0x38d   :  { %v3812_v19 = vadd.f32 %v3811_v50, %v3749_v24  ;;  %v3756_v50 = vmul.f32 %v11219_v48, %v11219_v48 }
 0x38f   :  { %v3813_v45 = vadd.f32 %v3812_v19, %v3750_v9  ;;  %v3757_v19 = vmul.f32 %v11223_v47, %v11223_v47 }
 0x391   :  { %v3814_v21 = vadd.f32 %v3813_v45, %v3751_v17  ;;  %v3758_v45 = vmul.f32 %v11227_v54, %v11227_v54 }
 0x393   :  { %v3815_v37 = vadd.f32 %v3814_v21, %v3752_v62  ;;  %v3759_v21 = vmul.f32 %v11231_v61, %v11231_v61 }
 0x395   :  { %v3816_v29 = vadd.f32 %v3815_v37, %v3753_v2  ;;  %v3760_v37 = vmul.f32 %v11235_v38, %v11235_v38 }
 0x397   :  { %v3817_v24 = vadd.f32 %v3816_v29, %v3754_v39  ;;  %v3761_v29 = vmul.f32 %v11239_v15, %v11239_v15 }
 0x399   :  { %v3818_v9 = vadd.f32 %v3817_v24, %v3755_v53  ;;  %v3762_v24 = vmul.f32 %v11243_v18, %v11243_v18 }
 0x39b   :  { %v3819_v17 = vadd.f32 %v3818_v9, %v3756_v50  ;;  %v3763_v9 = vmul.f32 %v11247_v51, %v11247_v51 }
 0x39d   :  { %v3820_v62 = vadd.f32 %v3819_v17, %v3757_v19  ;;  %v3764_v17 = vmul.f32 %v11251_v63, %v11251_v63 }
 0x39f   :  { %v3821_v2 = vadd.f32 %v3820_v62, %v3758_v45  ;;  %v3765_v62 = vmul.f32 %v11255_v3, %v11255_v3 }
 0x3a1   :  { %v3822_v39 = vadd.f32 %v3821_v2, %v3759_v21  ;;  %v3766_v2 = vmul.f32 %v11259_v34, %v11259_v34 }
 0x3a3   :  { %v3823_v53 = vadd.f32 %v3822_v39, %v3760_v37  ;;  %v3767_v39 = vmul.f32 %v11263_v40, %v11263_v40 }
 0x3a5   :  { %v3824_v50 = vadd.f32 %v3823_v53, %v3761_v29  ;;  %v3768_v53 = vmul.f32 %v11267_v7, %v11267_v7 }
 0x3a7   :  { %v3825_v19 = vadd.f32 %v3824_v50, %v3762_v24  ;;  %v3769_v50 = vmul.f32 %v11271_v20, %v11271_v20 }
 0x3a9   :  { %v3826_v45 = vadd.f32 %v3825_v19, %v3763_v9  ;;  %v3770_v19 = vmul.f32 %v11275_v42, %v11275_v42 }
 0x3ab   :  { %v3827_v21 = vadd.f32 %v3826_v45, %v3764_v17  ;;  %v3771_v45 = vmul.f32 %v11279_v59, %v11279_v59 }
 0x3ad   :  { %v3828_v37 = vadd.f32 %v3827_v21, %v3765_v62  ;;  %v3772_v21 = vmul.f32 %v11283_v44, %v11283_v44 }
 0x3af   :  { %v3829_v29 = vadd.f32 %v3828_v37, %v3766_v2  ;;  %v3773_v37 = vmul.f32 %v11287_v22, %v11287_v22 }
 0x3b1   :  { %v3830_v24 = vadd.f32 %v3829_v29, %v3767_v39  ;;  %v3774_v29 = vmul.f32 %v11291_v27, %v11291_v27 }
 0x3b3   :  { %v3831_v9 = vadd.f32 %v3830_v24, %v3768_v53  ;;  %v3775_v24 = vmul.f32 %v11295_v5, %v11295_v5 }
 0x3b5   :  { %v3832_v17 = vadd.f32 %v3831_v9, %v3769_v50  ;;  %v3776_v9 = vmul.f32 %v11299_v23, %v11299_v23 }
 0x3b7   :  { %v3833_v62 = vadd.f32 %v3832_v17, %v3770_v19  ;;  %v3777_v17 = vmul.f32 %v11303_v43, %v11303_v43 }
 0x3b9   :  { %v3834_v2 = vadd.f32 %v3833_v62, %v3771_v45  ;;  %v3778_v62 = vmul.f32 %v11307_v60, %v11307_v60 }
 0x3bb   :  { %v3835_v39 = vadd.f32 %v3834_v2, %v3772_v21  ;;  %v3779_v2 = vmul.f32 %v11311_v13, %v11311_v13 }
 0x3bd   :  { %v3836_v53 = vadd.f32 %v3835_v39, %v3773_v37  ;;  %v3780_v39 = vmul.f32 %v11315_v35, %v11315_v35 }
 0x3bf   :  { %v3837_v50 = vadd.f32 %v3836_v53, %v3774_v29  ;;  %v3781_v53 = vmul.f32 %v11319_v1, %v11319_v1 }
 0x3c1   :  { %v3838_v19 = vadd.f32 %v3837_v50, %v3775_v24  ;;  %v3782_v50 = vmul.f32 %v11323_v26, %v11323_v26 }
 0x3c3   :  { %v3839_v45 = vadd.f32 %v3838_v19, %v3776_v9  ;;  %v3783_v19 = vmul.f32 %v11327_v57, %v11327_v57 }
 0x3c5   :  { %v3840_v21 = vadd.f32 %v3839_v45, %v3777_v17  ;;  %v3784_v45 = vmul.f32 %v11331_v0, %v11331_v0 }
 0x3c7   :  { %v3841_v37 = vadd.f32 %v3840_v21, %v3778_v62  ;;  %v3785_v21 = vmul.f32 %v11335_v12, %v11335_v12 }
 0x3c9   :  { %v3842_v29 = vadd.f32 %v3841_v37, %v3779_v2  ;;  %v3786_v37 = vmul.f32 %v11339_v46, %v11339_v46 }
 0x3cb   :  { %v3843_v24 = vadd.f32 %v3842_v29, %v3780_v39  ;;  %v3787_v29 = vmul.f32 %v11343_v56, %v11343_v56 }
 0x3cd   :  { %v3844_v9 = vadd.f32 %v3843_v24, %v3781_v53  ;;  %v3788_v24 = vmul.f32 %v11347_v33, %v11347_v33 }
 0x3cf   :  { %v3845_v17 = vadd.f32 %v3844_v9, %v3782_v50  ;;  %v14076_v9 = vld [vmem:[#allocation14_spill] sm:$0xff] }
 0x3d0   :  { %v3789_v0 = vmul.f32 %v14076_v9, %v14076_v9 }
 0x3d1   :  { %v3846_v62 = vadd.f32 %v3845_v17, %v3783_v19  ;;  %v14077_v17 = vld [vmem:[#allocation26_spill] sm:$0xff] }
 0x3d2   :  { %v3790_v12 = vmul.f32 %v14077_v17, %v14077_v17 }
 0x3d3   :  { %v3847_v2 = vadd.f32 %v3846_v62, %v3784_v45  ;;  %v14078_v62 = vld [vmem:[#allocation27_spill] sm:$0xff] }
 0x3d4   :  { %v3791_v46 = vmul.f32 %v14078_v62, %v14078_v62 }
 0x3d5   :  { %v3848_v39 = vadd.f32 %v3847_v2, %v3785_v21  ;;  %v14079_v2 = vld [vmem:[#allocation17_spill] sm:$0xff] }
 0x3d6   :  { %v3792_v56 = vmul.f32 %v14079_v2, %v14079_v2 }
 0x3d7   :  { %v3849_v53 = vadd.f32 %v3848_v39, %v3786_v37  ;;  %v14080_v39 = vld [vmem:[#allocation18_spill] sm:$0xff] }
 0x3d8   :  { %v3793_v33 = vmul.f32 %v14080_v39, %v14080_v39 }
 0x3d9   :  { %v3850_v50 = vadd.f32 %v3849_v53, %v3787_v29  ;;  %v14081_v53 = vld [vmem:[#allocation16_spill] sm:$0xff] }
 0x3da   :  { %v3794_v9 = vmul.f32 %v14081_v53, %v14081_v53 }
 0x3db   :  { %v3851_v19 = vadd.f32 %v3850_v50, %v3788_v24  ;;  %v3795_v50 = vmul.f32 %v11375_v31, %v11375_v31 }
 0x3dd   :  { %v3852_v45 = vadd.f32 %v3851_v19, %v3789_v0  ;;  %v3796_v19 = vmul.f32 %v11379_v41, %v11379_v41 }
 0x3df   :  { %v3853_v21 = vadd.f32 %v3852_v45, %v3790_v12  ;;  %v3797_v45 = vmul.f32 %v11383_v58, %v11383_v58 }
 0x3e1   :  { %v3854_v37 = vadd.f32 %v3853_v21, %v3791_v46  ;;  %v3798_v21 = vmul.f32 %v11387_v14, %v11387_v14 }
 0x3e3   :  { %v3855_v29 = vadd.f32 %v3854_v37, %v3792_v56  ;;  %v14082_v37 = vld [vmem:[#allocation33_spill] sm:$0xff] }
 0x3e4   :  { %v3799_v53 = vmul.f32 %v14082_v37, %v14082_v37 }
 0x3e5   :  { %v3856_v24 = vadd.f32 %v3855_v29, %v3793_v33  ;;  %v14083_v29 = vld [vmem:[#allocation23_spill] sm:$0xff] }
 0x3e6   :  { %v3800_v31 = vmul.f32 %v14083_v29, %v14083_v29 }
 0x3e7   :  { %v3857_v0 = vadd.f32 %v3856_v24, %v3794_v9  ;;  %v14084_v24 = vld [vmem:[#allocation24_spill] sm:$0xff] }
 0x3e8   :  { %v3801_v41 = vmul.f32 %v14084_v24, %v14084_v24  ;;  %v3879_v24 = vlaneseq }
 0x3e9   :  { %v3858_v12 = vadd.f32 %v3857_v0, %v3795_v50  ;;  %v14085_v0 = vld [vmem:[#allocation38_spill] sm:$0xff] }
 0x3ea   :  { %v3802_v58 = vmul.f32 %v14085_v0, %v14085_v0 }
 0x3eb   :  { %v3859_v46 = vadd.f32 %v3858_v12, %v3796_v19  ;;  %v3803_v12 = vmul.f32 %v11407_v55, %v11407_v55 }
 0x3ed   :  { %v3860_v56 = vadd.f32 %v3859_v46, %v3797_v45 }
 0x3ef   :  { %v3861_v33 = vadd.f32 %v3860_v56, %v3798_v21 }
 0x3f1   :  { %v3862_v9 = vadd.f32 %v3861_v33, %v3799_v53 }
 0x3f3   :  { %v3863_v50 = vadd.f32 %v3862_v9, %v3800_v31  ;;  %v3880_v31 = vshrl.u32 %v3879_v24, 7  ;;  %v7911_v9 = vmov 1983009808  }
 0x3f4   :  { %v4085_v2 = vunpack.c.l.s4 %v7911_v9  ;;  %v14090_v9 = vld [vmem:[#allocation56_spill] sm:$0xff] }
 0x3f5   :  { %v3864_v19 = vadd.f32 %v3863_v50, %v3801_v41  ;;  %v3874_v41 = vld [vmem:[%s13570_s2] sm:$0x1]  ;;  %v3881_v50 = vsub.s32 0, %v3880_v31 }
 0x3f7   :  { %v3865_v45 = vadd.f32 %v3864_v19, %v3802_v58  ;;  %v4086_v19 = vunpack.c.0.s8 %v4085_v2 }
 0x3f9   :  { %v3866_v46 = vadd.f32 %v3865_v45, %v3803_v12  ;;  %v14088_v45 = vld [vmem:[#allocation55_spill] sm:$0xff] }
 0x3fb   :  { %v3867_v14 = vrot.slane %v3866_v46, 4 }
 0x3fd   :  { %v3868_v37 = vadd.f32 %v3867_v14, %v3866_v46  ;;  %v14089_v46 = vld [vmem:[#allocation8_spill] sm:$0xff] }
 0x3ff   :  { %v3869_v21 = vrot.slane %v3868_v37, 2 }
 0x401   :  { %v3870_v56 = vadd.f32 %v3869_v21, %v3868_v37  ;;  %v11542_v37 = vsub.s32 %v4086_v19, %v3880_v31  ;;  %v14094_v19 = vld [vmem:[#allocation59_spill] sm:$0xff] }
 0x403   :  { %v3871_v39 = vrot.slane %v3870_v56, 1  ;;  %14086 = vst [vmem:[#allocation39_spill] sm:$0xff] %v11542_v37  ;;  %v14105_v37 = vld [vmem:[#allocation19_spill] sm:$0xff] }
 0x405   :  { %v3872_v29 = vadd.f32 %v3871_v39, %v3870_v56  ;;  %v14087_v39 = vld [vmem:[#allocation53_spill] sm:$0xff] }
 0x407   :  { %v3873_v53 = vmul.f32 0.001953125, %v3872_v29 }
 0x409   :  { %v3875_v33 = vadd.f32 1e-05, %v3873_v53 }
 0x40b   :  { %7887 = vrsqrt.f32 %v3875_v33 }
 0x415   :  { %v7888_v58 = vpop.eup %7887 }
 0x416   :  { %v3877_v12 = vmul.f32 %v7888_v58, %v3874_v41  ;;  %v14091_v41 = vld [vmem:[#allocation57_spill] sm:$0xff]  ;;  %v14093_v58 = vld [vmem:[#allocation58_spill] sm:$0xff] }
 0x418   :  { %v11540_v14 = vrot.slane %v3877_v12, %v3881_v50  ;;  %v14092_v50 = vld [vmem:[#allocation9_spill] sm:$0xff]  ;;  %v14095_v12 = vld [vmem:[#allocation14_spill] sm:$0xff] }
 0x41a   :  { %v11546_v29 = vmul.f32 %v11540_v14, %v14087_v39  ;;  %v11550_v24 = vmul.f32 %v11540_v14, %v14088_v45  ;;  %v11554_v21 = vmul.f32 %v11540_v14, %v14089_v46  ;;  %v11558_v2 = vmul.f32 %v11540_v14, %v11167_v8 }
 0x41b   :  { %v11562_v56 = vmul.f32 %v11540_v14, %v11171_v32  ;;  %v11566_v53 = vmul.f32 %v11540_v14, %v11175_v36  ;;  %v11570_v33 = vmul.f32 %v11540_v14, %v11179_v49  ;;  %v11574_v31 = vmul.f32 %v11540_v14, %v11183_v4 }
 0x41c   :  { %v11578_v8 = vmul.f32 %v11540_v14, %v11187_v28  ;;  %v11582_v32 = vmul.f32 %v11540_v14, %v11191_v10  ;;  %v11586_v36 = vmul.f32 %v11540_v14, %v11195_v25  ;;  %v11590_v49 = vmul.f32 %v11540_v14, %v11199_v30 }
 0x41d   :  { %v11594_v4 = vmul.f32 %v11540_v14, %v11203_v52  ;;  %v11598_v28 = vmul.f32 %v11540_v14, %v11207_v11  ;;  %v11602_v10 = vmul.f32 %v11540_v14, %v11211_v16  ;;  %v11606_v25 = vmul.f32 %v11540_v14, %v11215_v6 }
 0x41e   :  { %v11610_v30 = vmul.f32 %v11540_v14, %v11219_v48  ;;  %v11614_v52 = vmul.f32 %v11540_v14, %v11223_v47  ;;  %v11618_v11 = vmul.f32 %v11540_v14, %v11227_v54  ;;  %v11622_v16 = vmul.f32 %v11540_v14, %v11231_v61 }
 0x41f   :  { %v11626_v6 = vmul.f32 %v11540_v14, %v11235_v38  ;;  %v11630_v48 = vmul.f32 %v11540_v14, %v11239_v15  ;;  %v11634_v47 = vmul.f32 %v11540_v14, %v11243_v18  ;;  %v11638_v54 = vmul.f32 %v11540_v14, %v11247_v51 }
 0x420   :  { %v11642_v61 = vmul.f32 %v11540_v14, %v11251_v63  ;;  %v11646_v38 = vmul.f32 %v11540_v14, %v11255_v3  ;;  %v11650_v15 = vmul.f32 %v11540_v14, %v11259_v34  ;;  %v11654_v18 = vmul.f32 %v11540_v14, %v11263_v40 }
 0x421   :  { %v11658_v51 = vmul.f32 %v11540_v14, %v11267_v7  ;;  %v11662_v63 = vmul.f32 %v11540_v14, %v11271_v20  ;;  %v11666_v3 = vmul.f32 %v11540_v14, %v11275_v42  ;;  %v11670_v34 = vmul.f32 %v11540_v14, %v11279_v59 }
 0x422   :  { %v11674_v40 = vmul.f32 %v11540_v14, %v11283_v44  ;;  %v11678_v7 = vmul.f32 %v11540_v14, %v11287_v22  ;;  %v11682_v20 = vmul.f32 %v11540_v14, %v11291_v27  ;;  %v11686_v42 = vmul.f32 %v11540_v14, %v11295_v5 }
 0x423   :  { %v11690_v59 = vmul.f32 %v11540_v14, %v11299_v23  ;;  %v11694_v44 = vmul.f32 %v11540_v14, %v11303_v43  ;;  %v11698_v22 = vmul.f32 %v11540_v14, %v11307_v60  ;;  %v11702_v27 = vmul.f32 %v11540_v14, %v11311_v13 }
 0x424   :  { %v11706_v5 = vmul.f32 %v11540_v14, %v11315_v35  ;;  %v11710_v23 = vmul.f32 %v11540_v14, %v11319_v1  ;;  %v11714_v43 = vmul.f32 %v11540_v14, %v11323_v26  ;;  %v11718_v60 = vmul.f32 %v11540_v14, %v11327_v57 }
 0x425   :  { %v11722_v13 = vmul.f32 %v11540_v14, %v14090_v9  ;;  %v11726_v35 = vmul.f32 %v11540_v14, %v14091_v41  ;;  %v11730_v1 = vmul.f32 %v11540_v14, %v14092_v50  ;;  %v11734_v26 = vmul.f32 %v11540_v14, %v14093_v58  ;;  %v14099_v9 = vld [vmem:[#allocation17_spill] sm:$0xff]  ;;  %v14101_v50 = vld [vmem:[#allocation18_spill] sm:$0xff] }
 0x426   :  { %v11738_v57 = vmul.f32 %v11540_v14, %v14094_v19  ;;  %v11742_v39 = vmul.f32 %v11540_v14, %v14095_v12  ;;  %v11746_v45 = vmul.f32 %v11540_v14, %v14077_v17  ;;  %v11750_v46 = vmul.f32 %v11540_v14, %v14078_v62  ;;  %v14103_v19 = vld [vmem:[#allocation16_spill] sm:$0xff]  ;;  %v11771_v62 = vld [vmem:[%s13571_s3] ss:$0 sm:$0xff] }
 0x427   :  { %v11754_v41 = vmul.f32 %v11540_v14, %v14099_v9  ;;  %v11758_v58 = vmul.f32 %v11540_v14, %v14101_v50  ;;  %v11762_v12 = vmul.f32 %v11540_v14, %v14103_v19  ;;  %v11766_v17 = vmul.f32 %v11540_v14, %v14105_v37 }
 0x428   :  { %14096 = vst [vmem:[#allocation29_spill] sm:$0xff] %v11742_v39  ;;  %14097 = vst [vmem:[#allocation30_spill] sm:$0xff] %v11746_v45  ;;  %v14115_v39 = vld [vmem:[#allocation24_spill] sm:$0xff] }
 0x429   :  { %14098 = vst [vmem:[#allocation28_spill] sm:$0xff] %v11750_v46  ;;  %14100 = vst [vmem:[#allocation31_spill] sm:$0xff] %v11754_v41  ;;  %v14107_v46 = vld [vmem:[#allocation22_spill] sm:$0xff]  ;;  %v14108_v41 = vld [vmem:[#allocation25_spill] sm:$0xff] }
 0x42a   :  { %14102 = vst [vmem:[#allocation34_spill] sm:$0xff] %v11758_v58  ;;  %14104 = vst [vmem:[#allocation37_spill] sm:$0xff] %v11762_v12  ;;  %v11775_v9 = vmul.f32 %v11540_v14, %v14107_v46  ;;  %v11779_v50 = vmul.f32 %v11540_v14, %v14108_v41  ;;  %v14109_v58 = vld [vmem:[#allocation32_spill] sm:$0xff]  ;;  %v14111_v12 = vld [vmem:[#allocation33_spill] sm:$0xff]  ;;  %v11795_v46 = vmul.f32 %v11540_v14, %v14115_v39 }
 0x42b   :  { %14106 = vst [vmem:[#allocation44_spill] sm:$0xff] %v11766_v17  ;;  %v11783_v19 = vmul.f32 %v11540_v14, %v14109_v58  ;;  %v11787_v37 = vmul.f32 %v11540_v14, %v14111_v12  ;;  %v14113_v17 = vld [vmem:[#allocation23_spill] sm:$0xff]  ;;  %v11799_v41 = vmul.f32 %v11540_v14, %v14085_v0  ;;  %v11803_v58 = vmul.f32 %v11540_v14, %v11407_v55 }
 0x42c   :  { %v11791_v45 = vmul.f32 %v11540_v14, %v14113_v17  ;;  %14116 = vst [vmem:[#allocation50_spill] sm:$0xff] %v11795_v46  ;;  %v11807_v12 = vadd.f32 %v11771_v62, %v11546_v29  ;;  %v11811_v17 = vadd.f32 %v11771_v62, %v11550_v24  ;;  %v3957_v39 = vadd.f32 %v11771_v62, %v11554_v21 }
 0x42d   :  { %14110 = vst [vmem:[#allocation45_spill] sm:$0xff] %v11783_v19  ;;  %14112 = vst [vmem:[#allocation35_spill] sm:$0xff] %v11787_v37  ;;  %v3958_v46 = vadd.f32 %v11771_v62, %v11558_v2  ;;  %v3959_v0 = vadd.f32 %v11771_v62, %v11562_v56  ;;  %v3960_v55 = vadd.f32 %v11771_v62, %v11566_v53 }
 0x42e   :  { %14114 = vst [vmem:[#allocation36_spill] sm:$0xff] %v11791_v45  ;;  %14117 = vst [vmem:[#allocation51_spill] sm:$0xff] %v11799_v41  ;;  %v3961_v14 = vadd.f32 %v11771_v62, %v11570_v33  ;;  %v3962_v29 = vadd.f32 %v11771_v62, %v11574_v31  ;;  %v3963_v24 = vadd.f32 %v11771_v62, %v11578_v8 }
 0x42f   :  { %14118 = vst [vmem:[#allocation41_spill] sm:$0xff] %v11803_v58  ;;  %14119 = vst [vmem:[#allocation42_spill] sm:$0xff] %v11807_v12  ;;  %v3964_v21 = vadd.f32 %v11771_v62, %v11582_v32  ;;  %v3965_v2 = vadd.f32 %v11771_v62, %v11586_v36  ;;  %v3966_v56 = vadd.f32 %v11771_v62, %v11590_v49  ;;  %v14122_v12 = vld [vmem:[#allocation30_spill] sm:$0xff] }
 0x430   :  { %14120 = vst [vmem:[#allocation40_spill] sm:$0xff] %v11811_v17  ;;  %v3967_v53 = vadd.f32 %v11771_v62, %v11594_v4  ;;  %v3968_v33 = vadd.f32 %v11771_v62, %v11598_v28  ;;  %v3969_v31 = vadd.f32 %v11771_v62, %v11602_v10  ;;  %v3970_v8 = vadd.f32 %v11771_v62, %v11606_v25  ;;  %v14121_v17 = vld [vmem:[#allocation29_spill] sm:$0xff]  ;;  %v14123_v58 = vld [vmem:[#allocation28_spill] sm:$0xff]  ;;  %v14124_v41 = vld [vmem:[#allocation31_spill] sm:$0xff] }
 0x431   :  { %v3971_v32 = vadd.f32 %v11771_v62, %v11610_v30  ;;  %v3972_v36 = vadd.f32 %v11771_v62, %v11614_v52  ;;  %v3973_v49 = vadd.f32 %v11771_v62, %v11618_v11  ;;  %v3974_v4 = vadd.f32 %v11771_v62, %v11622_v16  ;;  %v14125_v45 = vld [vmem:[#allocation34_spill] sm:$0xff]  ;;  %v14126_v37 = vld [vmem:[#allocation37_spill] sm:$0xff] }
 0x432   :  { %v3975_v28 = vadd.f32 %v11771_v62, %v11626_v6  ;;  %v3976_v10 = vadd.f32 %v11771_v62, %v11630_v48  ;;  %v3977_v25 = vadd.f32 %v11771_v62, %v11634_v47  ;;  %v3978_v30 = vadd.f32 %v11771_v62, %v11638_v54  ;;  %v14127_v19 = vld [vmem:[#allocation44_spill] sm:$0xff] }
 0x433   :  { %v3979_v52 = vadd.f32 %v11771_v62, %v11642_v61  ;;  %v3980_v11 = vadd.f32 %v11771_v62, %v11646_v38  ;;  %v3981_v16 = vadd.f32 %v11771_v62, %v11650_v15  ;;  %v3982_v6 = vadd.f32 %v11771_v62, %v11654_v18 }
 0x434   :  { %v3983_v48 = vadd.f32 %v11771_v62, %v11658_v51  ;;  %v3984_v47 = vadd.f32 %v11771_v62, %v11662_v63  ;;  %v3985_v54 = vadd.f32 %v11771_v62, %v11666_v3  ;;  %v3986_v61 = vadd.f32 %v11771_v62, %v11670_v34 }
 0x435   :  { %v3987_v38 = vadd.f32 %v11771_v62, %v11674_v40  ;;  %v3988_v15 = vadd.f32 %v11771_v62, %v11678_v7  ;;  %v3989_v18 = vadd.f32 %v11771_v62, %v11682_v20  ;;  %v3990_v51 = vadd.f32 %v11771_v62, %v11686_v42 }
 0x436   :  { %v3991_v63 = vadd.f32 %v11771_v62, %v11690_v59  ;;  %v3992_v3 = vadd.f32 %v11771_v62, %v11694_v44  ;;  %v3993_v34 = vadd.f32 %v11771_v62, %v11698_v22  ;;  %v3994_v40 = vadd.f32 %v11771_v62, %v11702_v27 }
 0x437   :  { %v3995_v7 = vadd.f32 %v11771_v62, %v11706_v5  ;;  %v3996_v20 = vadd.f32 %v11771_v62, %v11710_v23  ;;  %v3997_v42 = vadd.f32 %v11771_v62, %v11714_v43  ;;  %v3998_v59 = vadd.f32 %v11771_v62, %v11718_v60 }
 0x438   :  { %v3999_v44 = vadd.f32 %v11771_v62, %v11722_v13  ;;  %v4000_v22 = vadd.f32 %v11771_v62, %v11726_v35  ;;  %v4001_v27 = vadd.f32 %v11771_v62, %v11730_v1  ;;  %v4002_v5 = vadd.f32 %v11771_v62, %v11734_v26 }
 0x439   :  { %v4003_v23 = vadd.f32 %v11771_v62, %v11738_v57  ;;  %v4004_v43 = vadd.f32 %v11771_v62, %v14121_v17  ;;  %v4005_v60 = vadd.f32 %v11771_v62, %v14122_v12  ;;  %v4006_v13 = vadd.f32 %v11771_v62, %v14123_v58  ;;  %v14128_v58 = vld [vmem:[#allocation45_spill] sm:$0xff] }
 0x43a   :  { %v4007_v35 = vadd.f32 %v11771_v62, %v14124_v41  ;;  %v4008_v1 = vadd.f32 %v11771_v62, %v14125_v45  ;;  %v4009_v26 = vadd.f32 %v11771_v62, %v14126_v37  ;;  %v4010_v57 = vadd.f32 %v11771_v62, %v14127_v19  ;;  %v14129_v45 = vld [vmem:[#allocation35_spill] sm:$0xff]  ;;  %v14130_v19 = vld [vmem:[#allocation36_spill] sm:$0xff] }
 0x43b   :  { %v4011_v17 = vadd.f32 %v11771_v62, %v11775_v9  ;;  %v4012_v12 = vadd.f32 %v11771_v62, %v11779_v50  ;;  %v4013_v41 = vadd.f32 %v11771_v62, %v14128_v58  ;;  %v4014_v37 = vadd.f32 %v11771_v62, %v14129_v45  ;;  %v14131_v50 = vld [vmem:[#allocation50_spill] sm:$0xff]  ;;  %v14132_v45 = vld [vmem:[#allocation51_spill] sm:$0xff] }
 0x43c   :  { %v4015_v9 = vadd.f32 %v11771_v62, %v14130_v19  ;;  %v4016_v58 = vadd.f32 %v11771_v62, %v14131_v50  ;;  %v4017_v19 = vadd.f32 %v11771_v62, %v14132_v45  ;;  %v14133_v50 = vld [vmem:[#allocation41_spill] sm:$0xff] }
 0x43d   :  { %v4018_v45 = vadd.f32 %v11771_v62, %v14133_v50  ;;  %v14134_v50 = vld [vmem:[#allocation42_spill] sm:$0xff] }
 0x43e   :  { %v4019_v62 = vmax.f32 %v14134_v50, %v3957_v39  ;;  %v14135_v39 = vld [vmem:[#allocation40_spill] sm:$0xff] }
 0x43f   :  { %v4020_v50 = vmax.f32 %v14135_v39, %v3958_v46  ;;  %v4021_v39 = vmax.f32 %v3959_v0, %v3961_v14  ;;  %v4022_v46 = vmax.f32 %v3960_v55, %v3962_v29  ;;  %v4023_v0 = vmax.f32 %v3963_v24, %v3965_v2 }
 0x440   :  { %v4024_v14 = vmax.f32 %v3964_v21, %v3966_v56  ;;  %v4025_v29 = vmax.f32 %v3967_v53, %v3969_v31  ;;  %v11939_v55 = vmax.f32 %v3968_v33, %v3970_v8  ;;  %v11941_v2 = vmax.f32 %v3971_v32, %v3973_v49 }
 0x441   :  { %v11943_v24 = vmax.f32 %v3972_v36, %v3974_v4  ;;  %v11945_v21 = vmax.f32 %v3975_v28, %v3977_v25  ;;  %v11947_v56 = vmax.f32 %v3976_v10, %v3978_v30  ;;  %v11949_v31 = vmax.f32 %v3979_v52, %v3981_v16 }
 0x442   :  { %14136 = vst [vmem:[#allocation43_spill] sm:$0xff] %v11939_v55  ;;  %v11951_v53 = vmax.f32 %v3980_v11, %v3982_v6  ;;  %v11953_v8 = vmax.f32 %v3983_v48, %v3985_v54  ;;  %v11955_v33 = vmax.f32 %v3984_v47, %v3986_v61  ;;  %v11957_v55 = vmax.f32 %v3987_v38, %v3989_v18  ;;  %v14137_v38 = vld [vmem:[#allocation39_spill] sm:$0xff] }
 0x443   :  { %v11959_v32 = vmax.f32 %v3988_v15, %v3990_v51  ;;  %v11961_v49 = vmax.f32 %v3991_v63, %v3993_v34  ;;  %v11963_v36 = vmax.f32 %v3992_v3, %v3994_v40  ;;  %v11965_v4 = vmax.f32 %v3995_v7, %v3997_v42 }
 0x444   :  { %v11967_v28 = vmax.f32 %v3996_v20, %v3998_v59  ;;  %v11969_v10 = vmax.f32 %v3999_v44, %v4001_v27  ;;  %v11971_v25 = vmax.f32 %v4000_v22, %v4002_v5  ;;  %v11973_v30 = vmax.f32 %v4003_v23, %v4005_v60 }
 0x445   :  { %v11975_v52 = vmax.f32 %v4004_v43, %v4006_v13  ;;  %v11977_v11 = vmax.f32 %v4007_v35, %v4009_v26  ;;  %v11979_v16 = vmax.f32 %v4008_v1, %v4010_v57  ;;  %v11981_v6 = vmax.f32 %v4011_v17, %v4013_v41 }
 0x446   :  { %v11983_v48 = vmax.f32 %v4012_v12, %v4014_v37  ;;  %v11985_v47 = vmax.f32 %v4015_v9, %v4017_v19  ;;  %v11987_v54 = vmax.f32 %v4016_v58, %v4018_v45  ;;  %v4083_v61 = vcombine.high %v4019_v62, %v4019_v62 }
 0x447   :  { %v11990_v15 = vrot.slane %v4019_v62, %v14137_v38  ;;  %v4100_v18 = vcombine.high %v4020_v50, %v4020_v50  ;;  %v11993_v51 = vrot.slane %v4020_v50, %v14137_v38  ;;  %v4117_v63 = vcombine.high %v4021_v39, %v4021_v39 }
 0x448   :  { %v11996_v3 = vrot.slane %v4021_v39, %v14137_v38  ;;  %v4134_v34 = vcombine.high %v4022_v46, %v4022_v46  ;;  %v11999_v40 = vrot.slane %v4022_v46, %v14137_v38  ;;  %v12002_v7 = vrot.slane %v4083_v61, %v14137_v38 }
 0x449   :  { %v12007_v42 = vrot.slane %v4100_v18, %v14137_v38  ;;  %v12012_v44 = vrot.slane %v4117_v63, %v14137_v38  ;;  %v4151_v60 = vcombine.high %v4023_v0, %v4023_v0  ;;  %v12026_v13 = vrot.slane %v4023_v0, %v14137_v38  ;;  %v14138_v19 = vld [vmem:[#allocation43_spill] sm:$0xff] }
 0x44a   :  { %v12017_v27 = vrot.slane %v4134_v34, %v14137_v38  ;;  %v4168_v26 = vcombine.high %v4024_v14, %v4024_v14  ;;  %v12033_v57 = vrot.slane %v4024_v14, %v14137_v38  ;;  %v4185_v41 = vcombine.high %v4025_v29, %v4025_v29 }
 0x44b   :  { %v12036_v17 = vrot.slane %v4151_v60, %v14137_v38  ;;  %v12041_v37 = vrot.slane %v4025_v29, %v14137_v38  ;;  %v4202_v45 = vcombine.high %v14138_v19, %v14138_v19  ;;  %v12052_v62 = vrot.slane %v14138_v19, %v14137_v38 }
 0x44c   :  { %v12044_v9 = vrot.slane %v4168_v26, %v14137_v38  ;;  %v12057_v39 = vrot.slane %v4185_v41, %v14137_v38  ;;  %v4219_v0 = vcombine.high %v11941_v2, %v11941_v2  ;;  %v12072_v18 = vrot.slane %v11941_v2, %v14137_v38 }
 0x44d   :  { %v12066_v29 = vrot.slane %v4202_v45, %v14137_v38  ;;  %v4236_v60 = vcombine.high %v11943_v24, %v11943_v24  ;;  %v12083_v26 = vrot.slane %v11943_v24, %v14137_v38  ;;  %v4253_v19 = vcombine.high %v11945_v21, %v11945_v21 }
 0x44e   :  { %v12077_v34 = vrot.slane %v4219_v0, %v14137_v38  ;;  %v12093_v45 = vrot.slane %v11945_v21, %v14137_v38  ;;  %v4270_v41 = vcombine.high %v11947_v56, %v11947_v56  ;;  %v12111_v21 = vrot.slane %v11947_v56, %v14137_v38 }
 0x44f   :  { %v12098_v61 = vrot.slane %v4236_v60, %v14137_v38  ;;  %v12105_v2 = vrot.slane %v4253_v19, %v14137_v38  ;;  %v4287_v60 = vcombine.high %v11949_v31, %v11949_v31  ;;  %v12122_v19 = vrot.slane %v11949_v31, %v14137_v38 }
 0x450   :  { %v12118_v24 = vrot.slane %v4270_v41, %v14137_v38  ;;  %v4304_v63 = vcombine.high %v11951_v53, %v11951_v53  ;;  %v12135_v41 = vrot.slane %v11951_v53, %v14137_v38  ;;  %v4321_v56 = vcombine.high %v11953_v8, %v11953_v8 }
 0x451   :  { %v12131_v14 = vrot.slane %v4287_v60, %v14137_v38  ;;  %v12152_v53 = vrot.slane %v11953_v8, %v14137_v38  ;;  %v4338_v31 = vcombine.high %v11955_v33, %v11955_v33  ;;  %v12163_v50 = vrot.slane %v11955_v33, %v14137_v38 }
 0x452   :  { %v12142_v58 = vrot.slane %v4304_v63, %v14137_v38  ;;  %v12159_v0 = vrot.slane %v4321_v56, %v14137_v38  ;;  %v4355_v46 = vcombine.high %v11957_v55, %v11957_v55  ;;  %v12174_v12 = vrot.slane %v11957_v55, %v14137_v38 }
 0x453   :  { %v12170_v60 = vrot.slane %v4338_v31, %v14137_v38  ;;  %v4372_v56 = vcombine.high %v11959_v32, %v11959_v32  ;;  %v12187_v31 = vrot.slane %v11959_v32, %v14137_v38  ;;  %v4389_v33 = vcombine.high %v11961_v49, %v11961_v49 }
 0x454   :  { %v12183_v1 = vrot.slane %v4355_v46, %v14137_v38  ;;  %v12204_v32 = vrot.slane %v11961_v49, %v14137_v38  ;;  %v4406_v55 = vcombine.high %v11963_v36, %v11963_v36  ;;  %v12215_v35 = vrot.slane %v11963_v36, %v14137_v38 }
 0x455   :  { %v12194_v5 = vrot.slane %v4372_v56, %v14137_v38  ;;  %v12211_v8 = vrot.slane %v4389_v33, %v14137_v38  ;;  %v4423_v63 = vcombine.high %v11965_v4, %v11965_v4  ;;  %v12226_v22 = vrot.slane %v11965_v4, %v14137_v38 }
 0x456   :  { %14140 = vst [vmem:[#allocation54_spill] sm:$0xff] %v12215_v35  ;;  %v12222_v46 = vrot.slane %v4406_v55, %v14137_v38  ;;  %v4440_v33 = vcombine.high %v11967_v28, %v11967_v28  ;;  %v12239_v55 = vrot.slane %v11967_v28, %v14137_v38  ;;  %v4457_v36 = vcombine.high %v11969_v10, %v11969_v10 }
 0x457   :  { %14139 = vst [vmem:[#allocation52_spill] sm:$0xff] %v12211_v8  ;;  %14142 = vst [vmem:[#allocation48_spill] sm:$0xff] %v12226_v22  ;;  %v12235_v43 = vrot.slane %v4423_v63, %v14137_v38  ;;  %v12256_v28 = vrot.slane %v11969_v10, %v14137_v38  ;;  %v4474_v4 = vcombine.high %v11971_v25, %v11971_v25 }
 0x458   :  { %14141 = vst [vmem:[#allocation47_spill] sm:$0xff] %v12222_v46  ;;  %14144 = vst [vmem:[#allocation10_spill] sm:$0xff] %v12239_v55  ;;  %v12246_v59 = vrot.slane %v4440_v33, %v14137_v38  ;;  %v12263_v49 = vrot.slane %v4457_v36, %v14137_v38  ;;  %v12267_v23 = vrot.slane %v11971_v25, %v14137_v38 }
 0x459   :  { %14143 = vst [vmem:[#allocation11_spill] sm:$0xff] %v12235_v43  ;;  %14146 = vst [vmem:[#allocation21_spill] sm:$0xff] %v12256_v28  ;;  %v4491_v56 = vcombine.high %v11973_v30, %v11973_v30  ;;  %v12274_v63 = vrot.slane %v4474_v4, %v14137_v38  ;;  %v12278_v20 = vrot.slane %v11973_v30, %v14137_v38 }
 0x45a   :  { %14145 = vst [vmem:[#allocation15_spill] sm:$0xff] %v12246_v59  ;;  %14147 = vst [vmem:[#allocation12_spill] sm:$0xff] %v12263_v49  ;;  %v4508_v36 = vcombine.high %v11975_v52, %v11975_v52  ;;  %v12291_v4 = vrot.slane %v11975_v52, %v14137_v38  ;;  %v4525_v25 = vcombine.high %v11977_v11, %v11977_v11 }
 0x45b   :  { %14148 = vst [vmem:[#allocation20_spill] sm:$0xff] %v12267_v23  ;;  %14149 = vst [vmem:[#allocation2_spill] sm:$0xff] %v12274_v63  ;;  %v12287_v59 = vrot.slane %v4491_v56, %v14137_v38  ;;  %v12308_v52 = vrot.slane %v11977_v11, %v14137_v38  ;;  %v4542_v30 = vcombine.high %v11979_v16, %v11979_v16 }
 0x45c   :  { %14150 = vst [vmem:[#allocation4_spill] sm:$0xff] %v12278_v20  ;;  %14152 = vst [vmem:[#allocation3_spill] sm:$0xff] %v12291_v4  ;;  %v12298_v28 = vrot.slane %v4508_v36, %v14137_v38  ;;  %v12315_v10 = vrot.slane %v4525_v25, %v14137_v38  ;;  %v12319_v20 = vrot.slane %v11979_v16, %v14137_v38  ;;  %v4755_v36 = vsel %vm3313_vm2, %v11990_v15, -inf }
 0x45d   :  { %14151 = vst [vmem:[#allocation13_spill] sm:$0xff] %v12287_v59  ;;  %14154 = vst [vmem:[#allocation46_spill] sm:$0xff] %v12308_v52  ;;  %v4559_v33 = vcombine.high %v11981_v6, %v11981_v6  ;;  %v12326_v56 = vrot.slane %v4542_v30, %v14137_v38  ;;  %v12330_v4 = vrot.slane %v11981_v6, %v14137_v38 }
 0x45e   :  { %14153 = vst [vmem:[#allocation6_spill] sm:$0xff] %v12298_v28  ;;  %14155 = vst [vmem:[#allocation5_spill] sm:$0xff] %v12315_v10  ;;  %v4576_v25 = vcombine.high %v11983_v48, %v11983_v48  ;;  %v12343_v30 = vrot.slane %v11983_v48, %v14137_v38  ;;  %v4593_v16 = vcombine.high %v11985_v47, %v11985_v47 }
 0x45f   :  { %14156 = vst [vmem:[#allocation7_spill] sm:$0xff] %v12319_v20  ;;  %14157 = vst [vmem:[#allocation49_spill] sm:$0xff] %v12326_v56  ;;  %v12339_v28 = vrot.slane %v4559_v33, %v14137_v38  ;;  %v12360_v48 = vrot.slane %v11985_v47, %v14137_v38  ;;  %v4610_v6 = vcombine.high %v11987_v54, %v11987_v54  ;;  %v4769_v56 = vsel %vm3313_vm2, %v12002_v7, -inf }
 0x460   :  { %14158 = vst [vmem:[#allocation26_spill] sm:$0xff] %v12330_v4  ;;  %14160 = vst [vmem:[#allocation38_spill] sm:$0xff] %v12343_v30  ;;  %v12350_v52 = vrot.slane %v4576_v25, %v14137_v38  ;;  %v12367_v11 = vrot.slane %v4593_v16, %v14137_v38  ;;  %v12371_v4 = vrot.slane %v11987_v54, %v14137_v38  ;;  %v4756_v30 = vrot.slane %v4755_v36, 4 }
 0x461   :  { %14159 = vst [vmem:[#allocation27_spill] sm:$0xff] %v12339_v28  ;;  %14162 = vst [vmem:[#allocation55_spill] sm:$0xff] %v12360_v48  ;;  %v12378_v33 = vrot.slane %v4610_v6, %v14137_v38  ;;  %v14166_v25 = vcombine.high %v11990_v15, %v11990_v15  ;;  %v4770_v47 = vrot.slane %v4769_v56, 4  ;;  %v14167_v15 = vcombine.high %v12002_v7, %v12002_v7 }
 0x462   :  { %14161 = vst [vmem:[#allocation53_spill] sm:$0xff] %v12350_v52  ;;  %14163 = vst [vmem:[#allocation8_spill] sm:$0xff] %v12367_v11  ;;  %v4757_v6 = vmax.f32 %v4755_v36, %v4756_v30  ;;  %v4783_v52 = vsel %vm3313_vm2, %v11993_v51, -inf  ;;  %v14168_v54 = vcombine.high %v11993_v51, %v11993_v51  ;;  %v4797_v7 = vsel %vm3313_vm2, %v12007_v42, -inf }
 0x463   :  { %14164 = vst [vmem:[#allocation56_spill] sm:$0xff] %v12371_v4  ;;  %14165 = vst [vmem:[#allocation57_spill] sm:$0xff] %v12378_v33  ;;  %v4762_v16 = vsel %vm3313_vm2, %v14166_v25, -inf  ;;  %v4776_v25 = vsel %vm3313_vm2, %v14167_v15, -inf  ;;  %v4771_v10 = vmax.f32 %v4769_v56, %v4770_v47  ;;  %v4784_v38 = vrot.slane %v4783_v52, 4 }
 0x464   :  { %v4763_v28 = vrot.slane %v4762_v16, 4  ;;  %v4777_v20 = vrot.slane %v4776_v25, 4  ;;  %v4790_v4 = vsel %vm3313_vm2, %v14168_v54, -inf  ;;  %v4758_v11 = vrot.slane %v4757_v6, 2 }
 0x465   :  { %v4791_v36 = vrot.slane %v4790_v4, 4  ;;  %v4772_v59 = vrot.slane %v4771_v10, 2  ;;  %v4785_v63 = vmax.f32 %v4783_v52, %v4784_v38  ;;  %v4798_v49 = vrot.slane %v4797_v7, 4 }
 0x466   :  { %v4764_v48 = vmax.f32 %v4762_v16, %v4763_v28  ;;  %v4778_v33 = vmax.f32 %v4776_v25, %v4777_v20  ;;  %v14169_v28 = vcombine.high %v12007_v42, %v12007_v42  ;;  %v4759_v15 = vmax.f32 %v4757_v6, %v4758_v11 }
 0x467   :  { %v4792_v51 = vmax.f32 %v4790_v4, %v4791_v36  ;;  %v4773_v55 = vmax.f32 %v4771_v10, %v4772_v59  ;;  %v4786_v43 = vrot.slane %v4785_v63, 2  ;;  %v4799_v46 = vmax.f32 %v4797_v7, %v4798_v49 }
 0x468   :  { %v4765_v30 = vrot.slane %v4764_v48, 2  ;;  %v4804_v16 = vsel %vm3313_vm2, %v14169_v28, -inf  ;;  %v4779_v54 = vrot.slane %v4778_v33, 2  ;;  %v4760_v47 = vrot.slane %v4759_v15, 1 }
 0x469   :  { %v4805_v56 = vrot.slane %v4804_v16, 4  ;;  %v4793_v20 = vrot.slane %v4792_v51, 2  ;;  %v4774_v42 = vrot.slane %v4773_v55, 1  ;;  %v4787_v28 = vmax.f32 %v4785_v63, %v4786_v43 }
 0x46a   :  { %v4766_v23 = vmax.f32 %v4764_v48, %v4765_v30  ;;  %v4780_v22 = vmax.f32 %v4778_v33, %v4779_v54  ;;  %v12408_v8 = vmax.f32 %v4759_v15, %v4760_v47  ;;  %v4800_v52 = vrot.slane %v4799_v46, 2 }
 0x46b   :  { %v4806_v35 = vmax.f32 %v4804_v16, %v4805_v56  ;;  %v4794_v11 = vmax.f32 %v4792_v51, %v4793_v20  ;;  %v12412_v38 = vmax.f32 %v4773_v55, %v4774_v42  ;;  %v4788_v36 = vrot.slane %v4787_v28, 1 }
 0x46c   :  { %v4767_v25 = vrot.slane %v4766_v23, 1  ;;  %v4781_v4 = vrot.slane %v4780_v22, 1  ;;  %v4811_v10 = vsel %vm3313_vm2, %v11996_v3, -inf  ;;  %v4801_v49 = vmax.f32 %v4799_v46, %v4800_v52 }
 0x46d   :  { %v4807_v48 = vrot.slane %v4806_v35, 2  ;;  %v4795_v59 = vrot.slane %v4794_v11, 1  ;;  %v4812_v7 = vrot.slane %v4811_v10, 4  ;;  %v12418_v16 = vmax.f32 %v4787_v28, %v4788_v36 }
 0x46e   :  { %v12410_v6 = vmax.f32 %v4766_v23, %v4767_v25  ;;  %v12416_v33 = vmax.f32 %v4780_v22, %v4781_v4  ;;  %v14173_v23 = vcombine.high %v11996_v3, %v11996_v3  ;;  %v4825_v63 = vsel %vm3313_vm2, %v12012_v44, -inf }
 0x46f   :  { %v4808_v30 = vmax.f32 %v4806_v35, %v4807_v48  ;;  %14171 = vst [vmem:[#allocation58_spill] sm:$0xff] %v12418_v16  ;;  %v12420_v43 = vmax.f32 %v4794_v11, %v4795_v59  ;;  %v4802_v15 = vrot.slane %v4801_v49, 1  ;;  %v4813_v54 = vmax.f32 %v4811_v10, %v4812_v7 }
 0x470   :  { %14170 = vst [vmem:[#allocation9_spill] sm:$0xff] %v12416_v33  ;;  %v4818_v55 = vsel %vm3313_vm2, %v14173_v23, -inf  ;;  %v4826_v56 = vrot.slane %v4825_v63, 4  ;;  %v14174_v35 = vcombine.high %v12012_v44, %v12012_v44  ;;  %v4839_v47 = vsel %vm3313_vm2, %v11999_v40, -inf }
 0x471   :  { %14172 = vst [vmem:[#allocation59_spill] sm:$0xff] %v12420_v43  ;;  %v4809_v51 = vrot.slane %v4808_v30, 1  ;;  %v4819_v22 = vrot.slane %v4818_v55, 4  ;;  %v14175_v3 = vcombine.high %v11999_v40, %v11999_v40  ;;  %v12438_v25 = vmax.f32 %v4801_v49, %v4802_v15 }
 0x472   :  { %v4832_v46 = vsel %vm3313_vm2, %v14174_v35, -inf  ;;  %v4814_v28 = vrot.slane %v4813_v54, 2  ;;  %v4827_v4 = vmax.f32 %v4825_v63, %v4826_v56  ;;  %v4840_v48 = vrot.slane %v4839_v47, 4 }
 0x473   :  { %v4846_v20 = vsel %vm3313_vm2, %v14175_v3, -inf  ;;  %14176 = vst [vmem:[#allocation14_spill] sm:$0xff] %v12438_v25  ;;  %v12440_v42 = vmax.f32 %v4808_v30, %v4809_v51  ;;  %v4820_v11 = vmax.f32 %v4818_v55, %v4819_v22  ;;  %v4833_v52 = vrot.slane %v4832_v46, 4 }
 0x474   :  { %v4847_v44 = vrot.slane %v4846_v20, 4  ;;  %v4815_v36 = vmax.f32 %v4813_v54, %v4814_v28  ;;  %v4853_v10 = vsel %vm3313_vm2, %v12017_v27, -inf  ;;  %v14178_v40 = vcombine.high %v12017_v27, %v12017_v27 }
 0x475   :  { %14177 = vst [vmem:[#allocation17_spill] sm:$0xff] %v12440_v42  ;;  %v4821_v59 = vrot.slane %v4820_v11, 2  ;;  %v4828_v49 = vrot.slane %v4827_v4, 2  ;;  %v4834_v23 = vmax.f32 %v4832_v46, %v4833_v52  ;;  %v4841_v30 = vmax.f32 %v4839_v47, %v4840_v48 }
 0x476   :  { %v4860_v7 = vsel %vm3313_vm2, %v14178_v40, -inf  ;;  %v4848_v15 = vmax.f32 %v4846_v20, %v4847_v44  ;;  %v4816_v51 = vrot.slane %v4815_v36, 1  ;;  %v4854_v63 = vrot.slane %v4853_v10, 4 }
 0x477   :  { %v4822_v55 = vmax.f32 %v4820_v11, %v4821_v59  ;;  %v4861_v22 = vrot.slane %v4860_v7, 4  ;;  %v4829_v56 = vmax.f32 %v4827_v4, %v4828_v49  ;;  %v4835_v35 = vrot.slane %v4834_v23, 2 }
 0x478   :  { %v4842_v54 = vrot.slane %v4841_v30, 2  ;;  %v4849_v3 = vrot.slane %v4848_v15, 2  ;;  %v12448_v28 = vmax.f32 %v4815_v36, %v4816_v51  ;;  %v4855_v25 = vmax.f32 %v4853_v10, %v4854_v63 }
 0x479   :  { %v4823_v42 = vrot.slane %v4822_v55, 1  ;;  %v4862_v43 = vmax.f32 %v4860_v7, %v4861_v22  ;;  %v4830_v27 = vrot.slane %v4829_v56, 1  ;;  %v4836_v16 = vmax.f32 %v4834_v23, %v4835_v35 }
 0x47a   :  { %v4843_v40 = vmax.f32 %v4841_v30, %v4842_v54  ;;  %v4850_v33 = vmax.f32 %v4848_v15, %v4849_v3  ;;  %v4856_v47 = vrot.slane %v4855_v25, 2  ;;  %v4867_v11 = vsel %vm3313_vm2, %v12026_v13, -inf }
 0x47b   :  { %v12450_v46 = vmax.f32 %v4822_v55, %v4823_v42  ;;  %v4863_v20 = vrot.slane %v4862_v43, 2  ;;  %v12454_v4 = vmax.f32 %v4829_v56, %v4830_v27  ;;  %v4837_v52 = vrot.slane %v4836_v16, 1 }
 0x47c   :  { %v4844_v48 = vrot.slane %v4843_v40, 1  ;;  %v4851_v44 = vrot.slane %v4850_v33, 1  ;;  %v4857_v36 = vmax.f32 %v4855_v25, %v4856_v47  ;;  %v4868_v10 = vrot.slane %v4867_v11, 4 }
 0x47d   :  { %v4864_v59 = vmax.f32 %v4862_v43, %v4863_v20  ;;  %v14179_v7 = vcombine.high %v12026_v13, %v12026_v13  ;;  %v12460_v42 = vmax.f32 %v4836_v16, %v4837_v52  ;;  %v4881_v25 = vsel %vm3313_vm2, %v12036_v17, -inf }
 0x47e   :  { %v12462_v23 = vmax.f32 %v4843_v40, %v4844_v48  ;;  %v12464_v30 = vmax.f32 %v4850_v33, %v4851_v44  ;;  %v4858_v51 = vrot.slane %v4857_v36, 1  ;;  %v4869_v63 = vmax.f32 %v4867_v11, %v4868_v10 }
 0x47f   :  { %v4874_v49 = vsel %vm3313_vm2, %v14179_v7, -inf  ;;  %v4865_v55 = vrot.slane %v4864_v59, 1  ;;  %v4882_v22 = vrot.slane %v4881_v25, 4  ;;  %v14180_v13 = vcombine.high %v12036_v17, %v12036_v17 }
 0x480   :  { %v4875_v15 = vrot.slane %v4874_v49, 4  ;;  %v4895_v16 = vsel %vm3313_vm2, %v12033_v57, -inf  ;;  %v12474_v35 = vmax.f32 %v4857_v36, %v4858_v51  ;;  %v4870_v54 = vrot.slane %v4869_v63, 2 }
 0x481   :  { %v4888_v56 = vsel %vm3313_vm2, %v14180_v13, -inf  ;;  %v12476_v33 = vmax.f32 %v4864_v59, %v4865_v55  ;;  %v4883_v40 = vmax.f32 %v4881_v25, %v4882_v22  ;;  %v4896_v47 = vrot.slane %v4895_v16, 4 }
 0x482   :  { %v4876_v43 = vmax.f32 %v4874_v49, %v4875_v15  ;;  %14181 = vst [vmem:[#allocation18_spill] sm:$0xff] %v12474_v35  ;;  %v4889_v3 = vrot.slane %v4888_v56, 4  ;;  %v14183_v20 = vcombine.high %v12033_v57, %v12033_v57  ;;  %v4871_v17 = vmax.f32 %v4869_v63, %v4870_v54 }
 0x483   :  { %14182 = vst [vmem:[#allocation16_spill] sm:$0xff] %v12476_v33  ;;  %v4909_v44 = vsel %vm3313_vm2, %v12044_v9, -inf  ;;  %v4884_v10 = vrot.slane %v4883_v40, 2  ;;  %v4897_v59 = vmax.f32 %v4895_v16, %v4896_v47  ;;  %v14184_v55 = vcombine.high %v12044_v9, %v12044_v9 }
 0x484   :  { %v4877_v27 = vrot.slane %v4876_v43, 2  ;;  %v4902_v11 = vsel %vm3313_vm2, %v14183_v20, -inf  ;;  %v4890_v52 = vmax.f32 %v4888_v56, %v4889_v3  ;;  %v4910_v7 = vrot.slane %v4909_v44, 4 }
 0x485   :  { %v4903_v48 = vrot.slane %v4902_v11, 4  ;;  %v4872_v49 = vrot.slane %v4871_v17, 1  ;;  %v4916_v57 = vsel %vm3313_vm2, %v14184_v55, -inf  ;;  %v4885_v22 = vmax.f32 %v4883_v40, %v4884_v10 }
 0x486   :  { %v4878_v36 = vmax.f32 %v4876_v43, %v4877_v27  ;;  %v4891_v15 = vrot.slane %v4890_v52, 2  ;;  %v4898_v63 = vrot.slane %v4897_v59, 2  ;;  %v4911_v13 = vmax.f32 %v4909_v44, %v4910_v7 }
 0x487   :  { %v4904_v51 = vmax.f32 %v4902_v11, %v4903_v48  ;;  %v12488_v56 = vmax.f32 %v4871_v17, %v4872_v49  ;;  %v4917_v43 = vrot.slane %v4916_v57, 4  ;;  %v4886_v16 = vrot.slane %v4885_v22, 1 }
 0x488   :  { %v4879_v25 = vrot.slane %v4878_v36, 1  ;;  %v4892_v54 = vmax.f32 %v4890_v52, %v4891_v15  ;;  %v4899_v47 = vmax.f32 %v4897_v59, %v4898_v63  ;;  %v4912_v20 = vrot.slane %v4911_v13, 2 }
 0x489   :  { %v4905_v3 = vrot.slane %v4904_v51, 2  ;;  %v4918_v33 = vmax.f32 %v4916_v57, %v4917_v43  ;;  %v4923_v9 = vsel %vm3313_vm2, %v12041_v37, -inf  ;;  %v12494_v55 = vmax.f32 %v4885_v22, %v4886_v16 }
 0x48a   :  { %v12490_v27 = vmax.f32 %v4878_v36, %v4879_v25  ;;  %v4893_v11 = vrot.slane %v4892_v54, 1  ;;  %v4900_v40 = vrot.slane %v4899_v47, 1  ;;  %v4913_v44 = vmax.f32 %v4911_v13, %v4912_v20 }
 0x48b   :  { %v4906_v48 = vmax.f32 %v4904_v51, %v4905_v3  ;;  %v4924_v17 = vrot.slane %v4923_v9, 4  ;;  %v4919_v7 = vrot.slane %v4918_v33, 2  ;;  %v14185_v36 = vcombine.high %v12041_v37, %v12041_v37 }
 0x48c   :  { %v12496_v10 = vmax.f32 %v4892_v54, %v4893_v11  ;;  %v12502_v49 = vmax.f32 %v4899_v47, %v4900_v40  ;;  %v4914_v15 = vrot.slane %v4913_v44, 1  ;;  %v4937_v63 = vsel %vm3313_vm2, %v12057_v39, -inf }
 0x48d   :  { %v4907_v52 = vrot.slane %v4906_v48, 1  ;;  %v4930_v59 = vsel %vm3313_vm2, %v14185_v36, -inf  ;;  %v4925_v51 = vmax.f32 %v4923_v9, %v4924_v17  ;;  %v4920_v22 = vmax.f32 %v4918_v33, %v4919_v7 }
 0x48e   :  { %v4931_v57 = vrot.slane %v4930_v59, 4  ;;  %v14187_v13 = vcombine.high %v12057_v39, %v12057_v39  ;;  %v12512_v3 = vmax.f32 %v4913_v44, %v4914_v15  ;;  %v4938_v16 = vrot.slane %v4937_v63, 4 }
 0x48f   :  { %v12504_v25 = vmax.f32 %v4906_v48, %v4907_v52  ;;  %v4926_v37 = vrot.slane %v4925_v51, 2  ;;  %v4921_v47 = vrot.slane %v4920_v22, 1  ;;  %v4951_v11 = vsel %vm3313_vm2, %v12052_v62, -inf }
 0x490   :  { %v4944_v54 = vsel %vm3313_vm2, %v14187_v13, -inf  ;;  %14188 = vst [vmem:[#allocation22_spill] sm:$0xff] %v12512_v3  ;;  %v4932_v43 = vmax.f32 %v4930_v59, %v4931_v57  ;;  %v14189_v33 = vcombine.high %v12052_v62, %v12052_v62  ;;  %v4939_v39 = vmax.f32 %v4937_v63, %v4938_v16 }
 0x491   :  { %14186 = vst [vmem:[#allocation19_spill] sm:$0xff] %v12504_v25  ;;  %v4945_v20 = vrot.slane %v4944_v54, 4  ;;  %v4927_v9 = vmax.f32 %v4925_v51, %v4926_v37  ;;  %v4952_v17 = vrot.slane %v4951_v11, 4  ;;  %v12520_v52 = vmax.f32 %v4920_v22, %v4921_v47 }
 0x492   :  { %v4958_v48 = vsel %vm3313_vm2, %v14189_v33, -inf  ;;  %v4933_v40 = vrot.slane %v4932_v43, 2  ;;  %v4965_v36 = vsel %vm3313_vm2, %v12066_v29, -inf  ;;  %v4940_v57 = vrot.slane %v4939_v39, 2 }
 0x493   :  { %14190 = vst [vmem:[#allocation25_spill] sm:$0xff] %v12520_v52  ;;  %v4946_v44 = vmax.f32 %v4944_v54, %v4945_v20  ;;  %v4959_v7 = vrot.slane %v4958_v48, 4  ;;  %v4928_v59 = vrot.slane %v4927_v9, 1  ;;  %v4953_v13 = vmax.f32 %v4951_v11, %v4952_v17 }
 0x494   :  { %v4934_v15 = vmax.f32 %v4932_v43, %v4933_v40  ;;  %v4966_v62 = vrot.slane %v4965_v36, 4  ;;  %v14191_v51 = vcombine.high %v12066_v29, %v12066_v29  ;;  %v4941_v54 = vmax.f32 %v4939_v39, %v4940_v57 }
 0x495   :  { %v4947_v3 = vrot.slane %v4946_v44, 2  ;;  %v4960_v25 = vmax.f32 %v4958_v48, %v4959_v7  ;;  %v12528_v37 = vmax.f32 %v4927_v9, %v4928_v59  ;;  %v4954_v16 = vrot.slane %v4953_v13, 2 }
 0x496   :  { %v4972_v63 = vsel %vm3313_vm2, %v14191_v51, -inf  ;;  %v4935_v22 = vrot.slane %v4934_v15, 1  ;;  %v4967_v33 = vmax.f32 %v4965_v36, %v4966_v62  ;;  %v4942_v11 = vrot.slane %v4941_v54, 1 }
 0x497   :  { %v4948_v47 = vmax.f32 %v4946_v44, %v4947_v3  ;;  %v4961_v20 = vrot.slane %v4960_v25, 2  ;;  %v4973_v52 = vrot.slane %v4972_v63, 4  ;;  %v4955_v40 = vmax.f32 %v4953_v13, %v4954_v16 }
 0x498   :  { %v12530_v43 = vmax.f32 %v4934_v15, %v4935_v22  ;;  %v4979_v48 = vsel %vm3313_vm2, %v12072_v18, -inf  ;;  %v4968_v7 = vrot.slane %v4967_v33, 2  ;;  %v12534_v9 = vmax.f32 %v4941_v54, %v4942_v11 }
 0x499   :  { %v4949_v17 = vrot.slane %v4948_v47, 1  ;;  %v4962_v29 = vmax.f32 %v4960_v25, %v4961_v20  ;;  %v4974_v51 = vmax.f32 %v4972_v63, %v4973_v52  ;;  %v4956_v59 = vrot.slane %v4955_v40, 1 }
 0x49a   :  { %v4980_v39 = vrot.slane %v4979_v48, 4  ;;  %v14192_v3 = vcombine.high %v12072_v18, %v12072_v18  ;;  %v4969_v57 = vmax.f32 %v4967_v33, %v4968_v7  ;;  %v4993_v52 = vsel %vm3313_vm2, %v12077_v34, -inf }
 0x49b   :  { %v12540_v36 = vmax.f32 %v4948_v47, %v4949_v17  ;;  %v4963_v15 = vrot.slane %v4962_v29, 1  ;;  %v4975_v13 = vrot.slane %v4974_v51, 2  ;;  %v12542_v62 = vmax.f32 %v4955_v40, %v4956_v59 }
 0x49c   :  { %v4986_v44 = vsel %vm3313_vm2, %v14192_v3, -inf  ;;  %v4981_v22 = vmax.f32 %v4979_v48, %v4980_v39  ;;  %v4970_v54 = vrot.slane %v4969_v57, 1  ;;  %v4994_v20 = vrot.slane %v4993_v52, 4 }
 0x49d   :  { %14193 = vst [vmem:[#allocation32_spill] sm:$0xff] %v12542_v62  ;;  %v4987_v25 = vrot.slane %v4986_v44, 4  ;;  %v12546_v63 = vmax.f32 %v4962_v29, %v4963_v15  ;;  %v4976_v16 = vmax.f32 %v4974_v51, %v4975_v13  ;;  %v14195_v47 = vcombine.high %v12077_v34, %v12077_v34 }
 0x49e   :  { %v4982_v18 = vrot.slane %v4981_v22, 2  ;;  %v5007_v40 = vsel %vm3313_vm2, %v12083_v26, -inf  ;;  %v12554_v48 = vmax.f32 %v4969_v57, %v4970_v54  ;;  %v4995_v7 = vmax.f32 %v4993_v52, %v4994_v20 }
 0x49f   :  { %14194 = vst [vmem:[#allocation33_spill] sm:$0xff] %v12546_v63  ;;  %v4988_v11 = vmax.f32 %v4986_v44, %v4987_v25  ;;  %v5000_v33 = vsel %vm3313_vm2, %v14195_v47, -inf  ;;  %v4977_v17 = vrot.slane %v4976_v16, 1  ;;  %v5008_v3 = vrot.slane %v5007_v40, 4 }
 0x4a0   :  { %14196 = vst [vmem:[#allocation23_spill] sm:$0xff] %v12554_v48  ;;  %v5001_v59 = vrot.slane %v5000_v33, 4  ;;  %v4983_v29 = vmax.f32 %v4981_v22, %v4982_v18  ;;  %v14197_v51 = vcombine.high %v12083_v26, %v12083_v26  ;;  %v4996_v34 = vrot.slane %v4995_v7, 2 }
 0x4a1   :  { %v4989_v39 = vrot.slane %v4988_v11, 2  ;;  %v12560_v15 = vmax.f32 %v4976_v16, %v4977_v17  ;;  %v5009_v57 = vmax.f32 %v5007_v40, %v5008_v3  ;;  %v5021_v52 = vsel %vm3313_vm2, %v12098_v61, -inf }
 0x4a2   :  { %v5014_v44 = vsel %vm3313_vm2, %v14197_v51, -inf  ;;  %v5002_v13 = vmax.f32 %v5000_v33, %v5001_v59  ;;  %v4984_v47 = vrot.slane %v4983_v29, 1  ;;  %v4997_v54 = vmax.f32 %v4995_v7, %v4996_v34 }
 0x4a3   :  { %v5015_v25 = vrot.slane %v5014_v44, 4  ;;  %v4990_v63 = vmax.f32 %v4988_v11, %v4989_v39  ;;  %v5022_v18 = vrot.slane %v5021_v52, 4  ;;  %v5010_v62 = vrot.slane %v5009_v57, 2 }
 0x4a4   :  { %v5003_v22 = vrot.slane %v5002_v13, 2  ;;  %v12564_v48 = vmax.f32 %v4983_v29, %v4984_v47  ;;  %v14199_v16 = vcombine.high %v12098_v61, %v12098_v61  ;;  %v4998_v17 = vrot.slane %v4997_v54, 1 }
 0x4a5   :  { %v5016_v20 = vmax.f32 %v5014_v44, %v5015_v25  ;;  %v4991_v26 = vrot.slane %v4990_v63, 1  ;;  %v5023_v40 = vmax.f32 %v5021_v52, %v5022_v18  ;;  %v5011_v3 = vmax.f32 %v5009_v57, %v5010_v62 }
 0x4a6   :  { %14198 = vst [vmem:[#allocation24_spill] sm:$0xff] %v12564_v48  ;;  %v5028_v33 = vsel %vm3313_vm2, %v14199_v16, -inf  ;;  %v5004_v59 = vmax.f32 %v5002_v13, %v5003_v22  ;;  %v5035_v51 = vsel %vm3313_vm2, %v12093_v45, -inf  ;;  %v12574_v29 = vmax.f32 %v4997_v54, %v4998_v17 }
 0x4a7   :  { %v5017_v11 = vrot.slane %v5016_v20, 2  ;;  %v12570_v39 = vmax.f32 %v4990_v63, %v4991_v26  ;;  %v5029_v7 = vrot.slane %v5028_v33, 4  ;;  %v5024_v25 = vrot.slane %v5023_v40, 2  ;;  %v14363_v35 = vld [vmem:[#allocation23_spill] sm:$0xff] }
 0x4a8   :  { %14201 = vst [vmem:[#allocation30_spill] sm:$0xff] %v12574_v29  ;;  %v5005_v44 = vrot.slane %v5004_v59, 1  ;;  %v5012_v47 = vrot.slane %v5011_v3, 1  ;;  %v5036_v48 = vrot.slane %v5035_v51, 4  ;;  %v14202_v13 = vcombine.high %v12093_v45, %v12093_v45 }
 0x4a9   :  { %14200 = vst [vmem:[#allocation29_spill] sm:$0xff] %v12570_v39  ;;  %v5018_v34 = vmax.f32 %v5016_v20, %v5017_v11  ;;  %v5030_v61 = vmax.f32 %v5028_v33, %v5029_v7  ;;  %v5025_v57 = vmax.f32 %v5023_v40, %v5024_v25  ;;  %v5049_v20 = vsel %vm3313_vm2, %v12105_v2, -inf }
 0x4aa   :  { %v5042_v52 = vsel %vm3313_vm2, %v14202_v13, -inf  ;;  %v12580_v63 = vmax.f32 %v5004_v59, %v5005_v44  ;;  %v12582_v18 = vmax.f32 %v5011_v3, %v5012_v47  ;;  %v5037_v26 = vmax.f32 %v5035_v51, %v5036_v48 }
 0x4ab   :  { %v5019_v62 = vrot.slane %v5018_v34, 1  ;;  %v5043_v22 = vrot.slane %v5042_v52, 4  ;;  %v5031_v54 = vrot.slane %v5030_v61, 2  ;;  %v5026_v33 = vrot.slane %v5025_v57, 1 }
 0x4ac   :  { %14203 = vst [vmem:[#allocation28_spill] sm:$0xff] %v12580_v63  ;;  %14204 = vst [vmem:[#allocation31_spill] sm:$0xff] %v12582_v18  ;;  %v5050_v11 = vrot.slane %v5049_v20, 4  ;;  %v5038_v7 = vrot.slane %v5037_v26, 2  ;;  %v14206_v59 = vcombine.high %v12105_v2, %v12105_v2  ;;  %v5063_v3 = vsel %vm3313_vm2, %v12111_v21, -inf }
 0x4ad   :  { %v12586_v16 = vmax.f32 %v5018_v34, %v5019_v62  ;;  %v5044_v17 = vmax.f32 %v5042_v52, %v5043_v22  ;;  %v5032_v45 = vmax.f32 %v5030_v61, %v5031_v54  ;;  %v12594_v44 = vmax.f32 %v5025_v57, %v5026_v33 }
 0x4ae   :  { %v5056_v40 = vsel %vm3313_vm2, %v14206_v59, -inf  ;;  %v5051_v51 = vmax.f32 %v5049_v20, %v5050_v11  ;;  %v5039_v47 = vmax.f32 %v5037_v26, %v5038_v7  ;;  %v5064_v13 = vrot.slane %v5063_v3, 4 }
 0x4af   :  { %14205 = vst [vmem:[#allocation34_spill] sm:$0xff] %v12586_v16  ;;  %14207 = vst [vmem:[#allocation37_spill] sm:$0xff] %v12594_v44  ;;  %v5045_v48 = vrot.slane %v5044_v17, 2  ;;  %v5057_v25 = vrot.slane %v5056_v40, 4  ;;  %v5033_v34 = vrot.slane %v5032_v45, 1  ;;  %v14208_v61 = vcombine.high %v12111_v21, %v12111_v21 }
 0x4b0   :  { %v5052_v2 = vrot.slane %v5051_v51, 2  ;;  %v5040_v16 = vrot.slane %v5039_v47, 1  ;;  %v5065_v57 = vmax.f32 %v5063_v3, %v5064_v13  ;;  %v5077_v20 = vsel %vm3313_vm2, %v12118_v24, -inf }
 0x4b1   :  { %v5070_v52 = vsel %vm3313_vm2, %v14208_v61, -inf  ;;  %v5046_v62 = vmax.f32 %v5044_v17, %v5045_v48  ;;  %v5058_v22 = vmax.f32 %v5056_v40, %v5057_v25  ;;  %v12600_v59 = vmax.f32 %v5032_v45, %v5033_v34 }
 0x4b2   :  { %v5071_v54 = vrot.slane %v5070_v52, 4  ;;  %v5053_v11 = vmax.f32 %v5051_v51, %v5052_v2  ;;  %v12604_v44 = vmax.f32 %v5039_v47, %v5040_v16  ;;  %v5066_v21 = vrot.slane %v5065_v57, 2 }
 0x4b3   :  { %14209 = vst [vmem:[#allocation44_spill] sm:$0xff] %v12600_v59  ;;  %v5047_v33 = vrot.slane %v5046_v62, 1  ;;  %v5059_v26 = vrot.slane %v5058_v22, 2  ;;  %v5078_v18 = vrot.slane %v5077_v20, 4  ;;  %v14211_v17 = vcombine.high %v12118_v24, %v12118_v24 }
 0x4b4   :  { %v5072_v7 = vmax.f32 %v5070_v52, %v5071_v54  ;;  %14210 = vst [vmem:[#allocation45_spill] sm:$0xff] %v12604_v44  ;;  %v5054_v48 = vrot.slane %v5053_v11, 1  ;;  %v5067_v34 = vmax.f32 %v5065_v57, %v5066_v21  ;;  %v5091_v51 = vsel %vm3313_vm2, %v12122_v19, -inf }
 0x4b5   :  { %v5084_v40 = vsel %vm3313_vm2, %v14211_v17, -inf  ;;  %v12610_v45 = vmax.f32 %v5046_v62, %v5047_v33  ;;  %v5060_v3 = vmax.f32 %v5058_v22, %v5059_v26  ;;  %v5079_v13 = vmax.f32 %v5077_v20, %v5078_v18 }
 0x4b6   :  { %v5073_v25 = vrot.slane %v5072_v7, 2  ;;  %v5085_v61 = vrot.slane %v5084_v40, 4  ;;  %v12614_v16 = vmax.f32 %v5053_v11, %v5054_v48  ;;  %v5092_v2 = vrot.slane %v5091_v51, 4 }
 0x4b7   :  { %v5061_v47 = vrot.slane %v5060_v3, 1  ;;  %v5068_v54 = vrot.slane %v5067_v34, 1  ;;  %v5080_v24 = vrot.slane %v5079_v13, 2  ;;  %v14212_v62 = vcombine.high %v12122_v19, %v12122_v19 }
 0x4b8   :  { %v5074_v52 = vmax.f32 %v5072_v7, %v5073_v25  ;;  %v5086_v44 = vmax.f32 %v5084_v40, %v5085_v61  ;;  %v5093_v57 = vmax.f32 %v5091_v51, %v5092_v2  ;;  %v5105_v7 = vsel %vm3313_vm2, %v12131_v14, -inf }
 0x4b9   :  { %v5098_v22 = vsel %vm3313_vm2, %v14212_v62, -inf  ;;  %v12620_v33 = vmax.f32 %v5060_v3, %v5061_v47  ;;  %v12622_v26 = vmax.f32 %v5067_v34, %v5068_v54  ;;  %v5081_v11 = vmax.f32 %v5079_v13, %v5080_v24 }
 0x4ba   :  { %v5075_v18 = vrot.slane %v5074_v52, 1  ;;  %v5099_v20 = vrot.slane %v5098_v22, 4  ;;  %v5087_v21 = vrot.slane %v5086_v44, 2  ;;  %v5094_v40 = vrot.slane %v5093_v57, 2 }
 0x4bb   :  { %14213 = vst [vmem:[#allocation35_spill] sm:$0xff] %v12620_v33  ;;  %14214 = vst [vmem:[#allocation36_spill] sm:$0xff] %v12622_v26  ;;  %v5106_v25 = vrot.slane %v5105_v7, 4  ;;  %v5082_v19 = vrot.slane %v5081_v11, 1  ;;  %v14216_v3 = vcombine.high %v12131_v14, %v12131_v14  ;;  %v5119_v34 = vsel %vm3313_vm2, %v12135_v41, -inf }
 0x4bc   :  { %v12626_v17 = vmax.f32 %v5074_v52, %v5075_v18  ;;  %v5100_v48 = vmax.f32 %v5098_v22, %v5099_v20  ;;  %v5088_v61 = vmax.f32 %v5086_v44, %v5087_v21  ;;  %v5095_v13 = vmax.f32 %v5093_v57, %v5094_v40 }
 0x4bd   :  { %v5112_v51 = vsel %vm3313_vm2, %v14216_v3, -inf  ;;  %v5107_v2 = vmax.f32 %v5105_v7, %v5106_v25  ;;  %v12634_v24 = vmax.f32 %v5081_v11, %v5082_v19  ;;  %v5120_v62 = vrot.slane %v5119_v34, 4 }
 0x4be   :  { %14215 = vst [vmem:[#allocation50_spill] sm:$0xff] %v12626_v17  ;;  %v5101_v47 = vrot.slane %v5100_v48, 2  ;;  %v5113_v54 = vrot.slane %v5112_v51, 4  ;;  %v5089_v52 = vrot.slane %v5088_v61, 1  ;;  %v14218_v22 = vcombine.high %v12135_v41, %v12135_v41 }
 0x4bf   :  { %14217 = vst [vmem:[#allocation51_spill] sm:$0xff] %v12634_v24  ;;  %v5096_v18 = vrot.slane %v5095_v13, 1  ;;  %v5108_v20 = vrot.slane %v5107_v2, 2  ;;  %v5121_v17 = vmax.f32 %v5119_v34, %v5120_v62  ;;  %v5133_v7 = vsel %vm3313_vm2, %v12142_v58, -inf }
 0x4c0   :  { %v5126_v44 = vsel %vm3313_vm2, %v14218_v22, -inf  ;;  %v5102_v14 = vmax.f32 %v5100_v48, %v5101_v47  ;;  %v5114_v21 = vmax.f32 %v5112_v51, %v5113_v54  ;;  %v12640_v3 = vmax.f32 %v5088_v61, %v5089_v52 }
 0x4c1   :  { %v5127_v57 = vrot.slane %v5126_v44, 4  ;;  %v12644_v11 = vmax.f32 %v5095_v13, %v5096_v18  ;;  %v5109_v25 = vmax.f32 %v5107_v2, %v5108_v20  ;;  %v5122_v24 = vrot.slane %v5121_v17, 2 }
 0x4c2   :  { %14219 = vst [vmem:[#allocation41_spill] sm:$0xff] %v12640_v3  ;;  %v5103_v40 = vrot.slane %v5102_v14, 1  ;;  %v5115_v19 = vrot.slane %v5114_v21, 2  ;;  %v5134_v26 = vrot.slane %v5133_v7, 4  ;;  %v14221_v48 = vcombine.high %v12142_v58, %v12142_v58 }
 0x4c3   :  { %14220 = vst [vmem:[#allocation42_spill] sm:$0xff] %v12644_v11  ;;  %v5128_v41 = vmax.f32 %v5126_v44, %v5127_v57  ;;  %v5110_v34 = vrot.slane %v5109_v25, 1  ;;  %v5123_v52 = vmax.f32 %v5121_v17, %v5122_v24  ;;  %v5147_v2 = vsel %vm3313_vm2, %v12152_v53, -inf }
 0x4c4   :  { %v5140_v51 = vsel %vm3313_vm2, %v14221_v48, -inf  ;;  %v12650_v61 = vmax.f32 %v5102_v14, %v5103_v40  ;;  %v5116_v47 = vmax.f32 %v5114_v21, %v5115_v19  ;;  %v5135_v13 = vmax.f32 %v5133_v7, %v5134_v26 }
 0x4c5   :  { %v5141_v54 = vrot.slane %v5140_v51, 4  ;;  %v5129_v62 = vrot.slane %v5128_v41, 2  ;;  %v12654_v22 = vmax.f32 %v5109_v25, %v5110_v34  ;;  %v5148_v20 = vrot.slane %v5147_v2, 4 }
 0x4c6   :  { %v5117_v44 = vrot.slane %v5116_v47, 1  ;;  %v5124_v57 = vrot.slane %v5123_v52, 1  ;;  %v5136_v11 = vrot.slane %v5135_v13, 2  ;;  %v14222_v14 = vcombine.high %v12152_v53, %v12152_v53 }
 0x4c7   :  { %v5142_v18 = vmax.f32 %v5140_v51, %v5141_v54  ;;  %v5130_v58 = vmax.f32 %v5128_v41, %v5129_v62  ;;  %v5149_v26 = vmax.f32 %v5147_v2, %v5148_v20  ;;  %v5161_v48 = vsel %vm3313_vm2, %v12159_v0, -inf }
 0x4c8   :  { %v5154_v21 = vsel %vm3313_vm2, %v14222_v14, -inf  ;;  %v12660_v40 = vmax.f32 %v5116_v47, %v5117_v44  ;;  %v12662_v7 = vmax.f32 %v5123_v52, %v5124_v57  ;;  %v5137_v19 = vmax.f32 %v5135_v13, %v5136_v11 }
 0x4c9   :  { %v5143_v17 = vrot.slane %v5142_v18, 2  ;;  %v5155_v24 = vrot.slane %v5154_v21, 4  ;;  %v5131_v25 = vrot.slane %v5130_v58, 1  ;;  %v5150_v41 = vrot.slane %v5149_v26, 2 }
 0x4ca   :  { %14223 = vst [vmem:[#allocation40_spill] sm:$0xff] %v12660_v40  ;;  %14224 = vst [vmem:[#allocation39_spill] sm:$0xff] %v12662_v7  ;;  %v5162_v54 = vrot.slane %v5161_v48, 4  ;;  %v5138_v53 = vrot.slane %v5137_v19, 1  ;;  %v14226_v47 = vcombine.high %v12159_v0, %v12159_v0  ;;  %v5175_v52 = vsel %vm3313_vm2, %v12163_v50, -inf }
 0x4cb   :  { %v5144_v51 = vmax.f32 %v5142_v18, %v5143_v17  ;;  %v5156_v34 = vmax.f32 %v5154_v21, %v5155_v24  ;;  %v12666_v62 = vmax.f32 %v5130_v58, %v5131_v25  ;;  %v5151_v11 = vmax.f32 %v5149_v26, %v5150_v41 }
 0x4cc   :  { %v5168_v2 = vsel %vm3313_vm2, %v14226_v47, -inf  ;;  %v5163_v20 = vmax.f32 %v5161_v48, %v5162_v54  ;;  %v12674_v57 = vmax.f32 %v5137_v19, %v5138_v53  ;;  %v5176_v14 = vrot.slane %v5175_v52, 4 }
 0x4cd   :  { %14225 = vst [vmem:[#allocation43_spill] sm:$0xff] %v12666_v62  ;;  %v5145_v44 = vrot.slane %v5144_v51, 1  ;;  %v5157_v13 = vrot.slane %v5156_v34, 2  ;;  %v5169_v18 = vrot.slane %v5168_v2, 4  ;;  %v14228_v58 = vcombine.high %v12163_v50, %v12163_v50 }
 0x4ce   :  { %14227 = vst [vmem:[#allocation60_spill] sm:$0xff] %v12674_v57  ;;  %v5152_v0 = vrot.slane %v5151_v11, 1  ;;  %v5164_v25 = vrot.slane %v5163_v20, 2  ;;  %v5177_v62 = vmax.f32 %v5175_v52, %v5176_v14  ;;  %v5189_v26 = vsel %vm3313_vm2, %v12170_v60, -inf }
 0x4cf   :  { %v5182_v21 = vsel %vm3313_vm2, %v14228_v58, -inf  ;;  %v12680_v17 = vmax.f32 %v5144_v51, %v5145_v44  ;;  %v5158_v24 = vmax.f32 %v5156_v34, %v5157_v13  ;;  %v5170_v47 = vmax.f32 %v5168_v2, %v5169_v18 }
 0x4d0   :  { %v5183_v7 = vrot.slane %v5182_v21, 4  ;;  %v12684_v19 = vmax.f32 %v5151_v11, %v5152_v0  ;;  %v5165_v41 = vmax.f32 %v5163_v20, %v5164_v25  ;;  %v5190_v54 = vrot.slane %v5189_v26, 4 }
 0x4d1   :  { %14229 = vst [vmem:[#allocation61_spill] sm:$0xff] %v12680_v17  ;;  %v5159_v48 = vrot.slane %v5158_v24, 1  ;;  %v5171_v53 = vrot.slane %v5170_v47, 2  ;;  %v5178_v50 = vrot.slane %v5177_v62, 2  ;;  %v14231_v51 = vcombine.high %v12170_v60, %v12170_v60 }
 0x4d2   :  { %14230 = vst [vmem:[#allocation62_spill] sm:$0xff] %v12684_v19  ;;  %v5184_v57 = vmax.f32 %v5182_v21, %v5183_v7  ;;  %v5166_v2 = vrot.slane %v5165_v41, 1  ;;  %v5191_v52 = vmax.f32 %v5189_v26, %v5190_v54  ;;  %v5203_v20 = vsel %vm3313_vm2, %v12174_v12, -inf }
 0x4d3   :  { %v5196_v34 = vsel %vm3313_vm2, %v14231_v51, -inf  ;;  %v12690_v44 = vmax.f32 %v5158_v24, %v5159_v48  ;;  %v5172_v18 = vmax.f32 %v5170_v47, %v5171_v53  ;;  %v5179_v14 = vmax.f32 %v5177_v62, %v5178_v50 }
 0x4d4   :  { %v5197_v13 = vrot.slane %v5196_v34, 4  ;;  %v5185_v11 = vrot.slane %v5184_v57, 2  ;;  %v12694_v58 = vmax.f32 %v5165_v41, %v5166_v2  ;;  %v5192_v0 = vrot.slane %v5191_v52, 2 }
 0x4d5   :  { %v5204_v21 = vrot.slane %v5203_v20, 4  ;;  %v5173_v25 = vrot.slane %v5172_v18, 1  ;;  %v5180_v60 = vrot.slane %v5179_v14, 1  ;;  %v14232_v24 = vcombine.high %v12174_v12, %v12174_v12 }
 0x4d6   :  { %v5198_v7 = vmax.f32 %v5196_v34, %v5197_v13  ;;  %v5186_v19 = vmax.f32 %v5184_v57, %v5185_v11  ;;  %v5193_v48 = vmax.f32 %v5191_v52, %v5192_v0  ;;  %v5217_v51 = vsel %vm3313_vm2, %v12183_v1, -inf }
 0x4d7   :  { %v5210_v26 = vsel %vm3313_vm2, %v14232_v24, -inf  ;;  %v5205_v62 = vmax.f32 %v5203_v20, %v5204_v21  ;;  %v12700_v53 = vmax.f32 %v5172_v18, %v5173_v25  ;;  %v12702_v50 = vmax.f32 %v5179_v14, %v5180_v60 }
 0x4d8   :  { %v5199_v47 = vrot.slane %v5198_v7, 2  ;;  %v5211_v54 = vrot.slane %v5210_v26, 4  ;;  %v5187_v41 = vrot.slane %v5186_v19, 1  ;;  %v5194_v34 = vrot.slane %v5193_v48, 1 }
 0x4d9   :  { %14233 = vst [vmem:[#allocation63_spill] sm:$0xff] %v12700_v53  ;;  %14234 = vst [vmem:[#allocation64_spill] sm:$0xff] %v12702_v50  ;;  %v5206_v57 = vrot.slane %v5205_v62, 2  ;;  %v5218_v12 = vrot.slane %v5217_v51, 4  ;;  %v14236_v52 = vcombine.high %v12183_v1, %v12183_v1  ;;  %v5231_v18 = vsel %vm3313_vm2, %v12187_v31, -inf  ;;  %v14376_v29 = vld [vmem:[#allocation62_spill] sm:$0xff] }
 0x4da   :  { %v5200_v2 = vmax.f32 %v5198_v7, %v5199_v47  ;;  %v5212_v13 = vmax.f32 %v5210_v26, %v5211_v54  ;;  %v12706_v11 = vmax.f32 %v5186_v19, %v5187_v41  ;;  %v12714_v14 = vmax.f32 %v5193_v48, %v5194_v34 }
 0x4db   :  { %v5224_v20 = vsel %vm3313_vm2, %v14236_v52, -inf  ;;  %v5207_v21 = vmax.f32 %v5205_v62, %v5206_v57  ;;  %v5219_v60 = vmax.f32 %v5217_v51, %v5218_v12  ;;  %v5232_v24 = vrot.slane %v5231_v18, 4 }
 0x4dc   :  { %14235 = vst [vmem:[#allocation65_spill] sm:$0xff] %v12706_v11  ;;  %14237 = vst [vmem:[#allocation66_spill] sm:$0xff] %v12714_v14  ;;  %v5201_v0 = vrot.slane %v5200_v2, 1  ;;  %v5213_v25 = vrot.slane %v5212_v13, 2  ;;  %v5225_v7 = vrot.slane %v5224_v20, 4  ;;  %v14238_v19 = vcombine.high %v12187_v31, %v12187_v31 }
 0x4dd   :  { %v5208_v1 = vrot.slane %v5207_v21, 1  ;;  %v5220_v52 = vrot.slane %v5219_v60, 2  ;;  %v5233_v48 = vmax.f32 %v5231_v18, %v5232_v24  ;;  %v5245_v62 = vsel %vm3313_vm2, %v12194_v5, -inf }
 0x4de   :  { %v5238_v26 = vsel %vm3313_vm2, %v14238_v19, -inf  ;;  %v12720_v47 = vmax.f32 %v5200_v2, %v5201_v0  ;;  %v5214_v54 = vmax.f32 %v5212_v13, %v5213_v25  ;;  %v5226_v11 = vmax.f32 %v5224_v20, %v5225_v7 }
 0x4df   :  { %v5239_v41 = vrot.slane %v5238_v26, 4  ;;  %v12724_v34 = vmax.f32 %v5207_v21, %v5208_v1  ;;  %v5246_v12 = vrot.slane %v5245_v62, 4  ;;  %v5221_v14 = vmax.f32 %v5219_v60, %v5220_v52 }
 0x4e0   :  { %14239 = vst [vmem:[#allocation67_spill] sm:$0xff] %v12720_v47  ;;  %v5215_v51 = vrot.slane %v5214_v54, 1  ;;  %v5227_v31 = vrot.slane %v5226_v11, 2  ;;  %v5234_v50 = vrot.slane %v5233_v48, 2  ;;  %v14241_v2 = vcombine.high %v12194_v5, %v12194_v5 }
 0x4e1   :  { %14240 = vst [vmem:[#allocation68_spill] sm:$0xff] %v12724_v34  ;;  %v5240_v57 = vmax.f32 %v5238_v26, %v5239_v41  ;;  %v5247_v18 = vmax.f32 %v5245_v62, %v5246_v12  ;;  %v5222_v7 = vrot.slane %v5221_v14, 1  ;;  %v5259_v19 = vsel %vm3313_vm2, %v12204_v32, -inf }
 0x4e2   :  { %v5252_v13 = vsel %vm3313_vm2, %v14241_v2, -inf  ;;  %v12730_v0 = vmax.f32 %v5214_v54, %v5215_v51  ;;  %v5228_v24 = vmax.f32 %v5226_v11, %v5227_v31  ;;  %v5235_v21 = vmax.f32 %v5233_v48, %v5234_v50  ;;  %v14247_v2 = vld [vmem:[#allocation52_spill] sm:$0xff] }
 0x4e3   :  { %v5241_v20 = vrot.slane %v5240_v57, 2  ;;  %v5253_v25 = vrot.slane %v5252_v13, 4  ;;  %v5248_v60 = vrot.slane %v5247_v18, 2  ;;  %v5260_v41 = vrot.slane %v5259_v19, 4 }
 0x4e4   :  { %14242 = vst [vmem:[#allocation69_spill] sm:$0xff] %v12730_v0  ;;  %v12734_v52 = vmax.f32 %v5221_v14, %v5222_v7  ;;  %v5229_v5 = vrot.slane %v5228_v24, 1  ;;  %v5236_v34 = vrot.slane %v5235_v21, 1  ;;  %v14244_v54 = vcombine.high %v12204_v32, %v12204_v32 }
 0x4e5   :  { %v5242_v26 = vmax.f32 %v5240_v57, %v5241_v20  ;;  %v5254_v1 = vmax.f32 %v5252_v13, %v5253_v25  ;;  %v5249_v12 = vmax.f32 %v5247_v18, %v5248_v60  ;;  %v5261_v50 = vmax.f32 %v5259_v19, %v5260_v41 }
 0x4e6   :  { %14243 = vst [vmem:[#allocation70_spill] sm:$0xff] %v12734_v52  ;;  %v5266_v62 = vsel %vm3313_vm2, %v14244_v54, -inf  ;;  %v12740_v48 = vmax.f32 %v5228_v24, %v5229_v5  ;;  %v12742_v31 = vmax.f32 %v5235_v21, %v5236_v34  ;;  %v5273_v14 = vsel %vm3313_vm2, %v14247_v2, -inf  ;;  %v14250_v24 = vld [vmem:[#allocation54_spill] sm:$0xff] }
 0x4e7   :  { %v5243_v51 = vrot.slane %v5242_v26, 1  ;;  %v5255_v11 = vrot.slane %v5254_v1, 2  ;;  %v5267_v57 = vrot.slane %v5266_v62, 4  ;;  %v5250_v20 = vrot.slane %v5249_v12, 1 }
 0x4e8   :  { %14245 = vst [vmem:[#allocation71_spill] sm:$0xff] %v12740_v48  ;;  %14246 = vst [vmem:[#allocation72_spill] sm:$0xff] %v12742_v31  ;;  %v5262_v7 = vrot.slane %v5261_v50, 2  ;;  %v5274_v52 = vrot.slane %v5273_v14, 4  ;;  %v14249_v18 = vcombine.high %v14247_v2, %v14247_v2  ;;  %v5287_v34 = vsel %vm3313_vm2, %v14250_v24, -inf }
 0x4e9   :  { %v12746_v13 = vmax.f32 %v5242_v26, %v5243_v51  ;;  %v5256_v25 = vmax.f32 %v5254_v1, %v5255_v11  ;;  %v5268_v32 = vmax.f32 %v5266_v62, %v5267_v57  ;;  %v12754_v21 = vmax.f32 %v5249_v12, %v5250_v20  ;;  %v14254_v20 = vld [vmem:[#allocation47_spill] sm:$0xff] }
 0x4ea   :  { %v5280_v19 = vsel %vm3313_vm2, %v14249_v18, -inf  ;;  %v5263_v41 = vmax.f32 %v5261_v50, %v5262_v7  ;;  %v5275_v54 = vmax.f32 %v5273_v14, %v5274_v52  ;;  %v5288_v51 = vrot.slane %v5287_v34, 4 }
 0x4eb   :  { %14248 = vst [vmem:[#allocation52_spill] sm:$0xff] %v12746_v13  ;;  %14251 = vst [vmem:[#allocation54_spill] sm:$0xff] %v12754_v21  ;;  %v5257_v60 = vrot.slane %v5256_v25, 1  ;;  %v5281_v5 = vrot.slane %v5280_v19, 4  ;;  %v5269_v26 = vrot.slane %v5268_v32, 2  ;;  %v14252_v1 = vcombine.high %v14250_v24, %v14250_v24 }
 0x4ec   :  { %v5264_v57 = vrot.slane %v5263_v41, 1  ;;  %v5276_v31 = vrot.slane %v5275_v54, 2  ;;  %v5289_v12 = vmax.f32 %v5287_v34, %v5288_v51  ;;  %v5301_v50 = vsel %vm3313_vm2, %v14254_v20, -inf }
 0x4ed   :  { %v5294_v62 = vsel %vm3313_vm2, %v14252_v1, -inf  ;;  %v12760_v11 = vmax.f32 %v5256_v25, %v5257_v60  ;;  %v5282_v2 = vmax.f32 %v5280_v19, %v5281_v5  ;;  %v5270_v13 = vmax.f32 %v5268_v32, %v5269_v26  ;;  %v14258_v1 = vld [vmem:[#allocation48_spill] sm:$0xff] }
 0x4ee   :  { %v5295_v18 = vrot.slane %v5294_v62, 4  ;;  %v12764_v7 = vmax.f32 %v5263_v41, %v5264_v57  ;;  %v5302_v21 = vrot.slane %v5301_v50, 4  ;;  %v5277_v24 = vmax.f32 %v5275_v54, %v5276_v31 }
 0x4ef   :  { %14253 = vst [vmem:[#allocation73_spill] sm:$0xff] %v12760_v11  ;;  %v5283_v52 = vrot.slane %v5282_v2, 2  ;;  %v5271_v48 = vrot.slane %v5270_v13, 1  ;;  %v5290_v0 = vrot.slane %v5289_v12, 2  ;;  %v14256_v25 = vcombine.high %v14254_v20, %v14254_v20 }
 0x4f0   :  { %14255 = vst [vmem:[#allocation47_spill] sm:$0xff] %v12764_v7  ;;  %v5296_v14 = vmax.f32 %v5294_v62, %v5295_v18  ;;  %v5303_v5 = vmax.f32 %v5301_v50, %v5302_v21  ;;  %v5278_v51 = vrot.slane %v5277_v24, 1  ;;  %v5315_v62 = vsel %vm3313_vm2, %v14258_v1, -inf }
 0x4f1   :  { %v5308_v19 = vsel %vm3313_vm2, %v14256_v25, -inf  ;;  %v5284_v60 = vmax.f32 %v5282_v2, %v5283_v52  ;;  %v12770_v26 = vmax.f32 %v5270_v13, %v5271_v48  ;;  %v5291_v41 = vmax.f32 %v5289_v12, %v5290_v0  ;;  %v14263_v25 = vld [vmem:[#allocation11_spill] sm:$0xff] }
 0x4f2   :  { %v5297_v32 = vrot.slane %v5296_v14, 2  ;;  %v5309_v34 = vrot.slane %v5308_v19, 4  ;;  %v5304_v31 = vrot.slane %v5303_v5, 2  ;;  %v12774_v7 = vmax.f32 %v5277_v24, %v5278_v51 }
 0x4f3   :  { %14257 = vst [vmem:[#allocation74_spill] sm:$0xff] %v12770_v26  ;;  %v5285_v57 = vrot.slane %v5284_v60, 1  ;;  %v5292_v20 = vrot.slane %v5291_v41, 1  ;;  %v5316_v11 = vrot.slane %v5315_v62, 4  ;;  %v14260_v2 = vcombine.high %v14258_v1, %v14258_v1 }
 0x4f4   :  { %v5298_v18 = vmax.f32 %v5296_v14, %v5297_v32  ;;  %v5310_v54 = vmax.f32 %v5308_v19, %v5309_v34  ;;  %14259 = vst [vmem:[#allocation48_spill] sm:$0xff] %v12774_v7  ;;  %v5305_v0 = vmax.f32 %v5303_v5, %v5304_v31  ;;  %v5329_v24 = vsel %vm3313_vm2, %v14263_v25, -inf }
 0x4f5   :  { %v5322_v21 = vsel %vm3313_vm2, %v14260_v2, -inf  ;;  %v12780_v48 = vmax.f32 %v5284_v60, %v5285_v57  ;;  %v12782_v50 = vmax.f32 %v5291_v41, %v5292_v20  ;;  %v5317_v52 = vmax.f32 %v5315_v62, %v5316_v11  ;;  %v14266_v57 = vld [vmem:[#allocation10_spill] sm:$0xff] }
 0x4f6   :  { %v5299_v13 = vrot.slane %v5298_v18, 1  ;;  %v5311_v12 = vrot.slane %v5310_v54, 2  ;;  %v5323_v14 = vrot.slane %v5322_v21, 4  ;;  %v5306_v32 = vrot.slane %v5305_v0, 1 }
 0x4f7   :  { %14261 = vst [vmem:[#allocation75_spill] sm:$0xff] %v12780_v48  ;;  %14262 = vst [vmem:[#allocation76_spill] sm:$0xff] %v12782_v50  ;;  %v5330_v51 = vrot.slane %v5329_v24, 4  ;;  %v5318_v1 = vrot.slane %v5317_v52, 2  ;;  %v14265_v60 = vcombine.high %v14263_v25, %v14263_v25  ;;  %v5343_v41 = vsel %vm3313_vm2, %v14266_v57, -inf }
 0x4f8   :  { %v12786_v19 = vmax.f32 %v5298_v18, %v5299_v13  ;;  %v5312_v34 = vmax.f32 %v5310_v54, %v5311_v12  ;;  %v5324_v7 = vmax.f32 %v5322_v21, %v5323_v14  ;;  %v12794_v11 = vmax.f32 %v5305_v0, %v5306_v32  ;;  %v14270_v32 = vld [vmem:[#allocation15_spill] sm:$0xff] }
 0x4f9   :  { %v5336_v5 = vsel %vm3313_vm2, %v14265_v60, -inf  ;;  %v5331_v31 = vmax.f32 %v5329_v24, %v5330_v51  ;;  %v5319_v18 = vmax.f32 %v5317_v52, %v5318_v1  ;;  %v5344_v13 = vrot.slane %v5343_v41, 4 }
 0x4fa   :  { %14264 = vst [vmem:[#allocation11_spill] sm:$0xff] %v12786_v19  ;;  %14267 = vst [vmem:[#allocation10_spill] sm:$0xff] %v12794_v11  ;;  %v5313_v62 = vrot.slane %v5312_v34, 1  ;;  %v5337_v20 = vrot.slane %v5336_v5, 4  ;;  %v5325_v2 = vrot.slane %v5324_v7, 2  ;;  %v14268_v54 = vcombine.high %v14266_v57, %v14266_v57 }
 0x4fb   :  { %v5332_v14 = vrot.slane %v5331_v31, 2  ;;  %v5320_v19 = vrot.slane %v5319_v18, 1  ;;  %v5345_v0 = vmax.f32 %v5343_v41, %v5344_v13  ;;  %v5357_v24 = vsel %vm3313_vm2, %v14270_v32, -inf }
 0x4fc   :  { %v5350_v21 = vsel %vm3313_vm2, %v14268_v54, -inf  ;;  %v12800_v12 = vmax.f32 %v5312_v34, %v5313_v62  ;;  %v5338_v25 = vmax.f32 %v5336_v5, %v5337_v20  ;;  %v5326_v50 = vmax.f32 %v5324_v7, %v5325_v2  ;;  %v14274_v54 = vld [vmem:[#allocation21_spill] sm:$0xff] }
 0x4fd   :  { %v5351_v60 = vrot.slane %v5350_v21, 4  ;;  %v5333_v51 = vmax.f32 %v5331_v31, %v5332_v14  ;;  %v5358_v11 = vrot.slane %v5357_v24, 4  ;;  %v12804_v48 = vmax.f32 %v5319_v18, %v5320_v19 }
 0x4fe   :  { %14269 = vst [vmem:[#allocation77_spill] sm:$0xff] %v12800_v12  ;;  %v5339_v52 = vrot.slane %v5338_v25, 2  ;;  %v5327_v57 = vrot.slane %v5326_v50, 1  ;;  %v5346_v26 = vrot.slane %v5345_v0, 2  ;;  %v14272_v34 = vcombine.high %v14270_v32, %v14270_v32 }
 0x4ff   :  { %v5352_v1 = vmax.f32 %v5350_v21, %v5351_v60  ;;  %14271 = vst [vmem:[#allocation15_spill] sm:$0xff] %v12804_v48  ;;  %v5334_v62 = vrot.slane %v5333_v51, 1  ;;  %v5359_v41 = vmax.f32 %v5357_v24, %v5358_v11  ;;  %v5371_v21 = vsel %vm3313_vm2, %v14274_v54, -inf }
 0x500   :  { %v5364_v5 = vsel %vm3313_vm2, %v14272_v34, -inf  ;;  %v5340_v20 = vmax.f32 %v5338_v25, %v5339_v52  ;;  %v12810_v2 = vmax.f32 %v5326_v50, %v5327_v57  ;;  %v5347_v13 = vmax.f32 %v5345_v0, %v5346_v26  ;;  %v14279_v34 = vld [vmem:[#allocation12_spill] sm:$0xff] }
 0x501   :  { %v5353_v7 = vrot.slane %v5352_v1, 2  ;;  %v5365_v31 = vrot.slane %v5364_v5, 4  ;;  %v12814_v19 = vmax.f32 %v5333_v51, %v5334_v62  ;;  %v5360_v60 = vrot.slane %v5359_v41, 2 }
 0x502   :  { %14273 = vst [vmem:[#allocation78_spill] sm:$0xff] %v12810_v2  ;;  %v5341_v18 = vrot.slane %v5340_v20, 1  ;;  %v5348_v48 = vrot.slane %v5347_v13, 1  ;;  %v5372_v12 = vrot.slane %v5371_v21, 4  ;;  %v14276_v25 = vcombine.high %v14274_v54, %v14274_v54 }
 0x503   :  { %14275 = vst [vmem:[#allocation21_spill] sm:$0xff] %v12814_v19  ;;  %v5354_v14 = vmax.f32 %v5352_v1, %v5353_v7  ;;  %v5366_v32 = vmax.f32 %v5364_v5, %v5365_v31  ;;  %v5361_v0 = vmax.f32 %v5359_v41, %v5360_v60  ;;  %v5385_v1 = vsel %vm3313_vm2, %v14279_v34, -inf }
 0x504   :  { %v5378_v11 = vsel %vm3313_vm2, %v14276_v25, -inf  ;;  %v12820_v50 = vmax.f32 %v5340_v20, %v5341_v18  ;;  %v12822_v52 = vmax.f32 %v5347_v13, %v5348_v48  ;;  %v5373_v57 = vmax.f32 %v5371_v21, %v5372_v12  ;;  %v14282_v18 = vld [vmem:[#allocation20_spill] sm:$0xff] }
 0x505   :  { %v5355_v26 = vrot.slane %v5354_v14, 1  ;;  %v5379_v24 = vrot.slane %v5378_v11, 4  ;;  %v5367_v51 = vrot.slane %v5366_v32, 2  ;;  %v5362_v5 = vrot.slane %v5361_v0, 1 }
 0x506   :  { %14277 = vst [vmem:[#allocation79_spill] sm:$0xff] %v12820_v50  ;;  %14278 = vst [vmem:[#allocation80_spill] sm:$0xff] %v12822_v52  ;;  %v5386_v31 = vrot.slane %v5385_v1, 4  ;;  %v5374_v19 = vrot.slane %v5373_v57, 2  ;;  %v14281_v20 = vcombine.high %v14279_v34, %v14279_v34  ;;  %v5399_v48 = vsel %vm3313_vm2, %v14282_v18, -inf }
 0x507   :  { %v12826_v62 = vmax.f32 %v5354_v14, %v5355_v26  ;;  %v5380_v7 = vmax.f32 %v5378_v11, %v5379_v24  ;;  %v5368_v54 = vmax.f32 %v5366_v32, %v5367_v51  ;;  %v12834_v13 = vmax.f32 %v5361_v0, %v5362_v5  ;;  %v14286_v5 = vld [vmem:[#allocation2_spill] sm:$0xff] }
 0x508   :  { %v5392_v41 = vsel %vm3313_vm2, %v14281_v20, -inf  ;;  %v5387_v21 = vmax.f32 %v5385_v1, %v5386_v31  ;;  %v5375_v25 = vmax.f32 %v5373_v57, %v5374_v19  ;;  %v5400_v26 = vrot.slane %v5399_v48, 4 }
 0x509   :  { %14280 = vst [vmem:[#allocation12_spill] sm:$0xff] %v12826_v62  ;;  %14283 = vst [vmem:[#allocation20_spill] sm:$0xff] %v12834_v13  ;;  %v5381_v12 = vrot.slane %v5380_v7, 2  ;;  %v5393_v60 = vrot.slane %v5392_v41, 4  ;;  %v5369_v14 = vrot.slane %v5368_v54, 1  ;;  %v14284_v32 = vcombine.high %v14282_v18, %v14282_v18 }
 0x50a   :  { %v5388_v51 = vrot.slane %v5387_v21, 2  ;;  %v5376_v52 = vrot.slane %v5375_v25, 1  ;;  %v5401_v0 = vmax.f32 %v5399_v48, %v5400_v26  ;;  %v5413_v1 = vsel %vm3313_vm2, %v14286_v5, -inf }
 0x50b   :  { %v5406_v11 = vsel %vm3313_vm2, %v14284_v32, -inf  ;;  %v5382_v24 = vmax.f32 %v5380_v7, %v5381_v12  ;;  %v5394_v34 = vmax.f32 %v5392_v41, %v5393_v60  ;;  %v12840_v62 = vmax.f32 %v5368_v54, %v5369_v14 }
 0x50c   :  { %v5407_v20 = vrot.slane %v5406_v11, 4  ;;  %v5389_v13 = vmax.f32 %v5387_v21, %v5388_v51  ;;  %v12844_v50 = vmax.f32 %v5375_v25, %v5376_v52  ;;  %v5402_v18 = vrot.slane %v5401_v0, 2  ;;  %v14290_v21 = vld [vmem:[#allocation4_spill] sm:$0xff] }
 0x50d   :  { %14285 = vst [vmem:[#allocation81_spill] sm:$0xff] %v12840_v62  ;;  %v5383_v31 = vrot.slane %v5382_v24, 1  ;;  %v5395_v19 = vrot.slane %v5394_v34, 2  ;;  %v5414_v2 = vrot.slane %v5413_v1, 4  ;;  %v14288_v7 = vcombine.high %v14286_v5, %v14286_v5 }
 0x50e   :  { %v5408_v57 = vmax.f32 %v5406_v11, %v5407_v20  ;;  %14287 = vst [vmem:[#allocation2_spill] sm:$0xff] %v12844_v50  ;;  %v5390_v12 = vrot.slane %v5389_v13, 1  ;;  %v5403_v14 = vmax.f32 %v5401_v0, %v5402_v18  ;;  %v5427_v11 = vsel %vm3313_vm2, %v14290_v21, -inf }
 0x50f   :  { %v5420_v41 = vsel %vm3313_vm2, %v14288_v7, -inf  ;;  %v12850_v54 = vmax.f32 %v5382_v24, %v5383_v31  ;;  %v5396_v48 = vmax.f32 %v5394_v34, %v5395_v19  ;;  %v5415_v26 = vmax.f32 %v5413_v1, %v5414_v2  ;;  %v14295_v7 = vld [vmem:[#allocation13_spill] sm:$0xff] }
 0x510   :  { %v5409_v60 = vrot.slane %v5408_v57, 2  ;;  %v5421_v32 = vrot.slane %v5420_v41, 4  ;;  %v12854_v52 = vmax.f32 %v5389_v13, %v5390_v12  ;;  %v5428_v20 = vrot.slane %v5427_v11, 4 }
 0x511   :  { %14289 = vst [vmem:[#allocation82_spill] sm:$0xff] %v12850_v54  ;;  %v5397_v25 = vrot.slane %v5396_v48, 1  ;;  %v5404_v50 = vrot.slane %v5403_v14, 1  ;;  %v5416_v5 = vrot.slane %v5415_v26, 2  ;;  %v14292_v24 = vcombine.high %v14290_v21, %v14290_v21 }
 0x512   :  { %14291 = vst [vmem:[#allocation4_spill] sm:$0xff] %v12854_v52  ;;  %v5410_v51 = vmax.f32 %v5408_v57, %v5409_v60  ;;  %v5422_v62 = vmax.f32 %v5420_v41, %v5421_v32  ;;  %v5429_v0 = vmax.f32 %v5427_v11, %v5428_v20  ;;  %v5441_v57 = vsel %vm3313_vm2, %v14295_v7, -inf }
 0x513   :  { %v5434_v34 = vsel %vm3313_vm2, %v14292_v24, -inf  ;;  %v12860_v31 = vmax.f32 %v5396_v48, %v5397_v25  ;;  %v12862_v19 = vmax.f32 %v5403_v14, %v5404_v50  ;;  %v5417_v13 = vmax.f32 %v5415_v26, %v5416_v5  ;;  %v14298_v25 = vld [vmem:[#allocation3_spill] sm:$0xff] }
 0x514   :  { %v5411_v2 = vrot.slane %v5410_v51, 1  ;;  %v5435_v1 = vrot.slane %v5434_v34, 4  ;;  %v5423_v18 = vrot.slane %v5422_v62, 2  ;;  %v5430_v41 = vrot.slane %v5429_v0, 2 }
 0x515   :  { %14293 = vst [vmem:[#allocation83_spill] sm:$0xff] %v12860_v31  ;;  %14294 = vst [vmem:[#allocation84_spill] sm:$0xff] %v12862_v19  ;;  %v5442_v32 = vrot.slane %v5441_v57, 4  ;;  %v5418_v21 = vrot.slane %v5417_v13, 1  ;;  %v14297_v48 = vcombine.high %v14295_v7, %v14295_v7  ;;  %v5455_v50 = vsel %vm3313_vm2, %v14298_v25, -inf }
 0x516   :  { %v12866_v12 = vmax.f32 %v5410_v51, %v5411_v2  ;;  %v5436_v60 = vmax.f32 %v5434_v34, %v5435_v1  ;;  %v5424_v52 = vmax.f32 %v5422_v62, %v5423_v18  ;;  %v5431_v14 = vmax.f32 %v5429_v0, %v5430_v41  ;;  %v14302_v41 = vld [vmem:[#allocation6_spill] sm:$0xff] }
 0x517   :  { %v5448_v11 = vsel %vm3313_vm2, %v14297_v48, -inf  ;;  %v5443_v20 = vmax.f32 %v5441_v57, %v5442_v32  ;;  %v12874_v24 = vmax.f32 %v5417_v13, %v5418_v21  ;;  %v5456_v2 = vrot.slane %v5455_v50, 4 }
 0x518   :  { %14296 = vst [vmem:[#allocation13_spill] sm:$0xff] %v12866_v12  ;;  %v5437_v26 = vrot.slane %v5436_v60, 2  ;;  %v5449_v5 = vrot.slane %v5448_v11, 4  ;;  %v5425_v51 = vrot.slane %v5424_v52, 1  ;;  %v14300_v34 = vcombine.high %v14298_v25, %v14298_v25 }
 0x519   :  { %14299 = vst [vmem:[#allocation3_spill] sm:$0xff] %v12874_v24  ;;  %v5432_v1 = vrot.slane %v5431_v14, 1  ;;  %v5444_v7 = vrot.slane %v5443_v20, 2  ;;  %v5457_v19 = vmax.f32 %v5455_v50, %v5456_v2  ;;  %v5469_v57 = vsel %vm3313_vm2, %v14302_v41, -inf }
 0x51a   :  { %v5462_v62 = vsel %vm3313_vm2, %v14300_v34, -inf  ;;  %v5438_v18 = vmax.f32 %v5436_v60, %v5437_v26  ;;  %v5450_v48 = vmax.f32 %v5448_v11, %v5449_v5  ;;  %v12880_v12 = vmax.f32 %v5424_v52, %v5425_v51  ;;  %v14306_v34 = vld [vmem:[#allocation46_spill] sm:$0xff] }
 0x51b   :  { %v5463_v0 = vrot.slane %v5462_v62, 4  ;;  %v12884_v13 = vmax.f32 %v5431_v14, %v5432_v1  ;;  %v5445_v21 = vmax.f32 %v5443_v20, %v5444_v7  ;;  %v5458_v31 = vrot.slane %v5457_v19, 2 }
 0x51c   :  { %14301 = vst [vmem:[#allocation85_spill] sm:$0xff] %v12880_v12  ;;  %v5439_v32 = vrot.slane %v5438_v18, 1  ;;  %v5451_v24 = vrot.slane %v5450_v48, 2  ;;  %v5470_v54 = vrot.slane %v5469_v57, 4  ;;  %v14304_v60 = vcombine.high %v14302_v41, %v14302_v41 }
 0x51d   :  { %14303 = vst [vmem:[#allocation6_spill] sm:$0xff] %v12884_v13  ;;  %v5464_v25 = vmax.f32 %v5462_v62, %v5463_v0  ;;  %v5446_v50 = vrot.slane %v5445_v21, 1  ;;  %v5459_v51 = vmax.f32 %v5457_v19, %v5458_v31  ;;  %v5483_v20 = vsel %vm3313_vm2, %v14306_v34, -inf }
 0x51e   :  { %v5476_v11 = vsel %vm3313_vm2, %v14304_v60, -inf  ;;  %v12890_v52 = vmax.f32 %v5438_v18, %v5439_v32  ;;  %v5452_v26 = vmax.f32 %v5450_v48, %v5451_v24  ;;  %v5471_v14 = vmax.f32 %v5469_v57, %v5470_v54  ;;  %v14311_v60 = vld [vmem:[#allocation5_spill] sm:$0xff] }
 0x51f   :  { %v5477_v5 = vrot.slane %v5476_v11, 4  ;;  %v5465_v2 = vrot.slane %v5464_v25, 2  ;;  %v12894_v1 = vmax.f32 %v5445_v21, %v5446_v50  ;;  %v5484_v0 = vrot.slane %v5483_v20, 4 }
 0x520   :  { %14305 = vst [vmem:[#allocation86_spill] sm:$0xff] %v12890_v52  ;;  %v5453_v62 = vrot.slane %v5452_v26, 1  ;;  %v5460_v13 = vrot.slane %v5459_v51, 1  ;;  %v5472_v12 = vrot.slane %v5471_v14, 2  ;;  %v14308_v18 = vcombine.high %v14306_v34, %v14306_v34 }
 0x521   :  { %14307 = vst [vmem:[#allocation46_spill] sm:$0xff] %v12894_v1  ;;  %v5478_v7 = vmax.f32 %v5476_v11, %v5477_v5  ;;  %v5466_v41 = vmax.f32 %v5464_v25, %v5465_v2  ;;  %v5485_v54 = vmax.f32 %v5483_v20, %v5484_v0  ;;  %v5497_v11 = vsel %vm3313_vm2, %v14311_v60, -inf }
 0x522   :  { %v5490_v24 = vsel %vm3313_vm2, %v14308_v18, -inf  ;;  %v12900_v48 = vmax.f32 %v5452_v26, %v5453_v62  ;;  %v12902_v57 = vmax.f32 %v5459_v51, %v5460_v13  ;;  %v5473_v21 = vmax.f32 %v5471_v14, %v5472_v12  ;;  %v14314_v62 = vld [vmem:[#allocation7_spill] sm:$0xff] }
 0x523   :  { %v5479_v31 = vrot.slane %v5478_v7, 2  ;;  %v5491_v19 = vrot.slane %v5490_v24, 4  ;;  %v5467_v32 = vrot.slane %v5466_v41, 1  ;;  %v5486_v25 = vrot.slane %v5485_v54, 2 }
 0x524   :  { %14309 = vst [vmem:[#allocation87_spill] sm:$0xff] %v12900_v48  ;;  %14310 = vst [vmem:[#allocation88_spill] sm:$0xff] %v12902_v57  ;;  %v5498_v2 = vrot.slane %v5497_v11, 4  ;;  %v5474_v34 = vrot.slane %v5473_v21, 1  ;;  %v14313_v26 = vcombine.high %v14311_v60, %v14311_v60  ;;  %v5511_v13 = vsel %vm3313_vm2, %v14314_v62, -inf }
 0x525   :  { %v5480_v50 = vmax.f32 %v5478_v7, %v5479_v31  ;;  %v5492_v5 = vmax.f32 %v5490_v24, %v5491_v19  ;;  %v12906_v1 = vmax.f32 %v5466_v41, %v5467_v32  ;;  %v5487_v12 = vmax.f32 %v5485_v54, %v5486_v25  ;;  %v14318_v54 = vld [vmem:[#allocation49_spill] sm:$0xff] }
 0x526   :  { %v5504_v20 = vsel %vm3313_vm2, %v14313_v26, -inf  ;;  %v5499_v0 = vmax.f32 %v5497_v11, %v5498_v2  ;;  %v12914_v18 = vmax.f32 %v5473_v21, %v5474_v34  ;;  %v5512_v24 = vrot.slane %v5511_v13, 4 }
 0x527   :  { %14312 = vst [vmem:[#allocation5_spill] sm:$0xff] %v12906_v1  ;;  %v5481_v51 = vrot.slane %v5480_v50, 1  ;;  %v5493_v14 = vrot.slane %v5492_v5, 2  ;;  %v5505_v7 = vrot.slane %v5504_v20, 4  ;;  %v14316_v41 = vcombine.high %v14314_v62, %v14314_v62 }
 0x528   :  { %14315 = vst [vmem:[#allocation7_spill] sm:$0xff] %v12914_v18  ;;  %v5488_v32 = vrot.slane %v5487_v12, 1  ;;  %v5500_v26 = vrot.slane %v5499_v0, 2  ;;  %v5513_v57 = vmax.f32 %v5511_v13, %v5512_v24  ;;  %v5525_v11 = vsel %vm3313_vm2, %v14318_v54, -inf }
 0x529   :  { %v5518_v31 = vsel %vm3313_vm2, %v14316_v41, -inf  ;;  %v12920_v19 = vmax.f32 %v5480_v50, %v5481_v51  ;;  %v5494_v60 = vmax.f32 %v5492_v5, %v5493_v14  ;;  %v5506_v1 = vmax.f32 %v5504_v20, %v5505_v7  ;;  %v14322_v41 = vld [vmem:[#allocation26_spill] sm:$0xff] }
 0x52a   :  { %v5519_v48 = vrot.slane %v5518_v31, 4  ;;  %v12924_v21 = vmax.f32 %v5487_v12, %v5488_v32  ;;  %v5501_v2 = vmax.f32 %v5499_v0, %v5500_v26  ;;  %v5526_v34 = vrot.slane %v5525_v11, 4 }
 0x52b   :  { %14317 = vst [vmem:[#allocation89_spill] sm:$0xff] %v12920_v19  ;;  %v5495_v25 = vrot.slane %v5494_v60, 1  ;;  %v5507_v18 = vrot.slane %v5506_v1, 2  ;;  %v5514_v62 = vrot.slane %v5513_v57, 2  ;;  %v14320_v50 = vcombine.high %v14318_v54, %v14318_v54 }
 0x52c   :  { %14319 = vst [vmem:[#allocation49_spill] sm:$0xff] %v12924_v21  ;;  %v5520_v52 = vmax.f32 %v5518_v31, %v5519_v48  ;;  %v5502_v20 = vrot.slane %v5501_v2, 1  ;;  %v5527_v13 = vmax.f32 %v5525_v11, %v5526_v34  ;;  %v5539_v0 = vsel %vm3313_vm2, %v14322_v41, -inf }
 0x52d   :  { %v5532_v5 = vsel %vm3313_vm2, %v14320_v50, -inf  ;;  %v12930_v51 = vmax.f32 %v5494_v60, %v5495_v25  ;;  %v5508_v7 = vmax.f32 %v5506_v1, %v5507_v18  ;;  %v5515_v24 = vmax.f32 %v5513_v57, %v5514_v62  ;;  %v14327_v50 = vld [vmem:[#allocation27_spill] sm:$0xff] }
 0x52e   :  { %v5533_v14 = vrot.slane %v5532_v5, 4  ;;  %v5521_v12 = vrot.slane %v5520_v52, 2  ;;  %v12934_v32 = vmax.f32 %v5501_v2, %v5502_v20  ;;  %v5528_v26 = vrot.slane %v5527_v13, 2 }
 0x52f   :  { %14321 = vst [vmem:[#allocation90_spill] sm:$0xff] %v12930_v51  ;;  %v5540_v31 = vrot.slane %v5539_v0, 4  ;;  %v5509_v21 = vrot.slane %v5508_v7, 1  ;;  %v5516_v54 = vrot.slane %v5515_v24, 1  ;;  %v14324_v60 = vcombine.high %v14322_v41, %v14322_v41 }
 0x530   :  { %14323 = vst [vmem:[#allocation26_spill] sm:$0xff] %v12934_v32  ;;  %v5534_v48 = vmax.f32 %v5532_v5, %v5533_v14  ;;  %v5522_v19 = vmax.f32 %v5520_v52, %v5521_v12  ;;  %v5529_v25 = vmax.f32 %v5527_v13, %v5528_v26  ;;  %v5553_v5 = vsel %vm3313_vm2, %v14327_v50, -inf }
 0x531   :  { %v5546_v11 = vsel %vm3313_vm2, %v14324_v60, -inf  ;;  %v5541_v57 = vmax.f32 %v5539_v0, %v5540_v31  ;;  %v12940_v34 = vmax.f32 %v5508_v7, %v5509_v21  ;;  %v12942_v62 = vmax.f32 %v5515_v24, %v5516_v54  ;;  %v14330_v21 = vld [vmem:[#allocation38_spill] sm:$0xff] }
 0x532   :  { %v5535_v1 = vrot.slane %v5534_v48, 2  ;;  %v5547_v18 = vrot.slane %v5546_v11, 4  ;;  %v5523_v2 = vrot.slane %v5522_v19, 1  ;;  %v5530_v20 = vrot.slane %v5529_v25, 1 }
 0x533   :  { %14325 = vst [vmem:[#allocation91_spill] sm:$0xff] %v12940_v34  ;;  %14326 = vst [vmem:[#allocation92_spill] sm:$0xff] %v12942_v62  ;;  %v5542_v52 = vrot.slane %v5541_v57, 2  ;;  %v5554_v41 = vrot.slane %v5553_v5, 4  ;;  %v14329_v13 = vcombine.high %v14327_v50, %v14327_v50  ;;  %v5567_v7 = vsel %vm3313_vm2, %v14330_v21, -inf }
 0x534   :  { %v5536_v14 = vmax.f32 %v5534_v48, %v5535_v1  ;;  %v5548_v12 = vmax.f32 %v5546_v11, %v5547_v18  ;;  %v12946_v32 = vmax.f32 %v5522_v19, %v5523_v2  ;;  %v12954_v24 = vmax.f32 %v5529_v25, %v5530_v20  ;;  %v14334_v20 = vld [vmem:[#allocation53_spill] sm:$0xff] }
 0x535   :  { %v5560_v0 = vsel %vm3313_vm2, %v14329_v13, -inf  ;;  %v5543_v31 = vmax.f32 %v5541_v57, %v5542_v52  ;;  %v5555_v60 = vmax.f32 %v5553_v5, %v5554_v41  ;;  %v5568_v1 = vrot.slane %v5567_v7, 4 }
 0x536   :  { %14328 = vst [vmem:[#allocation27_spill] sm:$0xff] %v12946_v32  ;;  %14331 = vst [vmem:[#allocation38_spill] sm:$0xff] %v12954_v24  ;;  %v5537_v26 = vrot.slane %v5536_v14, 1  ;;  %v5549_v54 = vrot.slane %v5548_v12, 2  ;;  %v5561_v48 = vrot.slane %v5560_v0, 4  ;;  %v14332_v19 = vcombine.high %v14330_v21, %v14330_v21 }
 0x537   :  { %v5544_v2 = vrot.slane %v5543_v31, 1  ;;  %v5556_v32 = vrot.slane %v5555_v60, 2  ;;  %v5569_v25 = vmax.f32 %v5567_v7, %v5568_v1  ;;  %v5581_v57 = vsel %vm3313_vm2, %v14334_v20, -inf }
 0x538   :  { %v5574_v11 = vsel %vm3313_vm2, %v14332_v19, -inf  ;;  %v12960_v18 = vmax.f32 %v5536_v14, %v5537_v26  ;;  %v5550_v50 = vmax.f32 %v5548_v12, %v5549_v54  ;;  %v5562_v62 = vmax.f32 %v5560_v0, %v5561_v48  ;;  %v14338_v19 = vld [vmem:[#allocation55_spill] sm:$0xff] }
 0x539   :  { %v5575_v13 = vrot.slane %v5574_v11, 4  ;;  %v12964_v52 = vmax.f32 %v5543_v31, %v5544_v2  ;;  %v5582_v24 = vrot.slane %v5581_v57, 4  ;;  %v5557_v34 = vmax.f32 %v5555_v60, %v5556_v32 }
 0x53a   :  { %14333 = vst [vmem:[#allocation93_spill] sm:$0xff] %v12960_v18  ;;  %v5551_v5 = vrot.slane %v5550_v50, 1  ;;  %v5563_v21 = vrot.slane %v5562_v62, 2  ;;  %v5570_v51 = vrot.slane %v5569_v25, 2  ;;  %v14336_v14 = vcombine.high %v14334_v20, %v14334_v20 }
 0x53b   :  { %14335 = vst [vmem:[#allocation53_spill] sm:$0xff] %v12964_v52  ;;  %v5576_v41 = vmax.f32 %v5574_v11, %v5575_v13  ;;  %v5583_v7 = vmax.f32 %v5581_v57, %v5582_v24  ;;  %v5558_v48 = vrot.slane %v5557_v34, 1  ;;  %v5595_v11 = vsel %vm3313_vm2, %v14338_v19, -inf }
 0x53c   :  { %v5588_v12 = vsel %vm3313_vm2, %v14336_v14, -inf  ;;  %v12970_v26 = vmax.f32 %v5550_v50, %v5551_v5  ;;  %v5564_v1 = vmax.f32 %v5562_v62, %v5563_v21  ;;  %v5571_v31 = vmax.f32 %v5569_v25, %v5570_v51  ;;  %v14343_v14 = vld [vmem:[#allocation8_spill] sm:$0xff] }
 0x53d   :  { %v5577_v0 = vrot.slane %v5576_v41, 2  ;;  %v5589_v54 = vrot.slane %v5588_v12, 4  ;;  %v5584_v32 = vrot.slane %v5583_v7, 2  ;;  %v5596_v13 = vrot.slane %v5595_v11, 4  ;;  %v14426_v17 = vld [vmem:[#allocation38_spill] sm:$0xff] }
 0x53e   :  { %14337 = vst [vmem:[#allocation94_spill] sm:$0xff] %v12970_v26  ;;  %v12974_v52 = vmax.f32 %v5557_v34, %v5558_v48  ;;  %v5565_v20 = vrot.slane %v5564_v1, 1  ;;  %v5572_v18 = vrot.slane %v5571_v31, 1  ;;  %v14340_v50 = vcombine.high %v14338_v19, %v14338_v19 }
 0x53f   :  { %v5578_v2 = vmax.f32 %v5576_v41, %v5577_v0  ;;  %v5590_v60 = vmax.f32 %v5588_v12, %v5589_v54  ;;  %v5585_v5 = vmax.f32 %v5583_v7, %v5584_v32  ;;  %v5597_v51 = vmax.f32 %v5595_v11, %v5596_v13 }
 0x540   :  { %14339 = vst [vmem:[#allocation55_spill] sm:$0xff] %v12974_v52  ;;  %v5602_v24 = vsel %vm3313_vm2, %v14340_v50, -inf  ;;  %v12980_v25 = vmax.f32 %v5564_v1, %v5565_v20  ;;  %v12982_v21 = vmax.f32 %v5571_v31, %v5572_v18  ;;  %v5609_v34 = vsel %vm3313_vm2, %v14343_v14, -inf  ;;  %v14346_v1 = vld [vmem:[#allocation56_spill] sm:$0xff] }
 0x541   :  { %v5579_v57 = vrot.slane %v5578_v2, 1  ;;  %v5591_v62 = vrot.slane %v5590_v60, 2  ;;  %v5603_v41 = vrot.slane %v5602_v24, 4  ;;  %v5586_v0 = vrot.slane %v5585_v5, 1  ;;  %v14427_v59 = vld [vmem:[#allocation93_spill] sm:$0xff] }
 0x542   :  { %14341 = vst [vmem:[#allocation95_spill] sm:$0xff] %v12980_v25  ;;  %14342 = vst [vmem:[#allocation96_spill] sm:$0xff] %v12982_v21  ;;  %v5598_v48 = vrot.slane %v5597_v51, 2  ;;  %v5610_v52 = vrot.slane %v5609_v34, 4  ;;  %v14345_v7 = vcombine.high %v14343_v14, %v14343_v14  ;;  %v5623_v18 = vsel %vm3313_vm2, %v14346_v1, -inf  ;;  %v14428_v40 = vld [vmem:[#allocation53_spill] sm:$0xff] }
 0x543   :  { %v12986_v12 = vmax.f32 %v5578_v2, %v5579_v57  ;;  %v5592_v54 = vmax.f32 %v5590_v60, %v5591_v62  ;;  %v5604_v19 = vmax.f32 %v5602_v24, %v5603_v41  ;;  %v12994_v31 = vmax.f32 %v5585_v5, %v5586_v0  ;;  %v14349_v0 = vld [vmem:[#allocation57_spill] sm:$0xff] }
 0x544   :  { %v5616_v11 = vsel %vm3313_vm2, %v14345_v7, -inf  ;;  %v5599_v13 = vmax.f32 %v5597_v51, %v5598_v48  ;;  %v5611_v50 = vmax.f32 %v5609_v34, %v5610_v52  ;;  %v5624_v57 = vrot.slane %v5623_v18, 4 }
 0x545   :  { %14344 = vst [vmem:[#allocation8_spill] sm:$0xff] %v12986_v12  ;;  %14347 = vst [vmem:[#allocation56_spill] sm:$0xff] %v12994_v31  ;;  %v5593_v32 = vrot.slane %v5592_v54, 1  ;;  %v5617_v20 = vrot.slane %v5616_v11, 4  ;;  %v5605_v2 = vrot.slane %v5604_v19, 2  ;;  %v14348_v60 = vcombine.high %v14346_v1, %v14346_v1 }
 0x546   :  { %v5600_v41 = vrot.slane %v5599_v13, 1  ;;  %v5612_v21 = vrot.slane %v5611_v50, 2  ;;  %v5625_v5 = vmax.f32 %v5623_v18, %v5624_v57  ;;  %v5637_v51 = vsel %vm3313_vm2, %v14349_v0, -inf }
 0x547   :  { %v5630_v24 = vsel %vm3313_vm2, %v14348_v60, -inf  ;;  %v13000_v62 = vmax.f32 %v5592_v54, %v5593_v32  ;;  %v5618_v14 = vmax.f32 %v5616_v11, %v5617_v20  ;;  %v5606_v12 = vmax.f32 %v5604_v19, %v5605_v2  ;;  %v14430_v53 = vld [vmem:[#allocation55_spill] sm:$0xff] }
 0x548   :  { %v5631_v7 = vrot.slane %v5630_v24, 4  ;;  %v13004_v48 = vmax.f32 %v5599_v13, %v5600_v41  ;;  %v5638_v31 = vrot.slane %v5637_v51, 4  ;;  %v5613_v1 = vmax.f32 %v5611_v50, %v5612_v21 }
 0x549   :  { %v5619_v52 = vrot.slane %v5618_v14, 2  ;;  %v5607_v25 = vrot.slane %v5606_v12, 1  ;;  %v5626_v26 = vrot.slane %v5625_v5, 2  ;;  %v14351_v54 = vcombine.high %v14349_v0, %v14349_v0  ;;  %v14355_v0 = vld [vmem:[#allocation14_spill] sm:$0xff]  ;;  %v14431_v3 = vld [vmem:[#allocation95_spill] sm:$0xff]  ;;  %v14432_v63 = vld [vmem:[#allocation96_spill] sm:$0xff] }
 0x54a   :  { %14350 = vst [vmem:[#allocation57_spill] sm:$0xff] %v13004_v48  ;;  %v5632_v34 = vmax.f32 %v5630_v24, %v5631_v7  ;;  %v5639_v20 = vmax.f32 %v5637_v51, %v5638_v31  ;;  %v5614_v57 = vrot.slane %v5613_v1, 1  ;;  %v14438_v60 = vmax.f32 %v12412_v38, 0.0 }
 0x54b   :  { %v5644_v11 = vsel %vm3313_vm2, %v14351_v54, -inf  ;;  %v5620_v32 = vmax.f32 %v5618_v14, %v5619_v52  ;;  %v13010_v2 = vmax.f32 %v5606_v12, %v5607_v25  ;;  %v5627_v13 = vmax.f32 %v5625_v5, %v5626_v26  ;;  %v14352_v26 = vld [vmem:[#allocation9_spill] sm:$0xff]  ;;  %v14353_v54 = vld [vmem:[#allocation58_spill] sm:$0xff]  ;;  %v14361_v5 = vld [vmem:[#allocation32_spill] sm:$0xff] }
 0x54c   :  { %v5633_v19 = vrot.slane %v5632_v34, 2  ;;  %v5645_v18 = vrot.slane %v5644_v11, 4  ;;  %v5640_v7 = vrot.slane %v5639_v20, 2  ;;  %v13013_v50 = vmax.f32 %v5613_v1, %v5614_v57  ;;  %v14364_v14 = vld [vmem:[#allocation24_spill] sm:$0xff] }
 0x54d   :  { %v5621_v24 = vrot.slane %v5620_v32, 1  ;;  %v5628_v48 = vrot.slane %v5627_v13, 1  ;;  %v14433_v39 = vld [vmem:[#allocation8_spill] sm:$0xff] }
 0x54e   :  { %v5634_v41 = vmax.f32 %v5632_v34, %v5633_v19  ;;  %v5646_v21 = vmax.f32 %v5644_v11, %v5645_v18  ;;  %v5641_v25 = vmax.f32 %v5639_v20, %v5640_v7  ;;  %v14354_v19 = vld [vmem:[#allocation59_spill] sm:$0xff]  ;;  %v14372_v20 = vld [vmem:[#allocation42_spill] sm:$0xff]  ;;  %v14434_v47 = vld [vmem:[#allocation56_spill] sm:$0xff] }
 0x54f   :  { %v13017_v52 = vmax.f32 %v5620_v32, %v5621_v24  ;;  %v13019_v51 = vmax.f32 %v5627_v13, %v5628_v48  ;;  %v14424_v48 = vld [vmem:[#allocation92_spill] sm:$0xff]  ;;  %v14429_v24 = vld [vmem:[#allocation94_spill] sm:$0xff] }
 0x550   :  { %v5635_v31 = vrot.slane %v5634_v41, 1  ;;  %v5647_v12 = vrot.slane %v5646_v21, 2  ;;  %v5642_v18 = vrot.slane %v5641_v25, 1 }
 0x551   :  { %v14435_v33 = vld [vmem:[#allocation57_spill] sm:$0xff] }
 0x552   :  { %v13024_v1 = vmax.f32 %v5634_v41, %v5635_v31  ;;  %v5648_v57 = vmax.f32 %v5646_v21, %v5647_v12  ;;  %v13031_v13 = vmax.f32 %v5641_v25, %v5642_v18  ;;  %v14368_v12 = vld [vmem:[#allocation45_spill] sm:$0xff]  ;;  %v5771_v34 = vmax.f32 %v14435_v33, 0.0 }
 0x553   :  { %v14436_v18 = vmax.f32 %v12408_v8, 0.0  ;;  %v14437_v25 = vmax.f32 %v12410_v6, 0.0  ;;  %v14441_v41 = vmax.f32 %v12488_v56, 0.0  ;;  %v14442_v8 = vmax.f32 %v12490_v27, 0.0 }
 0x554   :  { %v5649_v7 = vrot.slane %v5648_v57, 1  ;;  %v14447_v56 = vmax.f32 %v12494_v55, 0.0  ;;  %v14452_v55 = vmax.f32 %v12540_v36, 0.0  ;;  %v14457_v36 = vmax.f32 %v14355_v0, 0.0 }
 0x555   :  { %v5908_v31 = vsel %vm5907_vm10, %v14437_v25, %v14436_v18  ;;  %v5928_v6 = vsel %vm5907_vm10, %v14442_v8, %v14441_v41  ;;  %v14443_v25 = vmax.f32 %v12528_v37, 0.0  ;;  %v14444_v18 = vmax.f32 %v12530_v43, 0.0 }
 0x556   :  { %v13039_v11 = vmax.f32 %v5648_v57, %v5649_v7  ;;  %v5910_v32 = vsel %vm5909_vm11, %v14438_v60, %v5908_v31  ;;  %v14439_v57 = vmax.f32 %v12448_v28, 0.0  ;;  %v14440_v7 = vmax.f32 %v12450_v46, 0.0 }
 0x557   :  { %v5935_v38 = vsel %vm5907_vm10, %v14444_v18, %v14443_v25  ;;  %v14445_v60 = vmax.f32 %v14352_v26, 0.0  ;;  %v14446_v46 = vmax.f32 %v12454_v4, 0.0  ;;  %v5929_v27 = vsel %vm5909_vm11, %v14447_v56, %v5928_v6 }
 0x558   :  { %v5921_v21 = vsel %vm5907_vm10, %v14440_v7, %v14439_v57  ;;  %v14448_v41 = vmax.f32 %v12534_v9, 0.0  ;;  %v14449_v43 = vmax.f32 %v14353_v54, 0.0  ;;  %v14450_v26 = vmax.f32 %v12460_v42, 0.0 }
 0x559   :  { %v5912_v28 = vsel %vm5911_vm12, %v14445_v60, %v5910_v32  ;;  %v5922_v31 = vsel %vm5909_vm11, %v14446_v46, %v5921_v21  ;;  %v14451_v4 = vmax.f32 %v12496_v10, 0.0  ;;  %v14453_v9 = vmax.f32 %v14354_v19, 0.0 }
 0x55a   :  { %v5936_v37 = vsel %vm5909_vm11, %v14448_v41, %v5935_v38  ;;  %v5914_v57 = vsel %vm5913_vm13, %v14449_v43, %v5912_v28  ;;  %v5923_v32 = vsel %vm5911_vm12, %v14450_v26, %v5922_v31  ;;  %v14454_v54 = vmax.f32 %v12462_v23, 0.0  ;;  %v14459_v28 = vld [vmem:[#allocation19_spill] sm:$0xff]  ;;  %v14461_v31 = vld [vmem:[#allocation33_spill] sm:$0xff] }
 0x55b   :  { %v5930_v21 = vsel %vm5911_vm12, %v14451_v4, %v5929_v27  ;;  %v5937_v7 = vsel %vm5911_vm12, %v14452_v55, %v5936_v37  ;;  %v5916_v8 = vsel %vm5915_vm14, %v14453_v9, %v5914_v57  ;;  %v14455_v42 = vmax.f32 %v12502_v49, 0.0  ;;  %v14463_v27 = vld [vmem:[#allocation17_spill] sm:$0xff]  ;;  %v14465_v37 = vld [vmem:[#allocation18_spill] sm:$0xff] }
 0x55c   :  { %v5924_v6 = vsel %vm5913_vm13, %v14454_v54, %v5923_v32  ;;  %v14456_v10 = vmax.f32 %v14361_v5, 0.0  ;;  %v5918_v38 = vsel %vm5917_vm15, %v14457_v36, %v5916_v8  ;;  %v14458_v19 = vmax.f32 %v12464_v30, 0.0  ;;  %v14467_v57 = vld [vmem:[#allocation22_spill] sm:$0xff]  ;;  %v14472_v9 = vld [vmem:[#allocation25_spill] sm:$0xff] }
 0x55d   :  { %v5931_v25 = vsel %vm5913_vm13, %v14455_v42, %v5930_v21  ;;  %v14460_v23 = vmax.f32 %v14459_v28, 0.0  ;;  %v14462_v49 = vmax.f32 %v14461_v31, 0.0  ;;  %v14464_v5 = vmax.f32 %v14463_v27, 0.0  ;;  %v14470_v21 = vld [vmem:[#allocation16_spill] sm:$0xff]  ;;  %v14478_v36 = vld [vmem:[#allocation30_spill] sm:$0xff] }
 0x55e   :  { %v5938_v18 = vsel %vm5913_vm13, %v14456_v10, %v5937_v7  ;;  %v5925_v60 = vsel %vm5915_vm14, %v14458_v19, %v5924_v6  ;;  %v14466_v0 = vmax.f32 %v14465_v37, 0.0  ;;  %v14468_v30 = vmax.f32 %v14467_v57, 0.0  ;;  %v14476_v10 = vld [vmem:[#allocation29_spill] sm:$0xff]  ;;  %v14491_v37 = vld [vmem:[#allocation31_spill] sm:$0xff] }
 0x55f   :  { %v5932_v46 = vsel %vm5915_vm14, %v14460_v23, %v5931_v25  ;;  %v5939_v56 = vsel %vm5915_vm14, %v14462_v49, %v5938_v18  ;;  %v5920_v41 = vsel %vm5919_vm0, %v14464_v5, %v5918_v38  ;;  %v14469_v32 = vmax.f32 %v14363_v35, 0.0  ;;  %v14493_v57 = vld [vmem:[#allocation35_spill] sm:$0xff] }
 0x560   :  { %v5926_v43 = vsel %vm5917_vm15, %v14466_v0, %v5925_v60  ;;  %v5933_v26 = vsel %vm5917_vm15, %v14468_v30, %v5932_v46  ;;  %v14471_v55 = vmax.f32 %v14470_v21, 0.0  ;;  %v14473_v8 = vmax.f32 %v14472_v9, 0.0  ;;  %6042 = vst [vmem:[%s13572_s4] sm:$0xff] %v5920_v41  ;;  %v14497_v21 = vld [vmem:[#allocation63_spill] sm:$0xff] }
 0x561   :  { %v5940_v4 = vsel %vm5917_vm15, %v14469_v32, %v5939_v56  ;;  %v14474_v6 = vmax.f32 %v12560_v15, 0.0  ;;  %v14475_v25 = vmax.f32 %v14364_v14, 0.0  ;;  %v14477_v18 = vmax.f32 %v14476_v10, 0.0  ;;  %v14495_v32 = vld [vmem:[#allocation40_spill] sm:$0xff] }
 0x562   :  { %v5927_v7 = vsel %vm5919_vm0, %v14471_v55, %v5926_v43  ;;  %v5934_v54 = vsel %vm5919_vm0, %v14473_v8, %v5933_v26  ;;  %v14479_v38 = vmax.f32 %v14478_v36, 0.0  ;;  %v14480_v60 = vmax.f32 %v14368_v12, 0.0  ;;  %v14501_v8 = vld [vmem:[#allocation36_spill] sm:$0xff] }
 0x563   :  { %v5941_v42 = vsel %vm5919_vm0, %v14474_v6, %v5940_v4  ;;  %v5942_v35 = vsel %vm5907_vm10, %v14477_v18, %v14475_v25  ;;  %v14481_v15 = vmax.f32 %v12610_v45, 0.0  ;;  %v14482_v14 = vmax.f32 %v14372_v20, 0.0  ;;  %6043 = vst [vmem:[%s13572_s4 + $0x8] sm:$0xff] %v5927_v7  ;;  %6044 = vst [vmem:[%s13572_s4 + $0x10] sm:$0xff] %v5934_v54  ;;  %v14486_v45 = vld [vmem:[#allocation28_spill] sm:$0xff]  ;;  %v14499_v7 = vld [vmem:[#allocation34_spill] sm:$0xff] }
 0x564   :  { %v5943_v19 = vsel %vm5909_vm11, %v14479_v38, %v5942_v35  ;;  %v14483_v23 = vmax.f32 %v12650_v61, 0.0  ;;  %v14484_v31 = vmax.f32 %v14376_v29, 0.0  ;;  %v14485_v49 = vmax.f32 %v12690_v44, 0.0  ;;  %6045 = vst [vmem:[%s13572_s4 + $0x18] sm:$0xff] %v5941_v42  ;;  %v14503_v42 = vld [vmem:[#allocation39_spill] sm:$0xff]  ;;  %v14505_v18 = vld [vmem:[#allocation64_spill] sm:$0xff] }
 0x565   :  { %v5949_v28 = vsel %vm5907_vm10, %v14481_v15, %v14480_v60  ;;  %v14487_v61 = vmax.f32 %v14486_v45, 0.0  ;;  %v14488_v44 = vmax.f32 %v12614_v16, 0.0  ;;  %v14489_v12 = vmax.f32 %v12654_v22, 0.0  ;;  %v14507_v38 = vld [vmem:[#allocation37_spill] sm:$0xff]  ;;  %v14509_v15 = vld [vmem:[#allocation50_spill] sm:$0xff] }
 0x566   :  { %v5956_v46 = vsel %vm5907_vm10, %v14483_v23, %v14482_v14  ;;  %v5963_v56 = vsel %vm5907_vm10, %v14485_v49, %v14484_v31  ;;  %v14490_v5 = vmax.f32 %v12694_v58, 0.0  ;;  %v14492_v0 = vmax.f32 %v14491_v37, 0.0  ;;  %v14511_v23 = vld [vmem:[#allocation43_spill] sm:$0xff]  ;;  %v14513_v49 = vld [vmem:[#allocation65_spill] sm:$0xff] }
 0x567   :  { %v5944_v29 = vsel %vm5911_vm12, %v14487_v61, %v5943_v19  ;;  %v5950_v20 = vsel %vm5909_vm11, %v14488_v44, %v5949_v28  ;;  %v5957_v27 = vsel %vm5909_vm11, %v14489_v12, %v5956_v46  ;;  %v14494_v30 = vmax.f32 %v14493_v57, 0.0  ;;  %v14515_v61 = vld [vmem:[#allocation44_spill] sm:$0xff] }
 0x568   :  { %v5964_v41 = vsel %vm5909_vm11, %v14490_v5, %v5963_v56  ;;  %v5945_v43 = vsel %vm5913_vm13, %v14492_v0, %v5944_v29  ;;  %v14496_v16 = vmax.f32 %v14495_v32, 0.0  ;;  %v14498_v22 = vmax.f32 %v14497_v21, 0.0  ;;  %v14519_v5 = vld [vmem:[#allocation60_spill] sm:$0xff]  ;;  %v14521_v0 = vld [vmem:[#allocation66_spill] sm:$0xff] }
 0x569   :  { %v5951_v26 = vsel %vm5911_vm12, %v14494_v30, %v5950_v20  ;;  %v14500_v58 = vmax.f32 %v14499_v7, 0.0  ;;  %v14502_v54 = vmax.f32 %v14501_v8, 0.0  ;;  %v14504_v25 = vmax.f32 %v14503_v42, 0.0  ;;  %v14517_v20 = vld [vmem:[#allocation51_spill] sm:$0xff]  ;;  %v14523_v30 = vld [vmem:[#allocation41_spill] sm:$0xff]  ;;  %v14533_v42 = vld [vmem:[#allocation70_spill] sm:$0xff] }
 0x56a   :  { %v5958_v4 = vsel %vm5911_vm12, %v14496_v16, %v5957_v27  ;;  %v5965_v55 = vsel %vm5911_vm12, %v14498_v22, %v5964_v41  ;;  %v14506_v35 = vmax.f32 %v14505_v18, 0.0  ;;  %v14508_v19 = vmax.f32 %v14507_v38, 0.0  ;;  %v14525_v16 = vld [vmem:[#allocation61_spill] sm:$0xff]  ;;  %v14527_v22 = vld [vmem:[#allocation67_spill] sm:$0xff] }
 0x56b   :  { %v5946_v9 = vsel %vm5915_vm14, %v14500_v58, %v5945_v43  ;;  %v5952_v6 = vsel %vm5913_vm13, %v14502_v54, %v5951_v26  ;;  %v5959_v10 = vsel %vm5913_vm13, %v14504_v25, %v5958_v4  ;;  %v14510_v28 = vmax.f32 %v14509_v15, 0.0  ;;  %v14529_v58 = vld [vmem:[#allocation68_spill] sm:$0xff]  ;;  %v14531_v8 = vld [vmem:[#allocation69_spill] sm:$0xff]  ;;  %v14535_v18 = vld [vmem:[#allocation47_spill] sm:$0xff] }
 0x56c   :  { %v5966_v36 = vsel %vm5913_vm13, %v14506_v35, %v5965_v55  ;;  %v5947_v60 = vsel %vm5917_vm15, %v14508_v19, %v5946_v9  ;;  %v14512_v46 = vmax.f32 %v14511_v23, 0.0  ;;  %v14514_v56 = vmax.f32 %v14513_v49, 0.0  ;;  %v14545_v49 = vld [vmem:[#allocation82_spill] sm:$0xff] }
 0x56d   :  { %v5953_v14 = vsel %vm5915_vm14, %v14510_v28, %v5952_v6  ;;  %v14516_v29 = vmax.f32 %v14515_v61, 0.0  ;;  %v14518_v12 = vmax.f32 %v14517_v20, 0.0  ;;  %v14520_v41 = vmax.f32 %v14519_v5, 0.0  ;;  %v14541_v28 = vld [vmem:[#allocation78_spill] sm:$0xff]  ;;  %v14547_v61 = vld [vmem:[#allocation71_spill] sm:$0xff]  ;;  %v14549_v20 = vld [vmem:[#allocation48_spill] sm:$0xff] }
 0x56e   :  { %v5960_v31 = vsel %vm5915_vm14, %v14512_v46, %v5959_v10  ;;  %v5967_v45 = vsel %vm5915_vm14, %v14514_v56, %v5966_v36  ;;  %v14522_v43 = vmax.f32 %v14521_v0, 0.0  ;;  %v14524_v26 = vmax.f32 %v14523_v30, 0.0  ;;  %v14537_v36 = vld [vmem:[#allocation74_spill] sm:$0xff]  ;;  %v14551_v5 = vld [vmem:[#allocation21_spill] sm:$0xff]  ;;  %v14553_v0 = vld [vmem:[#allocation4_spill] sm:$0xff] }
 0x56f   :  { %v5948_v44 = vsel %vm5919_vm0, %v14516_v29, %v5947_v60  ;;  %v5954_v27 = vsel %vm5917_vm15, %v14518_v12, %v5953_v14  ;;  %v5961_v37 = vsel %vm5917_vm15, %v14520_v41, %v5960_v31  ;;  %v14526_v4 = vmax.f32 %v14525_v16, 0.0  ;;  %v14539_v60 = vld [vmem:[#allocation15_spill] sm:$0xff]  ;;  %v14543_v46 = vld [vmem:[#allocation2_spill] sm:$0xff]  ;;  %v14555_v30 = vld [vmem:[#allocation72_spill] sm:$0xff] }
 0x570   :  { %v5968_v57 = vsel %vm5917_vm15, %v14522_v43, %v5967_v45  ;;  %v5955_v32 = vsel %vm5919_vm0, %v14524_v26, %v5954_v27  ;;  %v14528_v55 = vmax.f32 %v14527_v22, 0.0  ;;  %v14530_v9 = vmax.f32 %v14529_v58, 0.0  ;;  %6046 = vst [vmem:[%s13572_s4 + $0x20] sm:$0xff] %v5948_v44  ;;  %v14557_v16 = vld [vmem:[#allocation75_spill] sm:$0xff] }
 0x571   :  { %v5962_v21 = vsel %vm5919_vm0, %v14526_v4, %v5961_v37  ;;  %v14532_v54 = vmax.f32 %v14531_v8, 0.0  ;;  %v14534_v25 = vmax.f32 %v14533_v42, 0.0  ;;  %v14536_v35 = vmax.f32 %v14535_v18, 0.0  ;;  %6047 = vst [vmem:[%s13572_s4 + $0x28] sm:$0xff] %v5955_v32  ;;  %v14559_v22 = vld [vmem:[#allocation79_spill] sm:$0xff] }
 0x572   :  { %v5969_v7 = vsel %vm5919_vm0, %v14528_v55, %v5968_v57  ;;  %v14538_v38 = vmax.f32 %v14537_v36, 0.0  ;;  %v14540_v15 = vmax.f32 %v14539_v60, 0.0  ;;  %v14542_v14 = vmax.f32 %v14541_v28, 0.0  ;;  %6048 = vst [vmem:[%s13572_s4 + $0x30] sm:$0xff] %v5962_v21  ;;  %v14561_v58 = vld [vmem:[#allocation83_spill] sm:$0xff]  ;;  %v14571_v28 = vld [vmem:[#allocation54_spill] sm:$0xff] }
 0x573   :  { %v5970_v6 = vsel %vm5907_vm10, %v14532_v54, %v14530_v9  ;;  %v14544_v31 = vmax.f32 %v14543_v46, 0.0  ;;  %v14546_v56 = vmax.f32 %v14545_v49, 0.0  ;;  %6049 = vst [vmem:[%s13572_s4 + $0x38] sm:$0xff] %v5969_v7  ;;  %v14548_v29 = vmax.f32 %v14547_v61, 0.0  ;;  %v14563_v54 = vld [vmem:[#allocation52_spill] sm:$0xff]  ;;  %v14573_v46 = vld [vmem:[#allocation11_spill] sm:$0xff] }
 0x574   :  { %v5971_v10 = vsel %vm5909_vm11, %v14534_v25, %v5970_v6  ;;  %v5977_v19 = vsel %vm5907_vm10, %v14538_v38, %v14536_v35  ;;  %v5984_v23 = vsel %vm5907_vm10, %v14542_v14, %v14540_v15  ;;  %v14550_v12 = vmax.f32 %v14549_v20, 0.0  ;;  %v14565_v25 = vld [vmem:[#allocation76_spill] sm:$0xff] }
 0x575   :  { %v5991_v45 = vsel %vm5907_vm10, %v14546_v56, %v14544_v31  ;;  %v5972_v44 = vsel %vm5911_vm12, %v14548_v29, %v5971_v10  ;;  %v14552_v41 = vmax.f32 %v14551_v5, 0.0  ;;  %v14554_v43 = vmax.f32 %v14553_v0, 0.0  ;;  %v14567_v35 = vld [vmem:[#allocation80_spill] sm:$0xff]  ;;  %v14577_v29 = vld [vmem:[#allocation13_spill] sm:$0xff] }
 0x576   :  { %v5978_v27 = vsel %vm5909_vm11, %v14550_v12, %v5977_v19  ;;  %v14556_v26 = vmax.f32 %v14555_v30, 0.0  ;;  %v14558_v4 = vmax.f32 %v14557_v16, 0.0  ;;  %v14560_v55 = vmax.f32 %v14559_v22, 0.0  ;;  %v14569_v19 = vld [vmem:[#allocation84_spill] sm:$0xff]  ;;  %v14579_v12 = vld [vmem:[#allocation73_spill] sm:$0xff] }
 0x577   :  { %v5985_v37 = vsel %vm5909_vm11, %v14552_v41, %v5984_v23  ;;  %v5992_v57 = vsel %vm5909_vm11, %v14554_v43, %v5991_v45  ;;  %v14562_v9 = vmax.f32 %v14561_v58, 0.0  ;;  %v14564_v6 = vmax.f32 %v14563_v54, 0.0  ;;  %v14575_v56 = vld [vmem:[#allocation12_spill] sm:$0xff]  ;;  %v14581_v41 = vld [vmem:[#allocation10_spill] sm:$0xff] }
 0x578   :  { %v5973_v32 = vsel %vm5913_vm13, %v14556_v26, %v5972_v44  ;;  %v5979_v21 = vsel %vm5911_vm12, %v14558_v4, %v5978_v27  ;;  %v5986_v7 = vsel %vm5911_vm12, %v14560_v55, %v5985_v37  ;;  %v14566_v10 = vmax.f32 %v14565_v25, 0.0  ;;  %v14583_v43 = vld [vmem:[#allocation20_spill] sm:$0xff]  ;;  %v14585_v26 = vld [vmem:[#allocation3_spill] sm:$0xff]  ;;  %v14587_v4 = vld [vmem:[#allocation77_spill] sm:$0xff] }
 0x579   :  { %v5993_v8 = vsel %vm5911_vm12, %v14562_v9, %v5992_v57  ;;  %v5974_v42 = vsel %vm5915_vm14, %v14564_v6, %v5973_v32  ;;  %v14568_v36 = vmax.f32 %v14567_v35, 0.0  ;;  %v14570_v60 = vmax.f32 %v14569_v19, 0.0  ;;  %v14589_v55 = vld [vmem:[#allocation81_spill] sm:$0xff]  ;;  %v14593_v6 = vld [vmem:[#allocation6_spill] sm:$0xff] }
 0x57a   :  { %v5980_v18 = vsel %vm5913_vm13, %v14566_v10, %v5979_v21  ;;  %v14572_v14 = vmax.f32 %v14571_v28, 0.0  ;;  %v14574_v31 = vmax.f32 %v14573_v46, 0.0  ;;  %v14576_v45 = vmax.f32 %v14575_v56, 0.0  ;;  %v14591_v9 = vld [vmem:[#allocation85_spill] sm:$0xff]  ;;  %v14595_v25 = vld [vmem:[#allocation86_spill] sm:$0xff] }
 0x57b   :  { %v5987_v38 = vsel %vm5913_vm13, %v14568_v36, %v5986_v7  ;;  %v5994_v15 = vsel %vm5913_vm13, %v14570_v60, %v5993_v8  ;;  %v14578_v44 = vmax.f32 %v14577_v29, 0.0  ;;  %v14580_v27 = vmax.f32 %v14579_v12, 0.0  ;;  %v14597_v35 = vld [vmem:[#allocation46_spill] sm:$0xff]  ;;  %v14599_v19 = vld [vmem:[#allocation49_spill] sm:$0xff]  ;;  %v14612_v12 = vld [vmem:[#allocation88_spill] sm:$0xff] }
 0x57c   :  { %v5975_v23 = vsel %vm5917_vm15, %v14572_v14, %v5974_v42  ;;  %v5981_v49 = vsel %vm5915_vm14, %v14574_v31, %v5980_v18  ;;  %v5988_v61 = vsel %vm5915_vm14, %v14576_v45, %v5987_v38  ;;  %v14582_v37 = vmax.f32 %v14581_v41, 0.0  ;;  %v14608_v45 = vld [vmem:[#allocation26_spill] sm:$0xff]  ;;  %v14614_v41 = vld [vmem:[#allocation91_spill] sm:$0xff] }
 0x57d   :  { %v5995_v20 = vsel %vm5915_vm14, %v14578_v44, %v5994_v15  ;;  %v5976_v5 = vsel %vm5919_vm0, %v14580_v27, %v5975_v23  ;;  %v14584_v57 = vmax.f32 %v14583_v43, 0.0  ;;  %v14586_v32 = vmax.f32 %v14585_v26, 0.0  ;;  %v14601_v15 = vld [vmem:[#allocation90_spill] sm:$0xff]  ;;  %v14618_v26 = vld [vmem:[#allocation5_spill] sm:$0xff] }
 0x57e   :  { %v5982_v0 = vsel %vm5917_vm15, %v14582_v37, %v5981_v49  ;;  %v14588_v21 = vmax.f32 %v14587_v4, 0.0  ;;  %v14590_v7 = vmax.f32 %v14589_v55, 0.0  ;;  %v14592_v8 = vmax.f32 %v14591_v9, 0.0  ;;  %6050 = vst [vmem:[%s13572_s4 + $0x40] sm:$0xff] %v5976_v5  ;;  %v14625_v9 = vld [vmem:[#allocation27_spill] sm:$0xff] }
 0x57f   :  { %v5989_v30 = vsel %vm5917_vm15, %v14584_v57, %v5988_v61  ;;  %v5996_v16 = vsel %vm5917_vm15, %v14586_v32, %v5995_v20  ;;  %v14594_v42 = vmax.f32 %v14593_v6, 0.0  ;;  %v14596_v10 = vmax.f32 %v14595_v25, 0.0  ;;  %v14629_v25 = vld [vmem:[#allocation89_spill] sm:$0xff] }
 0x580   :  { %v5983_v22 = vsel %vm5919_vm0, %v14588_v21, %v5982_v0  ;;  %v5990_v58 = vsel %vm5919_vm0, %v14590_v7, %v5989_v30  ;;  %v5997_v54 = vsel %vm5919_vm0, %v14592_v8, %v5996_v16  ;;  %v14598_v36 = vmax.f32 %v14597_v35, 0.0  ;;  %v14623_v7 = vld [vmem:[#allocation7_spill] sm:$0xff] }
 0x581   :  { %v5998_v18 = vsel %vm5907_vm10, %v14596_v10, %v14594_v42  ;;  %v14600_v60 = vmax.f32 %v14599_v19, 0.0  ;;  %v14602_v28 = vmax.f32 %v14601_v15, 0.0  ;;  %v14603_v23 = vmax.f32 %v14428_v40, 0.0  ;;  %6051 = vst [vmem:[%s13572_s4 + $0x48] sm:$0xff] %v5983_v22  ;;  %6052 = vst [vmem:[%s13572_s4 + $0x50] sm:$0xff] %v5990_v58  ;;  %v14606_v40 = vld [vmem:[#allocation87_spill] sm:$0xff] }
 0x582   :  { %v5999_v38 = vsel %vm5909_vm11, %v14598_v36, %v5998_v18  ;;  %v14604_v46 = vmax.f32 %v14429_v24, 0.0  ;;  %v14605_v49 = vmax.f32 %v13010_v2, 0.0  ;;  %6053 = vst [vmem:[%s13572_s4 + $0x58] sm:$0xff] %v5997_v54  ;;  %v14607_v24 = vmax.f32 %v14606_v40, 0.0 }
 0x583   :  { %v6005_v14 = vsel %vm5907_vm10, %v14602_v28, %v14600_v60  ;;  %v14609_v2 = vmax.f32 %v14608_v45, 0.0  ;;  %v14610_v61 = vmax.f32 %v14430_v53, 0.0  ;;  %v14611_v44 = vmax.f32 %v13013_v50, 0.0 }
 0x584   :  { %v6012_v31 = vsel %vm5907_vm10, %v14604_v46, %v14603_v23  ;;  %v6019_v56 = vsel %vm5907_vm10, %v14605_v49, %v5771_v34  ;;  %v6000_v33 = vsel %vm5911_vm12, %v14607_v24, %v5999_v38  ;;  %v14613_v27 = vmax.f32 %v14612_v12, 0.0 }
 0x585   :  { %v6006_v34 = vsel %vm5909_vm11, %v14609_v2, %v6005_v14  ;;  %v6013_v29 = vsel %vm5909_vm11, %v14610_v61, %v6012_v31  ;;  %v6020_v20 = vsel %vm5909_vm11, %v14611_v44, %v6019_v56  ;;  %v14615_v37 = vmax.f32 %v14614_v41, 0.0 }
 0x586   :  { %v6001_v5 = vsel %vm5913_vm13, %v14613_v27, %v6000_v33  ;;  %v14616_v43 = vmax.f32 %v14431_v3, 0.0  ;;  %v14617_v53 = vmax.f32 %v13017_v52, 0.0  ;;  %v14619_v50 = vmax.f32 %v14618_v26, 0.0 }
 0x587   :  { %v6007_v0 = vsel %vm5911_vm12, %v14615_v37, %v6006_v34  ;;  %v14620_v16 = vmax.f32 %v14424_v48, 0.0  ;;  %v14621_v21 = vmax.f32 %v14432_v63, 0.0  ;;  %v14622_v3 = vmax.f32 %v13019_v51, 0.0 }
 0x588   :  { %v6014_v57 = vsel %vm5911_vm12, %v14616_v43, %v6013_v29  ;;  %v6021_v30 = vsel %vm5911_vm12, %v14617_v53, %v6020_v20  ;;  %v6002_v32 = vsel %vm5915_vm14, %v14619_v50, %v6001_v5  ;;  %v14624_v52 = vmax.f32 %v14623_v7, 0.0 }
 0x589   :  { %v6008_v4 = vsel %vm5913_vm13, %v14620_v16, %v6007_v0  ;;  %v6015_v22 = vsel %vm5913_vm13, %v14621_v21, %v6014_v57  ;;  %v6022_v55 = vsel %vm5913_vm13, %v14622_v3, %v6021_v30  ;;  %v14626_v8 = vmax.f32 %v14625_v9, 0.0 }
 0x58a   :  { %v6003_v58 = vsel %vm5917_vm15, %v14624_v52, %v6002_v32  ;;  %v14627_v48 = vmax.f32 %v14433_v39, 0.0  ;;  %v14628_v63 = vmax.f32 %v13024_v1, 0.0  ;;  %v14630_v51 = vmax.f32 %v14629_v25, 0.0 }
 0x58b   :  { %v6009_v54 = vsel %vm5915_vm14, %v14626_v8, %v6008_v4  ;;  %v14631_v18 = vmax.f32 %v14426_v17, 0.0  ;;  %v14632_v36 = vmax.f32 %v14434_v47, 0.0  ;;  %v14633_v39 = vmax.f32 %v13031_v13, 0.0 }
 0x58c   :  { %v6016_v6 = vsel %vm5915_vm14, %v14627_v48, %v6015_v22  ;;  %v6023_v42 = vsel %vm5915_vm14, %v14628_v63, %v6022_v55  ;;  %v6004_v10 = vsel %vm5919_vm0, %v14630_v51, %v6003_v58  ;;  %v14634_v1 = vmax.f32 %v14427_v59, 0.0 }
 0x58d   :  { %v6010_v35 = vsel %vm5917_vm15, %v14631_v18, %v6009_v54  ;;  %v6017_v38 = vsel %vm5917_vm15, %v14632_v36, %v6016_v6  ;;  %v6024_v19 = vsel %vm5917_vm15, %v14633_v39, %v6023_v42  ;;  %v14635_v15 = vmax.f32 %v13000_v62, 0.0  ;;  %6054 = vst [vmem:[%s13572_s4 + $0x60] sm:$0xff] %v6004_v10 }
 0x58e   :  { %v6011_v60 = vsel %vm5919_vm0, %v14634_v1, %v6010_v35  ;;  %v14636_v17 = vmax.f32 %v13039_v11, 0.0 }
 0x58f   :  { %v6018_v28 = vsel %vm5919_vm0, %v14635_v15, %v6017_v38  ;;  %6055 = vst [vmem:[%s13572_s4 + $0x68] sm:$0xff] %v6011_v60 }
 0x590   :  { %v6025_v14 = vsel %vm5919_vm0, %v14636_v17, %v6024_v19  ;;  %6056 = vst [vmem:[%s13572_s4 + $0x70] sm:$0xff] %v6018_v28 }
 0x591   :  { %6057 = vst [vmem:[%s13572_s4 + $0x78] sm:$0xff] %v6025_v14 }

</bundles_post_ra>
